<compile_context>
chip_gen: v6e
topology: v6e:2x2x1
jax: 0.10.0
libtpu: 0.0.40
codegen_flags: <defaults>
</compile_context>

<pallas_src>
import math

import jax
import jax.numpy as jnp
from jax.experimental import pallas as pl
from jax.experimental.pallas import tpu as pltpu


def _round_up(x, m):
    return ((x + m - 1) // m) * m


def _choose_batch_tiling(batch, tile_b_max, sublane=16):
    """Pick (tile_b, padded_batch, n_tiles) minimizing padded rows for a given
    max tile size, with tile_b a multiple of `sublane`."""
    tile_b_max = _round_up(max(int(tile_b_max), sublane), sublane)
    b_min = _round_up(batch, sublane)
    n_tiles = -(-b_min // tile_b_max)  # ceil
    tile_b = _round_up(-(-b_min // n_tiles), sublane)
    return tile_b, tile_b * n_tiles, n_tiles


def _make_kernel(n_layers, compute_dtype):
    """Fused resnet_encoder kernel for a fixed number of residual blocks."""

    def kernel(*refs):
        # refs = (x, w0, b0, [wa_i, ba_i, wb_i, bb_i]*n_layers, wf, bf, out)
        x_ref = refs[0]
        o_ref = refs[-1]
        p = refs[1:-1]

        w0_ref, b0_ref = p[0], p[1]
        wf_ref, bf_ref = p[-2], p[-1]
        blocks = p[2:-2]

        # preproc + relu_0.  Bias is (1, n): implicit broadcast, nothing
        # materializes a (tile_b, n) broadcast explicitly.
        z = jnp.maximum(
            jnp.dot(x_ref[...], w0_ref[...], preferred_element_type=jnp.float32)
            + b0_ref[...],
            0.0,
        )  # f32 residual stream

        # residual blocks: z = relu(z + W2(relu(W1 z + b1)) + b2)
        # MXU inputs in compute_dtype (bf16 on v6e/v7x), accumulation in f32.
        for i in range(n_layers):
            wa_ref, ba_ref, wb_ref, bb_ref = blocks[4 * i : 4 * i + 4]
            h = jnp.maximum(
                jnp.dot(
                    z.astype(compute_dtype),
                    wa_ref[...],
                    preferred_element_type=jnp.float32,
                )
                + ba_ref[...],
                0.0,
            )
            z = jnp.maximum(
                z
                + jnp.dot(
                    h.astype(compute_dtype),
                    wb_ref[...],
                    preferred_element_type=jnp.float32,
                )
                + bb_ref[...],
                0.0,
            )

        # finalize (output columns zero-padded to a lane-dense 128-wide slab)
        o_ref[...] = (
            jnp.dot(
                z.astype(compute_dtype),
                wf_ref[...],
                preferred_element_type=jnp.float32,
            )
            + bf_ref[...]
        ).astype(o_ref.dtype)

    return kernel


def resnet_encoder_forward(
    x_nchw, params, *, n_layers, tile_b=128, compute_dtype=jnp.bfloat16
):
    """Pallas forward pass for resnet_encoder.

    x_nchw: (B, C, H, W) float32
    params: dict of PyTorch-layout weights (out, in) and biases (out,)
    compute_dtype: dtype fed to the MXU (bf16 recommended; f32 for exact parity).
    """
    B = x_nchw.shape[0]
    d_in = int(math.prod(x_nchw.shape[1:]))
    n_nodes = params["preproc_w"].shape[0]
    n_comp = params["finalize_w"].shape[0]

    # Lane-dense padded output width (multiple of 128).
    n_out = _round_up(n_comp, 128)

    # Batch tiling: minimum padding at <= tile_b rows per step.
    tile_b, B_pad, n_tiles = _choose_batch_tiling(B, tile_b)

    # Glue: flatten NCHW -> (B, C*H*W), pad batch, cast to compute dtype.
    x2d = x_nchw.reshape(B, d_in).astype(compute_dtype)
    if B_pad != B:
        x2d = jnp.pad(x2d, ((0, B_pad - B), (0, 0)))

    # Weights transposed to (in, out) in compute dtype; biases stay f32 (added
    # after the f32-accumulated matmul).
    flat_params = [
        params["preproc_w"].T.astype(compute_dtype),
        params["preproc_b"][None, :].astype(jnp.float32),
    ]
    for i in range(1, n_layers + 1):
        flat_params += [
            params[f"layer_first_{i}_w"].T.astype(compute_dtype),
            params[f"layer_first_{i}_b"][None, :].astype(jnp.float32),
            params[f"layer_second_{i}_w"].T.astype(compute_dtype),
            params[f"layer_second_{i}_b"][None, :].astype(jnp.float32),
        ]
    wf = params["finalize_w"].T.astype(compute_dtype)  # (n_nodes, n_comp)
    bf = params["finalize_b"][None, :].astype(jnp.float32)
    if n_out != n_comp:
        wf = jnp.pad(wf, ((0, 0), (0, n_out - n_comp)))
        bf = jnp.pad(bf, ((0, 0), (0, n_out - n_comp)))
    flat_params += [wf, bf]

    # VMEM limit: chip capacity minus ~20% headroom (v7x: ~51 MiB of 64;
    # v5e/v6e: ~102 MiB of 128).  Fall back to 64 MiB if the query fails.
    try:
        vmem_cap = int(pltpu.get_tpu_info().vmem_capacity_bytes)
        vmem_limit = int(vmem_cap * 0.8)
    except Exception:
        vmem_limit = 64 << 20

    x_spec = pl.BlockSpec((tile_b, d_in), lambda i: (i, 0))
    out_spec = pl.BlockSpec((tile_b, n_out), lambda i: (i, 0))

    kernel = _make_kernel(n_layers, compute_dtype)

    def _call(param_pipeline_mode):
        if param_pipeline_mode is None:
            param_specs = [
                pl.BlockSpec(p.shape, lambda i: (0, 0)) for p in flat_params
            ]
        else:
            param_specs = [
                pl.BlockSpec(
                    p.shape, lambda i: (0, 0), pipeline_mode=param_pipeline_mode
                )
                for p in flat_params
            ]
        fn = pl.pallas_call(
            kernel,
            out_shape=jax.ShapeDtypeStruct((B_pad, n_out), jnp.float32),
            grid_spec=pltpu.PrefetchScalarGridSpec(
                num_scalar_prefetch=0,
                grid=(n_tiles,),
                in_specs=[x_spec] + param_specs,
                out_specs=out_spec,
            ),
            compiler_params=pltpu.CompilerParams(
                dimension_semantics=("parallel",),
                vmem_limit_bytes=vmem_limit,
            ),
        )
        out = fn(x2d, *flat_params)
        return jax.block_until_ready(out)

    try:
        # Grid-invariant weights: single buffer (halves their VMEM footprint).
        out = _call(pl.Buffered(1))
    except Exception:
        # Fallback: default double buffering (still correct, just more VMEM).
        out = _call(None)

    return out[:B, :n_comp]


def reference_forward(x_nchw, params, *, n_layers):
    """Pure-JAX f32 reference mirroring the PyTorch forward."""
    B = x_nchw.shape[0]
    z = x_nchw.reshape(B, -1).astype(jnp.float32)
    z = jnp.maximum(z @ params["preproc_w"].T + params["preproc_b"], 0.0)
    for i in range(1, n_layers + 1):
        h = jnp.maximum(
            z @ params[f"layer_first_{i}_w"].T + params[f"layer_first_{i}_b"], 0.0
        )
        z = jnp.maximum(
            z + h @ params[f"layer_second_{i}_w"].T + params[f"layer_second_{i}_b"],
            0.0,
        )
    return z @ params["finalize_w"].T + params["finalize_b"]


def init_params(key, d_in, n_nodes, n_layers, n_components):
    """Deterministic PyTorch-like init: U(-1/sqrt(fan_in), 1/sqrt(fan_in))."""
    params = {}

    def linear(key, out_f, in_f):
        kw, kb = jax.random.split(key)
        bound = 1.0 / jnp.sqrt(jnp.float32(in_f))
        w = jax.random.uniform(kw, (out_f, in_f), jnp.float32, -bound, bound)
        b = jax.random.uniform(kb, (out_f,), jnp.float32, -bound, bound)
        return w, b

    keys = jax.random.split(key, 2 * n_layers + 2)
    params["preproc_w"], params["preproc_b"] = linear(keys[0], n_nodes, d_in)
    for i in range(1, n_layers + 1):
        w, b = linear(keys[2 * i - 1], n_nodes, n_nodes)
        params[f"layer_first_{i}_w"], params[f"layer_first_{i}_b"] = w, b
        w, b = linear(keys[2 * i], n_nodes, n_nodes)
        params[f"layer_second_{i}_w"], params[f"layer_second_{i}_b"] = w, b
    params["finalize_w"], params["finalize_b"] = linear(
        keys[-1], n_components, n_nodes
    )
    return params


if __name__ == "__main__":
    # Small shapes consistent with the module: dims=(4,16,16) -> d_in=1024,
    # scaled-down n_nodes/n_layers, n_components=2 as in the default.
    # B=200 is deliberately not a multiple of the batch tile so the padding
    # path and a 2-step batch grid are both exercised.
    B, C, H, W = 200, 4, 16, 16
    d_in = C * H * W
    n_nodes = 256
    n_layers = 2
    n_components = 2

    key = jax.random.PRNGKey(0)
    kx, kp = jax.random.split(key)
    x = jax.random.normal(kx, (B, C, H, W), jnp.float32)
    params = init_params(kp, d_in, n_nodes, n_layers, n_components)

    ref = reference_forward(x, params, n_layers=n_layers)
    ref = jax.block_until_ready(ref)

    # Exact-parity path (f32 compute) vs the reference.
    out_f32 = resnet_encoder_forward(
        x, params, n_layers=n_layers, tile_b=128, compute_dtype=jnp.float32
    )
    out_f32 = jax.block_until_ready(out_f32)
    assert out_f32.shape == (B, n_components)
    assert jnp.allclose(out_f32, ref, atol=5e-4, rtol=5e-4), "f32 mismatch vs ref"

    # Default fast path (bf16 MXU inputs, f32 accumulation): loose check.
    out_bf16 = resnet_encoder_forward(x, params, n_layers=n_layers, tile_b=128)
    out_bf16 = jax.block_until_ready(out_bf16)
    assert out_bf16.shape == (B, n_components)
    err = float(jnp.max(jnp.abs(out_bf16 - ref)))
    scale = float(jnp.max(jnp.abs(ref)))
    assert err <= 0.1 * scale + 0.05, f"bf16 path too far from reference: {err}"

    print("KERNEL_OK")
</pallas_src>

<mosaic_0001>
module attributes {stable_mosaic.version = 11 : i64} {
  func.func @kernel(%arg0: i32, %arg1: memref<112x1024xf32, #tpu.memory_space<vmem>>, %arg2: memref<1024x256xf32, #tpu.memory_space<vmem>>, %arg3: memref<1x256xf32, #tpu.memory_space<vmem>>, %arg4: memref<256x256xf32, #tpu.memory_space<vmem>>, %arg5: memref<1x256xf32, #tpu.memory_space<vmem>>, %arg6: memref<256x256xf32, #tpu.memory_space<vmem>>, %arg7: memref<1x256xf32, #tpu.memory_space<vmem>>, %arg8: memref<256x256xf32, #tpu.memory_space<vmem>>, %arg9: memref<1x256xf32, #tpu.memory_space<vmem>>, %arg10: memref<256x256xf32, #tpu.memory_space<vmem>>, %arg11: memref<1x256xf32, #tpu.memory_space<vmem>>, %arg12: memref<256x128xf32, #tpu.memory_space<vmem>>, %arg13: memref<1x128xf32, #tpu.memory_space<vmem>>, %arg14: memref<112x128xf32, #tpu.memory_space<vmem>>) attributes {dimension_semantics = [#tpu.dimension_semantics<parallel>], iteration_bounds = array<i64: 2>, scalar_prefetch = 0 : i64, scratch_operands = 0 : i64, tpu.core_type = #tpu.core_type<tc>, window_params = [{transform_indices = @transform_0, window_bounds = array<i64: 112, 1024>}, {pipeline_mode = #tpu.pipeline_mode<synchronous>, transform_indices = @transform_1, window_bounds = array<i64: 1024, 256>}, {pipeline_mode = #tpu.pipeline_mode<synchronous>, transform_indices = @transform_2, window_bounds = array<i64: 1, 256>}, {pipeline_mode = #tpu.pipeline_mode<synchronous>, transform_indices = @transform_3, window_bounds = array<i64: 256, 256>}, {pipeline_mode = #tpu.pipeline_mode<synchronous>, transform_indices = @transform_4, window_bounds = array<i64: 1, 256>}, {pipeline_mode = #tpu.pipeline_mode<synchronous>, transform_indices = @transform_5, window_bounds = array<i64: 256, 256>}, {pipeline_mode = #tpu.pipeline_mode<synchronous>, transform_indices = @transform_6, window_bounds = array<i64: 1, 256>}, {pipeline_mode = #tpu.pipeline_mode<synchronous>, transform_indices = @transform_7, window_bounds = array<i64: 256, 256>}, {pipeline_mode = #tpu.pipeline_mode<synchronous>, transform_indices = @transform_8, window_bounds = array<i64: 1, 256>}, {pipeline_mode = #tpu.pipeline_mode<synchronous>, transform_indices = @transform_9, window_bounds = array<i64: 256, 256>}, {pipeline_mode = #tpu.pipeline_mode<synchronous>, transform_indices = @transform_10, window_bounds = array<i64: 1, 256>}, {pipeline_mode = #tpu.pipeline_mode<synchronous>, transform_indices = @transform_11, window_bounds = array<i64: 256, 128>}, {pipeline_mode = #tpu.pipeline_mode<synchronous>, transform_indices = @transform_12, window_bounds = array<i64: 1, 128>}, {transform_indices = @transform_13, window_bounds = array<i64: 112, 128>}]} {
    %c0 = arith.constant 0 : index
    %c0_0 = arith.constant 0 : index
    %0 = vector.load %arg1[%c0, %c0_0] : memref<112x1024xf32, #tpu.memory_space<vmem>>, vector<112x1024xf32>
    %c0_1 = arith.constant 0 : index
    %c0_2 = arith.constant 0 : index
    %1 = vector.load %arg2[%c0_1, %c0_2] : memref<1024x256xf32, #tpu.memory_space<vmem>>, vector<1024x256xf32>
    %cst = arith.constant dense<0.000000e+00> : vector<112x256xf32>
    %2 = tpu.matmul %0, %1, %cst {dimension_numbers = #tpu.dot_dimension_numbers<[1], [0], [0], [1], [0, 0, 1, 1], [], []>} : vector<112x1024xf32>, vector<1024x256xf32>, vector<112x256xf32> -> vector<112x256xf32>
    %c0_3 = arith.constant 0 : index
    %c0_4 = arith.constant 0 : index
    %3 = vector.load %arg3[%c0_3, %c0_4] : memref<1x256xf32, #tpu.memory_space<vmem>>, vector<1x256xf32>
    %4 = vector.broadcast %3 : vector<1x256xf32> to vector<112x256xf32>
    %5 = arith.addf %2, %4 : vector<112x256xf32>
    %cst_5 = arith.constant 0.000000e+00 : f32
    %6 = vector.broadcast %cst_5 : f32 to vector<112x256xf32>
    %7 = arith.maximumf %5, %6 : vector<112x256xf32>
    %c0_6 = arith.constant 0 : index
    %c0_7 = arith.constant 0 : index
    %8 = vector.load %arg4[%c0_6, %c0_7] : memref<256x256xf32, #tpu.memory_space<vmem>>, vector<256x256xf32>
    %cst_8 = arith.constant dense<0.000000e+00> : vector<112x256xf32>
    %9 = tpu.matmul %7, %8, %cst_8 {dimension_numbers = #tpu.dot_dimension_numbers<[1], [0], [0], [1], [0, 0, 1, 1], [], []>} : vector<112x256xf32>, vector<256x256xf32>, vector<112x256xf32> -> vector<112x256xf32>
    %c0_9 = arith.constant 0 : index
    %c0_10 = arith.constant 0 : index
    %10 = vector.load %arg5[%c0_9, %c0_10] : memref<1x256xf32, #tpu.memory_space<vmem>>, vector<1x256xf32>
    %11 = vector.broadcast %10 : vector<1x256xf32> to vector<112x256xf32>
    %12 = arith.addf %9, %11 : vector<112x256xf32>
    %cst_11 = arith.constant 0.000000e+00 : f32
    %13 = vector.broadcast %cst_11 : f32 to vector<112x256xf32>
    %14 = arith.maximumf %12, %13 : vector<112x256xf32>
    %c0_12 = arith.constant 0 : index
    %c0_13 = arith.constant 0 : index
    %15 = vector.load %arg6[%c0_12, %c0_13] : memref<256x256xf32, #tpu.memory_space<vmem>>, vector<256x256xf32>
    %cst_14 = arith.constant dense<0.000000e+00> : vector<112x256xf32>
    %16 = tpu.matmul %14, %15, %cst_14 {dimension_numbers = #tpu.dot_dimension_numbers<[1], [0], [0], [1], [0, 0, 1, 1], [], []>} : vector<112x256xf32>, vector<256x256xf32>, vector<112x256xf32> -> vector<112x256xf32>
    %17 = arith.addf %7, %16 : vector<112x256xf32>
    %c0_15 = arith.constant 0 : index
    %c0_16 = arith.constant 0 : index
    %18 = vector.load %arg7[%c0_15, %c0_16] : memref<1x256xf32, #tpu.memory_space<vmem>>, vector<1x256xf32>
    %19 = vector.broadcast %18 : vector<1x256xf32> to vector<112x256xf32>
    %20 = arith.addf %17, %19 : vector<112x256xf32>
    %cst_17 = arith.constant 0.000000e+00 : f32
    %21 = vector.broadcast %cst_17 : f32 to vector<112x256xf32>
    %22 = arith.maximumf %20, %21 : vector<112x256xf32>
    %c0_18 = arith.constant 0 : index
    %c0_19 = arith.constant 0 : index
    %23 = vector.load %arg8[%c0_18, %c0_19] : memref<256x256xf32, #tpu.memory_space<vmem>>, vector<256x256xf32>
    %cst_20 = arith.constant dense<0.000000e+00> : vector<112x256xf32>
    %24 = tpu.matmul %22, %23, %cst_20 {dimension_numbers = #tpu.dot_dimension_numbers<[1], [0], [0], [1], [0, 0, 1, 1], [], []>} : vector<112x256xf32>, vector<256x256xf32>, vector<112x256xf32> -> vector<112x256xf32>
    %c0_21 = arith.constant 0 : index
    %c0_22 = arith.constant 0 : index
    %25 = vector.load %arg9[%c0_21, %c0_22] : memref<1x256xf32, #tpu.memory_space<vmem>>, vector<1x256xf32>
    %26 = vector.broadcast %25 : vector<1x256xf32> to vector<112x256xf32>
    %27 = arith.addf %24, %26 : vector<112x256xf32>
    %cst_23 = arith.constant 0.000000e+00 : f32
    %28 = vector.broadcast %cst_23 : f32 to vector<112x256xf32>
    %29 = arith.maximumf %27, %28 : vector<112x256xf32>
    %c0_24 = arith.constant 0 : index
    %c0_25 = arith.constant 0 : index
    %30 = vector.load %arg10[%c0_24, %c0_25] : memref<256x256xf32, #tpu.memory_space<vmem>>, vector<256x256xf32>
    %cst_26 = arith.constant dense<0.000000e+00> : vector<112x256xf32>
    %31 = tpu.matmul %29, %30, %cst_26 {dimension_numbers = #tpu.dot_dimension_numbers<[1], [0], [0], [1], [0, 0, 1, 1], [], []>} : vector<112x256xf32>, vector<256x256xf32>, vector<112x256xf32> -> vector<112x256xf32>
    %32 = arith.addf %22, %31 : vector<112x256xf32>
    %c0_27 = arith.constant 0 : index
    %c0_28 = arith.constant 0 : index
    %33 = vector.load %arg11[%c0_27, %c0_28] : memref<1x256xf32, #tpu.memory_space<vmem>>, vector<1x256xf32>
    %34 = vector.broadcast %33 : vector<1x256xf32> to vector<112x256xf32>
    %35 = arith.addf %32, %34 : vector<112x256xf32>
    %cst_29 = arith.constant 0.000000e+00 : f32
    %36 = vector.broadcast %cst_29 : f32 to vector<112x256xf32>
    %37 = arith.maximumf %35, %36 : vector<112x256xf32>
    %c0_30 = arith.constant 0 : index
    %c0_31 = arith.constant 0 : index
    %38 = vector.load %arg12[%c0_30, %c0_31] : memref<256x128xf32, #tpu.memory_space<vmem>>, vector<256x128xf32>
    %cst_32 = arith.constant dense<0.000000e+00> : vector<112x128xf32>
    %39 = tpu.matmul %37, %38, %cst_32 {dimension_numbers = #tpu.dot_dimension_numbers<[1], [0], [0], [1], [0, 0, 1, 1], [], []>} : vector<112x256xf32>, vector<256x128xf32>, vector<112x128xf32> -> vector<112x128xf32>
    %c0_33 = arith.constant 0 : index
    %c0_34 = arith.constant 0 : index
    %40 = vector.load %arg13[%c0_33, %c0_34] : memref<1x128xf32, #tpu.memory_space<vmem>>, vector<1x128xf32>
    %41 = vector.broadcast %40 : vector<1x128xf32> to vector<112x128xf32>
    %42 = arith.addf %39, %41 : vector<112x128xf32>
    %c0_35 = arith.constant 0 : index
    %c0_36 = arith.constant 0 : index
    %43 = vector.load %arg14[%c0_35, %c0_36] : memref<112x128xf32, #tpu.memory_space<vmem>>, vector<112x128xf32>
    tpu.vector_store %arg14[%c0_35, %c0_36], %42 {strides = array<i32>} : memref<112x128xf32, #tpu.memory_space<vmem>>, vector<112x128xf32>,
    return
  }
  func.func @transform_0(%arg0: i32) -> (i32, i32) {
    %c0_i32 = arith.constant 0 : i32
    %c0_i32_0 = arith.constant 0 : i32
    return %arg0, %c0_i32 : i32, i32
  }
  func.func @transform_1(%arg0: i32) -> (i32, i32) {
    %c0_i32 = arith.constant 0 : i32
    %c0_i32_0 = arith.constant 0 : i32
    %c0_i32_1 = arith.constant 0 : i32
    return %c0_i32, %c0_i32_0 : i32, i32
  }
  func.func @transform_2(%arg0: i32) -> (i32, i32) {
    %c0_i32 = arith.constant 0 : i32
    %c0_i32_0 = arith.constant 0 : i32
    %c0_i32_1 = arith.constant 0 : i32
    return %c0_i32, %c0_i32_0 : i32, i32
  }
  func.func @transform_3(%arg0: i32) -> (i32, i32) {
    %c0_i32 = arith.constant 0 : i32
    %c0_i32_0 = arith.constant 0 : i32
    %c0_i32_1 = arith.constant 0 : i32
    return %c0_i32, %c0_i32_0 : i32, i32
  }
  func.func @transform_4(%arg0: i32) -> (i32, i32) {
    %c0_i32 = arith.constant 0 : i32
    %c0_i32_0 = arith.constant 0 : i32
    %c0_i32_1 = arith.constant 0 : i32
    return %c0_i32, %c0_i32_0 : i32, i32
  }
  func.func @transform_5(%arg0: i32) -> (i32, i32) {
    %c0_i32 = arith.constant 0 : i32
    %c0_i32_0 = arith.constant 0 : i32
    %c0_i32_1 = arith.constant 0 : i32
    return %c0_i32, %c0_i32_0 : i32, i32
  }
  func.func @transform_6(%arg0: i32) -> (i32, i32) {
    %c0_i32 = arith.constant 0 : i32
    %c0_i32_0 = arith.constant 0 : i32
    %c0_i32_1 = arith.constant 0 : i32
    return %c0_i32, %c0_i32_0 : i32, i32
  }
  func.func @transform_7(%arg0: i32) -> (i32, i32) {
    %c0_i32 = arith.constant 0 : i32
    %c0_i32_0 = arith.constant 0 : i32
    %c0_i32_1 = arith.constant 0 : i32
    return %c0_i32, %c0_i32_0 : i32, i32
  }
  func.func @transform_8(%arg0: i32) -> (i32, i32) {
    %c0_i32 = arith.constant 0 : i32
    %c0_i32_0 = arith.constant 0 : i32
    %c0_i32_1 = arith.constant 0 : i32
    return %c0_i32, %c0_i32_0 : i32, i32
  }
  func.func @transform_9(%arg0: i32) -> (i32, i32) {
    %c0_i32 = arith.constant 0 : i32
    %c0_i32_0 = arith.constant 0 : i32
    %c0_i32_1 = arith.constant 0 : i32
    return %c0_i32, %c0_i32_0 : i32, i32
  }
  func.func @transform_10(%arg0: i32) -> (i32, i32) {
    %c0_i32 = arith.constant 0 : i32
    %c0_i32_0 = arith.constant 0 : i32
    %c0_i32_1 = arith.constant 0 : i32
    return %c0_i32, %c0_i32_0 : i32, i32
  }
  func.func @transform_11(%arg0: i32) -> (i32, i32) {
    %c0_i32 = arith.constant 0 : i32
    %c0_i32_0 = arith.constant 0 : i32
    %c0_i32_1 = arith.constant 0 : i32
    return %c0_i32, %c0_i32_0 : i32, i32
  }
  func.func @transform_12(%arg0: i32) -> (i32, i32) {
    %c0_i32 = arith.constant 0 : i32
    %c0_i32_0 = arith.constant 0 : i32
    %c0_i32_1 = arith.constant 0 : i32
    return %c0_i32, %c0_i32_0 : i32, i32
  }
  func.func @transform_13(%arg0: i32) -> (i32, i32) {
    %c0_i32 = arith.constant 0 : i32
    %c0_i32_0 = arith.constant 0 : i32
    return %arg0, %c0_i32 : i32, i32
  }
}

module attributes {stable_mosaic.version = 11 : i64} {
  func.func @kernel(%arg0: i32, %arg1: memref<112x1024xf32, #tpu.memory_space<vmem>>, %arg2: memref<1024x256xf32, #tpu.memory_space<vmem>>, %arg3: memref<1x256xf32, #tpu.memory_space<vmem>>, %arg4: memref<256x256xf32, #tpu.memory_space<vmem>>, %arg5: memref<1x256xf32, #tpu.memory_space<vmem>>, %arg6: memref<256x256xf32, #tpu.memory_space<vmem>>, %arg7: memref<1x256xf32, #tpu.memory_space<vmem>>, %arg8: memref<256x256xf32, #tpu.memory_space<vmem>>, %arg9: memref<1x256xf32, #tpu.memory_space<vmem>>, %arg10: memref<256x256xf32, #tpu.memory_space<vmem>>, %arg11: memref<1x256xf32, #tpu.memory_space<vmem>>, %arg12: memref<256x128xf32, #tpu.memory_space<vmem>>, %arg13: memref<1x128xf32, #tpu.memory_space<vmem>>, %arg14: memref<112x128xf32, #tpu.memory_space<vmem>>) attributes {dimension_semantics = [#tpu.dimension_semantics<parallel>], iteration_bounds = array<i64: 2>, scalar_prefetch = 0 : i64, scratch_operands = 0 : i64, tpu.core_type = #tpu.core_type<tc>, window_params = [{transform_indices = @transform_0, window_bounds = array<i64: 112, 1024>}, {pipeline_mode = #tpu.pipeline_mode<synchronous>, transform_indices = @transform_1, window_bounds = array<i64: 1024, 256>}, {pipeline_mode = #tpu.pipeline_mode<synchronous>, transform_indices = @transform_2, window_bounds = array<i64: 1, 256>}, {pipeline_mode = #tpu.pipeline_mode<synchronous>, transform_indices = @transform_3, window_bounds = array<i64: 256, 256>}, {pipeline_mode = #tpu.pipeline_mode<synchronous>, transform_indices = @transform_4, window_bounds = array<i64: 1, 256>}, {pipeline_mode = #tpu.pipeline_mode<synchronous>, transform_indices = @transform_5, window_bounds = array<i64: 256, 256>}, {pipeline_mode = #tpu.pipeline_mode<synchronous>, transform_indices = @transform_6, window_bounds = array<i64: 1, 256>}, {pipeline_mode = #tpu.pipeline_mode<synchronous>, transform_indices = @transform_7, window_bounds = array<i64: 256, 256>}, {pipeline_mode = #tpu.pipeline_mode<synchronous>, transform_indices = @transform_8, window_bounds = array<i64: 1, 256>}, {pipeline_mode = #tpu.pipeline_mode<synchronous>, transform_indices = @transform_9, window_bounds = array<i64: 256, 256>}, {pipeline_mode = #tpu.pipeline_mode<synchronous>, transform_indices = @transform_10, window_bounds = array<i64: 1, 256>}, {pipeline_mode = #tpu.pipeline_mode<synchronous>, transform_indices = @transform_11, window_bounds = array<i64: 256, 128>}, {pipeline_mode = #tpu.pipeline_mode<synchronous>, transform_indices = @transform_12, window_bounds = array<i64: 1, 128>}, {transform_indices = @transform_13, window_bounds = array<i64: 112, 128>}]} {
    %c0 = arith.constant 0 : index
    %c0_0 = arith.constant 0 : index
    %0 = vector.load %arg1[%c0, %c0_0] : memref<112x1024xf32, #tpu.memory_space<vmem>>, vector<112x1024xf32>
    %c0_1 = arith.constant 0 : index
    %c0_2 = arith.constant 0 : index
    %1 = vector.load %arg2[%c0_1, %c0_2] : memref<1024x256xf32, #tpu.memory_space<vmem>>, vector<1024x256xf32>
    %cst = arith.constant dense<0.000000e+00> : vector<112x256xf32>
    %2 = tpu.matmul %0, %1, %cst {dimension_numbers = #tpu.dot_dimension_numbers<[1], [0], [0], [1], [0, 0, 1, 1], [], []>} : vector<112x1024xf32>, vector<1024x256xf32>, vector<112x256xf32> -> vector<112x256xf32>
    %c0_3 = arith.constant 0 : index
    %c0_4 = arith.constant 0 : index
    %3 = vector.load %arg3[%c0_3, %c0_4] : memref<1x256xf32, #tpu.memory_space<vmem>>, vector<1x256xf32>
    %4 = vector.broadcast %3 : vector<1x256xf32> to vector<112x256xf32>
    %5 = arith.addf %2, %4 : vector<112x256xf32>
    %cst_5 = arith.constant 0.000000e+00 : f32
    %6 = vector.broadcast %cst_5 : f32 to vector<112x256xf32>
    %7 = arith.maximumf %5, %6 : vector<112x256xf32>
    %c0_6 = arith.constant 0 : index
    %c0_7 = arith.constant 0 : index
    %8 = vector.load %arg4[%c0_6, %c0_7] : memref<256x256xf32, #tpu.memory_space<vmem>>, vector<256x256xf32>
    %cst_8 = arith.constant dense<0.000000e+00> : vector<112x256xf32>
    %9 = tpu.matmul %7, %8, %cst_8 {dimension_numbers = #tpu.dot_dimension_numbers<[1], [0], [0], [1], [0, 0, 1, 1], [], []>} : vector<112x256xf32>, vector<256x256xf32>, vector<112x256xf32> -> vector<112x256xf32>
    %c0_9 = arith.constant 0 : index
    %c0_10 = arith.constant 0 : index
    %10 = vector.load %arg5[%c0_9, %c0_10] : memref<1x256xf32, #tpu.memory_space<vmem>>, vector<1x256xf32>
    %11 = vector.broadcast %10 : vector<1x256xf32> to vector<112x256xf32>
    %12 = arith.addf %9, %11 : vector<112x256xf32>
    %cst_11 = arith.constant 0.000000e+00 : f32
    %13 = vector.broadcast %cst_11 : f32 to vector<112x256xf32>
    %14 = arith.maximumf %12, %13 : vector<112x256xf32>
    %c0_12 = arith.constant 0 : index
    %c0_13 = arith.constant 0 : index
    %15 = vector.load %arg6[%c0_12, %c0_13] : memref<256x256xf32, #tpu.memory_space<vmem>>, vector<256x256xf32>
    %cst_14 = arith.constant dense<0.000000e+00> : vector<112x256xf32>
    %16 = tpu.matmul %14, %15, %cst_14 {dimension_numbers = #tpu.dot_dimension_numbers<[1], [0], [0], [1], [0, 0, 1, 1], [], []>} : vector<112x256xf32>, vector<256x256xf32>, vector<112x256xf32> -> vector<112x256xf32>
    %17 = arith.addf %7, %16 : vector<112x256xf32>
    %c0_15 = arith.constant 0 : index
    %c0_16 = arith.constant 0 : index
    %18 = vector.load %arg7[%c0_15, %c0_16] : memref<1x256xf32, #tpu.memory_space<vmem>>, vector<1x256xf32>
    %19 = vector.broadcast %18 : vector<1x256xf32> to vector<112x256xf32>
    %20 = arith.addf %17, %19 : vector<112x256xf32>
    %cst_17 = arith.constant 0.000000e+00 : f32
    %21 = vector.broadcast %cst_17 : f32 to vector<112x256xf32>
    %22 = arith.maximumf %20, %21 : vector<112x256xf32>
    %c0_18 = arith.constant 0 : index
    %c0_19 = arith.constant 0 : index
    %23 = vector.load %arg8[%c0_18, %c0_19] : memref<256x256xf32, #tpu.memory_space<vmem>>, vector<256x256xf32>
    %cst_20 = arith.constant dense<0.000000e+00> : vector<112x256xf32>
    %24 = tpu.matmul %22, %23, %cst_20 {dimension_numbers = #tpu.dot_dimension_numbers<[1], [0], [0], [1], [0, 0, 1, 1], [], []>} : vector<112x256xf32>, vector<256x256xf32>, vector<112x256xf32> -> vector<112x256xf32>
    %c0_21 = arith.constant 0 : index
    %c0_22 = arith.constant 0 : index
    %25 = vector.load %arg9[%c0_21, %c0_22] : memref<1x256xf32, #tpu.memory_space<vmem>>, vector<1x256xf32>
    %26 = vector.broadcast %25 : vector<1x256xf32> to vector<112x256xf32>
    %27 = arith.addf %24, %26 : vector<112x256xf32>
    %cst_23 = arith.constant 0.000000e+00 : f32
    %28 = vector.broadcast %cst_23 : f32 to vector<112x256xf32>
    %29 = arith.maximumf %27, %28 : vector<112x256xf32>
    %c0_24 = arith.constant 0 : index
    %c0_25 = arith.constant 0 : index
    %30 = vector.load %arg10[%c0_24, %c0_25] : memref<256x256xf32, #tpu.memory_space<vmem>>, vector<256x256xf32>
    %cst_26 = arith.constant dense<0.000000e+00> : vector<112x256xf32>
    %31 = tpu.matmul %29, %30, %cst_26 {dimension_numbers = #tpu.dot_dimension_numbers<[1], [0], [0], [1], [0, 0, 1, 1], [], []>} : vector<112x256xf32>, vector<256x256xf32>, vector<112x256xf32> -> vector<112x256xf32>
    %32 = arith.addf %22, %31 : vector<112x256xf32>
    %c0_27 = arith.constant 0 : index
    %c0_28 = arith.constant 0 : index
    %33 = vector.load %arg11[%c0_27, %c0_28] : memref<1x256xf32, #tpu.memory_space<vmem>>, vector<1x256xf32>
    %34 = vector.broadcast %33 : vector<1x256xf32> to vector<112x256xf32>
    %35 = arith.addf %32, %34 : vector<112x256xf32>
    %cst_29 = arith.constant 0.000000e+00 : f32
    %36 = vector.broadcast %cst_29 : f32 to vector<112x256xf32>
    %37 = arith.maximumf %35, %36 : vector<112x256xf32>
    %c0_30 = arith.constant 0 : index
    %c0_31 = arith.constant 0 : index
    %38 = vector.load %arg12[%c0_30, %c0_31] : memref<256x128xf32, #tpu.memory_space<vmem>>, vector<256x128xf32>
    %cst_32 = arith.constant dense<0.000000e+00> : vector<112x128xf32>
    %39 = tpu.matmul %37, %38, %cst_32 {dimension_numbers = #tpu.dot_dimension_numbers<[1], [0], [0], [1], [0, 0, 1, 1], [], []>} : vector<112x256xf32>, vector<256x128xf32>, vector<112x128xf32> -> vector<112x128xf32>
    %c0_33 = arith.constant 0 : index
    %c0_34 = arith.constant 0 : index
    %40 = vector.load %arg13[%c0_33, %c0_34] : memref<1x128xf32, #tpu.memory_space<vmem>>, vector<1x128xf32>
    %41 = vector.broadcast %40 : vector<1x128xf32> to vector<112x128xf32>
    %42 = arith.addf %39, %41 : vector<112x128xf32>
    %c0_35 = arith.constant 0 : index
    %c0_36 = arith.constant 0 : index
    %43 = vector.load %arg14[%c0_35, %c0_36] : memref<112x128xf32, #tpu.memory_space<vmem>>, vector<112x128xf32>
    tpu.vector_store %arg14[%c0_35, %c0_36], %42 {strides = array<i32>} : memref<112x128xf32, #tpu.memory_space<vmem>>, vector<112x128xf32>,
    return
  }
  func.func @transform_0(%arg0: i32) -> (i32, i32) {
    %c0_i32 = arith.constant 0 : i32
    %c0_i32_0 = arith.constant 0 : i32
    return %arg0, %c0_i32 : i32, i32
  }
  func.func @transform_1(%arg0: i32) -> (i32, i32) {
    %c0_i32 = arith.constant 0 : i32
    %c0_i32_0 = arith.constant 0 : i32
    %c0_i32_1 = arith.constant 0 : i32
    return %c0_i32, %c0_i32_0 : i32, i32
  }
  func.func @transform_2(%arg0: i32) -> (i32, i32) {
    %c0_i32 = arith.constant 0 : i32
    %c0_i32_0 = arith.constant 0 : i32
    %c0_i32_1 = arith.constant 0 : i32
    return %c0_i32, %c0_i32_0 : i32, i32
  }
  func.func @transform_3(%arg0: i32) -> (i32, i32) {
    %c0_i32 = arith.constant 0 : i32
    %c0_i32_0 = arith.constant 0 : i32
    %c0_i32_1 = arith.constant 0 : i32
    return %c0_i32, %c0_i32_0 : i32, i32
  }
  func.func @transform_4(%arg0: i32) -> (i32, i32) {
    %c0_i32 = arith.constant 0 : i32
    %c0_i32_0 = arith.constant 0 : i32
    %c0_i32_1 = arith.constant 0 : i32
    return %c0_i32, %c0_i32_0 : i32, i32
  }
  func.func @transform_5(%arg0: i32) -> (i32, i32) {
    %c0_i32 = arith.constant 0 : i32
    %c0_i32_0 = arith.constant 0 : i32
    %c0_i32_1 = arith.constant 0 : i32
    return %c0_i32, %c0_i32_0 : i32, i32
  }
  func.func @transform_6(%arg0: i32) -> (i32, i32) {
    %c0_i32 = arith.constant 0 : i32
    %c0_i32_0 = arith.constant 0 : i32
    %c0_i32_1 = arith.constant 0 : i32
    return %c0_i32, %c0_i32_0 : i32, i32
  }
  func.func @transform_7(%arg0: i32) -> (i32, i32) {
    %c0_i32 = arith.constant 0 : i32
    %c0_i32_0 = arith.constant 0 : i32
    %c0_i32_1 = arith.constant 0 : i32
    return %c0_i32, %c0_i32_0 : i32, i32
  }
  func.func @transform_8(%arg0: i32) -> (i32, i32) {
    %c0_i32 = arith.constant 0 : i32
    %c0_i32_0 = arith.constant 0 : i32
    %c0_i32_1 = arith.constant 0 : i32
    return %c0_i32, %c0_i32_0 : i32, i32
  }
  func.func @transform_9(%arg0: i32) -> (i32, i32) {
    %c0_i32 = arith.constant 0 : i32
    %c0_i32_0 = arith.constant 0 : i32
    %c0_i32_1 = arith.constant 0 : i32
    return %c0_i32, %c0_i32_0 : i32, i32
  }
  func.func @transform_10(%arg0: i32) -> (i32, i32) {
    %c0_i32 = arith.constant 0 : i32
    %c0_i32_0 = arith.constant 0 : i32
    %c0_i32_1 = arith.constant 0 : i32
    return %c0_i32, %c0_i32_0 : i32, i32
  }
  func.func @transform_11(%arg0: i32) -> (i32, i32) {
    %c0_i32 = arith.constant 0 : i32
    %c0_i32_0 = arith.constant 0 : i32
    %c0_i32_1 = arith.constant 0 : i32
    return %c0_i32, %c0_i32_0 : i32, i32
  }
  func.func @transform_12(%arg0: i32) -> (i32, i32) {
    %c0_i32 = arith.constant 0 : i32
    %c0_i32_0 = arith.constant 0 : i32
    %c0_i32_1 = arith.constant 0 : i32
    return %c0_i32, %c0_i32_0 : i32, i32
  }
  func.func @transform_13(%arg0: i32) -> (i32, i32) {
    %c0_i32 = arith.constant 0 : i32
    %c0_i32_0 = arith.constant 0 : i32
    return %arg0, %c0_i32 : i32, i32
  }
}

</mosaic_0001>

<bundles_post_ra>
// kernel: tpu_custom_call.1
= control target key start
LH: loop header
LB: loop body
LE: loop exit
PB: predicated region body
PF: predicated region fallthrough
CT: control target
= control target key end

     0   :  { %s4840_s0 = inlined_call_operand.hbm [shape: f32[224,1024], index: 0, kind: input, shape index: {}]   ;;  %s4841_s1 = inlined_call_operand.hbm [shape: f32[1024,256], index: 1, kind: input, shape index: {}]   ;;  %s4842_s2 = inlined_call_operand.vmem [shape: f32[1,256], index: 2, kind: input, shape index: {}]   ;;  %s4843_s3 = inlined_call_operand.hbm [shape: f32[256,256], index: 3, kind: input, shape index: {}]   ;;  %s4844_s4 = inlined_call_operand.vmem [shape: f32[1,256], index: 4, kind: input, shape index: {}]   ;;  %s4845_s5 = inlined_call_operand.hbm [shape: f32[256,256], index: 5, kind: input, shape index: {}]   ;;  %s4846_s6 = inlined_call_operand.vmem [shape: f32[1,256], index: 6, kind: input, shape index: {}]   ;;  %s4847_s7 = inlined_call_operand.hbm [shape: f32[256,256], index: 7, kind: input, shape index: {}]   ;;  %s4848_s8 = inlined_call_operand.vmem [shape: f32[1,256], index: 8, kind: input, shape index: {}]   ;;  %s4849_s9 = inlined_call_operand.hbm [shape: f32[256,256], index: 9, kind: input, shape index: {}]   ;;  %s4850_s10 = inlined_call_operand.vmem [shape: f32[1,256], index: 10, kind: input, shape index: {}]   ;;  %s4851_s11 = inlined_call_operand.hbm [shape: f32[256,128], index: 11, kind: input, shape index: {}]   ;;  %s4852_s12 = inlined_call_operand.vmem [shape: f32[1,128], index: 12, kind: input, shape index: {}]   ;;  %s4853_s13 = inlined_call_operand.hbm [shape: f32[224,128], index: 13, kind: output, shape index: {}]  }
   0x1   :  { %4905 = sst [smem:[#allocation30_spill]] %s4841_s1 }
   0x2   :  { %4906 = sst [smem:[#allocation31_spill]] %s4843_s3 }
   0x3   :  { %4907 = sst [smem:[#allocation32_spill]] %s4845_s5 }
   0x4   :  { %4908 = sst [smem:[#allocation33_spill]] %s4847_s7 }
   0x5   :  { %4909 = sst [smem:[#allocation34_spill]] %s4849_s9 }
   0x6   :  { %4910 = sst [smem:[#allocation35_spill]] %s4851_s11 }
   0x7   :  { %18 = vsyncpa [#allocation3], 0 }
   0x8   :  { %20 = vsyncpa [#allocation3 + $0x1], 0 }
   0x9   :  { %21 = vsyncpa [#allocation6], 0 }
   0xa   :  { %22 = vsyncpa [#allocation9], 0 }
   0xb   :  { %23 = vsyncpa [#allocation12], 0 }
   0xc   :  { %24 = vsyncpa [#allocation4], 0 }
   0xd   :  { %26 = vsyncpa [#allocation4 + $0x1], 0  ;;  %s3607_s25 = smov 0   ;;  %s3609_s26 = smov 0  }
   0xe   :  { %s3611_s27 = smov 0   ;;  %s3613_s28 = smov 0  }
   0xf LB: > { %s3521_s29 = smov [#allocation5]   ;;  %s3628_s14 = sadd.s32 4294967295, %s3519_s28   ;;  %s3519_s28 = sphi %s3613_s28, %s5004_s28   ;;  %s3515_s27 = sphi %s3611_s27, %s5003_s27   ;;  %s3511_s26 = sphi %s3609_s26, %s5002_s26   ;;  %s3507_s25 = sphi %s3607_s25, %s5001_s25  }
  0x10   : > { %s353_s30 = sshll.u32 %s3521_s29, 4  ;;  %p3010_p0 = scmp.ge.s32.totalorder %s3519_s28, 1  ;;  %s354_s30 = int_to_ptr.vmem [resolvable:$true] %s353_s30 }
  0x11   : > { %p4854_p1 = scmp.eq.s32.totalorder %s3628_s14, 0  ;;  %p341_p2 = scmp.lt.s32.totalorder %s3519_s28, 3 }
  0x12   : > { %s3522_s16 = smov [#allocation8]   ;;  %s3523_s19 = smov [#allocation11]  }
  0x13   : > { %p3633_p3 = pnand %p3010_p0, %p341_p2  ;;  %s385_s17 = sshll.u32 %s3522_s16, 4  ;;  %s3646_s17 = int_to_ptr.vmem [resolvable:$true] %s385_s17 }
  0x14   : > { %s417_s20 = sshll.u32 %s3523_s19, 4  ;;  %s3270_s22 = scalar_lea.vmem %s354_s30, 32768  ;;  %s3648_s20 = int_to_ptr.vmem [resolvable:$true] %s417_s20 }
  0x15   : > { %s4911_s15 = scalar_select %p3633_p3, 1, 0 }
  0x16   : > { %p3172_p5 = pneg %p3633_p3  ;;  %p3271_p8 = scmp.ne.s32.totalorder %s354_s30, %s3270_s22 }
  0x17   : > { %p3278_p11 = scmp.lt.s32.totalorder %s354_s30, %s354_s30  ;;  %p3279_p12 = scmp.lt.s32.totalorder %s3270_s22, %s3270_s22 }
  0x18   : > { %p3642_p6 = pnand %p3172_p5, %p4854_p1 }
  0x19   : > { %p3280_p13 = por %p3279_p12, %p3278_p11 }
  0x1a   : > { %p3652_p7 = pneg %p3642_p6 }
  0x1c   : > { %p3273_p9 = pnand %p3271_p8, %p3652_p7 }
  0x1e   : > { %p3274_p10 = pneg %p3273_p9 }
  0x20   : > { %p3281_p0 = pnand %p3280_p13, %p3274_p10 }
  0x22   : > { %3284 = shalt.err (!%p3281_p0)
}
  0x23   : > { %s3524_s23 = smov 256   ;;  %s3525_s24 = smov 16  }
  0x24   : > { %s4914_s1 = sld [smem:[#allocation30_spill]]  ;;  %s3296_s19 = scalar_lea.vmem %s3646_s17, 8192 }
  0x25   : > { %p3297_p2 = scmp.ne.s32.totalorder %s3646_s17, %s3296_s19  ;;  %p3304_p9 = scmp.lt.s32.totalorder %s3646_s17, %s3646_s17 }
  0x26   : > { %p3305_p10 = scmp.lt.s32.totalorder %s3296_s19, %s3296_s19 }
  0x27   : > { %p3299_p5 = pnand %p3297_p2, %p3652_p7 }
  0x28   : > { %p3306_p11 = por %p3305_p10, %p3304_p9 }
  0x29   : > { %p3300_p8 = pneg %p3299_p5 }
  0x2a   : > { %3175 = dma.hbm_to_vmem [thread:$0]  (!%p3642_p6), %s4914_s1, 32768, %s354_s30, [#allocation6], %s3524_s23, %s3524_s23, %s3525_s24  }
  0x2b   : > { %p3307_p12 = pnand %p3306_p11, %p3300_p8 }
  0x2d   : > { %3310 = shalt.err (!%p3307_p12)
}
  0x2e   : > { %s4915_s5 = sld [smem:[#allocation32_spill]]  ;;  %s3322_s30 = scalar_lea.vmem %s3648_s20, 8192 }
  0x2f   : > { %p3323_p13 = scmp.ne.s32.totalorder %s3648_s20, %s3322_s30  ;;  %p3330_p5 = scmp.lt.s32.totalorder %s3648_s20, %s3648_s20 }
  0x30   : > { %p3331_p8 = scmp.lt.s32.totalorder %s3322_s30, %s3322_s30 }
  0x31   : > { %p3325_p0 = pnand %p3323_p13, %p3652_p7 }
  0x32   : > { %p3332_p9 = por %p3331_p8, %p3330_p5 }
  0x33   : > { %p3326_p2 = pneg %p3325_p0 }
  0x34   : > { %3181 = dma.hbm_to_vmem [thread:$0]  (!%p3642_p6), %s4915_s5, 8192, %s3646_s17, [#allocation9], %s3524_s23, %s3524_s23, %s3525_s24  }
  0x35   : > { %p3333_p10 = pnand %p3332_p9, %p3326_p2 }
  0x37   : > { %3336 = shalt.err (!%p3333_p10)
}
  0x38   : > { %s4916_s9 = sld [smem:[#allocation34_spill]]  ;;  %s3526_s17 = smov [#allocation7]  }
  0x39   : > { %s369_s22 = sshll.u32 %s3526_s17, 4  ;;  %s3527_s29 = smov [#allocation10]   ;;  %s370_s22 = int_to_ptr.vmem [resolvable:$true] %s369_s22 }
  0x3a   : > { %s401_s1 = sshll.u32 %s3527_s29, 4  ;;  %s3348_s30 = scalar_lea.vmem %s370_s22, 8192  ;;  %s402_s1 = int_to_ptr.vmem [resolvable:$true] %s401_s1 }
  0x3b   : > { %p3349_p11 = scmp.ne.s32.totalorder %s370_s22, %s3348_s30  ;;  %p3356_p0 = scmp.lt.s32.totalorder %s370_s22, %s370_s22 }
  0x3c   : > { %p3357_p2 = scmp.lt.s32.totalorder %s3348_s30, %s3348_s30 }
  0x3d   : > { %p3351_p12 = pnand %p3349_p11, %p3652_p7 }
  0x3e   : > { %3187 = dma.hbm_to_vmem [thread:$0]  (!%p3642_p6), %s4916_s9, 8192, %s3648_s20, [#allocation12], %s3524_s23, %s3524_s23, %s3525_s24  }
  0x3f   : > { %p3352_p13 = pneg %p3351_p12  ;;  %p3358_p5 = por %p3357_p2, %p3356_p0 }
  0x41   : > { %p3359_p8 = pnand %p3358_p5, %p3352_p13 }
  0x43   : > { %3362 = shalt.err (!%p3359_p8)
}
  0x44   : > { %s4917_s3 = sld [smem:[#allocation31_spill]]  ;;  %s3374_s19 = scalar_lea.vmem %s402_s1, 8192 }
  0x45   : > { %p3375_p9 = scmp.ne.s32.totalorder %s402_s1, %s3374_s19  ;;  %p3382_p12 = scmp.lt.s32.totalorder %s402_s1, %s402_s1 }
  0x46   : > { %p3383_p0 = scmp.lt.s32.totalorder %s3374_s19, %s3374_s19 }
  0x47   : > { %p3377_p10 = pnand %p3375_p9, %p3652_p7 }
  0x48   : > { %p3384_p13 = por %p3383_p0, %p3382_p12 }
  0x49   : > { %p3378_p11 = pneg %p3377_p10 }
  0x4a   : > { %3178 = dma.hbm_to_vmem [thread:$0]  (!%p3642_p6), %s4917_s3, 8192, %s370_s22, [#allocation6], %s3524_s23, %s3524_s23, %s3525_s24  }
  0x4b   : > { %p3385_p2 = pnand %p3384_p13, %p3378_p11 }
  0x4d   : > { %3388 = shalt.err (!%p3385_p2)
}
  0x4e   : > { %s4918_s7 = sld [smem:[#allocation33_spill]]  ;;  %s3528_s22 = smov [#allocation13]  }
  0x4f   : > { %s433_s30 = sshll.u32 %s3528_s22, 4  ;;  %s434_s30 = int_to_ptr.vmem [resolvable:$true] %s433_s30 }
  0x50   : > { %s3400_s20 = scalar_lea.vmem %s434_s30, 4096  ;;  %p3408_p10 = scmp.lt.s32.totalorder %s434_s30, %s434_s30 }
  0x51   : > { %p3401_p5 = scmp.ne.s32.totalorder %s434_s30, %s3400_s20  ;;  %p3409_p11 = scmp.lt.s32.totalorder %s3400_s20, %s3400_s20 }
  0x53   : > { %p3403_p8 = pnand %p3401_p5, %p3652_p7  ;;  %p3410_p12 = por %p3409_p11, %p3408_p10 }
  0x54   : > { %3184 = dma.hbm_to_vmem [thread:$0]  (!%p3642_p6), %s4918_s7, 8192, %s402_s1, [#allocation9], %s3524_s23, %s3524_s23, %s3525_s24  }
  0x55   : > { %p3404_p9 = pneg %p3403_p8 }
  0x57   : > { %p3411_p0 = pnand %p3410_p12, %p3404_p9 }
  0x59   : > { %3414 = shalt.err (!%p3411_p0)
}
  0x5a   : > { %s3529_s16 = smov 128   ;;  %s3530_s1 = smov 8  }
  0x5b   : > { %s4919_s11 = sld [smem:[#allocation35_spill]]  ;;  %s3009_s24 = sadd.s32 4294967294, %s3519_s28  }
  0x5c   : > { %s3725_s19 = sadd.s32 1, %s3519_s28   ;;  %s39_s29 = sadd.s32 1, %s3515_s27 }
  0x5d   : > { %s36_s17 = ssub.s32 %s3519_s28, %s3725_s19  ;;  %p46_p13 = scmp.ne.s32.totalorder %s3515_s27, %s3511_s26 }
  0x5e   : > { %p37_p7 = scmp.eq.s32.totalorder %s36_s17, 0  ;;  %p47_p2 = scmp.eq.s32.totalorder %s3519_s28, 0 }
  0x5f   : > { %p52_p5 = scmp.ne.s32.totalorder %s3511_s26, %s3507_s25  ;;  %p334_p10 = scmp.eq.s32.totalorder %s3009_s24, 1 }
  0x60   : > { %s3736_s22 = scalar_select %p37_p7, %s3515_s27, %s39_s29  }
  0x61   : > { %3190 = dma.hbm_to_vmem [thread:$0]  (!%p3642_p6), %s4919_s11, 4096, %s434_s30, [#allocation12], %s3529_s16, %s3529_s16, %s3530_s1  }
  0x62   : > { %4920 = sst [smem:[#allocation20_spill]] %s3736_s22  ;;  %p48_p8 = por %p47_p2, %p46_p13 }
  0x63   : > { %p3740_p9 = por %p4854_p1, %p52_p5  ;;  %p328_p6 = scmp.eq.s32.totalorder %s3628_s14, 1 }
  0x64   : > { %p3205_p11 = scmp.lt.s32.totalorder %s3519_s28, 2  ;;  %s450_s30 = sand.u32 1, %s3515_s27  }
  0x65   : > { %s4921_s18 = scalar_select %p3740_p9, 1, 0 }
  0x66   : > { %p3747_p12 = por %p328_p6, %p46_p13  ;;  %p3751_p0 = por %p334_p10, %p52_p5 }
  0x67   : > { %s3141_s1 = smul.u32 896, %s450_s30  ;;  %p3756_p7 = pnand %p3205_p11, %p48_p8 }
  0x68   : > { %s4922_s20 = scalar_select %p3747_p12, 1, 0 }
  0x69   : > { %s4923_s16 = scalar_select %p3751_p0, 1, 0 }
  0x6a   : > { %s3034_s21 = smul.u32 14336, %s3519_s28  ;;  %s454_s3 = scalar_lea.vmem [#allocation2], %s3141_s1 }
  0x6b   : > { %s462_s5 = sshll.u32 %s454_s3, 4  ;;  %s3767_s7 = scalar_lea.sflag [#allocation3], %s450_s30  ;;  %s3765_s5 = int_to_ptr.vmem [resolvable:$true] %s462_s5 }
  0x6c   : > { %s3763_s24 = scalar_lea.hbm %s4840_s0, %s3034_s21  ;;  %p3417_p2 = pneg %p3756_p7 }
  0x6d   : > { %s3415_s9 = scalar_lea.hbm %s3763_s24, 14336  ;;  %s3420_s21 = scalar_lea.hbm %s4840_s0, 28672 }
  0x6e   : > { %p3416_p13 = scmp.ne.s32.totalorder %s3763_s24, %s3415_s9  ;;  %p3421_p6 = scmp.lt.s32.totalorder %s3763_s24, %s4840_s0 }
  0x6f   : > { %p3422_p10 = scmp.lt.s32.totalorder %s3420_s21, %s3415_s9 }
  0x70   : > { %p3418_p5 = pnand %p3417_p2, %p3416_p13 }
  0x71   : > { %p3423_p11 = por %p3422_p10, %p3421_p6 }
  0x72   : > { %p3419_p8 = pneg %p3418_p5 }
  0x74   : > { %p3424_p4 = pnand %p3423_p11, %p3419_p8 }
  0x76   : > { %3427 = shalt.err (!%p3424_p4)
}
  0x77   : > { %s3428_s3 = scalar_lea.vmem %s3765_s5, 14336  ;;  %s3531_s30 = smov [#allocation2]  }
  0x78   : > { %p3429_p1 = scmp.ne.s32.totalorder %s3765_s5, %s3428_s3  ;;  %s3433_s1 = sshll.u32 %s3531_s30, 4  ;;  %s3434_s1 = int_to_ptr.vmem [resolvable:$false] %s3433_s1 }
  0x79   : > { %s3435_s11 = scalar_lea.vmem %s3434_s1, 28672  ;;  %p3436_p5 = scmp.lt.s32.totalorder %s3765_s5, %s3434_s1 }
  0x7a   : > { %p3431_p0 = pnand %p3429_p1, %p3417_p2  ;;  %p3437_p12 = scmp.lt.s32.totalorder %s3435_s11, %s3428_s3 }
  0x7c   : > { %p3432_p13 = pneg %p3431_p0  ;;  %p3438_p9 = por %p3437_p12, %p3436_p5 }
  0x7e   : > { %p3439_p3 = pnand %p3438_p9, %p3432_p13 }
  0x80   : > { %3442 = shalt.err (!%p3439_p3)
}
  0x81   : > { %s3532_s9 = smov 1024   ;;  %s3533_s22 = smov 64  }
  0x82   : > { %3194 = dma.hbm_to_vmem [thread:$0]  (!%p3756_p7), %s3763_s24, 14336, %s3765_s5, %s3767_s7, %s3532_s9, %s3532_s9, %s3533_s22  }
  0x83   : > { %p4925_p1 = scmp.ne.s32.totalorder %s4911_s15, 0 }
  0x85   : > { %474 = sbr.rel (%p4925_p1) target bundleno = 1582 (0x62e), region = 72 }
  0x8a   : > { %s3791_s17 = sand.u32 1, %s3511_s26   ;;  %p4926_p3 = scmp.ne.s32.totalorder %s4921_s18, 0 }
  0x8b   : > { %s3142_s21 = smul.u32 896, %s3791_s17  ;;  %s477_s29 = scalar_lea.sflag [#allocation3], %s3791_s17 }
  0x8d   : > { %s3795_s3 = scalar_lea.vmem [#allocation2], %s3142_s21 }
  0x8e   : > { %3486 = dma.done.wait (%p4926_p3), %s477_s29, 14336  }
  0x8f   : > { %3488 = vsyncadd (%p4926_p3), %s477_s29, 4294952960  ;;  %p4927_p4 = scmp.eq.s32.totalorder %s3628_s14, 0 }
  0x91   : > { %3490 = dma.done.wait (%p4927_p4), [#allocation6], 40960   ;;  %p4928_p9 = pmov %p4927_p4 }
  0x92   : > { %p4929_p12 = pmov %p4927_p4 }
  0x93   : > { %3492 = vsyncadd (%p4928_p9), [#allocation6], 4294926336 }
  0x94   : > { %3494 = dma.done.wait (%p4929_p12), [#allocation9], 16384   ;;  %p4930_p0 = pmov %p4927_p4 }
  0x96   : > { %3496 = vsyncadd (%p4930_p0), [#allocation9], 4294950912  ;;  %p4931_p7 = pmov %p4930_p0 }
  0x97   : > { %p4932_p2 = pmov %p4930_p0 }
  0x98   : > { %3498 = dma.done.wait (%p4931_p7), [#allocation12], 12288  }
  0x99   : > { %3500 = vsyncadd (%p4932_p2), [#allocation12], 4294955008  ;;  %v692_v0 = vld [vmem:[#allocation5 + $0xf8] sm:$0xff]  ;;  %v691_v2 = vld [vmem:[#allocation5 + $0xf0] sm:$0xff]  ;;  %s3143_s22 = smul.u32 112, %s3791_s17  ;;  %p4997_p6 = scmp.ne.s32.totalorder %s4922_s20, 0 }
  0x9a   : > { %v756_v1 = vld [vmem:[#allocation5 + $0x2f8] sm:$0xff]  ;;  %929 = vmatprep.subr.mxu0 %v692_v0  ;;  %v755_v3 = vld [vmem:[#allocation5 + $0x2f0] sm:$0xff]  ;;  %v690_v4 = vld [vmem:[#allocation5 + $0xe8] sm:$0xff]  ;;  %s3033_s5 = smul.u32 1792, %s3628_s14  ;;  %s2866_s14 = scalar_lea.sflag [#allocation4], %s3791_s17 }
  0x9b   : > { %1078 = vmatprep.subr.mxu1 %v756_v1  ;;  %v754_v5 = vld [vmem:[#allocation5 + $0x2e8] sm:$0xff]  ;;  %930 = vmatpush1.msra.mxu0 %v691_v2  ;;  %v689_v6 = vld [vmem:[#allocation5 + $0xe0] sm:$0xff]  ;;  %v688_v8 = vld [vmem:[#allocation5 + $0xd8] sm:$0xff]  ;;  %s3534_s30 = smov [#allocation14]  }
  0x9c   : > { %1079 = vmatpush1.msra.mxu1 %v755_v3  ;;  %v753_v7 = vld [vmem:[#allocation5 + $0x2e0] sm:$0xff]  ;;  %931 = vmatprep.subr.mxu0 %v690_v4  ;;  %v752_v9 = vld [vmem:[#allocation5 + $0x2d8] sm:$0xff]  ;;  %v687_v10 = vld [vmem:[#allocation5 + $0xd0] sm:$0xff]  ;;  %s4793_s23 = scalar_lea.hbm %s4853_s13, %s3033_s5  ;;  %s3447_s1 = sshll.u32 %s3534_s30, 4  ;;  %s3448_s1 = int_to_ptr.vmem [resolvable:$false] %s3447_s1 }
  0x9d   : > { %1080 = vmatprep.subr.mxu1 %v754_v5  ;;  %v751_v11 = vld [vmem:[#allocation5 + $0x2d0] sm:$0xff]  ;;  %932 = vmatpush1.msra.mxu0 %v689_v6  ;;  %v686_v12 = vld [vmem:[#allocation5 + $0xc8] sm:$0xff]  ;;  %v685_v14 = vld [vmem:[#allocation5 + $0xc0] sm:$0xff]  ;;  %s3449_s11 = scalar_lea.vmem %s3448_s1, 3584 }
  0x9e   : > { %1081 = vmatpush1.msra.mxu1 %v753_v7  ;;  %v750_v13 = vld [vmem:[#allocation5 + $0x2c8] sm:$0xff]  ;;  %933 = vmatprep.subr.mxu0 %v688_v8  ;;  %v749_v15 = vld [vmem:[#allocation5 + $0x2c0] sm:$0xff]  ;;  %v684_v16 = vld [vmem:[#allocation5 + $0xb8] sm:$0xff] }
  0x9f   : > { %1082 = vmatprep.subr.mxu1 %v752_v9  ;;  %934 = vmatpush1.msra.mxu0 %v687_v10  ;;  %v748_v17 = vld [vmem:[#allocation5 + $0x2b8] sm:$0xff]  ;;  %v683_v18 = vld [vmem:[#allocation5 + $0xb0] sm:$0xff]  ;;  %v682_v20 = vld [vmem:[#allocation5 + $0xa8] sm:$0xff] }
  0xa0   : > { %1083 = vmatpush1.msra.mxu1 %v751_v11  ;;  %935 = vmatprep.subr.mxu0 %v686_v12  ;;  %v747_v19 = vld [vmem:[#allocation5 + $0x2b0] sm:$0xff]  ;;  %v746_v21 = vld [vmem:[#allocation5 + $0x2a8] sm:$0xff]  ;;  %v681_v22 = vld [vmem:[#allocation5 + $0xa0] sm:$0xff] }
  0xa1   : > { %1084 = vmatprep.subr.mxu1 %v750_v13  ;;  %936 = vmatpush1.msra.mxu0 %v685_v14  ;;  %v745_v23 = vld [vmem:[#allocation5 + $0x2a0] sm:$0xff]  ;;  %v680_v24 = vld [vmem:[#allocation5 + $0x98] sm:$0xff]  ;;  %v679_v26 = vld [vmem:[#allocation5 + $0x90] sm:$0xff] }
  0xa2   : > { %1085 = vmatpush1.msra.mxu1 %v749_v15  ;;  %937 = vmatprep.subr.mxu0 %v684_v16  ;;  %v744_v25 = vld [vmem:[#allocation5 + $0x298] sm:$0xff]  ;;  %v743_v27 = vld [vmem:[#allocation5 + $0x290] sm:$0xff]  ;;  %v678_v28 = vld [vmem:[#allocation5 + $0x88] sm:$0xff] }
  0xa3   : > { %1086 = vmatprep.subr.mxu1 %v748_v17  ;;  %938 = vmatpush1.msra.mxu0 %v683_v18  ;;  %v742_v29 = vld [vmem:[#allocation5 + $0x288] sm:$0xff]  ;;  %v677_v30 = vld [vmem:[#allocation5 + $0x80] sm:$0xff]  ;;  %v676_v32 = vld [vmem:[#allocation5 + $0x78] sm:$0xff] }
  0xa4   : > { %1087 = vmatpush1.msra.mxu1 %v747_v19  ;;  %939 = vmatprep.subr.mxu0 %v682_v20  ;;  %v741_v31 = vld [vmem:[#allocation5 + $0x280] sm:$0xff]  ;;  %v740_v33 = vld [vmem:[#allocation5 + $0x278] sm:$0xff]  ;;  %v675_v34 = vld [vmem:[#allocation5 + $0x70] sm:$0xff] }
  0xa5   : > { %1088 = vmatprep.subr.mxu1 %v746_v21  ;;  %940 = vmatpush1.msra.mxu0 %v681_v22  ;;  %v739_v35 = vld [vmem:[#allocation5 + $0x270] sm:$0xff]  ;;  %v674_v36 = vld [vmem:[#allocation5 + $0x68] sm:$0xff]  ;;  %v673_v38 = vld [vmem:[#allocation5 + $0x60] sm:$0xff] }
  0xa6   : > { %1089 = vmatpush1.msra.mxu1 %v745_v23  ;;  %941 = vmatprep.subr.mxu0 %v680_v24  ;;  %v738_v37 = vld [vmem:[#allocation5 + $0x268] sm:$0xff]  ;;  %v737_v39 = vld [vmem:[#allocation5 + $0x260] sm:$0xff]  ;;  %v672_v40 = vld [vmem:[#allocation5 + $0x58] sm:$0xff] }
  0xa7   : > { %1090 = vmatprep.subr.mxu1 %v744_v25  ;;  %942 = vmatpush1.msra.mxu0 %v679_v26  ;;  %v736_v41 = vld [vmem:[#allocation5 + $0x258] sm:$0xff]  ;;  %v671_v42 = vld [vmem:[#allocation5 + $0x50] sm:$0xff]  ;;  %v670_v44 = vld [vmem:[#allocation5 + $0x48] sm:$0xff] }
  0xa8   : > { %1091 = vmatpush1.msra.mxu1 %v743_v27  ;;  %943 = vmatprep.subr.mxu0 %v678_v28  ;;  %v735_v43 = vld [vmem:[#allocation5 + $0x250] sm:$0xff]  ;;  %v734_v45 = vld [vmem:[#allocation5 + $0x248] sm:$0xff]  ;;  %v669_v46 = vld [vmem:[#allocation5 + $0x40] sm:$0xff] }
  0xa9   : > { %1092 = vmatprep.subr.mxu1 %v742_v29  ;;  %944 = vmatpush1.msra.mxu0 %v677_v30  ;;  %v733_v47 = vld [vmem:[#allocation5 + $0x240] sm:$0xff]  ;;  %v668_v48 = vld [vmem:[#allocation5 + $0x38] sm:$0xff]  ;;  %v667_v50 = vld [vmem:[#allocation5 + $0x30] sm:$0xff] }
  0xaa   : > { %1093 = vmatpush1.msra.mxu1 %v741_v31  ;;  %945 = vmatprep.subr.mxu0 %v676_v32  ;;  %v732_v49 = vld [vmem:[#allocation5 + $0x238] sm:$0xff]  ;;  %v731_v51 = vld [vmem:[#allocation5 + $0x230] sm:$0xff]  ;;  %v666_v52 = vld [vmem:[#allocation5 + $0x28] sm:$0xff] }
  0xab   : > { %1094 = vmatprep.subr.mxu1 %v740_v33  ;;  %946 = vmatpush1.msra.mxu0 %v675_v34  ;;  %v730_v53 = vld [vmem:[#allocation5 + $0x228] sm:$0xff]  ;;  %v665_v54 = vld [vmem:[#allocation5 + $0x20] sm:$0xff]  ;;  %v664_v56 = vld [vmem:[#allocation5 + $0x18] sm:$0xff] }
  0xac   : > { %1095 = vmatpush1.msra.mxu1 %v739_v35  ;;  %947 = vmatprep.subr.mxu0 %v674_v36  ;;  %v729_v55 = vld [vmem:[#allocation5 + $0x220] sm:$0xff]  ;;  %v728_v57 = vld [vmem:[#allocation5 + $0x218] sm:$0xff]  ;;  %v663_v58 = vld [vmem:[#allocation5 + $0x10] sm:$0xff] }
  0xad   : > { %1096 = vmatprep.subr.mxu1 %v738_v37  ;;  %948 = vmatpush1.msra.mxu0 %v673_v38  ;;  %v727_v59 = vld [vmem:[#allocation5 + $0x210] sm:$0xff]  ;;  %v662_v60 = vld [vmem:[#allocation5 + $0x8] sm:$0xff]  ;;  %v661_v62 = vld [vmem:[#allocation5] sm:$0xff] }
  0xae   : > { %1097 = vmatpush1.msra.mxu1 %v737_v39  ;;  %949 = vmatprep.subr.mxu0 %v672_v40  ;;  %v726_v61 = vld [vmem:[#allocation5 + $0x208] sm:$0xff]  ;;  %v725_v63 = vld [vmem:[#allocation5 + $0x200] sm:$0xff]  ;;  %v724_v0 = vld [vmem:[#allocation5 + $0x1f8] sm:$0xff] }
  0xaf   : > { %1098 = vmatprep.subr.mxu1 %v736_v41  ;;  %950 = vmatpush1.msra.mxu0 %v671_v42  ;;  %v788_v1 = vld [vmem:[#allocation5 + $0x3f8] sm:$0xff]  ;;  %v723_v2 = vld [vmem:[#allocation5 + $0x1f0] sm:$0xff]  ;;  %v722_v4 = vld [vmem:[#allocation5 + $0x1e8] sm:$0xff] }
  0xb0   : > { %1099 = vmatpush1.msra.mxu1 %v735_v43  ;;  %951 = vmatprep.subr.mxu0 %v670_v44  ;;  %v787_v3 = vld [vmem:[#allocation5 + $0x3f0] sm:$0xff]  ;;  %v786_v5 = vld [vmem:[#allocation5 + $0x3e8] sm:$0xff]  ;;  %v721_v6 = vld [vmem:[#allocation5 + $0x1e0] sm:$0xff] }
  0xb1   : > { %1100 = vmatprep.subr.mxu1 %v734_v45  ;;  %952 = vmatpush1.msra.mxu0 %v669_v46  ;;  %v785_v7 = vld [vmem:[#allocation5 + $0x3e0] sm:$0xff]  ;;  %v720_v8 = vld [vmem:[#allocation5 + $0x1d8] sm:$0xff]  ;;  %v719_v10 = vld [vmem:[#allocation5 + $0x1d0] sm:$0xff] }
  0xb2   : > { %1101 = vmatpush1.msra.mxu1 %v733_v47  ;;  %953 = vmatprep.subr.mxu0 %v668_v48  ;;  %v784_v9 = vld [vmem:[#allocation5 + $0x3d8] sm:$0xff]  ;;  %v783_v11 = vld [vmem:[#allocation5 + $0x3d0] sm:$0xff]  ;;  %v718_v12 = vld [vmem:[#allocation5 + $0x1c8] sm:$0xff] }
  0xb3   : > { %1102 = vmatprep.subr.mxu1 %v732_v49  ;;  %954 = vmatpush1.msra.mxu0 %v667_v50  ;;  %v782_v13 = vld [vmem:[#allocation5 + $0x3c8] sm:$0xff]  ;;  %v717_v14 = vld [vmem:[#allocation5 + $0x1c0] sm:$0xff]  ;;  %v716_v16 = vld [vmem:[#allocation5 + $0x1b8] sm:$0xff] }
  0xb4   : > { %1103 = vmatpush1.msra.mxu1 %v731_v51  ;;  %955 = vmatprep.subr.mxu0 %v666_v52  ;;  %v781_v15 = vld [vmem:[#allocation5 + $0x3c0] sm:$0xff]  ;;  %v780_v17 = vld [vmem:[#allocation5 + $0x3b8] sm:$0xff]  ;;  %v715_v18 = vld [vmem:[#allocation5 + $0x1b0] sm:$0xff] }
  0xb5   : > { %1104 = vmatprep.subr.mxu1 %v730_v53  ;;  %956 = vmatpush1.msra.mxu0 %v665_v54  ;;  %v779_v19 = vld [vmem:[#allocation5 + $0x3b0] sm:$0xff]  ;;  %v714_v20 = vld [vmem:[#allocation5 + $0x1a8] sm:$0xff]  ;;  %v713_v22 = vld [vmem:[#allocation5 + $0x1a0] sm:$0xff] }
  0xb6   : > { %1105 = vmatpush1.msra.mxu1 %v729_v55  ;;  %957 = vmatprep.subr.mxu0 %v664_v56  ;;  %v778_v21 = vld [vmem:[#allocation5 + $0x3a8] sm:$0xff]  ;;  %v777_v23 = vld [vmem:[#allocation5 + $0x3a0] sm:$0xff]  ;;  %v712_v24 = vld [vmem:[#allocation5 + $0x198] sm:$0xff] }
  0xb7   : > { %1106 = vmatprep.subr.mxu1 %v728_v57  ;;  %958 = vmatpush1.msra.mxu0 %v663_v58  ;;  %v776_v25 = vld [vmem:[#allocation5 + $0x398] sm:$0xff]  ;;  %v711_v26 = vld [vmem:[#allocation5 + $0x190] sm:$0xff]  ;;  %v710_v28 = vld [vmem:[#allocation5 + $0x188] sm:$0xff] }
  0xb8   : > { %1107 = vmatpush1.msra.mxu1 %v727_v59  ;;  %959 = vmatprep.subr.mxu0 %v662_v60  ;;  %v775_v27 = vld [vmem:[#allocation5 + $0x390] sm:$0xff]  ;;  %v774_v29 = vld [vmem:[#allocation5 + $0x388] sm:$0xff]  ;;  %v709_v30 = vld [vmem:[#allocation5 + $0x180] sm:$0xff] }
  0xb9   : > { %1108 = vmatprep.subr.mxu1 %v726_v61  ;;  %960 = vmatpush1.msra.mxu0 %v661_v62  ;;  %v773_v31 = vld [vmem:[#allocation5 + $0x380] sm:$0xff]  ;;  %v708_v32 = vld [vmem:[#allocation5 + $0x178] sm:$0xff]  ;;  %v707_v34 = vld [vmem:[#allocation5 + $0x170] sm:$0xff] }
  0xba   : > { %1109 = vmatpush1.msra.mxu1 %v725_v63  ;;  %961 = vmatprep.subr.mxu0 %v724_v0  ;;  %v772_v33 = vld [vmem:[#allocation5 + $0x378] sm:$0xff]  ;;  %v771_v35 = vld [vmem:[#allocation5 + $0x370] sm:$0xff]  ;;  %v706_v36 = vld [vmem:[#allocation5 + $0x168] sm:$0xff] }
  0xbb   : > { %1110 = vmatprep.subr.mxu1 %v788_v1  ;;  %962 = vmatpush2.msra.mxu0 %v723_v2  ;;  %v770_v37 = vld [vmem:[#allocation5 + $0x368] sm:$0xff]  ;;  %v705_v38 = vld [vmem:[#allocation5 + $0x160] sm:$0xff]  ;;  %v704_v40 = vld [vmem:[#allocation5 + $0x158] sm:$0xff] }
  0xbc   : > { %1111 = vmatpush2.msra.mxu1 %v787_v3  ;;  %963 = vmatprep.subr.mxu0 %v722_v4  ;;  %v769_v39 = vld [vmem:[#allocation5 + $0x360] sm:$0xff]  ;;  %v768_v41 = vld [vmem:[#allocation5 + $0x358] sm:$0xff]  ;;  %v703_v42 = vld [vmem:[#allocation5 + $0x150] sm:$0xff] }
  0xbd   : > { %1112 = vmatprep.subr.mxu1 %v786_v5  ;;  %964 = vmatpush2.msra.mxu0 %v721_v6  ;;  %v767_v43 = vld [vmem:[#allocation5 + $0x350] sm:$0xff]  ;;  %v702_v44 = vld [vmem:[#allocation5 + $0x148] sm:$0xff]  ;;  %v701_v46 = vld [vmem:[#allocation5 + $0x140] sm:$0xff] }
  0xbe   : > { %1113 = vmatpush2.msra.mxu1 %v785_v7  ;;  %965 = vmatprep.subr.mxu0 %v720_v8  ;;  %v766_v45 = vld [vmem:[#allocation5 + $0x348] sm:$0xff]  ;;  %v765_v47 = vld [vmem:[#allocation5 + $0x340] sm:$0xff]  ;;  %v700_v48 = vld [vmem:[#allocation5 + $0x138] sm:$0xff] }
  0xbf   : > { %1114 = vmatprep.subr.mxu1 %v784_v9  ;;  %966 = vmatpush2.msra.mxu0 %v719_v10  ;;  %v764_v49 = vld [vmem:[#allocation5 + $0x338] sm:$0xff]  ;;  %v699_v50 = vld [vmem:[#allocation5 + $0x130] sm:$0xff]  ;;  %v698_v52 = vld [vmem:[#allocation5 + $0x128] sm:$0xff] }
  0xc0   : > { %1115 = vmatpush2.msra.mxu1 %v783_v11  ;;  %967 = vmatprep.subr.mxu0 %v718_v12  ;;  %v763_v51 = vld [vmem:[#allocation5 + $0x330] sm:$0xff]  ;;  %v762_v53 = vld [vmem:[#allocation5 + $0x328] sm:$0xff]  ;;  %v697_v54 = vld [vmem:[#allocation5 + $0x120] sm:$0xff] }
  0xc1   : > { %1116 = vmatprep.subr.mxu1 %v782_v13  ;;  %968 = vmatpush2.msra.mxu0 %v717_v14  ;;  %v761_v55 = vld [vmem:[#allocation5 + $0x320] sm:$0xff]  ;;  %v696_v56 = vld [vmem:[#allocation5 + $0x118] sm:$0xff]  ;;  %v695_v58 = vld [vmem:[#allocation5 + $0x110] sm:$0xff] }
  0xc2   : > { %1117 = vmatpush2.msra.mxu1 %v781_v15  ;;  %969 = vmatprep.subr.mxu0 %v716_v16  ;;  %v760_v57 = vld [vmem:[#allocation5 + $0x318] sm:$0xff]  ;;  %v759_v59 = vld [vmem:[#allocation5 + $0x310] sm:$0xff]  ;;  %v694_v60 = vld [vmem:[#allocation5 + $0x108] sm:$0xff] }
  0xc3   : > { %1118 = vmatprep.subr.mxu1 %v780_v17  ;;  %970 = vmatpush2.msra.mxu0 %v715_v18  ;;  %v758_v61 = vld [vmem:[#allocation5 + $0x308] sm:$0xff]  ;;  %v693_v62 = vld [vmem:[#allocation5 + $0x100] sm:$0xff]  ;;  %v552_v2 = vld [vmem:[%s3795_s3 + $0x18] sm:$0xff] }
  0xc4   : > { %1119 = vmatpush2.msra.mxu1 %v779_v19  ;;  %971 = vmatprep.subr.mxu0 %v714_v20  ;;  %v550_v63 = vld [vmem:[%s3795_s3 + $0x8] sm:$0xff]  ;;  %v757_v0 = vld [vmem:[#allocation5 + $0x300] sm:$0xff]  ;;  %v820_v3 = vld [vmem:[#allocation5 + $0x4f8] sm:$0xff] }
  0xc5   : > { %1120 = vmatprep.subr.mxu1 %v778_v21  ;;  %972 = vmatpush2.msra.mxu0 %v713_v22  ;;  %v549_v1 = vld [vmem:[%s3795_s3] sm:$0xff]  ;;  %v884_v4 = vld [vmem:[#allocation5 + $0x6f8] sm:$0xff]  ;;  %v551_v5 = vld [vmem:[%s3795_s3 + $0x10] sm:$0xff] }
  0xc6   : > { %1121 = vmatpush2.msra.mxu1 %v777_v23  ;;  %973 = vmatprep.subr.mxu0 %v712_v24  ;;  %v819_v6 = vld [vmem:[#allocation5 + $0x4f0] sm:$0xff]  ;;  %v818_v8 = vld [vmem:[#allocation5 + $0x4e8] sm:$0xff]  ;;  %v817_v10 = vld [vmem:[#allocation5 + $0x4e0] sm:$0xff] }
  0xc7   : > { %1122 = vmatprep.subr.mxu1 %v776_v25  ;;  %974 = vmatpush2.msra.mxu0 %v711_v26  ;;  %v883_v7 = vld [vmem:[#allocation5 + $0x6f0] sm:$0xff]  ;;  %v882_v9 = vld [vmem:[#allocation5 + $0x6e8] sm:$0xff]  ;;  %v881_v11 = vld [vmem:[#allocation5 + $0x6e0] sm:$0xff] }
  0xc8   : > { %1123 = vmatpush2.msra.mxu1 %v775_v27  ;;  %975 = vmatprep.subr.mxu0 %v710_v28  ;;  %v816_v12 = vld [vmem:[#allocation5 + $0x4d8] sm:$0xff]  ;;  %v815_v14 = vld [vmem:[#allocation5 + $0x4d0] sm:$0xff]  ;;  %v814_v16 = vld [vmem:[#allocation5 + $0x4c8] sm:$0xff] }
  0xc9   : > { %1124 = vmatprep.subr.mxu1 %v774_v29  ;;  %976 = vmatpush2.msra.mxu0 %v709_v30  ;;  %v880_v13 = vld [vmem:[#allocation5 + $0x6d8] sm:$0xff]  ;;  %v879_v15 = vld [vmem:[#allocation5 + $0x6d0] sm:$0xff]  ;;  %v878_v17 = vld [vmem:[#allocation5 + $0x6c8] sm:$0xff] }
  0xca   : > { %1125 = vmatpush2.msra.mxu1 %v773_v31  ;;  %977 = vmatprep.subr.mxu0 %v708_v32  ;;  %v813_v18 = vld [vmem:[#allocation5 + $0x4c0] sm:$0xff]  ;;  %v812_v20 = vld [vmem:[#allocation5 + $0x4b8] sm:$0xff]  ;;  %v558_v22 = vld [vmem:[%s3795_s3 + $0x48] sm:$0xff] }
  0xcb   : > { %1126 = vmatprep.subr.mxu1 %v772_v33  ;;  %978 = vmatpush2.msra.mxu0 %v707_v34  ;;  %v877_v19 = vld [vmem:[#allocation5 + $0x6c0] sm:$0xff]  ;;  %v876_v21 = vld [vmem:[#allocation5 + $0x6b8] sm:$0xff]  ;;  %v811_v23 = vld [vmem:[#allocation5 + $0x4b0] sm:$0xff] }
  0xcc   : > { %1127 = vmatpush2.msra.mxu1 %v771_v35  ;;  %979 = vmatprep.subr.mxu0 %v706_v36  ;;  %v875_v24 = vld [vmem:[#allocation5 + $0x6b0] sm:$0xff]  ;;  %v557_v25 = vld [vmem:[%s3795_s3 + $0x40] sm:$0xff]  ;;  %v810_v26 = vld [vmem:[#allocation5 + $0x4a8] sm:$0xff] }
  0xcd   : > { %1128 = vmatprep.subr.mxu1 %v770_v37  ;;  %980 = vmatpush2.msra.mxu0 %v705_v38  ;;  %v874_v27 = vld [vmem:[#allocation5 + $0x6a8] sm:$0xff]  ;;  %v560_v28 = vld [vmem:[%s3795_s3 + $0x58] sm:$0xff]  ;;  %v809_v29 = vld [vmem:[#allocation5 + $0x4a0] sm:$0xff] }
  0xce   : > { %1129 = vmatpush2.msra.mxu1 %v769_v39  ;;  %981 = vmatprep.subr.mxu0 %v704_v40  ;;  %v873_v30 = vld [vmem:[#allocation5 + $0x6a0] sm:$0xff]  ;;  %v808_v31 = vld [vmem:[#allocation5 + $0x498] sm:$0xff]  ;;  %v559_v32 = vld [vmem:[%s3795_s3 + $0x50] sm:$0xff] }
  0xcf   : > { %1130 = vmatprep.subr.mxu1 %v768_v41  ;;  %982 = vmatpush2.msra.mxu0 %v703_v42  ;;  %v872_v33 = vld [vmem:[#allocation5 + $0x698] sm:$0xff]  ;;  %v566_v34 = vld [vmem:[%s3795_s3 + $0x88] sm:$0xff]  ;;  %v807_v35 = vld [vmem:[#allocation5 + $0x490] sm:$0xff] }
  0xd0   : > { %1131 = vmatpush2.msra.mxu1 %v767_v43  ;;  %983 = vmatprep.subr.mxu0 %v702_v44  ;;  %v871_v36 = vld [vmem:[#allocation5 + $0x690] sm:$0xff]  ;;  %v565_v37 = vld [vmem:[%s3795_s3 + $0x80] sm:$0xff]  ;;  %v806_v38 = vld [vmem:[#allocation5 + $0x488] sm:$0xff] }
  0xd1   : > { %1132 = vmatprep.subr.mxu1 %v766_v45  ;;  %984 = vmatpush2.msra.mxu0 %v701_v46  ;;  %v870_v39 = vld [vmem:[#allocation5 + $0x688] sm:$0xff]  ;;  %v568_v40 = vld [vmem:[%s3795_s3 + $0x98] sm:$0xff]  ;;  %v805_v41 = vld [vmem:[#allocation5 + $0x480] sm:$0xff] }
  0xd2   : > { %1133 = vmatpush2.msra.mxu1 %v765_v47  ;;  %985 = vmatprep.subr.mxu0 %v700_v48  ;;  %v869_v42 = vld [vmem:[#allocation5 + $0x680] sm:$0xff]  ;;  %v804_v43 = vld [vmem:[#allocation5 + $0x478] sm:$0xff]  ;;  %v567_v44 = vld [vmem:[%s3795_s3 + $0x90] sm:$0xff] }
  0xd3   : > { %1134 = vmatprep.subr.mxu1 %v764_v49  ;;  %986 = vmatpush2.msra.mxu0 %v699_v50  ;;  %v868_v45 = vld [vmem:[#allocation5 + $0x678] sm:$0xff]  ;;  %v574_v46 = vld [vmem:[%s3795_s3 + $0xc8] sm:$0xff]  ;;  %v803_v47 = vld [vmem:[#allocation5 + $0x470] sm:$0xff] }
  0xd4   : > { %1135 = vmatpush2.msra.mxu1 %v763_v51  ;;  %987 = vmatprep.subr.mxu0 %v698_v52  ;;  %v867_v48 = vld [vmem:[#allocation5 + $0x670] sm:$0xff]  ;;  %v573_v49 = vld [vmem:[%s3795_s3 + $0xc0] sm:$0xff]  ;;  %v802_v50 = vld [vmem:[#allocation5 + $0x468] sm:$0xff] }
  0xd5   : > { %1136 = vmatprep.subr.mxu1 %v762_v53  ;;  %988 = vmatpush2.msra.mxu0 %v697_v54  ;;  %v866_v51 = vld [vmem:[#allocation5 + $0x668] sm:$0xff]  ;;  %v576_v52 = vld [vmem:[%s3795_s3 + $0xd8] sm:$0xff]  ;;  %v801_v53 = vld [vmem:[#allocation5 + $0x460] sm:$0xff] }
  0xd6   : > { %1137 = vmatpush2.msra.mxu1 %v761_v55  ;;  %989 = vmatprep.subr.mxu0 %v696_v56  ;;  %v865_v54 = vld [vmem:[#allocation5 + $0x660] sm:$0xff]  ;;  %v800_v55 = vld [vmem:[#allocation5 + $0x458] sm:$0xff]  ;;  %v575_v56 = vld [vmem:[%s3795_s3 + $0xd0] sm:$0xff] }
  0xd7   : > { %1138 = vmatprep.subr.mxu1 %v760_v57  ;;  %990 = vmatpush2.msra.mxu0 %v695_v58  ;;  %v864_v57 = vld [vmem:[#allocation5 + $0x658] sm:$0xff]  ;;  %v582_v58 = vld [vmem:[%s3795_s3 + $0x108] sm:$0xff] }
  0xd8   : > { %1139 = vmatpush2.msra.mxu1 %v759_v59  ;;  %991 = vmatprep.subr.mxu0 %v694_v60  ;;  %v799_v59 = vld [vmem:[#allocation5 + $0x450] sm:$0xff] }
  0xd9   : > { %1140 = vmatprep.subr.mxu1 %v758_v61  ;;  %992 = vmatpush2.msra.mxu0 %v693_v62  ;;  %v863_v60 = vld [vmem:[#allocation5 + $0x650] sm:$0xff]  ;;  %v581_v61 = vld [vmem:[%s3795_s3 + $0x100] sm:$0xff]  ;;  %v798_v62 = vld [vmem:[#allocation5 + $0x448] sm:$0xff] }
  0xda   : > { %993 = vmatprep.mubr.f32.mxu0 %v550_v63  ;;  %1141 = vmatpush2.msra.mxu1 %v757_v0  ;;  %v862_v63 = vld [vmem:[#allocation5 + $0x648] sm:$0xff]  ;;  %v584_v0 = vld [vmem:[%s3795_s3 + $0x118] sm:$0xff] }
  0xdb   : > { %994 = vmatmul.mubr.f32.vlgmr.msra.gmra.mxu0 %v549_v1  ;;  %1142 = vmatprep.mubr.f32.mxu1 %v552_v2  ;;  %v797_v1 = vld [vmem:[#allocation5 + $0x440] sm:$0xff] }
  0xdc   : > { %1227 = vmatprep.subr.mxu0 %v820_v3  ;;  %1376 = vmatprep.subr.mxu1 %v884_v4  ;;  %v861_v2 = vld [vmem:[#allocation5 + $0x640] sm:$0xff]  ;;  %v796_v3 = vld [vmem:[#allocation5 + $0x438] sm:$0xff]  ;;  %v583_v4 = vld [vmem:[%s3795_s3 + $0x110] sm:$0xff] }
  0xdd   : > { %1143 = vmatmul.mubr.f32.vlgmr.msra.gmra.mxu1 %v551_v5  ;;  %1228 = vmatpush1.msra.mxu0 %v819_v6  ;;  %v860_v5 = vld [vmem:[#allocation5 + $0x638] sm:$0xff]  ;;  %v590_v6 = vld [vmem:[%s3795_s3 + $0x148] sm:$0xff] }
  0xde   : > { %1377 = vmatpush1.msra.mxu1 %v883_v7  ;;  %1229 = vmatprep.subr.mxu0 %v818_v8  ;;  %v795_v7 = vld [vmem:[#allocation5 + $0x430] sm:$0xff] }
  0xdf   : > { %1378 = vmatprep.subr.mxu1 %v882_v9  ;;  %1230 = vmatpush1.msra.mxu0 %v817_v10  ;;  %v859_v8 = vld [vmem:[#allocation5 + $0x630] sm:$0xff]  ;;  %v589_v9 = vld [vmem:[%s3795_s3 + $0x140] sm:$0xff]  ;;  %v794_v10 = vld [vmem:[#allocation5 + $0x428] sm:$0xff] }
  0xe0   : > { %1379 = vmatpush1.msra.mxu1 %v881_v11  ;;  %1231 = vmatprep.subr.mxu0 %v816_v12  ;;  %v858_v11 = vld [vmem:[#allocation5 + $0x628] sm:$0xff]  ;;  %v592_v12 = vld [vmem:[%s3795_s3 + $0x158] sm:$0xff] }
  0xe1   : > { %1380 = vmatprep.subr.mxu1 %v880_v13  ;;  %1232 = vmatpush1.msra.mxu0 %v815_v14  ;;  %v793_v13 = vld [vmem:[#allocation5 + $0x420] sm:$0xff] }
  0xe2   : > { %1381 = vmatpush1.msra.mxu1 %v879_v15  ;;  %1233 = vmatprep.subr.mxu0 %v814_v16  ;;  %v857_v14 = vld [vmem:[#allocation5 + $0x620] sm:$0xff]  ;;  %v792_v15 = vld [vmem:[#allocation5 + $0x418] sm:$0xff]  ;;  %v591_v16 = vld [vmem:[%s3795_s3 + $0x150] sm:$0xff] }
  0xe3   : > { %1382 = vmatprep.subr.mxu1 %v878_v17  ;;  %1234 = vmatpush1.msra.mxu0 %v813_v18  ;;  %v856_v17 = vld [vmem:[#allocation5 + $0x618] sm:$0xff]  ;;  %v598_v18 = vld [vmem:[%s3795_s3 + $0x188] sm:$0xff] }
  0xe4   : > { %1383 = vmatpush1.msra.mxu1 %v877_v19  ;;  %1235 = vmatprep.subr.mxu0 %v812_v20  ;;  %v791_v19 = vld [vmem:[#allocation5 + $0x410] sm:$0xff] }
  0xe5   : > { %1384 = vmatprep.subr.mxu1 %v876_v21  ;;  %999 = vmatprep.mubr.f32.mxu0 %v558_v22  ;;  %v855_v20 = vld [vmem:[#allocation5 + $0x610] sm:$0xff]  ;;  %v597_v21 = vld [vmem:[%s3795_s3 + $0x180] sm:$0xff]  ;;  %v790_v22 = vld [vmem:[#allocation5 + $0x408] sm:$0xff] }
  0xe6   : > { %1236 = vmatpush1.msra.mxu0 %v811_v23  ;;  %1385 = vmatpush1.msra.mxu1 %v875_v24  ;;  %v854_v23 = vld [vmem:[#allocation5 + $0x608] sm:$0xff]  ;;  %v600_v24 = vld [vmem:[%s3795_s3 + $0x198] sm:$0xff] }
  0xe7   : > { %1000 = vmatmul.mubr.f32.gmra.mxu0 %v557_v25  ;;  %1237 = vmatprep.subr.mxu0 %v810_v26  ;;  %v789_v25 = vld [vmem:[#allocation5 + $0x400] sm:$0xff] }
  0xe8   : > { %1386 = vmatprep.subr.mxu1 %v874_v27  ;;  %1148 = vmatprep.mubr.f32.mxu1 %v560_v28  ;;  %v853_v26 = vld [vmem:[#allocation5 + $0x600] sm:$0xff]  ;;  %v852_v27 = vld [vmem:[#allocation5 + $0x5f8] sm:$0xff]  ;;  %v599_v28 = vld [vmem:[%s3795_s3 + $0x190] sm:$0xff] }
  0xe9   : > { %1238 = vmatpush1.msra.mxu0 %v809_v29  ;;  %1387 = vmatpush1.msra.mxu1 %v873_v30  ;;  %v916_v29 = vld [vmem:[#allocation5 + $0x7f8] sm:$0xff]  ;;  %v606_v30 = vld [vmem:[%s3795_s3 + $0x1c8] sm:$0xff] }
  0xea   : > { %1239 = vmatprep.subr.mxu0 %v808_v31  ;;  %1149 = vmatmul.mubr.f32.gmra.mxu1 %v559_v32  ;;  %v851_v31 = vld [vmem:[#allocation5 + $0x5f0] sm:$0xff] }
  0xeb   : > { %1388 = vmatprep.subr.mxu1 %v872_v33  ;;  %1005 = vmatprep.mubr.f32.mxu0 %v566_v34  ;;  %v915_v32 = vld [vmem:[#allocation5 + $0x7f0] sm:$0xff]  ;;  %v605_v33 = vld [vmem:[%s3795_s3 + $0x1c0] sm:$0xff]  ;;  %v850_v34 = vld [vmem:[#allocation5 + $0x5e8] sm:$0xff] }
  0xec   : > { %1240 = vmatpush1.msra.mxu0 %v807_v35  ;;  %1389 = vmatpush1.msra.mxu1 %v871_v36  ;;  %v914_v35 = vld [vmem:[#allocation5 + $0x7e8] sm:$0xff]  ;;  %v608_v36 = vld [vmem:[%s3795_s3 + $0x1d8] sm:$0xff] }
  0xed   : > { %1006 = vmatmul.mubr.f32.gmra.mxu0 %v565_v37  ;;  %1241 = vmatprep.subr.mxu0 %v806_v38  ;;  %v849_v37 = vld [vmem:[#allocation5 + $0x5e0] sm:$0xff] }
  0xee   : > { %1390 = vmatprep.subr.mxu1 %v870_v39  ;;  %1154 = vmatprep.mubr.f32.mxu1 %v568_v40  ;;  %v913_v38 = vld [vmem:[#allocation5 + $0x7e0] sm:$0xff]  ;;  %v848_v39 = vld [vmem:[#allocation5 + $0x5d8] sm:$0xff]  ;;  %v607_v40 = vld [vmem:[%s3795_s3 + $0x1d0] sm:$0xff] }
  0xef   : > { %1242 = vmatpush1.msra.mxu0 %v805_v41  ;;  %1391 = vmatpush1.msra.mxu1 %v869_v42  ;;  %v912_v41 = vld [vmem:[#allocation5 + $0x7d8] sm:$0xff]  ;;  %v614_v42 = vld [vmem:[%s3795_s3 + $0x208] sm:$0xff] }
  0xf0   : > { %1243 = vmatprep.subr.mxu0 %v804_v43  ;;  %1155 = vmatmul.mubr.f32.gmra.mxu1 %v567_v44  ;;  %v847_v43 = vld [vmem:[#allocation5 + $0x5d0] sm:$0xff] }
  0xf1   : > { %1392 = vmatprep.subr.mxu1 %v868_v45  ;;  %1011 = vmatprep.mubr.f32.mxu0 %v574_v46  ;;  %v911_v44 = vld [vmem:[#allocation5 + $0x7d0] sm:$0xff]  ;;  %v613_v45 = vld [vmem:[%s3795_s3 + $0x200] sm:$0xff]  ;;  %v846_v46 = vld [vmem:[#allocation5 + $0x5c8] sm:$0xff] }
  0xf2   : > { %1244 = vmatpush1.msra.mxu0 %v803_v47  ;;  %1393 = vmatpush1.msra.mxu1 %v867_v48  ;;  %v910_v47 = vld [vmem:[#allocation5 + $0x7c8] sm:$0xff]  ;;  %v616_v48 = vld [vmem:[%s3795_s3 + $0x218] sm:$0xff] }
  0xf3   : > { %1012 = vmatmul.mubr.f32.gmra.mxu0 %v573_v49  ;;  %1245 = vmatprep.subr.mxu0 %v802_v50  ;;  %v845_v49 = vld [vmem:[#allocation5 + $0x5c0] sm:$0xff] }
  0xf4   : > { %1394 = vmatprep.subr.mxu1 %v866_v51  ;;  %1160 = vmatprep.mubr.f32.mxu1 %v576_v52  ;;  %v909_v50 = vld [vmem:[#allocation5 + $0x7c0] sm:$0xff]  ;;  %v844_v51 = vld [vmem:[#allocation5 + $0x5b8] sm:$0xff]  ;;  %v615_v52 = vld [vmem:[%s3795_s3 + $0x210] sm:$0xff] }
  0xf5   : > { %1246 = vmatpush1.msra.mxu0 %v801_v53  ;;  %1395 = vmatpush1.msra.mxu1 %v865_v54  ;;  %v908_v53 = vld [vmem:[#allocation5 + $0x7b8] sm:$0xff]  ;;  %v622_v54 = vld [vmem:[%s3795_s3 + $0x248] sm:$0xff] }
  0xf6   : > { %1247 = vmatprep.subr.mxu0 %v800_v55  ;;  %1161 = vmatmul.mubr.f32.gmra.mxu1 %v575_v56  ;;  %v843_v55 = vld [vmem:[#allocation5 + $0x5b0] sm:$0xff] }
  0xf7   : > { %1396 = vmatprep.subr.mxu1 %v864_v57  ;;  %1017 = vmatprep.mubr.f32.mxu0 %v582_v58  ;;  %v907_v56 = vld [vmem:[#allocation5 + $0x7b0] sm:$0xff]  ;;  %v621_v57 = vld [vmem:[%s3795_s3 + $0x240] sm:$0xff]  ;;  %v842_v58 = vld [vmem:[#allocation5 + $0x5a8] sm:$0xff] }
  0xf8   : > { %1248 = vmatpush1.msra.mxu0 %v799_v59  ;;  %1397 = vmatpush1.msra.mxu1 %v863_v60  ;;  %v906_v59 = vld [vmem:[#allocation5 + $0x7a8] sm:$0xff]  ;;  %v624_v60 = vld [vmem:[%s3795_s3 + $0x258] sm:$0xff] }
  0xf9   : > { %1018 = vmatmul.mubr.f32.gmra.mxu0 %v581_v61  ;;  %1249 = vmatprep.subr.mxu0 %v798_v62  ;;  %v841_v61 = vld [vmem:[#allocation5 + $0x5a0] sm:$0xff] }
  0xfa   : > { %1398 = vmatprep.subr.mxu1 %v862_v63  ;;  %1166 = vmatprep.mubr.f32.mxu1 %v584_v0  ;;  %v905_v62 = vld [vmem:[#allocation5 + $0x7a0] sm:$0xff]  ;;  %v840_v63 = vld [vmem:[#allocation5 + $0x598] sm:$0xff]  ;;  %v623_v0 = vld [vmem:[%s3795_s3 + $0x250] sm:$0xff] }
  0xfb   : > { %1250 = vmatpush1.msra.mxu0 %v797_v1  ;;  %1399 = vmatpush1.msra.mxu1 %v861_v2  ;;  %v904_v1 = vld [vmem:[#allocation5 + $0x798] sm:$0xff]  ;;  %v630_v2 = vld [vmem:[%s3795_s3 + $0x288] sm:$0xff] }
  0xfc   : > { %1251 = vmatprep.subr.mxu0 %v796_v3  ;;  %1167 = vmatmul.mubr.f32.gmra.mxu1 %v583_v4  ;;  %v839_v3 = vld [vmem:[#allocation5 + $0x590] sm:$0xff] }
  0xfd   : > { %1400 = vmatprep.subr.mxu1 %v860_v5  ;;  %1023 = vmatprep.mubr.f32.mxu0 %v590_v6  ;;  %v903_v4 = vld [vmem:[#allocation5 + $0x790] sm:$0xff]  ;;  %v629_v5 = vld [vmem:[%s3795_s3 + $0x280] sm:$0xff]  ;;  %v838_v6 = vld [vmem:[#allocation5 + $0x588] sm:$0xff] }
  0xfe   : > { %1252 = vmatpush1.msra.mxu0 %v795_v7  ;;  %1401 = vmatpush1.msra.mxu1 %v859_v8  ;;  %v902_v7 = vld [vmem:[#allocation5 + $0x788] sm:$0xff]  ;;  %v632_v8 = vld [vmem:[%s3795_s3 + $0x298] sm:$0xff] }
  0xff   : > { %1024 = vmatmul.mubr.f32.gmra.mxu0 %v589_v9  ;;  %1253 = vmatprep.subr.mxu0 %v794_v10  ;;  %v837_v9 = vld [vmem:[#allocation5 + $0x580] sm:$0xff] }
 0x100   : > { %1402 = vmatprep.subr.mxu1 %v858_v11  ;;  %1172 = vmatprep.mubr.f32.mxu1 %v592_v12  ;;  %v901_v10 = vld [vmem:[#allocation5 + $0x780] sm:$0xff]  ;;  %v836_v11 = vld [vmem:[#allocation5 + $0x578] sm:$0xff]  ;;  %v631_v12 = vld [vmem:[%s3795_s3 + $0x290] sm:$0xff] }
 0x101   : > { %1254 = vmatpush1.msra.mxu0 %v793_v13  ;;  %1403 = vmatpush1.msra.mxu1 %v857_v14  ;;  %v900_v13 = vld [vmem:[#allocation5 + $0x778] sm:$0xff]  ;;  %v638_v14 = vld [vmem:[%s3795_s3 + $0x2c8] sm:$0xff] }
 0x102   : > { %1255 = vmatprep.subr.mxu0 %v792_v15  ;;  %1173 = vmatmul.mubr.f32.gmra.mxu1 %v591_v16  ;;  %v835_v15 = vld [vmem:[#allocation5 + $0x570] sm:$0xff] }
 0x103   : > { %1404 = vmatprep.subr.mxu1 %v856_v17  ;;  %1029 = vmatprep.mubr.f32.mxu0 %v598_v18  ;;  %v899_v16 = vld [vmem:[#allocation5 + $0x770] sm:$0xff]  ;;  %v637_v17 = vld [vmem:[%s3795_s3 + $0x2c0] sm:$0xff]  ;;  %v834_v18 = vld [vmem:[#allocation5 + $0x568] sm:$0xff] }
 0x104   : > { %1256 = vmatpush1.msra.mxu0 %v791_v19  ;;  %1405 = vmatpush1.msra.mxu1 %v855_v20  ;;  %v898_v19 = vld [vmem:[#allocation5 + $0x768] sm:$0xff]  ;;  %v640_v20 = vld [vmem:[%s3795_s3 + $0x2d8] sm:$0xff] }
 0x105   : > { %1030 = vmatmul.mubr.f32.gmra.mxu0 %v597_v21  ;;  %1257 = vmatprep.subr.mxu0 %v790_v22  ;;  %v833_v21 = vld [vmem:[#allocation5 + $0x560] sm:$0xff] }
 0x106   : > { %1406 = vmatprep.subr.mxu1 %v854_v23  ;;  %1178 = vmatprep.mubr.f32.mxu1 %v600_v24  ;;  %v897_v22 = vld [vmem:[#allocation5 + $0x760] sm:$0xff]  ;;  %v832_v23 = vld [vmem:[#allocation5 + $0x558] sm:$0xff]  ;;  %v639_v24 = vld [vmem:[%s3795_s3 + $0x2d0] sm:$0xff] }
 0x107   : > { %1258 = vmatpush1.msra.mxu0 %v789_v25  ;;  %1407 = vmatpush1.msra.mxu1 %v853_v26  ;;  %v896_v25 = vld [vmem:[#allocation5 + $0x758] sm:$0xff]  ;;  %v646_v26 = vld [vmem:[%s3795_s3 + $0x308] sm:$0xff] }
 0x108   : > { %1259 = vmatprep.subr.mxu0 %v852_v27  ;;  %1179 = vmatmul.mubr.f32.gmra.mxu1 %v599_v28  ;;  %v831_v27 = vld [vmem:[#allocation5 + $0x550] sm:$0xff] }
 0x109   : > { %1408 = vmatprep.subr.mxu1 %v916_v29  ;;  %1035 = vmatprep.mubr.f32.mxu0 %v606_v30  ;;  %v895_v28 = vld [vmem:[#allocation5 + $0x750] sm:$0xff]  ;;  %v645_v29 = vld [vmem:[%s3795_s3 + $0x300] sm:$0xff]  ;;  %v830_v30 = vld [vmem:[#allocation5 + $0x548] sm:$0xff] }
 0x10a   : > { %1260 = vmatpush2.msra.mxu0 %v851_v31  ;;  %1409 = vmatpush2.msra.mxu1 %v915_v32  ;;  %v894_v31 = vld [vmem:[#allocation5 + $0x748] sm:$0xff]  ;;  %v648_v32 = vld [vmem:[%s3795_s3 + $0x318] sm:$0xff] }
 0x10b   : > { %1036 = vmatmul.mubr.f32.gmra.mxu0 %v605_v33  ;;  %1261 = vmatprep.subr.mxu0 %v850_v34  ;;  %v829_v33 = vld [vmem:[#allocation5 + $0x540] sm:$0xff] }
 0x10c   : > { %1410 = vmatprep.subr.mxu1 %v914_v35  ;;  %1184 = vmatprep.mubr.f32.mxu1 %v608_v36  ;;  %v893_v34 = vld [vmem:[#allocation5 + $0x740] sm:$0xff]  ;;  %v828_v35 = vld [vmem:[#allocation5 + $0x538] sm:$0xff]  ;;  %v647_v36 = vld [vmem:[%s3795_s3 + $0x310] sm:$0xff] }
 0x10d   : > { %1262 = vmatpush2.msra.mxu0 %v849_v37  ;;  %1411 = vmatpush2.msra.mxu1 %v913_v38  ;;  %v892_v37 = vld [vmem:[#allocation5 + $0x738] sm:$0xff]  ;;  %v654_v38 = vld [vmem:[%s3795_s3 + $0x348] sm:$0xff] }
 0x10e   : > { %1263 = vmatprep.subr.mxu0 %v848_v39  ;;  %1185 = vmatmul.mubr.f32.gmra.mxu1 %v607_v40  ;;  %v827_v39 = vld [vmem:[#allocation5 + $0x530] sm:$0xff] }
 0x10f   : > { %1412 = vmatprep.subr.mxu1 %v912_v41  ;;  %1041 = vmatprep.mubr.f32.mxu0 %v614_v42  ;;  %v891_v40 = vld [vmem:[#allocation5 + $0x730] sm:$0xff]  ;;  %v653_v41 = vld [vmem:[%s3795_s3 + $0x340] sm:$0xff]  ;;  %v826_v42 = vld [vmem:[#allocation5 + $0x528] sm:$0xff] }
 0x110   : > { %1264 = vmatpush2.msra.mxu0 %v847_v43  ;;  %1413 = vmatpush2.msra.mxu1 %v911_v44  ;;  %v890_v43 = vld [vmem:[#allocation5 + $0x728] sm:$0xff]  ;;  %v656_v44 = vld [vmem:[%s3795_s3 + $0x358] sm:$0xff] }
 0x111   : > { %1042 = vmatmul.mubr.f32.gmra.mxu0 %v613_v45  ;;  %1265 = vmatprep.subr.mxu0 %v846_v46  ;;  %v825_v45 = vld [vmem:[#allocation5 + $0x520] sm:$0xff] }
 0x112   : > { %1414 = vmatprep.subr.mxu1 %v910_v47  ;;  %1190 = vmatprep.mubr.f32.mxu1 %v616_v48  ;;  %v889_v46 = vld [vmem:[#allocation5 + $0x720] sm:$0xff]  ;;  %v824_v47 = vld [vmem:[#allocation5 + $0x518] sm:$0xff]  ;;  %v655_v48 = vld [vmem:[%s3795_s3 + $0x350] sm:$0xff] }
 0x113   : > { %1266 = vmatpush2.msra.mxu0 %v845_v49  ;;  %1415 = vmatpush2.msra.mxu1 %v909_v50  ;;  %v888_v49 = vld [vmem:[#allocation5 + $0x718] sm:$0xff]  ;;  %v823_v50 = vld [vmem:[#allocation5 + $0x510] sm:$0xff] }
 0x114   : > { %1267 = vmatprep.subr.mxu0 %v844_v51  ;;  %1191 = vmatmul.mubr.f32.gmra.mxu1 %v615_v52  ;;  %v887_v51 = vld [vmem:[#allocation5 + $0x710] sm:$0xff]  ;;  %v822_v52 = vld [vmem:[#allocation5 + $0x508] sm:$0xff] }
 0x115   : > { %1416 = vmatprep.subr.mxu1 %v908_v53  ;;  %1047 = vmatprep.mubr.f32.mxu0 %v622_v54  ;;  %v886_v53 = vld [vmem:[#allocation5 + $0x708] sm:$0xff]  ;;  %v821_v54 = vld [vmem:[#allocation5 + $0x500] sm:$0xff] }
 0x116   : > { %1268 = vmatpush2.msra.mxu0 %v843_v55  ;;  %1417 = vmatpush2.msra.mxu1 %v907_v56  ;;  %v554_v55 = vld [vmem:[%s3795_s3 + $0x28] sm:$0xff]  ;;  %v885_v56 = vld [vmem:[#allocation5 + $0x700] sm:$0xff] }
 0x117   : > { %1048 = vmatmul.mubr.f32.gmra.mxu0 %v621_v57  ;;  %1269 = vmatprep.subr.mxu0 %v842_v58  ;;  %v556_v57 = vld [vmem:[%s3795_s3 + $0x38] sm:$0xff]  ;;  %v553_v58 = vld [vmem:[%s3795_s3 + $0x20] sm:$0xff] }
 0x118   : > { %1418 = vmatprep.subr.mxu1 %v906_v59  ;;  %1196 = vmatprep.mubr.f32.mxu1 %v624_v60  ;;  %v555_v59 = vld [vmem:[%s3795_s3 + $0x30] sm:$0xff]  ;;  %v562_v60 = vld [vmem:[%s3795_s3 + $0x68] sm:$0xff] }
 0x119   : > { %1270 = vmatpush2.msra.mxu0 %v841_v61  ;;  %1419 = vmatpush2.msra.mxu1 %v905_v62  ;;  %v564_v61 = vld [vmem:[%s3795_s3 + $0x78] sm:$0xff] }
 0x11a   : > { %1271 = vmatprep.subr.mxu0 %v840_v63  ;;  %1197 = vmatmul.mubr.f32.gmra.mxu1 %v623_v0  ;;  %v1584_v62 = vld [vmem:[#allocation7 + $0xf8] sm:$0xff]  ;;  %v1583_v63 = vld [vmem:[#allocation7 + $0xf0] sm:$0xff]  ;;  %v561_v0 = vld [vmem:[%s3795_s3 + $0x60] sm:$0xff] }
 0x11b   : > { %1420 = vmatprep.subr.mxu1 %v904_v1  ;;  %1053 = vmatprep.mubr.f32.mxu0 %v630_v2  ;;  %v563_v1 = vld [vmem:[%s3795_s3 + $0x70] sm:$0xff]  ;;  %v570_v2 = vld [vmem:[%s3795_s3 + $0xa8] sm:$0xff] }
 0x11c   : > { %1272 = vmatpush2.msra.mxu0 %v839_v3  ;;  %1421 = vmatpush2.msra.mxu1 %v903_v4  ;;  %v572_v3 = vld [vmem:[%s3795_s3 + $0xb8] sm:$0xff]  ;;  %v1582_v4 = vld [vmem:[#allocation7 + $0xe8] sm:$0xff] }
 0x11d   : > { %1054 = vmatmul.mubr.f32.gmra.mxu0 %v629_v5  ;;  %1273 = vmatprep.subr.mxu0 %v838_v6  ;;  %v1581_v5 = vld [vmem:[#allocation7 + $0xe0] sm:$0xff] }
 0x11e   : > { %1422 = vmatprep.subr.mxu1 %v902_v7  ;;  %1202 = vmatprep.mubr.f32.mxu1 %v632_v8  ;;  %v569_v6 = vld [vmem:[%s3795_s3 + $0xa0] sm:$0xff]  ;;  %v571_v7 = vld [vmem:[%s3795_s3 + $0xb0] sm:$0xff]  ;;  %v578_v8 = vld [vmem:[%s3795_s3 + $0xe8] sm:$0xff] }
 0x11f   : > { %1274 = vmatpush2.msra.mxu0 %v837_v9  ;;  %1423 = vmatpush2.msra.mxu1 %v901_v10  ;;  %v580_v9 = vld [vmem:[%s3795_s3 + $0xf8] sm:$0xff] }
 0x120   : > { %1275 = vmatprep.subr.mxu0 %v836_v11  ;;  %1203 = vmatmul.mubr.f32.gmra.mxu1 %v631_v12  ;;  %v1580_v10 = vld [vmem:[#allocation7 + $0xd8] sm:$0xff]  ;;  %v1579_v11 = vld [vmem:[#allocation7 + $0xd0] sm:$0xff]  ;;  %v577_v12 = vld [vmem:[%s3795_s3 + $0xe0] sm:$0xff] }
 0x121   : > { %1424 = vmatprep.subr.mxu1 %v900_v13  ;;  %1059 = vmatprep.mubr.f32.mxu0 %v638_v14  ;;  %v579_v13 = vld [vmem:[%s3795_s3 + $0xf0] sm:$0xff]  ;;  %v586_v14 = vld [vmem:[%s3795_s3 + $0x128] sm:$0xff] }
 0x122   : > { %1276 = vmatpush2.msra.mxu0 %v835_v15  ;;  %1425 = vmatpush2.msra.mxu1 %v899_v16  ;;  %v588_v15 = vld [vmem:[%s3795_s3 + $0x138] sm:$0xff]  ;;  %v1578_v16 = vld [vmem:[#allocation7 + $0xc8] sm:$0xff] }
 0x123   : > { %1060 = vmatmul.mubr.f32.gmra.mxu0 %v637_v17  ;;  %1277 = vmatprep.subr.mxu0 %v834_v18  ;;  %v1577_v17 = vld [vmem:[#allocation7 + $0xc0] sm:$0xff] }
 0x124   : > { %1426 = vmatprep.subr.mxu1 %v898_v19  ;;  %1208 = vmatprep.mubr.f32.mxu1 %v640_v20  ;;  %v585_v18 = vld [vmem:[%s3795_s3 + $0x120] sm:$0xff]  ;;  %v587_v19 = vld [vmem:[%s3795_s3 + $0x130] sm:$0xff]  ;;  %v594_v20 = vld [vmem:[%s3795_s3 + $0x168] sm:$0xff] }
 0x125   : > { %1278 = vmatpush2.msra.mxu0 %v833_v21  ;;  %1427 = vmatpush2.msra.mxu1 %v897_v22  ;;  %v596_v21 = vld [vmem:[%s3795_s3 + $0x178] sm:$0xff] }
 0x126   : > { %1279 = vmatprep.subr.mxu0 %v832_v23  ;;  %1209 = vmatmul.mubr.f32.gmra.mxu1 %v639_v24  ;;  %v1576_v22 = vld [vmem:[#allocation7 + $0xb8] sm:$0xff]  ;;  %v1575_v23 = vld [vmem:[#allocation7 + $0xb0] sm:$0xff]  ;;  %v593_v24 = vld [vmem:[%s3795_s3 + $0x160] sm:$0xff] }
 0x127   : > { %1428 = vmatprep.subr.mxu1 %v896_v25  ;;  %1065 = vmatprep.mubr.f32.mxu0 %v646_v26  ;;  %v595_v25 = vld [vmem:[%s3795_s3 + $0x170] sm:$0xff]  ;;  %v602_v26 = vld [vmem:[%s3795_s3 + $0x1a8] sm:$0xff] }
 0x128   : > { %1280 = vmatpush2.msra.mxu0 %v831_v27  ;;  %1429 = vmatpush2.msra.mxu1 %v895_v28  ;;  %v604_v27 = vld [vmem:[%s3795_s3 + $0x1b8] sm:$0xff]  ;;  %v1574_v28 = vld [vmem:[#allocation7 + $0xa8] sm:$0xff] }
 0x129   : > { %1066 = vmatmul.mubr.f32.gmra.mxu0 %v645_v29  ;;  %1281 = vmatprep.subr.mxu0 %v830_v30  ;;  %v1573_v29 = vld [vmem:[#allocation7 + $0xa0] sm:$0xff] }
 0x12a   : > { %1430 = vmatprep.subr.mxu1 %v894_v31  ;;  %1214 = vmatprep.mubr.f32.mxu1 %v648_v32  ;;  %v601_v30 = vld [vmem:[%s3795_s3 + $0x1a0] sm:$0xff]  ;;  %v603_v31 = vld [vmem:[%s3795_s3 + $0x1b0] sm:$0xff]  ;;  %v610_v32 = vld [vmem:[%s3795_s3 + $0x1e8] sm:$0xff] }
 0x12b   : > { %1282 = vmatpush2.msra.mxu0 %v829_v33  ;;  %1431 = vmatpush2.msra.mxu1 %v893_v34  ;;  %v612_v33 = vld [vmem:[%s3795_s3 + $0x1f8] sm:$0xff] }
 0x12c   : > { %1283 = vmatprep.subr.mxu0 %v828_v35  ;;  %1215 = vmatmul.mubr.f32.gmra.mxu1 %v647_v36  ;;  %v1572_v34 = vld [vmem:[#allocation7 + $0x98] sm:$0xff]  ;;  %v1571_v35 = vld [vmem:[#allocation7 + $0x90] sm:$0xff]  ;;  %v609_v36 = vld [vmem:[%s3795_s3 + $0x1e0] sm:$0xff] }
 0x12d   : > { %1432 = vmatprep.subr.mxu1 %v892_v37  ;;  %1071 = vmatprep.mubr.f32.mxu0 %v654_v38  ;;  %v611_v37 = vld [vmem:[%s3795_s3 + $0x1f0] sm:$0xff]  ;;  %v618_v38 = vld [vmem:[%s3795_s3 + $0x228] sm:$0xff] }
 0x12e   : > { %1284 = vmatpush2.msra.mxu0 %v827_v39  ;;  %1433 = vmatpush2.msra.mxu1 %v891_v40  ;;  %v620_v39 = vld [vmem:[%s3795_s3 + $0x238] sm:$0xff]  ;;  %v1570_v40 = vld [vmem:[#allocation7 + $0x88] sm:$0xff] }
 0x12f   : > { %1072 = vmatmul.mubr.f32.gmra.mxu0 %v653_v41  ;;  %1285 = vmatprep.subr.mxu0 %v826_v42  ;;  %v1569_v41 = vld [vmem:[#allocation7 + $0x80] sm:$0xff] }
 0x130   : > { %1434 = vmatprep.subr.mxu1 %v890_v43  ;;  %1220 = vmatprep.mubr.f32.mxu1 %v656_v44  ;;  %v617_v42 = vld [vmem:[%s3795_s3 + $0x220] sm:$0xff]  ;;  %v619_v43 = vld [vmem:[%s3795_s3 + $0x230] sm:$0xff]  ;;  %v626_v44 = vld [vmem:[%s3795_s3 + $0x268] sm:$0xff] }
 0x131   : > { %1286 = vmatpush2.msra.mxu0 %v825_v45  ;;  %1435 = vmatpush2.msra.mxu1 %v889_v46  ;;  %v628_v45 = vld [vmem:[%s3795_s3 + $0x278] sm:$0xff] }
 0x132   : > { %1287 = vmatprep.subr.mxu0 %v824_v47  ;;  %1221 = vmatmul.mubr.f32.gmra.mxu1 %v655_v48  ;;  %v1568_v46 = vld [vmem:[#allocation7 + $0x78] sm:$0xff]  ;;  %v1567_v47 = vld [vmem:[#allocation7 + $0x70] sm:$0xff]  ;;  %v625_v48 = vld [vmem:[%s3795_s3 + $0x260] sm:$0xff] }
 0x133   : > { %1436 = vmatprep.subr.mxu1 %v888_v49  ;;  %1288 = vmatpush2.msra.mxu0 %v823_v50  ;;  %v627_v49 = vld [vmem:[%s3795_s3 + $0x270] sm:$0xff]  ;;  %v634_v50 = vld [vmem:[%s3795_s3 + $0x2a8] sm:$0xff] }
 0x134   : > { %1437 = vmatpush2.msra.mxu1 %v887_v51  ;;  %1289 = vmatprep.subr.mxu0 %v822_v52  ;;  %v636_v51 = vld [vmem:[%s3795_s3 + $0x2b8] sm:$0xff]  ;;  %v1566_v52 = vld [vmem:[#allocation7 + $0x68] sm:$0xff] }
 0x135   : > { %1438 = vmatprep.subr.mxu1 %v886_v53  ;;  %1290 = vmatpush2.msra.mxu0 %v821_v54  ;;  %v1565_v53 = vld [vmem:[#allocation7 + $0x60] sm:$0xff] }
 0x136   : > { %1291 = vmatprep.mubr.f32.mxu0 %v554_v55  ;;  %1439 = vmatpush2.msra.mxu1 %v885_v56  ;;  %v633_v54 = vld [vmem:[%s3795_s3 + $0x2a0] sm:$0xff]  ;;  %v635_v55 = vld [vmem:[%s3795_s3 + $0x2b0] sm:$0xff]  ;;  %v642_v56 = vld [vmem:[%s3795_s3 + $0x2e8] sm:$0xff] }
 0x137   : > { %1440 = vmatprep.mubr.f32.mxu1 %v556_v57  ;;  %1292 = vmatmul.mubr.f32.vlgmr.msra.gmra.mxu0 %v553_v58  ;;  %v644_v57 = vld [vmem:[%s3795_s3 + $0x2f8] sm:$0xff] }
 0x138   : > { %1441 = vmatmul.mubr.f32.vlgmr.msra.gmra.mxu1 %v555_v59  ;;  %1297 = vmatprep.mubr.f32.mxu0 %v562_v60  ;;  %v1564_v58 = vld [vmem:[#allocation7 + $0x58] sm:$0xff]  ;;  %v1563_v59 = vld [vmem:[#allocation7 + $0x50] sm:$0xff]  ;;  %v641_v60 = vld [vmem:[%s3795_s3 + $0x2e0] sm:$0xff] }
 0x139   : > { %1446 = vmatprep.mubr.f32.mxu1 %v564_v61  ;;  %1629 = vmatprep.subr.mxu0 %v1584_v62  ;;  %v643_v61 = vld [vmem:[%s3795_s3 + $0x2f0] sm:$0xff]  ;;  %v650_v62 = vld [vmem:[%s3795_s3 + $0x328] sm:$0xff] }
 0x13a   : > { %1630 = vmatpush1.msra.mxu0 %v1583_v63  ;;  %v652_v63 = vld [vmem:[%s3795_s3 + $0x338] sm:$0xff] }
 0x13b   : > { %1298 = vmatmul.mubr.f32.gmra.mxu0 %v561_v0  ;;  %1631 = vmatprep.subr.mxu0 %v1582_v4  ;;  %v1562_v0 = vld [vmem:[#allocation7 + $0x48] sm:$0xff] }
 0x13c   : > { %1447 = vmatmul.mubr.f32.gmra.mxu1 %v563_v1  ;;  %1303 = vmatprep.mubr.f32.mxu0 %v570_v2  ;;  %v1561_v1 = vld [vmem:[#allocation7 + $0x40] sm:$0xff]  ;;  %v658_v4 = vld [vmem:[%s3795_s3 + $0x368] sm:$0xff] }
 0x13d   : > { %1452 = vmatprep.mubr.f32.mxu1 %v572_v3  ;;  %1632 = vmatpush1.msra.mxu0 %v1581_v5  ;;  %v649_v2 = vld [vmem:[%s3795_s3 + $0x320] sm:$0xff]  ;;  %v651_v3 = vld [vmem:[%s3795_s3 + $0x330] sm:$0xff]  ;;  %v660_v5 = vld [vmem:[%s3795_s3 + $0x378] sm:$0xff] }
 0x13e   : > { %1633 = vmatprep.subr.mxu0 %v1580_v10  ;;  %v1558_v10 = vld [vmem:[#allocation7 + $0x28] sm:$0xff] }
 0x13f   : > { %1304 = vmatmul.mubr.f32.gmra.mxu0 %v569_v6  ;;  %v1560_v6 = vld [vmem:[#allocation7 + $0x38] sm:$0xff] }
 0x140   : > { %1453 = vmatmul.mubr.f32.gmra.mxu1 %v571_v7  ;;  %1309 = vmatprep.mubr.f32.mxu0 %v578_v8  ;;  %v1559_v7 = vld [vmem:[#allocation7 + $0x30] sm:$0xff]  ;;  %v657_v8 = vld [vmem:[%s3795_s3 + $0x360] sm:$0xff] }
 0x141   : > { %1458 = vmatprep.mubr.f32.mxu1 %v580_v9  ;;  %1634 = vmatpush1.msra.mxu0 %v1579_v11  ;;  %v659_v9 = vld [vmem:[%s3795_s3 + $0x370] sm:$0xff]  ;;  %v1557_v11 = vld [vmem:[#allocation7 + $0x20] sm:$0xff]  ;;  %s4761_s3 = scalar_lea.vmem [#allocation14], %s3143_s22 }
 0x142   : > { %1635 = vmatprep.subr.mxu0 %v1578_v16  ;;  %v1616_v16 = vld [vmem:[#allocation7 + $0x1f8] sm:$0xff]  ;;  %s2879_s7 = sshll.u32 %s4761_s3, 4  ;;  %s4795_s7 = int_to_ptr.vmem [resolvable:$true] %s2879_s7 }
 0x143   : > { %1310 = vmatmul.mubr.f32.gmra.mxu0 %v577_v12  ;;  %v1556_v12 = vld [vmem:[#allocation7 + $0x18] sm:$0xff]  ;;  %s3443_s24 = scalar_lea.vmem %s4795_s7, 1792  ;;  %p3450_p13 = scmp.lt.s32.totalorder %s4795_s7, %s3448_s1 }
 0x144   : > { %1459 = vmatmul.mubr.f32.gmra.mxu1 %v579_v13  ;;  %1315 = vmatprep.mubr.f32.mxu0 %v586_v14  ;;  %v1555_v13 = vld [vmem:[#allocation7 + $0x10] sm:$0xff]  ;;  %v1554_v14 = vld [vmem:[#allocation7 + $0x8] sm:$0xff]  ;;  %p3444_p8 = scmp.ne.s32.totalorder %s4795_s7, %s3443_s24  ;;  %p3451_p5 = scmp.lt.s32.totalorder %s3449_s11, %s3443_s24 }
 0x145   : > { %1464 = vmatprep.mubr.f32.mxu1 %v588_v15  ;;  %1636 = vmatpush1.msra.mxu0 %v1577_v17  ;;  %v1553_v15 = vld [vmem:[#allocation7] sm:$0xff]  ;;  %v1615_v17 = vld [vmem:[#allocation7 + $0x1f0] sm:$0xff] }
 0x146   : > { %1637 = vmatprep.subr.mxu0 %v1576_v22  ;;  %v1610_v22 = vld [vmem:[#allocation7 + $0x1c8] sm:$0xff]  ;;  %p3445_p10 = pnand %p3444_p8, %p4997_p6  ;;  %p3452_p1 = por %p3451_p5, %p3450_p13 }
 0x147   : > { %1316 = vmatmul.mubr.f32.gmra.mxu0 %v585_v18  ;;  %v1614_v18 = vld [vmem:[#allocation7 + $0x1e8] sm:$0xff] }
 0x148   : > { %1465 = vmatmul.mubr.f32.gmra.mxu1 %v587_v19  ;;  %1321 = vmatprep.mubr.f32.mxu0 %v594_v20  ;;  %v1613_v19 = vld [vmem:[#allocation7 + $0x1e0] sm:$0xff]  ;;  %v1612_v20 = vld [vmem:[#allocation7 + $0x1d8] sm:$0xff]  ;;  %p3446_p11 = pneg %p3445_p10 }
 0x149   : > { %1470 = vmatprep.mubr.f32.mxu1 %v596_v21  ;;  %1638 = vmatpush1.msra.mxu0 %v1575_v23  ;;  %v1611_v21 = vld [vmem:[#allocation7 + $0x1d0] sm:$0xff]  ;;  %v1609_v23 = vld [vmem:[#allocation7 + $0x1c0] sm:$0xff] }
 0x14a   : > { %1639 = vmatprep.subr.mxu0 %v1574_v28  ;;  %v1604_v28 = vld [vmem:[#allocation7 + $0x198] sm:$0xff]  ;;  %p3453_p3 = pnand %p3452_p1, %p3446_p11 }
 0x14b   : > { %1322 = vmatmul.mubr.f32.gmra.mxu0 %v593_v24  ;;  %v1608_v24 = vld [vmem:[#allocation7 + $0x1b8] sm:$0xff] }
 0x14c   : > { %1471 = vmatmul.mubr.f32.gmra.mxu1 %v595_v25  ;;  %1327 = vmatprep.mubr.f32.mxu0 %v602_v26  ;;  %v1607_v25 = vld [vmem:[#allocation7 + $0x1b0] sm:$0xff]  ;;  %v1606_v26 = vld [vmem:[#allocation7 + $0x1a8] sm:$0xff] }
 0x14d   : > { %1476 = vmatprep.mubr.f32.mxu1 %v604_v27  ;;  %1640 = vmatpush1.msra.mxu0 %v1573_v29  ;;  %v1605_v27 = vld [vmem:[#allocation7 + $0x1a0] sm:$0xff]  ;;  %v1603_v29 = vld [vmem:[#allocation7 + $0x190] sm:$0xff] }
 0x14e   : > { %1641 = vmatprep.subr.mxu0 %v1572_v34  ;;  %v1598_v34 = vld [vmem:[#allocation7 + $0x168] sm:$0xff] }
 0x14f   : > { %1328 = vmatmul.mubr.f32.gmra.mxu0 %v601_v30  ;;  %v1602_v30 = vld [vmem:[#allocation7 + $0x188] sm:$0xff] }
 0x150   : > { %1477 = vmatmul.mubr.f32.gmra.mxu1 %v603_v31  ;;  %1333 = vmatprep.mubr.f32.mxu0 %v610_v32  ;;  %v1601_v31 = vld [vmem:[#allocation7 + $0x180] sm:$0xff]  ;;  %v1600_v32 = vld [vmem:[#allocation7 + $0x178] sm:$0xff] }
 0x151   : > { %1482 = vmatprep.mubr.f32.mxu1 %v612_v33  ;;  %1642 = vmatpush1.msra.mxu0 %v1571_v35  ;;  %v1599_v33 = vld [vmem:[#allocation7 + $0x170] sm:$0xff]  ;;  %v1597_v35 = vld [vmem:[#allocation7 + $0x160] sm:$0xff] }
 0x152   : > { %1643 = vmatprep.subr.mxu0 %v1570_v40  ;;  %v1592_v40 = vld [vmem:[#allocation7 + $0x138] sm:$0xff] }
 0x153   : > { %1334 = vmatmul.mubr.f32.gmra.mxu0 %v609_v36  ;;  %v1596_v36 = vld [vmem:[#allocation7 + $0x158] sm:$0xff] }
 0x154   : > { %1483 = vmatmul.mubr.f32.gmra.mxu1 %v611_v37  ;;  %1339 = vmatprep.mubr.f32.mxu0 %v618_v38  ;;  %v1595_v37 = vld [vmem:[#allocation7 + $0x150] sm:$0xff]  ;;  %v1594_v38 = vld [vmem:[#allocation7 + $0x148] sm:$0xff] }
 0x155   : > { %1488 = vmatprep.mubr.f32.mxu1 %v620_v39  ;;  %1644 = vmatpush1.msra.mxu0 %v1569_v41  ;;  %v1593_v39 = vld [vmem:[#allocation7 + $0x140] sm:$0xff]  ;;  %v1591_v41 = vld [vmem:[#allocation7 + $0x130] sm:$0xff] }
 0x156   : > { %1645 = vmatprep.subr.mxu0 %v1568_v46  ;;  %v1586_v46 = vld [vmem:[#allocation7 + $0x108] sm:$0xff] }
 0x157   : > { %1340 = vmatmul.mubr.f32.gmra.mxu0 %v617_v42  ;;  %v1590_v42 = vld [vmem:[#allocation7 + $0x128] sm:$0xff] }
 0x158   : > { %1489 = vmatmul.mubr.f32.gmra.mxu1 %v619_v43  ;;  %1345 = vmatprep.mubr.f32.mxu0 %v626_v44  ;;  %v1589_v43 = vld [vmem:[#allocation7 + $0x120] sm:$0xff]  ;;  %v1588_v44 = vld [vmem:[#allocation7 + $0x118] sm:$0xff] }
 0x159   : > { %1494 = vmatprep.mubr.f32.mxu1 %v628_v45  ;;  %1646 = vmatpush1.msra.mxu0 %v1567_v47  ;;  %v1587_v45 = vld [vmem:[#allocation7 + $0x110] sm:$0xff]  ;;  %v1585_v47 = vld [vmem:[#allocation7 + $0x100] sm:$0xff] }
 0x15a   : > { %1647 = vmatprep.subr.mxu0 %v1566_v52 }
 0x15b   : > { %1346 = vmatmul.mubr.f32.gmra.mxu0 %v625_v48 }
 0x15c   : > { %1495 = vmatmul.mubr.f32.gmra.mxu1 %v627_v49  ;;  %1351 = vmatprep.mubr.f32.mxu0 %v634_v50 }
 0x15d   : > { %1500 = vmatprep.mubr.f32.mxu1 %v636_v51  ;;  %1648 = vmatpush1.msra.mxu0 %v1565_v53 }
 0x15e   : > { %1649 = vmatprep.subr.mxu0 %v1564_v58 }
 0x15f   : > { %1352 = vmatmul.mubr.f32.gmra.mxu0 %v633_v54 }
 0x160   : > { %1501 = vmatmul.mubr.f32.gmra.mxu1 %v635_v55  ;;  %1357 = vmatprep.mubr.f32.mxu0 %v642_v56 }
 0x161   : > { %1506 = vmatprep.mubr.f32.mxu1 %v644_v57  ;;  %1650 = vmatpush1.msra.mxu0 %v1563_v59 }
 0x162   : > { %1651 = vmatprep.subr.mxu0 %v1562_v0  ;;  %v1835_v0 = vld [vmem:[#allocation8 + $0xe8] sm:$0xff] }
 0x163   : > { %1358 = vmatmul.mubr.f32.gmra.mxu0 %v641_v60 }
 0x164   : > { %1507 = vmatmul.mubr.f32.gmra.mxu1 %v643_v61  ;;  %1363 = vmatprep.mubr.f32.mxu0 %v650_v62  ;;  %v1837_v62 = vld [vmem:[#allocation8 + $0xf8] sm:$0xff] }
 0x165   : > { %1512 = vmatprep.mubr.f32.mxu1 %v652_v63  ;;  %1652 = vmatpush1.msra.mxu0 %v1561_v1  ;;  %v1836_v63 = vld [vmem:[#allocation8 + $0xf0] sm:$0xff] }
 0x166   : > { %1653 = vmatprep.subr.mxu0 %v1560_v6  ;;  %1870 = vmatprep.subr.mxu1 %v1837_v62  ;;  %v1832_v6 = vld [vmem:[#allocation8 + $0xd0] sm:$0xff] }
 0x167   : > { %1364 = vmatmul.mubr.f32.gmra.mxu0 %v649_v2  ;;  %v1834_v2 = vld [vmem:[#allocation8 + $0xe0] sm:$0xff]  ;;  %1871 = vmatpush1.msra.mxu1 %v1836_v63 }
 0x168   : > { %1513 = vmatmul.mubr.f32.gmra.mxu1 %v651_v3  ;;  %1369 = vmatprep.mubr.f32.mxu0 %v658_v4  ;;  %v1833_v3 = vld [vmem:[#allocation8 + $0xd8] sm:$0xff]  ;;  %v1806_v63 = vld [vmem:[#allocation8] sm:$0xff] }
 0x169   : > { %1518 = vmatprep.mubr.f32.mxu1 %v660_v5  ;;  %1654 = vmatpush1.msra.mxu0 %v1559_v7  ;;  %v1831_v7 = vld [vmem:[#allocation8 + $0xc8] sm:$0xff] }
 0x16a   : > { %1655 = vmatprep.subr.mxu0 %v1558_v10  ;;  %1872 = vmatprep.subr.mxu1 %v1835_v0  ;;  %v1829_v10 = vld [vmem:[#allocation8 + $0xb8] sm:$0xff] }
 0x16b   : > { %1370 = vmatmul.mubr.f32.gmra.mxu0 %v657_v8  ;;  %1873 = vmatpush1.msra.mxu1 %v1834_v2  ;;  %v1869_v0 = vld [vmem:[#allocation8 + $0x1f8] sm:$0xff] }
 0x16c   : > { %1519 = vmatmul.mubr.f32.gmra.mxu1 %v659_v9  ;;  %1656 = vmatpush1.msra.mxu0 %v1557_v11  ;;  %v1830_v9 = vld [vmem:[#allocation8 + $0xc0] sm:$0xff] }
 0x16d   : > { %1657 = vmatprep.subr.mxu0 %v1556_v12  ;;  %1874 = vmatprep.subr.mxu1 %v1833_v3  ;;  %v1828_v12 = vld [vmem:[#allocation8 + $0xb0] sm:$0xff] }
 0x16e   : > { %1658 = vmatpush1.msra.mxu0 %v1555_v13  ;;  %1875 = vmatpush1.msra.mxu1 %v1832_v6  ;;  %v1827_v13 = vld [vmem:[#allocation8 + $0xa8] sm:$0xff]  ;;  %v1868_v3 = vld [vmem:[#allocation8 + $0x1f0] sm:$0xff] }
 0x16f   : > { %1659 = vmatprep.subr.mxu0 %v1554_v14  ;;  %1876 = vmatprep.subr.mxu1 %v1831_v7  ;;  %v1867_v6 = vld [vmem:[#allocation8 + $0x1e8] sm:$0xff] }
 0x170   : > { %1660 = vmatpush1.msra.mxu0 %v1553_v15  ;;  %1877 = vmatpush1.msra.mxu1 %v1830_v9 }
 0x171   : > { %1661 = vmatprep.subr.mxu0 %v1616_v16  ;;  %1878 = vmatprep.subr.mxu1 %v1829_v10  ;;  %v1826_v16 = vld [vmem:[#allocation8 + $0xa0] sm:$0xff] }
 0x172   : > { %1662 = vmatpush2.msra.mxu0 %v1615_v17  ;;  %1879 = vmatpush1.msra.mxu1 %v1828_v12  ;;  %v1825_v17 = vld [vmem:[#allocation8 + $0x98] sm:$0xff]  ;;  %v1866_v10 = vld [vmem:[#allocation8 + $0x1e0] sm:$0xff] }
 0x173   : > { %1663 = vmatprep.subr.mxu0 %v1614_v18  ;;  %1880 = vmatprep.subr.mxu1 %v1827_v13  ;;  %v1865_v12 = vld [vmem:[#allocation8 + $0x1d8] sm:$0xff] }
 0x174   : > { %1664 = vmatpush2.msra.mxu0 %v1613_v19  ;;  %v1824_v19 = vld [vmem:[#allocation8 + $0x90] sm:$0xff]  ;;  %1881 = vmatpush1.msra.mxu1 %v1826_v16 }
 0x175   : > { %1665 = vmatprep.subr.mxu0 %v1612_v20  ;;  %v1823_v20 = vld [vmem:[#allocation8 + $0x88] sm:$0xff]  ;;  %1882 = vmatprep.subr.mxu1 %v1825_v17  ;;  %v1864_v16 = vld [vmem:[#allocation8 + $0x1d0] sm:$0xff] }
 0x176   : > { %1666 = vmatpush2.msra.mxu0 %v1611_v21  ;;  %1883 = vmatpush1.msra.mxu1 %v1824_v19  ;;  %v1863_v17 = vld [vmem:[#allocation8 + $0x1c8] sm:$0xff] }
 0x177   : > { %1667 = vmatprep.subr.mxu0 %v1610_v22  ;;  %v1822_v22 = vld [vmem:[#allocation8 + $0x80] sm:$0xff]  ;;  %1884 = vmatprep.subr.mxu1 %v1823_v20 }
 0x178   : > { %1668 = vmatpush2.msra.mxu0 %v1609_v23  ;;  %v1821_v23 = vld [vmem:[#allocation8 + $0x78] sm:$0xff]  ;;  %1885 = vmatpush1.msra.mxu1 %v1822_v22  ;;  %v1862_v20 = vld [vmem:[#allocation8 + $0x1c0] sm:$0xff] }
 0x179   : > { %1669 = vmatprep.subr.mxu0 %v1608_v24  ;;  %1886 = vmatprep.subr.mxu1 %v1821_v23  ;;  %v1861_v22 = vld [vmem:[#allocation8 + $0x1b8] sm:$0xff] }
 0x17a   : > { %1670 = vmatpush2.msra.mxu0 %v1607_v25 }
 0x17b   : > { %1671 = vmatprep.subr.mxu0 %v1606_v26  ;;  %v1820_v26 = vld [vmem:[#allocation8 + $0x70] sm:$0xff] }
 0x17c   : > { %1672 = vmatpush2.msra.mxu0 %v1605_v27  ;;  %v1819_v27 = vld [vmem:[#allocation8 + $0x68] sm:$0xff]  ;;  %1887 = vmatpush1.msra.mxu1 %v1820_v26 }
 0x17d   : > { %1673 = vmatprep.subr.mxu0 %v1604_v28  ;;  %1888 = vmatprep.subr.mxu1 %v1819_v27  ;;  %v1860_v27 = vld [vmem:[#allocation8 + $0x1b0] sm:$0xff] }
 0x17e   : > { %1674 = vmatpush2.msra.mxu0 %v1603_v29  ;;  %v1818_v29 = vld [vmem:[#allocation8 + $0x60] sm:$0xff] }
 0x17f   : > { %1675 = vmatprep.subr.mxu0 %v1602_v30  ;;  %v1817_v30 = vld [vmem:[#allocation8 + $0x58] sm:$0xff]  ;;  %1889 = vmatpush1.msra.mxu1 %v1818_v29  ;;  %v1859_v29 = vld [vmem:[#allocation8 + $0x1a8] sm:$0xff] }
 0x180   : > { %1676 = vmatpush2.msra.mxu0 %v1601_v31  ;;  %1890 = vmatprep.subr.mxu1 %v1817_v30 }
 0x181   : > { %1677 = vmatprep.subr.mxu0 %v1600_v32  ;;  %v1816_v32 = vld [vmem:[#allocation8 + $0x50] sm:$0xff] }
 0x182   : > { %1678 = vmatpush2.msra.mxu0 %v1599_v33  ;;  %v1815_v33 = vld [vmem:[#allocation8 + $0x48] sm:$0xff]  ;;  %1891 = vmatpush1.msra.mxu1 %v1816_v32  ;;  %v1858_v32 = vld [vmem:[#allocation8 + $0x1a0] sm:$0xff] }
 0x183   : > { %1679 = vmatprep.subr.mxu0 %v1598_v34  ;;  %1892 = vmatprep.subr.mxu1 %v1815_v33  ;;  %v1857_v33 = vld [vmem:[#allocation8 + $0x198] sm:$0xff] }
 0x184   : > { %1680 = vmatpush2.msra.mxu0 %v1597_v35 }
 0x185   : > { %1681 = vmatprep.subr.mxu0 %v1596_v36  ;;  %v1814_v36 = vld [vmem:[#allocation8 + $0x40] sm:$0xff] }
 0x186   : > { %1682 = vmatpush2.msra.mxu0 %v1595_v37  ;;  %v1813_v37 = vld [vmem:[#allocation8 + $0x38] sm:$0xff]  ;;  %1893 = vmatpush1.msra.mxu1 %v1814_v36 }
 0x187   : > { %1683 = vmatprep.subr.mxu0 %v1594_v38  ;;  %1894 = vmatprep.subr.mxu1 %v1813_v37  ;;  %v1856_v37 = vld [vmem:[#allocation8 + $0x190] sm:$0xff] }
 0x188   : > { %1684 = vmatpush2.msra.mxu0 %v1593_v39  ;;  %v1812_v39 = vld [vmem:[#allocation8 + $0x30] sm:$0xff] }
 0x189   : > { %1685 = vmatprep.subr.mxu0 %v1592_v40  ;;  %v1811_v40 = vld [vmem:[#allocation8 + $0x28] sm:$0xff]  ;;  %1895 = vmatpush1.msra.mxu1 %v1812_v39 }
 0x18a   : > { %1686 = vmatpush2.msra.mxu0 %v1591_v41  ;;  %1896 = vmatprep.subr.mxu1 %v1811_v40  ;;  %v1855_v39 = vld [vmem:[#allocation8 + $0x188] sm:$0xff]  ;;  %v919_v40 = vlaneseq }
 0x18b   : > { %1687 = vmatprep.subr.mxu0 %v1590_v42  ;;  %v1810_v42 = vld [vmem:[#allocation8 + $0x20] sm:$0xff] }
 0x18c   : > { %1688 = vmatpush2.msra.mxu0 %v1589_v43  ;;  %v1809_v43 = vld [vmem:[#allocation8 + $0x18] sm:$0xff]  ;;  %1897 = vmatpush1.msra.mxu1 %v1810_v42 }
 0x18d   : > { %1689 = vmatprep.subr.mxu0 %v1588_v44  ;;  %1898 = vmatprep.subr.mxu1 %v1809_v43 }
 0x18e   : > { %1690 = vmatpush2.msra.mxu0 %v1587_v45 }
 0x18f   : > { %1691 = vmatprep.subr.mxu0 %v1586_v46  ;;  %v1808_v46 = vld [vmem:[#allocation8 + $0x10] sm:$0xff] }
 0x190   : > { %1692 = vmatpush2.msra.mxu0 %v1585_v47  ;;  %v1807_v47 = vld [vmem:[#allocation8 + $0x8] sm:$0xff]  ;;  %1899 = vmatpush1.msra.mxu1 %v1808_v46  ;;  %v1854_v46 = vld [vmem:[#allocation8 + $0x180] sm:$0xff] }
 0x191   : > { %1900 = vmatprep.subr.mxu1 %v1807_v47  ;;  %v1853_v47 = vld [vmem:[#allocation8 + $0x178] sm:$0xff] }
 0x192   : > { %1901 = vmatpush1.msra.mxu1 %v1806_v63  ;;  %v1852_v63 = vld [vmem:[#allocation8 + $0x170] sm:$0xff] }
 0x193   : > { %1902 = vmatprep.subr.mxu1 %v1869_v0 }
 0x194   : > { %1903 = vmatpush2.msra.mxu1 %v1868_v3  ;;  %v1851_v3 = vld [vmem:[#allocation8 + $0x168] sm:$0xff] }
 0x195   : > { %1904 = vmatprep.subr.mxu1 %v1867_v6  ;;  %v920_v6 = vshrl.u32 %v919_v40, 7 }
 0x196   : > { %1905 = vmatpush2.msra.mxu1 %v1866_v10 }
 0x197   : > { %1906 = vmatprep.subr.mxu1 %v1865_v12  ;;  %v1850_v12 = vld [vmem:[#allocation8 + $0x160] sm:$0xff] }
 0x198   : > { %1907 = vmatpush2.msra.mxu1 %v1864_v16  ;;  %v1849_v16 = vld [vmem:[#allocation8 + $0x158] sm:$0xff] }
 0x199   : > { %1908 = vmatprep.subr.mxu1 %v1863_v17 }
 0x19a   : > { %1909 = vmatpush2.msra.mxu1 %v1862_v20  ;;  %v1848_v20 = vld [vmem:[#allocation8 + $0x150] sm:$0xff] }
 0x19b   : > { %v3925_v48 = vpop.f32.mrf.mxu0  ;;  %1910 = vmatprep.subr.mxu1 %v1861_v22 }
 0x19c   : > { %1911 = vmatpush2.msra.mxu1 %v1860_v27  ;;  %v1847_v27 = vld [vmem:[#allocation8 + $0x148] sm:$0xff] }
 0x19d   : > { %v3927_v49 = vpop.f32.mrf.mxu1  ;;  %v3929_v50 = vpop.f32.mrf.mxu0  ;;  %1912 = vmatprep.subr.mxu1 %v1859_v29  ;;  %v4023_v29 = vsub.s32 0, %v920_v6 }
 0x19e   : > { %1913 = vmatpush2.msra.mxu1 %v1858_v32  ;;  %v1846_v32 = vld [vmem:[#allocation8 + $0x140] sm:$0xff] }
 0x19f   : > { %v3933_v52 = vpop.f32.mrf.mxu1  ;;  %1914 = vmatprep.subr.mxu1 %v1857_v33  ;;  %4933 = vst [vmem:[#allocation21_spill] sm:$0xff] %v4023_v29  ;;  %v917_v33 = vld [vmem:[%s4842_s2] sm:$0x3] }
 0x1a0   : > { %1915 = vmatpush2.msra.mxu1 %v1856_v37  ;;  %v4028_v37 = vsub.s32 1, %v920_v6 }
 0x1a1   : > { %1916 = vmatprep.subr.mxu1 %v1855_v39 }
 0x1a2   : > { %1917 = vmatpush2.msra.mxu1 %v1854_v46  ;;  %4934 = vst [vmem:[#allocation22_spill] sm:$0xff] %v4028_v37  ;;  %v4035_v46 = vrot.slane %v917_v33, %v4023_v29 }
 0x1a3   : > { %1918 = vmatprep.subr.mxu1 %v1853_v47 }
 0x1a4   : > { %1919 = vmatpush2.msra.mxu1 %v1852_v63  ;;  %v4040_v63 = vrot.slane %v917_v33, %v4028_v37  ;;  %v996_v6 = vadd.f32 %v3925_v48, %v4035_v46 }
 0x1a5   : > { %1920 = vmatprep.subr.mxu1 %v1851_v3 }
 0x1a6   : > { %1921 = vmatpush2.msra.mxu1 %v1850_v12 }
 0x1a7   : > { %v3931_v51 = vpop.f32.mrf.mxu0  ;;  %1922 = vmatprep.subr.mxu1 %v1849_v16  ;;  %v998_v16 = vadd.f32 %v3929_v50, %v4040_v63 }
 0x1a8   : > { %1923 = vmatpush2.msra.mxu1 %v1848_v20  ;;  %v1002_v33 = vadd.f32 %v3931_v51, %v4035_v46 }
 0x1a9   : > { %v3935_v53 = vpop.f32.mrf.mxu0  ;;  %1924 = vmatprep.subr.mxu1 %v1847_v27 }
 0x1aa   : > { %v3937_v54 = vpop.f32.mrf.mxu1  ;;  %1925 = vmatpush2.msra.mxu1 %v1846_v32  ;;  %v1145_v32 = vadd.f32 %v3927_v49, %v996_v6  ;;  %v1004_v48 = vadd.f32 %v3935_v53, %v4040_v63 }
 0x1ab   : > { %v1151_v50 = vadd.f32 %v3937_v54, %v1002_v33 }
 0x1ac   : > { %v3941_v56 = vpop.f32.mrf.mxu1 }
 0x1ad   : > { %v3939_v55 = vpop.f32.mrf.mxu0 }
 0x1af   : > { %v3943_v57 = vpop.f32.mrf.mxu0 }
 0x1b0   : > { %v3945_v58 = vpop.f32.mrf.mxu1 }
 0x1b2   : > { %v3949_v60 = vpop.f32.mrf.mxu1 }
 0x1b3   : > { %v3947_v59 = vpop.f32.mrf.mxu0 }
 0x1b5   : > { %v3951_v61 = vpop.f32.mrf.mxu0 }
 0x1b6   : > { %v3953_v1 = vpop.f32.mrf.mxu1 }
 0x1b8   : > { %v3957_v5 = vpop.f32.mrf.mxu1 }
 0x1b9   : > { %v3955_v4 = vpop.f32.mrf.mxu0 }
 0x1bb   : > { %v3959_v8 = vpop.f32.mrf.mxu0 }
 0x1bc   : > { %v3961_v11 = vpop.f32.mrf.mxu1 }
 0x1be   : > { %v3965_v15 = vpop.f32.mrf.mxu1 }
 0x1bf   : > { %v3963_v14 = vpop.f32.mrf.mxu0 }
 0x1c1   : > { %v3967_v18 = vpop.f32.mrf.mxu0 }
 0x1c2   : > { %v3969_v21 = vpop.f32.mrf.mxu1 }
 0x1c4   : > { %v3973_v25 = vpop.f32.mrf.mxu1 }
 0x1c5   : > { %v3971_v24 = vpop.f32.mrf.mxu0 }
 0x1c7   : > { %v3975_v28 = vpop.f32.mrf.mxu0 }
 0x1c8   : > { %v3977_v31 = vpop.f32.mrf.mxu1 }
 0x1ca   : > { %v3981_v35 = vpop.f32.mrf.mxu1 }
 0x1cb   : > { %v3979_v34 = vpop.f32.mrf.mxu0 }
 0x1cd   : > { %v3983_v38 = vpop.f32.mrf.mxu0 }
 0x1ce   : > { %v3985_v41 = vpop.f32.mrf.mxu1 }
 0x1d0   : > { %v3989_v45 = vpop.f32.mrf.mxu1 }
 0x1d1   : > { %v3987_v44 = vpop.f32.mrf.mxu0 }
 0x1d3   : > { %v3991_v62 = vpop.f32.mrf.mxu0 }
 0x1d4   : > { %v3993_v2 = vpop.f32.mrf.mxu1 }
 0x1d6   : > { %v3997_v9 = vpop.f32.mrf.mxu1 }
 0x1d7   : > { %v3995_v7 = vpop.f32.mrf.mxu0 }
 0x1d9   : > { %v3999_v13 = vpop.f32.mrf.mxu0 }
 0x1da   : > { %v4001_v19 = vpop.f32.mrf.mxu1 }
 0x1dc   : > { %v4005_v26 = vpop.f32.mrf.mxu1 }
 0x1dd   : > { %v4003_v23 = vpop.f32.mrf.mxu0 }
 0x1df   : > { %v4007_v30 = vpop.f32.mrf.mxu0 }
 0x1e0   : > { %v4009_v36 = vpop.f32.mrf.mxu1 }
 0x1e2   : > { %v4013_v43 = vpop.f32.mrf.mxu1 }
 0x1e3   : > { %v4011_v42 = vpop.f32.mrf.mxu0 }
 0x1e5   : > { %v4015_v0 = vpop.f32.mrf.mxu0 }
 0x1e6   : > { %v4017_v10 = vpop.f32.mrf.mxu1 }
 0x1e8   : > { %v4019_v17 = vpop.f32.mrf.mxu1 }
 0x1e9   : > { %v4021_v22 = vpop.f32.mrf.mxu0 }
 0x1eb   : > { %v4032_v40 = vpop.f32.mrf.mxu0 }
 0x1ec   : > { %v4030_v39 = vpop.f32.mrf.mxu1  ;;  %4936 = vst [vmem:[#allocation24_spill] sm:$0xff] %v4032_v40  ;;  %v1153_v40 = vadd.f32 %v3941_v56, %v1004_v48  ;;  %v1020_v48 = vadd.f32 %v3955_v4, %v4035_v46 }
 0x1ed   : > { %4935 = vst [vmem:[#allocation23_spill] sm:$0xff] %v4030_v39 }
 0x1ee   : > { %v4037_v47 = vpop.f32.mrf.mxu1 }
 0x1ef   : > { %4937 = vst [vmem:[#allocation25_spill] sm:$0xff] %v4037_v47  ;;  %v4042_v3 = vpop.f32.mrf.mxu0  ;;  %v1147_v47 = vadd.f32 %v3933_v52, %v998_v16  ;;  %v1010_v52 = vadd.f32 %v3943_v57, %v4040_v63 }
 0x1f0   : > { %4938 = vst [vmem:[#allocation26_spill] sm:$0xff] %v4042_v3 }
 0x1f1   : > { %v4052_v27 = vpop.f32.mrf.mxu0  ;;  %v1159_v57 = vadd.f32 %v3949_v60, %v1010_v52 }
 0x1f2   : > { %v4046_v12 = vpop.f32.mrf.mxu1  ;;  %4941 = vst [vmem:[#allocation29_spill] sm:$0xff] %v4052_v27 }
 0x1f3   : > { %4939 = vst [vmem:[#allocation27_spill] sm:$0xff] %v4046_v12 }
 0x1f4   : > { %v4050_v20 = vpop.f32.mrf.mxu1 }
 0x1f5   : > { %4940 = vst [vmem:[#allocation28_spill] sm:$0xff] %v4050_v20  ;;  %v1008_v20 = vadd.f32 %v3939_v55, %v4035_v46  ;;  %v1014_v55 = vadd.f32 %v3947_v59, %v4035_v46 }
 0x1f7   : > { %v1293_v37 = vpop.f32.mrf.mxu0  ;;  %v1157_v54 = vadd.f32 %v3945_v58, %v1008_v20 }
 0x1f8   : > { %v1442_v29 = vpop.f32.mrf.mxu1  ;;  %v1294_v12 = vadd.f32 %v1293_v37, %v1145_v32 }
 0x1f9   : > { %v1295_v3 = vpop.f32.mrf.mxu0 }
 0x1fa   : > { %v1444_v39 = vpop.f32.mrf.mxu1  ;;  %v1296_v27 = vadd.f32 %v1295_v3, %v1147_v47  ;;  %v4063_v49 = vadd.f32 %v1442_v29, %v1294_v12 }
 0x1fb   : > { %v1299_v6 = vpop.f32.mrf.mxu0 }
 0x1fc   : > { %v1448_v51 = vpop.f32.mrf.mxu1  ;;  %v4068_v16 = vadd.f32 %v1444_v39, %v1296_v27  ;;  %v1300_v53 = vadd.f32 %v1299_v6, %v1151_v50  ;;  %v1525_v3 = vmax.f32 %v4063_v49, 0.0  ;;  %v1016_v39 = vadd.f32 %v3951_v61, %v4040_v63 }
 0x1fd   : > { %v1301_v37 = vpop.f32.mrf.mxu0 }
 0x1fe   : > { %v1450_v32 = vpop.f32.mrf.mxu1  ;;  %v1526_v29 = vmax.f32 %v4068_v16, 0.0  ;;  %v1302_v47 = vadd.f32 %v1301_v37, %v1153_v40  ;;  %v4075_v12 = vadd.f32 %v1448_v51, %v1300_v53  ;;  %v1163_v40 = vadd.f32 %v3953_v1, %v1014_v55 }
 0x1ff   : > { %v1305_v56 = vpop.f32.mrf.mxu0  ;;  %v1165_v53 = vadd.f32 %v3957_v5, %v1016_v39  ;;  %v1022_v37 = vadd.f32 %v3959_v8, %v4040_v63  ;;  %v1169_v55 = vadd.f32 %v3961_v11, %v1020_v48 }
 0x200   : > { %v1454_v33 = vpop.f32.mrf.mxu1  ;;  %v4080_v27 = vadd.f32 %v1450_v32, %v1302_v47  ;;  %v1306_v58 = vadd.f32 %v1305_v56, %v1157_v54  ;;  %1693 = vmatprep.mubr.f32.mxu0 %v1526_v29  ;;  %v1527_v61 = vmax.f32 %v4075_v12, 0.0  ;;  %v1026_v47 = vadd.f32 %v3963_v14, %v4035_v46 }
 0x201   : > { %v1307_v59 = vpop.f32.mrf.mxu0  ;;  %1694 = vmatmul.mubr.f32.vlgmr.msra.gmra.mxu0 %v1525_v3 }
 0x202   : > { %v1456_v20 = vpop.f32.mrf.mxu1  ;;  %v1528_v60 = vmax.f32 %v4080_v27, 0.0  ;;  %v1308_v50 = vadd.f32 %v1307_v59, %v1159_v57  ;;  %v4091_v6 = vadd.f32 %v1454_v33, %v1306_v58  ;;  %v1171_v58 = vadd.f32 %v3965_v15, %v1022_v37 }
 0x203   : > { %v1311_v51 = vpop.f32.mrf.mxu0  ;;  %v1028_v59 = vadd.f32 %v3967_v18, %v4040_v63  ;;  %v1175_v48 = vadd.f32 %v3969_v21, %v1026_v47 }
 0x204   : > { %v1460_v52 = vpop.f32.mrf.mxu1  ;;  %v4096_v32 = vadd.f32 %v1456_v20, %v1308_v50  ;;  %v1312_v1 = vadd.f32 %v1311_v51, %v1163_v40  ;;  %1699 = vmatprep.mubr.f32.mxu0 %v1528_v60  ;;  %v1529_v8 = vmax.f32 %v4091_v6, 0.0  ;;  %v1032_v50 = vadd.f32 %v3971_v24, %v4035_v46 }
 0x205   : > { %v1313_v4 = vpop.f32.mrf.mxu0  ;;  %1700 = vmatmul.mubr.f32.gmra.mxu0 %v1527_v61 }
 0x206   : > { %v1462_v54 = vpop.f32.mrf.mxu1  ;;  %v1530_v5 = vmax.f32 %v4096_v32, 0.0  ;;  %v1314_v56 = vadd.f32 %v1313_v4, %v1165_v53  ;;  %v4107_v33 = vadd.f32 %v1460_v52, %v1312_v1  ;;  %v1177_v1 = vadd.f32 %v3973_v25, %v1028_v59 }
 0x207   : > { %v1317_v57 = vpop.f32.mrf.mxu0  ;;  %v1034_v4 = vadd.f32 %v3975_v28, %v4040_v63  ;;  %v1181_v47 = vadd.f32 %v3977_v31, %v1032_v50 }
 0x208   : > { %v1466_v39 = vpop.f32.mrf.mxu1  ;;  %v4112_v20 = vadd.f32 %v1462_v54, %v1314_v56  ;;  %v1318_v11 = vadd.f32 %v1317_v57, %v1169_v55  ;;  %1705 = vmatprep.mubr.f32.mxu0 %v1530_v5  ;;  %v1531_v18 = vmax.f32 %v4107_v33, 0.0  ;;  %v1038_v56 = vadd.f32 %v3979_v34, %v4035_v46 }
 0x209   : > { %v1319_v14 = vpop.f32.mrf.mxu0  ;;  %1706 = vmatmul.mubr.f32.gmra.mxu0 %v1529_v8 }
 0x20a   : > { %v1468_v40 = vpop.f32.mrf.mxu1  ;;  %v1532_v15 = vmax.f32 %v4112_v20, 0.0  ;;  %v1320_v51 = vadd.f32 %v1319_v14, %v1171_v58  ;;  %v4123_v52 = vadd.f32 %v1466_v39, %v1318_v11  ;;  %v1183_v11 = vadd.f32 %v3981_v35, %v1034_v4 }
 0x20b   : > { %v1323_v53 = vpop.f32.mrf.mxu0  ;;  %v1040_v14 = vadd.f32 %v3983_v38, %v4040_v63  ;;  %v1187_v50 = vadd.f32 %v3985_v41, %v1038_v56 }
 0x20c   : > { %v1472_v37 = vpop.f32.mrf.mxu1  ;;  %v4128_v54 = vadd.f32 %v1468_v40, %v1320_v51  ;;  %v1324_v21 = vadd.f32 %v1323_v53, %v1175_v48  ;;  %1711 = vmatprep.mubr.f32.mxu0 %v1532_v15  ;;  %v1533_v28 = vmax.f32 %v4123_v52, 0.0  ;;  %v1044_v51 = vadd.f32 %v3987_v44, %v4035_v46 }
 0x20d   : > { %v1325_v24 = vpop.f32.mrf.mxu0  ;;  %1712 = vmatmul.mubr.f32.gmra.mxu0 %v1531_v18 }
 0x20e   : > { %v1474_v55 = vpop.f32.mrf.mxu1  ;;  %v1534_v25 = vmax.f32 %v4128_v54, 0.0  ;;  %v1326_v57 = vadd.f32 %v1325_v24, %v1177_v1  ;;  %v4139_v39 = vadd.f32 %v1472_v37, %v1324_v21  ;;  %v1189_v21 = vadd.f32 %v3989_v45, %v1040_v14 }
 0x20f   : > { %v1329_v58 = vpop.f32.mrf.mxu0  ;;  %v1046_v24 = vadd.f32 %v3991_v62, %v4040_v63  ;;  %v1193_v56 = vadd.f32 %v3993_v2, %v1044_v51 }
 0x210   : > { %v1478_v59 = vpop.f32.mrf.mxu1  ;;  %v4144_v40 = vadd.f32 %v1474_v55, %v1326_v57  ;;  %v1330_v31 = vadd.f32 %v1329_v58, %v1181_v47  ;;  %1717 = vmatprep.mubr.f32.mxu0 %v1534_v25  ;;  %v1535_v38 = vmax.f32 %v4139_v39, 0.0  ;;  %v1050_v57 = vadd.f32 %v3995_v7, %v4035_v46 }
 0x211   : > { %v1331_v34 = vpop.f32.mrf.mxu0  ;;  %1718 = vmatmul.mubr.f32.gmra.mxu0 %v1533_v28 }
 0x212   : > { %v1480_v48 = vpop.f32.mrf.mxu1  ;;  %v1536_v35 = vmax.f32 %v4144_v40, 0.0  ;;  %v1332_v53 = vadd.f32 %v1331_v34, %v1183_v11  ;;  %v4155_v37 = vadd.f32 %v1478_v59, %v1330_v31  ;;  %v1195_v31 = vadd.f32 %v3997_v9, %v1046_v24 }
 0x213   : > { %v1335_v1 = vpop.f32.mrf.mxu0  ;;  %v1052_v34 = vadd.f32 %v3999_v13, %v4040_v63  ;;  %v1199_v51 = vadd.f32 %v4001_v19, %v1050_v57 }
 0x214   : > { %v1484_v4 = vpop.f32.mrf.mxu1  ;;  %v4160_v55 = vadd.f32 %v1480_v48, %v1332_v53  ;;  %v1336_v41 = vadd.f32 %v1335_v1, %v1187_v50  ;;  %1723 = vmatprep.mubr.f32.mxu0 %v1536_v35  ;;  %v1537_v62 = vmax.f32 %v4155_v37, 0.0  ;;  %v1056_v53 = vadd.f32 %v4003_v23, %v4035_v46 }
 0x215   : > { %v1337_v44 = vpop.f32.mrf.mxu0  ;;  %1724 = vmatmul.mubr.f32.gmra.mxu0 %v1535_v38 }
 0x216   : > { %v1486_v47 = vpop.f32.mrf.mxu1  ;;  %v1538_v45 = vmax.f32 %v4160_v55, 0.0  ;;  %v1338_v58 = vadd.f32 %v1337_v44, %v1189_v21  ;;  %v4171_v59 = vadd.f32 %v1484_v4, %v1336_v41  ;;  %v1201_v41 = vadd.f32 %v4005_v26, %v1052_v34 }
 0x217   : > { %v1341_v11 = vpop.f32.mrf.mxu0  ;;  %v1058_v44 = vadd.f32 %v4007_v30, %v4040_v63  ;;  %v1205_v57 = vadd.f32 %v4009_v36, %v1056_v53 }
 0x218   : > { %v1490_v14 = vpop.f32.mrf.mxu1  ;;  %v4176_v48 = vadd.f32 %v1486_v47, %v1338_v58  ;;  %v1342_v2 = vadd.f32 %v1341_v11, %v1193_v56  ;;  %1729 = vmatprep.mubr.f32.mxu0 %v1538_v45  ;;  %v1539_v13 = vmax.f32 %v4171_v59, 0.0  ;;  %v1062_v58 = vadd.f32 %v4011_v42, %v4035_v46 }
 0x219   : > { %v1343_v7 = vpop.f32.mrf.mxu0  ;;  %1730 = vmatmul.mubr.f32.gmra.mxu0 %v1537_v62 }
 0x21a   : > { %v1492_v50 = vpop.f32.mrf.mxu1  ;;  %v1540_v9 = vmax.f32 %v4176_v48, 0.0  ;;  %v1344_v1 = vadd.f32 %v1343_v7, %v1195_v31  ;;  %v4187_v4 = vadd.f32 %v1490_v14, %v1342_v2  ;;  %v1207_v2 = vadd.f32 %v4013_v43, %v1058_v44 }
 0x21b   : > { %v1347_v21 = vpop.f32.mrf.mxu0  ;;  %v1064_v7 = vadd.f32 %v4015_v0, %v4040_v63  ;;  %v1211_v53 = vadd.f32 %v4017_v10, %v1062_v58 }
 0x21c   : > { %v1496_v24 = vpop.f32.mrf.mxu1  ;;  %v4192_v47 = vadd.f32 %v1492_v50, %v1344_v1  ;;  %v1348_v19 = vadd.f32 %v1347_v21, %v1199_v51  ;;  %1735 = vmatprep.mubr.f32.mxu0 %v1540_v9  ;;  %v4873_v30 = vmax.f32 %v4187_v4, 0.0  ;;  %v1068_v1 = vadd.f32 %v4021_v22, %v4035_v46 }
 0x21d   : > { %v1349_v23 = vpop.f32.mrf.mxu0  ;;  %1736 = vmatmul.mubr.f32.gmra.mxu0 %v1539_v13 }
 0x21e   : > { %v1498_v56 = vpop.f32.mrf.mxu1  ;;  %v4872_v26 = vmax.f32 %v4192_v47, 0.0  ;;  %v1350_v11 = vadd.f32 %v1349_v23, %v1201_v41  ;;  %v4203_v14 = vadd.f32 %v1496_v24, %v1348_v19  ;;  %v1213_v19 = vadd.f32 %v4019_v17, %v1064_v7  ;;  %v4942_v23 = vld [vmem:[#allocation24_spill] sm:$0xff] }
 0x21f   : > { %v1353_v31 = vpop.f32.mrf.mxu0 }
 0x220   : > { %v1502_v34 = vpop.f32.mrf.mxu1  ;;  %v4208_v50 = vadd.f32 %v1498_v56, %v1350_v11  ;;  %v1354_v36 = vadd.f32 %v1353_v31, %v1205_v57  ;;  %1741 = vmatprep.mubr.f32.mxu0 %v4872_v26  ;;  %v4863_v0 = vmax.f32 %v4203_v14, 0.0  ;;  %v1070_v56 = vadd.f32 %v4942_v23, %v4040_v63  ;;  %v4943_v11 = vld [vmem:[#allocation23_spill] sm:$0xff]  ;;  %v4946_v23 = vld [vmem:[#allocation29_spill] sm:$0xff] }
 0x221   : > { %v1355_v42 = vpop.f32.mrf.mxu0  ;;  %1742 = vmatmul.mubr.f32.gmra.mxu0 %v4873_v30  ;;  %v1217_v31 = vadd.f32 %v4943_v11, %v1068_v1 }
 0x222   : > { %v1504_v51 = vpop.f32.mrf.mxu1  ;;  %v4862_v43 = vmax.f32 %v4208_v50, 0.0  ;;  %v1356_v21 = vadd.f32 %v1355_v42, %v1207_v2  ;;  %v4219_v24 = vadd.f32 %v1502_v34, %v1354_v36  ;;  %v4944_v34 = vld [vmem:[#allocation26_spill] sm:$0xff] }
 0x223   : > { %v1359_v41 = vpop.f32.mrf.mxu0  ;;  %v1074_v2 = vadd.f32 %v4944_v34, %v4035_v46 }
 0x224   : > { %v1508_v44 = vpop.f32.mrf.mxu1  ;;  %v4224_v57 = vadd.f32 %v1504_v51, %v1356_v21  ;;  %v1360_v10 = vadd.f32 %v1359_v41, %v1211_v53  ;;  %1747 = vmatprep.mubr.f32.mxu0 %v4862_v43  ;;  %v4871_v36 = vmax.f32 %v4219_v24, 0.0  ;;  %v4945_v21 = vld [vmem:[#allocation25_spill] sm:$0xff]  ;;  %v1076_v43 = vadd.f32 %v4946_v23, %v4040_v63 }
 0x225   : > { %v1361_v22 = vpop.f32.mrf.mxu0  ;;  %1748 = vmatmul.mubr.f32.gmra.mxu0 %v4863_v0  ;;  %v1219_v41 = vadd.f32 %v4945_v21, %v1070_v56 }
 0x226   : > { %v1510_v58 = vpop.f32.mrf.mxu1  ;;  %v4870_v17 = vmax.f32 %v4224_v57, 0.0  ;;  %v1362_v7 = vadd.f32 %v1361_v22, %v1213_v19  ;;  %v4235_v42 = vadd.f32 %v1508_v44, %v1360_v10  ;;  %v4947_v44 = vld [vmem:[#allocation27_spill] sm:$0xff] }
 0x227   : > { %v1365_v51 = vpop.f32.mrf.mxu0  ;;  %v1223_v19 = vadd.f32 %v4947_v44, %v1074_v2 }
 0x228   : > { %v1514_v53 = vpop.f32.mrf.mxu1  ;;  %v4240_v0 = vadd.f32 %v1510_v58, %v1362_v7  ;;  %v1366_v1 = vadd.f32 %v1365_v51, %v1217_v31  ;;  %1753 = vmatprep.mubr.f32.mxu0 %v4870_v17  ;;  %v4869_v56 = vmax.f32 %v4235_v42, 0.0  ;;  %v4948_v31 = vld [vmem:[#allocation28_spill] sm:$0xff] }
 0x229   : > { %v1367_v46 = vpop.f32.mrf.mxu0  ;;  %1754 = vmatmul.mubr.f32.gmra.mxu0 %v4871_v36  ;;  %v1225_v7 = vadd.f32 %v4948_v31, %v1076_v43  ;;  %v1841_v31 = vld [vmem:[#allocation8 + $0x118] sm:$0xff] }
 0x22a   : > { %v1516_v11 = vpop.f32.mrf.mxu1  ;;  %v4868_v10 = vmax.f32 %v4240_v0, 0.0  ;;  %v1368_v22 = vadd.f32 %v1367_v46, %v1219_v41  ;;  %v4249_v34 = vadd.f32 %v1514_v53, %v1366_v1 }
 0x22b   : > { %v1371_v63 = vpop.f32.mrf.mxu0 }
 0x22c   : > { %v1520_v58 = vpop.f32.mrf.mxu1  ;;  %v4252_v51 = vadd.f32 %v1516_v11, %v1368_v22  ;;  %v1372_v21 = vadd.f32 %v1371_v63, %v1223_v19  ;;  %1759 = vmatprep.mubr.f32.mxu0 %v4868_v10  ;;  %v4867_v53 = vmax.f32 %v4249_v34, 0.0  ;;  %v1845_v19 = vld [vmem:[#allocation8 + $0x138] sm:$0xff]  ;;  %v1844_v22 = vld [vmem:[#allocation8 + $0x130] sm:$0xff]  ;;  %v1843_v63 = vld [vmem:[#allocation8 + $0x128] sm:$0xff] }
 0x22d   : > { %v1373_v23 = vpop.f32.mrf.mxu0  ;;  %1760 = vmatmul.mubr.f32.gmra.mxu0 %v4869_v56  ;;  %1926 = vmatprep.subr.mxu1 %v1845_v19  ;;  %v2142_v19 = vld [vmem:[#allocation10 + $0xd8] sm:$0xff] }
 0x22e   : > { %v4866_v2 = vmax.f32 %v4252_v51, 0.0  ;;  %v1374_v41 = vadd.f32 %v1373_v23, %v1225_v7  ;;  %v4260_v1 = vadd.f32 %v1520_v58, %v1372_v21  ;;  %v1522_v46 = vpop.f32.mrf.mxu1  ;;  %1927 = vmatpush2.msra.mxu1 %v1844_v22  ;;  %v1842_v58 = vld [vmem:[#allocation8 + $0x120] sm:$0xff]  ;;  %v1840_v7 = vld [vmem:[#allocation8 + $0x110] sm:$0xff]  ;;  %v1839_v21 = vld [vmem:[#allocation8 + $0x108] sm:$0xff] }
 0x22f   : > { %1928 = vmatprep.subr.mxu1 %v1843_v63  ;;  %v1838_v23 = vld [vmem:[#allocation8 + $0x100] sm:$0xff]  ;;  %v2141_v22 = vld [vmem:[#allocation10 + $0xd0] sm:$0xff]  ;;  %v2140_v63 = vld [vmem:[#allocation10 + $0xc8] sm:$0xff] }
 0x230   : > { %v4262_v44 = vadd.f32 %v1522_v46, %v1374_v41  ;;  %1765 = vmatprep.mubr.f32.mxu0 %v4866_v2  ;;  %v4865_v11 = vmax.f32 %v4260_v1, 0.0  ;;  %1929 = vmatpush2.msra.mxu1 %v1842_v58  ;;  %v2146_v41 = vld [vmem:[#allocation10 + $0xf8] sm:$0xff]  ;;  %v2145_v46 = vld [vmem:[#allocation10 + $0xf0] sm:$0xff]  ;;  %v2139_v58 = vld [vmem:[#allocation10 + $0xc0] sm:$0xff] }
 0x231   : > { %1766 = vmatmul.mubr.f32.gmra.mxu0 %v4867_v53  ;;  %1930 = vmatprep.subr.mxu1 %v1841_v31  ;;  %v2138_v31 = vld [vmem:[#allocation10 + $0xb8] sm:$0xff] }
 0x232   : > { %v4864_v43 = vmax.f32 %v4262_v44, 0.0  ;;  %1931 = vmatpush2.msra.mxu1 %v1840_v7  ;;  %2191 = vmatprep.subr.mxu0 %v2146_v41  ;;  %v2137_v7 = vld [vmem:[#allocation10 + $0xb0] sm:$0xff]  ;;  %v2134_v2 = vld [vmem:[#allocation10 + $0x98] sm:$0xff] }
 0x233   : > { %1932 = vmatprep.subr.mxu1 %v1839_v21  ;;  %2192 = vmatpush1.msra.mxu0 %v2145_v46  ;;  %v2136_v21 = vld [vmem:[#allocation10 + $0xa8] sm:$0xff]  ;;  %v2133_v41 = vld [vmem:[#allocation10 + $0x90] sm:$0xff] }
 0x234   : > { %1771 = vmatprep.mubr.f32.mxu0 %v4864_v43  ;;  %1933 = vmatpush2.msra.mxu1 %v1838_v23  ;;  %v2144_v43 = vld [vmem:[#allocation10 + $0xe8] sm:$0xff]  ;;  %v2135_v23 = vld [vmem:[#allocation10 + $0xa0] sm:$0xff] }
 0x235   : > { %1772 = vmatmul.mubr.f32.gmra.mxu0 %v4865_v11  ;;  %v2143_v11 = vld [vmem:[#allocation10 + $0xe0] sm:$0xff]  ;;  %2193 = vmatprep.subr.mxu0 %v2144_v43  ;;  %v2132_v46 = vld [vmem:[#allocation10 + $0x88] sm:$0xff] }
 0x236   : > { %2194 = vmatpush1.msra.mxu0 %v2143_v11  ;;  %v2131_v43 = vld [vmem:[#allocation10 + $0x80] sm:$0xff]  ;;  %v2130_v11 = vld [vmem:[#allocation10 + $0x78] sm:$0xff] }
 0x237   : > { %2195 = vmatprep.subr.mxu0 %v2142_v19  ;;  %v2129_v19 = vld [vmem:[#allocation10 + $0x70] sm:$0xff] }
 0x238   : > { %2196 = vmatpush1.msra.mxu0 %v2141_v22  ;;  %v2128_v22 = vld [vmem:[#allocation10 + $0x68] sm:$0xff] }
 0x239   : > { %2197 = vmatprep.subr.mxu0 %v2140_v63  ;;  %v2127_v63 = vld [vmem:[#allocation10 + $0x60] sm:$0xff] }
 0x23a   : > { %2198 = vmatpush1.msra.mxu0 %v2139_v58  ;;  %v2126_v58 = vld [vmem:[#allocation10 + $0x58] sm:$0xff] }
 0x23b   : > { %2199 = vmatprep.subr.mxu0 %v2138_v31  ;;  %v2125_v31 = vld [vmem:[#allocation10 + $0x50] sm:$0xff] }
 0x23c   : > { %2200 = vmatpush1.msra.mxu0 %v2137_v7  ;;  %v2124_v7 = vld [vmem:[#allocation10 + $0x48] sm:$0xff] }
 0x23d   : > { %2201 = vmatprep.subr.mxu0 %v2136_v21  ;;  %v2123_v21 = vld [vmem:[#allocation10 + $0x40] sm:$0xff] }
 0x23e   : > { %2202 = vmatpush1.msra.mxu0 %v2135_v23  ;;  %v2122_v23 = vld [vmem:[#allocation10 + $0x38] sm:$0xff] }
 0x23f   : > { %2203 = vmatprep.subr.mxu0 %v2134_v2  ;;  %v2121_v2 = vld [vmem:[#allocation10 + $0x30] sm:$0xff] }
 0x240   : > { %2204 = vmatpush1.msra.mxu0 %v2133_v41  ;;  %v2120_v41 = vld [vmem:[#allocation10 + $0x28] sm:$0xff] }
 0x241   : > { %2205 = vmatprep.subr.mxu0 %v2132_v46  ;;  %v2119_v46 = vld [vmem:[#allocation10 + $0x20] sm:$0xff] }
 0x242   : > { %2206 = vmatpush1.msra.mxu0 %v2131_v43  ;;  %v2118_v43 = vld [vmem:[#allocation10 + $0x18] sm:$0xff] }
 0x243   : > { %2207 = vmatprep.subr.mxu0 %v2130_v11  ;;  %v2117_v11 = vld [vmem:[#allocation10 + $0x10] sm:$0xff] }
 0x244   : > { %2208 = vmatpush1.msra.mxu0 %v2129_v19  ;;  %v2116_v19 = vld [vmem:[#allocation10 + $0x8] sm:$0xff] }
 0x245   : > { %2209 = vmatprep.subr.mxu0 %v2128_v22  ;;  %v2115_v22 = vld [vmem:[#allocation10] sm:$0xff] }
 0x246   : > { %2210 = vmatpush1.msra.mxu0 %v2127_v63  ;;  %v2178_v63 = vld [vmem:[#allocation10 + $0x1f8] sm:$0xff] }
 0x247   : > { %2211 = vmatprep.subr.mxu0 %v2126_v58  ;;  %v2177_v58 = vld [vmem:[#allocation10 + $0x1f0] sm:$0xff] }
 0x248   : > { %2212 = vmatpush1.msra.mxu0 %v2125_v31  ;;  %v2176_v31 = vld [vmem:[#allocation10 + $0x1e8] sm:$0xff] }
 0x249   : > { %2213 = vmatprep.subr.mxu0 %v2124_v7  ;;  %v2175_v7 = vld [vmem:[#allocation10 + $0x1e0] sm:$0xff] }
 0x24a   : > { %2214 = vmatpush1.msra.mxu0 %v2123_v21  ;;  %v2174_v21 = vld [vmem:[#allocation10 + $0x1d8] sm:$0xff] }
 0x24b   : > { %2215 = vmatprep.subr.mxu0 %v2122_v23  ;;  %v2173_v23 = vld [vmem:[#allocation10 + $0x1d0] sm:$0xff] }
 0x24c   : > { %2216 = vmatpush1.msra.mxu0 %v2121_v2  ;;  %v2172_v2 = vld [vmem:[#allocation10 + $0x1c8] sm:$0xff] }
 0x24d   : > { %2217 = vmatprep.subr.mxu0 %v2120_v41  ;;  %v2171_v41 = vld [vmem:[#allocation10 + $0x1c0] sm:$0xff] }
 0x24e   : > { %2218 = vmatpush1.msra.mxu0 %v2119_v46  ;;  %v2170_v46 = vld [vmem:[#allocation10 + $0x1b8] sm:$0xff] }
 0x24f   : > { %2219 = vmatprep.subr.mxu0 %v2118_v43  ;;  %v2169_v43 = vld [vmem:[#allocation10 + $0x1b0] sm:$0xff] }
 0x250   : > { %2220 = vmatpush1.msra.mxu0 %v2117_v11  ;;  %v2168_v11 = vld [vmem:[#allocation10 + $0x1a8] sm:$0xff] }
 0x251   : > { %2221 = vmatprep.subr.mxu0 %v2116_v19  ;;  %v2167_v19 = vld [vmem:[#allocation10 + $0x1a0] sm:$0xff] }
 0x252   : > { %2222 = vmatpush1.msra.mxu0 %v2115_v22  ;;  %v2166_v22 = vld [vmem:[#allocation10 + $0x198] sm:$0xff] }
 0x253   : > { %2223 = vmatprep.subr.mxu0 %v2178_v63  ;;  %v2165_v63 = vld [vmem:[#allocation10 + $0x190] sm:$0xff] }
 0x254   : > { %2224 = vmatpush2.msra.mxu0 %v2177_v58  ;;  %v2164_v58 = vld [vmem:[#allocation10 + $0x188] sm:$0xff] }
 0x255   : > { %2225 = vmatprep.subr.mxu0 %v2176_v31  ;;  %v2163_v31 = vld [vmem:[#allocation10 + $0x180] sm:$0xff] }
 0x256   : > { %2226 = vmatpush2.msra.mxu0 %v2175_v7  ;;  %v2162_v7 = vld [vmem:[#allocation10 + $0x178] sm:$0xff] }
 0x257   : > { %2227 = vmatprep.subr.mxu0 %v2174_v21  ;;  %v2161_v21 = vld [vmem:[#allocation10 + $0x170] sm:$0xff] }
 0x258   : > { %2228 = vmatpush2.msra.mxu0 %v2173_v23  ;;  %v2160_v23 = vld [vmem:[#allocation10 + $0x168] sm:$0xff] }
 0x259   : > { %2229 = vmatprep.subr.mxu0 %v2172_v2  ;;  %v2159_v2 = vld [vmem:[#allocation10 + $0x160] sm:$0xff] }
 0x25a   : > { %2230 = vmatpush2.msra.mxu0 %v2171_v41  ;;  %v2158_v41 = vld [vmem:[#allocation10 + $0x158] sm:$0xff] }
 0x25b   : > { %2231 = vmatprep.subr.mxu0 %v2170_v46  ;;  %v2157_v46 = vld [vmem:[#allocation10 + $0x150] sm:$0xff] }
 0x25c   : > { %2232 = vmatpush2.msra.mxu0 %v2169_v43  ;;  %v1617_v43 = vld [vmem:[%s4844_s4] sm:$0x3] }
 0x25d   : > { %2233 = vmatprep.subr.mxu0 %v2168_v11  ;;  %v4949_v11 = vld [vmem:[#allocation21_spill] sm:$0xff] }
 0x25e   : > { %2234 = vmatpush2.msra.mxu0 %v2167_v19  ;;  %v4278_v19 = vrot.slane %v1617_v43, %v4949_v11 }
 0x25f   : > { %2235 = vmatprep.subr.mxu0 %v2166_v22  ;;  %v4950_v22 = vld [vmem:[#allocation22_spill] sm:$0xff] }
 0x260   : > { %2236 = vmatpush2.msra.mxu0 %v2165_v63  ;;  %v4281_v63 = vrot.slane %v1617_v43, %v4950_v22 }
 0x261   : > { %2237 = vmatprep.subr.mxu0 %v2164_v58 }
 0x262   : > { %2238 = vmatpush2.msra.mxu0 %v2163_v31 }
 0x263   : > { %2239 = vmatprep.subr.mxu0 %v2162_v7 }
 0x264   : > { %2240 = vmatpush2.msra.mxu0 %v2161_v21 }
 0x265   : > { %2241 = vmatprep.subr.mxu0 %v2160_v23 }
 0x266   : > { %2242 = vmatpush2.msra.mxu0 %v2159_v2 }
 0x267   : > { %2243 = vmatprep.subr.mxu0 %v2158_v41 }
 0x268   : > { %2244 = vmatpush2.msra.mxu0 %v2157_v46 }
 0x2c1   : > { %v1695_v58 = vpop.f32.mrf.mxu0 }
 0x2c2   : > { %v1696_v31 = vadd.f32 %v1695_v58, %v4278_v19 }
 0x2c3   : > { %v1697_v7 = vpop.f32.mrf.mxu0 }
 0x2c4   : > { %v1698_v21 = vadd.f32 %v1697_v7, %v4281_v63  ;;  %v1778_v41 = vmax.f32 %v1696_v31, 0.0 }
 0x2c5   : > { %v1701_v23 = vpop.f32.mrf.mxu0 }
 0x2c6   : > { %v1779_v2 = vmax.f32 %v1698_v21, 0.0  ;;  %v1702_v46 = vadd.f32 %v1701_v23, %v4278_v19 }
 0x2c7   : > { %v1703_v53 = vpop.f32.mrf.mxu0 }
 0x2c8   : > { %v1704_v10 = vadd.f32 %v1703_v53, %v4281_v63  ;;  %1934 = vmatprep.mubr.f32.mxu1 %v1779_v2  ;;  %v1780_v43 = vmax.f32 %v1702_v46, 0.0 }
 0x2c9   : > { %v1707_v56 = vpop.f32.mrf.mxu0  ;;  %1935 = vmatmul.mubr.f32.vlgmr.msra.gmra.mxu1 %v1778_v41 }
 0x2ca   : > { %v1781_v17 = vmax.f32 %v1704_v10, 0.0  ;;  %v1708_v36 = vadd.f32 %v1707_v56, %v4278_v19 }
 0x2cb   : > { %v1709_v26 = vpop.f32.mrf.mxu0 }
 0x2cc   : > { %v1710_v58 = vadd.f32 %v1709_v26, %v4281_v63  ;;  %1940 = vmatprep.mubr.f32.mxu1 %v1781_v17  ;;  %v1782_v31 = vmax.f32 %v1708_v36, 0.0 }
 0x2cd   : > { %v1713_v7 = vpop.f32.mrf.mxu0  ;;  %1941 = vmatmul.mubr.f32.gmra.mxu1 %v1780_v43 }
 0x2ce   : > { %v1783_v21 = vmax.f32 %v1710_v58, 0.0  ;;  %v1714_v23 = vadd.f32 %v1713_v7, %v4278_v19 }
 0x2cf   : > { %v1715_v30 = vpop.f32.mrf.mxu0 }
 0x2d0   : > { %v1716_v53 = vadd.f32 %v1715_v30, %v4281_v63  ;;  %1946 = vmatprep.mubr.f32.mxu1 %v1783_v21  ;;  %v1784_v41 = vmax.f32 %v1714_v23, 0.0 }
 0x2d1   : > { %v1719_v2 = vpop.f32.mrf.mxu0  ;;  %1947 = vmatmul.mubr.f32.gmra.mxu1 %v1782_v31 }
 0x2d2   : > { %v1785_v10 = vmax.f32 %v1716_v53, 0.0  ;;  %v1720_v56 = vadd.f32 %v1719_v2, %v4278_v19 }
 0x2d3   : > { %v1721_v46 = vpop.f32.mrf.mxu0 }
 0x2d4   : > { %v1722_v26 = vadd.f32 %v1721_v46, %v4281_v63  ;;  %1952 = vmatprep.mubr.f32.mxu1 %v1785_v10  ;;  %v1786_v36 = vmax.f32 %v1720_v56, 0.0 }
 0x2d5   : > { %v1725_v17 = vpop.f32.mrf.mxu0  ;;  %1953 = vmatmul.mubr.f32.gmra.mxu1 %v1784_v41 }
 0x2d6   : > { %v1787_v43 = vmax.f32 %v1722_v26, 0.0  ;;  %v1726_v58 = vadd.f32 %v1725_v17, %v4278_v19 }
 0x2d7   : > { %v1727_v7 = vpop.f32.mrf.mxu0 }
 0x2d8   : > { %v1728_v30 = vadd.f32 %v1727_v7, %v4281_v63  ;;  %1958 = vmatprep.mubr.f32.mxu1 %v1787_v43  ;;  %v1788_v23 = vmax.f32 %v1726_v58, 0.0 }
 0x2d9   : > { %v1731_v21 = vpop.f32.mrf.mxu0  ;;  %1959 = vmatmul.mubr.f32.gmra.mxu1 %v1786_v36 }
 0x2da   : > { %v1789_v31 = vmax.f32 %v1728_v30, 0.0  ;;  %v1732_v53 = vadd.f32 %v1731_v21, %v4278_v19 }
 0x2db   : > { %v1733_v2 = vpop.f32.mrf.mxu0 }
 0x2dc   : > { %v1734_v46 = vadd.f32 %v1733_v2, %v4281_v63  ;;  %1964 = vmatprep.mubr.f32.mxu1 %v1789_v31  ;;  %v1790_v56 = vmax.f32 %v1732_v53, 0.0 }
 0x2dd   : > { %v1737_v10 = vpop.f32.mrf.mxu0  ;;  %1965 = vmatmul.mubr.f32.gmra.mxu1 %v1788_v23 }
 0x2de   : > { %v1791_v41 = vmax.f32 %v1734_v46, 0.0  ;;  %v1738_v26 = vadd.f32 %v1737_v10, %v4278_v19 }
 0x2df   : > { %v1739_v17 = vpop.f32.mrf.mxu0 }
 0x2e0   : > { %v1740_v7 = vadd.f32 %v1739_v17, %v4281_v63  ;;  %1970 = vmatprep.mubr.f32.mxu1 %v1791_v41  ;;  %v1792_v58 = vmax.f32 %v1738_v26, 0.0 }
 0x2e1   : > { %v1743_v43 = vpop.f32.mrf.mxu0  ;;  %1971 = vmatmul.mubr.f32.gmra.mxu1 %v1790_v56 }
 0x2e2   : > { %v1793_v36 = vmax.f32 %v1740_v7, 0.0  ;;  %v1744_v30 = vadd.f32 %v1743_v43, %v4278_v19 }
 0x2e3   : > { %v1745_v21 = vpop.f32.mrf.mxu0 }
 0x2e4   : > { %v1746_v2 = vadd.f32 %v1745_v21, %v4281_v63  ;;  %1976 = vmatprep.mubr.f32.mxu1 %v1793_v36  ;;  %v1794_v53 = vmax.f32 %v1744_v30, 0.0 }
 0x2e5   : > { %v1749_v31 = vpop.f32.mrf.mxu0  ;;  %1977 = vmatmul.mubr.f32.gmra.mxu1 %v1792_v58 }
 0x2e6   : > { %v1795_v23 = vmax.f32 %v1746_v2, 0.0  ;;  %v1750_v46 = vadd.f32 %v1749_v31, %v4278_v19 }
 0x2e7   : > { %v1751_v10 = vpop.f32.mrf.mxu0 }
 0x2e8   : > { %v1752_v17 = vadd.f32 %v1751_v10, %v4281_v63  ;;  %1982 = vmatprep.mubr.f32.mxu1 %v1795_v23  ;;  %v1796_v26 = vmax.f32 %v1750_v46, 0.0 }
 0x2e9   : > { %v1755_v41 = vpop.f32.mrf.mxu0  ;;  %1983 = vmatmul.mubr.f32.gmra.mxu1 %v1794_v53 }
 0x2ea   : > { %v1797_v56 = vmax.f32 %v1752_v17, 0.0  ;;  %v1756_v7 = vadd.f32 %v1755_v41, %v4278_v19 }
 0x2eb   : > { %v1757_v43 = vpop.f32.mrf.mxu0 }
 0x2ec   : > { %v1758_v21 = vadd.f32 %v1757_v43, %v4281_v63  ;;  %1988 = vmatprep.mubr.f32.mxu1 %v1797_v56  ;;  %v1798_v30 = vmax.f32 %v1756_v7, 0.0 }
 0x2ed   : > { %v1761_v36 = vpop.f32.mrf.mxu0  ;;  %1989 = vmatmul.mubr.f32.gmra.mxu1 %v1796_v26 }
 0x2ee   : > { %v1799_v58 = vmax.f32 %v1758_v21, 0.0  ;;  %v1762_v2 = vadd.f32 %v1761_v36, %v4278_v19 }
 0x2ef   : > { %v1763_v31 = vpop.f32.mrf.mxu0 }
 0x2f0   : > { %v1764_v10 = vadd.f32 %v1763_v31, %v4281_v63  ;;  %1994 = vmatprep.mubr.f32.mxu1 %v1799_v58  ;;  %v1800_v46 = vmax.f32 %v1762_v2, 0.0  ;;  %v2156_v2 = vld [vmem:[#allocation10 + $0x148] sm:$0xff] }
 0x2f1   : > { %v1767_v23 = vpop.f32.mrf.mxu0  ;;  %1995 = vmatmul.mubr.f32.gmra.mxu1 %v1798_v30  ;;  %2245 = vmatprep.subr.mxu0 %v2156_v2  ;;  %v2391_v2 = vld [vmem:[#allocation11 + $0xb8] sm:$0xff] }
 0x2f2   : > { %v1801_v53 = vmax.f32 %v1764_v10, 0.0  ;;  %v1768_v17 = vadd.f32 %v1767_v23, %v4278_v19  ;;  %v2155_v10 = vld [vmem:[#allocation10 + $0x140] sm:$0xff]  ;;  %v2154_v23 = vld [vmem:[#allocation10 + $0x138] sm:$0xff] }
 0x2f3   : > { %v1769_v41 = vpop.f32.mrf.mxu0  ;;  %2246 = vmatpush2.msra.mxu0 %v2155_v10  ;;  %v2390_v10 = vld [vmem:[#allocation11 + $0xb0] sm:$0xff] }
 0x2f4   : > { %v1770_v43 = vadd.f32 %v1769_v41, %v4281_v63  ;;  %2000 = vmatprep.mubr.f32.mxu1 %v1801_v53  ;;  %v1802_v7 = vmax.f32 %v1768_v17, 0.0  ;;  %2247 = vmatprep.subr.mxu0 %v2154_v23  ;;  %v2153_v53 = vld [vmem:[#allocation10 + $0x130] sm:$0xff]  ;;  %v2150_v17 = vld [vmem:[#allocation10 + $0x118] sm:$0xff]  ;;  %v2148_v41 = vld [vmem:[#allocation10 + $0x108] sm:$0xff] }
 0x2f5   : > { %v1773_v56 = vpop.f32.mrf.mxu0  ;;  %2001 = vmatmul.mubr.f32.gmra.mxu1 %v1800_v46  ;;  %2248 = vmatpush2.msra.mxu0 %v2153_v53  ;;  %v2152_v46 = vld [vmem:[#allocation10 + $0x128] sm:$0xff]  ;;  %v2388_v53 = vld [vmem:[#allocation11 + $0xa0] sm:$0xff] }
 0x2f6   : > { %v1803_v26 = vmax.f32 %v1770_v43, 0.0  ;;  %v1774_v21 = vadd.f32 %v1773_v56, %v4278_v19  ;;  %2249 = vmatprep.subr.mxu0 %v2152_v46  ;;  %v2151_v19 = vld [vmem:[#allocation10 + $0x120] sm:$0xff]  ;;  %v2399_v56 = vld [vmem:[#allocation11 + $0xf8] sm:$0xff]  ;;  %v2389_v23 = vld [vmem:[#allocation11 + $0xa8] sm:$0xff] }
 0x2f7   : > { %v1775_v36 = vpop.f32.mrf.mxu0  ;;  %2250 = vmatpush2.msra.mxu0 %v2151_v19  ;;  %v2147_v43 = vld [vmem:[#allocation10 + $0x100] sm:$0xff]  ;;  %2432 = vmatprep.subr.mxu1 %v2399_v56  ;;  %v2387_v46 = vld [vmem:[#allocation11 + $0x98] sm:$0xff]  ;;  %v2386_v19 = vld [vmem:[#allocation11 + $0x90] sm:$0xff] }
 0x2f8   : > { %v1776_v31 = vadd.f32 %v1775_v36, %v4281_v63  ;;  %2006 = vmatprep.mubr.f32.mxu1 %v1803_v26  ;;  %v1804_v30 = vmax.f32 %v1774_v21, 0.0  ;;  %2251 = vmatprep.subr.mxu0 %v2150_v17  ;;  %v2149_v63 = vld [vmem:[#allocation10 + $0x110] sm:$0xff]  ;;  %v2396_v21 = vld [vmem:[#allocation11 + $0xe0] sm:$0xff]  ;;  %v2395_v36 = vld [vmem:[#allocation11 + $0xd8] sm:$0xff] }
 0x2f9   : > { %2007 = vmatmul.mubr.f32.gmra.mxu1 %v1802_v7  ;;  %2252 = vmatpush2.msra.mxu0 %v2149_v63  ;;  %v2398_v26 = vld [vmem:[#allocation11 + $0xf0] sm:$0xff]  ;;  %v2397_v7 = vld [vmem:[#allocation11 + $0xe8] sm:$0xff]  ;;  %v2384_v63 = vld [vmem:[#allocation11 + $0x80] sm:$0xff] }
 0x2fa   : > { %v1805_v58 = vmax.f32 %v1776_v31, 0.0  ;;  %2253 = vmatprep.subr.mxu0 %v2148_v41  ;;  %2433 = vmatpush1.msra.mxu1 %v2398_v26  ;;  %v2394_v31 = vld [vmem:[#allocation11 + $0xd0] sm:$0xff]  ;;  %v2385_v17 = vld [vmem:[#allocation11 + $0x88] sm:$0xff]  ;;  %v2383_v41 = vld [vmem:[#allocation11 + $0x78] sm:$0xff] }
 0x2fb   : > { %2254 = vmatpush2.msra.mxu0 %v2147_v43  ;;  %2434 = vmatprep.subr.mxu1 %v2397_v7  ;;  %v2382_v43 = vld [vmem:[#allocation11 + $0x70] sm:$0xff]  ;;  %v2381_v56 = vld [vmem:[#allocation11 + $0x68] sm:$0xff]  ;;  %v2380_v26 = vld [vmem:[#allocation11 + $0x60] sm:$0xff] }
 0x2fc   : > { %2012 = vmatprep.mubr.f32.mxu1 %v1805_v58  ;;  %2435 = vmatpush1.msra.mxu1 %v2396_v21  ;;  %v2393_v58 = vld [vmem:[#allocation11 + $0xc8] sm:$0xff]  ;;  %v2379_v7 = vld [vmem:[#allocation11 + $0x58] sm:$0xff]  ;;  %v2378_v21 = vld [vmem:[#allocation11 + $0x50] sm:$0xff] }
 0x2fd   : > { %2013 = vmatmul.mubr.f32.gmra.mxu1 %v1804_v30  ;;  %2436 = vmatprep.subr.mxu1 %v2395_v36  ;;  %v2392_v30 = vld [vmem:[#allocation11 + $0xc0] sm:$0xff]  ;;  %v2377_v36 = vld [vmem:[#allocation11 + $0x48] sm:$0xff] }
 0x2fe   : > { %2437 = vmatpush1.msra.mxu1 %v2394_v31  ;;  %v2376_v31 = vld [vmem:[#allocation11 + $0x40] sm:$0xff] }
 0x2ff   : > { %2438 = vmatprep.subr.mxu1 %v2393_v58  ;;  %v2375_v58 = vld [vmem:[#allocation11 + $0x38] sm:$0xff] }
 0x300   : > { %2439 = vmatpush1.msra.mxu1 %v2392_v30  ;;  %v2374_v30 = vld [vmem:[#allocation11 + $0x30] sm:$0xff] }
 0x301   : > { %2440 = vmatprep.subr.mxu1 %v2391_v2  ;;  %v2373_v2 = vld [vmem:[#allocation11 + $0x28] sm:$0xff] }
 0x302   : > { %2441 = vmatpush1.msra.mxu1 %v2390_v10  ;;  %v2372_v10 = vld [vmem:[#allocation11 + $0x20] sm:$0xff] }
 0x303   : > { %2442 = vmatprep.subr.mxu1 %v2389_v23  ;;  %v2371_v23 = vld [vmem:[#allocation11 + $0x18] sm:$0xff] }
 0x304   : > { %2443 = vmatpush1.msra.mxu1 %v2388_v53  ;;  %v2370_v53 = vld [vmem:[#allocation11 + $0x10] sm:$0xff] }
 0x305   : > { %2444 = vmatprep.subr.mxu1 %v2387_v46  ;;  %v2369_v46 = vld [vmem:[#allocation11 + $0x8] sm:$0xff] }
 0x306   : > { %2445 = vmatpush1.msra.mxu1 %v2386_v19  ;;  %v2368_v19 = vld [vmem:[#allocation11] sm:$0xff] }
 0x307   : > { %2446 = vmatprep.subr.mxu1 %v2385_v17  ;;  %v2431_v17 = vld [vmem:[#allocation11 + $0x1f8] sm:$0xff] }
 0x308   : > { %2447 = vmatpush1.msra.mxu1 %v2384_v63  ;;  %v2430_v63 = vld [vmem:[#allocation11 + $0x1f0] sm:$0xff] }
 0x309   : > { %2448 = vmatprep.subr.mxu1 %v2383_v41  ;;  %v2429_v41 = vld [vmem:[#allocation11 + $0x1e8] sm:$0xff] }
 0x30a   : > { %2449 = vmatpush1.msra.mxu1 %v2382_v43  ;;  %v2428_v43 = vld [vmem:[#allocation11 + $0x1e0] sm:$0xff] }
 0x30b   : > { %2450 = vmatprep.subr.mxu1 %v2381_v56  ;;  %v2427_v56 = vld [vmem:[#allocation11 + $0x1d8] sm:$0xff] }
 0x30c   : > { %2451 = vmatpush1.msra.mxu1 %v2380_v26  ;;  %v2426_v26 = vld [vmem:[#allocation11 + $0x1d0] sm:$0xff] }
 0x30d   : > { %2452 = vmatprep.subr.mxu1 %v2379_v7  ;;  %v2425_v7 = vld [vmem:[#allocation11 + $0x1c8] sm:$0xff] }
 0x30e   : > { %2453 = vmatpush1.msra.mxu1 %v2378_v21  ;;  %v2424_v21 = vld [vmem:[#allocation11 + $0x1c0] sm:$0xff] }
 0x30f   : > { %2454 = vmatprep.subr.mxu1 %v2377_v36  ;;  %v2423_v36 = vld [vmem:[#allocation11 + $0x1b8] sm:$0xff] }
 0x310   : > { %2455 = vmatpush1.msra.mxu1 %v2376_v31  ;;  %v2422_v31 = vld [vmem:[#allocation11 + $0x1b0] sm:$0xff] }
 0x311   : > { %2456 = vmatprep.subr.mxu1 %v2375_v58  ;;  %v2421_v58 = vld [vmem:[#allocation11 + $0x1a8] sm:$0xff] }
 0x312   : > { %2457 = vmatpush1.msra.mxu1 %v2374_v30  ;;  %v2420_v30 = vld [vmem:[#allocation11 + $0x1a0] sm:$0xff] }
 0x313   : > { %2458 = vmatprep.subr.mxu1 %v2373_v2  ;;  %v2419_v2 = vld [vmem:[#allocation11 + $0x198] sm:$0xff] }
 0x314   : > { %2459 = vmatpush1.msra.mxu1 %v2372_v10  ;;  %v2418_v10 = vld [vmem:[#allocation11 + $0x190] sm:$0xff] }
 0x315   : > { %2460 = vmatprep.subr.mxu1 %v2371_v23  ;;  %v2417_v23 = vld [vmem:[#allocation11 + $0x188] sm:$0xff] }
 0x316   : > { %2461 = vmatpush1.msra.mxu1 %v2370_v53  ;;  %v2416_v53 = vld [vmem:[#allocation11 + $0x180] sm:$0xff] }
 0x317   : > { %2462 = vmatprep.subr.mxu1 %v2369_v46  ;;  %v2415_v46 = vld [vmem:[#allocation11 + $0x178] sm:$0xff] }
 0x318   : > { %2463 = vmatpush1.msra.mxu1 %v2368_v19  ;;  %v2414_v19 = vld [vmem:[#allocation11 + $0x170] sm:$0xff] }
 0x319   : > { %2464 = vmatprep.subr.mxu1 %v2431_v17  ;;  %v2413_v17 = vld [vmem:[#allocation11 + $0x168] sm:$0xff] }
 0x31a   : > { %2465 = vmatpush2.msra.mxu1 %v2430_v63  ;;  %v2412_v63 = vld [vmem:[#allocation11 + $0x160] sm:$0xff] }
 0x31b   : > { %2466 = vmatprep.subr.mxu1 %v2429_v41  ;;  %v2411_v41 = vld [vmem:[#allocation11 + $0x158] sm:$0xff] }
 0x31c   : > { %2467 = vmatpush2.msra.mxu1 %v2428_v43  ;;  %v2410_v43 = vld [vmem:[#allocation11 + $0x150] sm:$0xff] }
 0x31d   : > { %2468 = vmatprep.subr.mxu1 %v2427_v56  ;;  %v2409_v56 = vld [vmem:[#allocation11 + $0x148] sm:$0xff] }
 0x31e   : > { %2469 = vmatpush2.msra.mxu1 %v2426_v26  ;;  %v2408_v26 = vld [vmem:[#allocation11 + $0x140] sm:$0xff] }
 0x31f   : > { %2470 = vmatprep.subr.mxu1 %v2425_v7  ;;  %v2047_v7 = vld [vmem:[%s4846_s6] sm:$0x3] }
 0x320   : > { %2471 = vmatpush2.msra.mxu1 %v2424_v21 }
 0x321   : > { %2472 = vmatprep.subr.mxu1 %v2423_v36  ;;  %v4315_v36 = vrot.slane %v2047_v7, %v4949_v11 }
 0x322   : > { %2473 = vmatpush2.msra.mxu1 %v2422_v31 }
 0x323   : > { %2474 = vmatprep.subr.mxu1 %v2421_v58  ;;  %v4320_v58 = vrot.slane %v2047_v7, %v4950_v22 }
 0x324   : > { %2475 = vmatpush2.msra.mxu1 %v2420_v30 }
 0x325   : > { %2476 = vmatprep.subr.mxu1 %v2419_v2 }
 0x326   : > { %2477 = vmatpush2.msra.mxu1 %v2418_v10 }
 0x327   : > { %2478 = vmatprep.subr.mxu1 %v2417_v23 }
 0x328   : > { %2479 = vmatpush2.msra.mxu1 %v2416_v53 }
 0x329   : > { %2480 = vmatprep.subr.mxu1 %v2415_v46 }
 0x32a   : > { %2481 = vmatpush2.msra.mxu1 %v2414_v19 }
 0x32b   : > { %2482 = vmatprep.subr.mxu1 %v2413_v17 }
 0x32c   : > { %2483 = vmatpush2.msra.mxu1 %v2412_v63 }
 0x32d   : > { %2484 = vmatprep.subr.mxu1 %v2411_v41 }
 0x32e   : > { %2485 = vmatpush2.msra.mxu1 %v2410_v43 }
 0x32f   : > { %2486 = vmatprep.subr.mxu1 %v2409_v56 }
 0x330   : > { %2487 = vmatpush2.msra.mxu1 %v2408_v26 }
 0x389   : > { %v1936_v21 = vpop.f32.mrf.mxu1 }
 0x38a   : > { %v2019_v31 = vadd.f32 %v1936_v21, %v1525_v3 }
 0x38b   : > { %v1938_v30 = vpop.f32.mrf.mxu1 }
 0x38c   : > { %v2020_v2 = vadd.f32 %v1938_v30, %v1526_v29  ;;  %v4325_v10 = vadd.f32 %v4315_v36, %v2019_v31 }
 0x38d   : > { %v1942_v23 = vpop.f32.mrf.mxu1 }
 0x38e   : > { %v4328_v53 = vadd.f32 %v4320_v58, %v2020_v2  ;;  %v2021_v46 = vadd.f32 %v1942_v23, %v1527_v61  ;;  %v4901_v17 = vmax.f32 %v4325_v10, 0.0 }
 0x38f   : > { %v1944_v19 = vpop.f32.mrf.mxu1 }
 0x390   : > { %v4900_v49 = vmax.f32 %v4328_v53, 0.0  ;;  %v2022_v3 = vadd.f32 %v1944_v19, %v1528_v60  ;;  %v4337_v16 = vadd.f32 %v4315_v36, %v2021_v46 }
 0x391   : > { %v1948_v29 = vpop.f32.mrf.mxu1 }
 0x392   : > { %v4340_v63 = vadd.f32 %v4320_v58, %v2022_v3  ;;  %v2023_v41 = vadd.f32 %v1948_v29, %v1529_v8  ;;  %2255 = vmatprep.mubr.f32.mxu0 %v4900_v49  ;;  %v4899_v61 = vmax.f32 %v4337_v16, 0.0 }
 0x393   : > { %v1950_v12 = vpop.f32.mrf.mxu1  ;;  %2256 = vmatmul.mubr.f32.vlgmr.msra.gmra.mxu0 %v4901_v17 }
 0x394   : > { %v4898_v27 = vmax.f32 %v4340_v63, 0.0  ;;  %v2024_v60 = vadd.f32 %v1950_v12, %v1530_v5  ;;  %v4353_v43 = vadd.f32 %v4315_v36, %v2023_v41 }
 0x395   : > { %v1954_v56 = vpop.f32.mrf.mxu1 }
 0x396   : > { %v4356_v6 = vadd.f32 %v4320_v58, %v2024_v60  ;;  %v2025_v8 = vadd.f32 %v1954_v56, %v1531_v18  ;;  %2261 = vmatprep.mubr.f32.mxu0 %v4898_v27  ;;  %v4897_v7 = vmax.f32 %v4353_v43, 0.0 }
 0x397   : > { %v1956_v26 = vpop.f32.mrf.mxu1  ;;  %2262 = vmatmul.mubr.f32.gmra.mxu0 %v4899_v61 }
 0x398   : > { %v4896_v32 = vmax.f32 %v4356_v6, 0.0  ;;  %v2026_v5 = vadd.f32 %v1956_v26, %v1532_v15  ;;  %v4369_v21 = vadd.f32 %v4315_v36, %v2025_v8 }
 0x399   : > { %v1960_v31 = vpop.f32.mrf.mxu1 }
 0x39a   : > { %v4372_v33 = vadd.f32 %v4320_v58, %v2026_v5  ;;  %v2027_v18 = vadd.f32 %v1960_v31, %v1533_v28  ;;  %2267 = vmatprep.mubr.f32.mxu0 %v4896_v32  ;;  %v4895_v2 = vmax.f32 %v4369_v21, 0.0 }
 0x39b   : > { %v1962_v30 = vpop.f32.mrf.mxu1  ;;  %2268 = vmatmul.mubr.f32.gmra.mxu0 %v4897_v7 }
 0x39c   : > { %v4894_v20 = vmax.f32 %v4372_v33, 0.0  ;;  %v2028_v15 = vadd.f32 %v1962_v30, %v1534_v25  ;;  %v4385_v23 = vadd.f32 %v4315_v36, %v2027_v18 }
 0x39d   : > { %v1966_v46 = vpop.f32.mrf.mxu1 }
 0x39e   : > { %v4388_v52 = vadd.f32 %v4320_v58, %v2028_v15  ;;  %v2029_v28 = vadd.f32 %v1966_v46, %v1535_v38  ;;  %2273 = vmatprep.mubr.f32.mxu0 %v4894_v20  ;;  %v4893_v3 = vmax.f32 %v4385_v23, 0.0 }
 0x39f   : > { %v1968_v19 = vpop.f32.mrf.mxu1  ;;  %2274 = vmatmul.mubr.f32.gmra.mxu0 %v4895_v2 }
 0x3a0   : > { %v4892_v54 = vmax.f32 %v4388_v52, 0.0  ;;  %v2030_v25 = vadd.f32 %v1968_v19, %v1536_v35  ;;  %v4401_v29 = vadd.f32 %v4315_v36, %v2029_v28 }
 0x3a1   : > { %v1972_v41 = vpop.f32.mrf.mxu1 }
 0x3a2   : > { %v4404_v39 = vadd.f32 %v4320_v58, %v2030_v25  ;;  %v2031_v38 = vadd.f32 %v1972_v41, %v1537_v62  ;;  %2279 = vmatprep.mubr.f32.mxu0 %v4892_v54  ;;  %v4891_v60 = vmax.f32 %v4401_v29, 0.0  ;;  %v4953_v41 = vmax.f32 %v4203_v14, 0.0 }
 0x3a3   : > { %v1974_v12 = vpop.f32.mrf.mxu1  ;;  %2280 = vmatmul.mubr.f32.gmra.mxu0 %v4893_v3 }
 0x3a4   : > { %v4890_v40 = vmax.f32 %v4404_v39, 0.0  ;;  %v2032_v35 = vadd.f32 %v1974_v12, %v1538_v45  ;;  %v4417_v56 = vadd.f32 %v4315_v36, %v2031_v38 }
 0x3a5   : > { %v1978_v8 = vpop.f32.mrf.mxu1 }
 0x3a6   : > { %v4420_v37 = vadd.f32 %v4320_v58, %v2032_v35  ;;  %v2033_v62 = vadd.f32 %v1978_v8, %v1539_v13  ;;  %2285 = vmatprep.mubr.f32.mxu0 %v4890_v40  ;;  %v4889_v5 = vmax.f32 %v4417_v56, 0.0  ;;  %v4951_v13 = vmax.f32 %v4187_v4, 0.0 }
 0x3a7   : > { %v1980_v26 = vpop.f32.mrf.mxu1  ;;  %2286 = vmatmul.mubr.f32.gmra.mxu0 %v4891_v60  ;;  %v4954_v35 = vmax.f32 %v4208_v50, 0.0 }
 0x3a8   : > { %v4888_v55 = vmax.f32 %v4420_v37, 0.0  ;;  %v2034_v45 = vadd.f32 %v1980_v26, %v1540_v9  ;;  %v4433_v31 = vadd.f32 %v4315_v36, %v2033_v62  ;;  %v4952_v9 = vmax.f32 %v4192_v47, 0.0 }
 0x3a9   : > { %v1984_v18 = vpop.f32.mrf.mxu1 }
 0x3aa   : > { %v4436_v59 = vadd.f32 %v4320_v58, %v2034_v45  ;;  %v2035_v30 = vadd.f32 %v1984_v18, %v4951_v13  ;;  %2291 = vmatprep.mubr.f32.mxu0 %v4888_v55  ;;  %v4887_v28 = vmax.f32 %v4433_v31, 0.0  ;;  %v4955_v18 = vmax.f32 %v4219_v24, 0.0  ;;  %v4599_v55 = vld [vmem:[#allocation13 + $0x28] sm:$0xff] }
 0x3ab   : > { %v1986_v15 = vpop.f32.mrf.mxu1  ;;  %2292 = vmatmul.mubr.f32.gmra.mxu0 %v4889_v5  ;;  %v2179_v5 = vld [vmem:[%s4848_s8] sm:$0x3] }
 0x3ac   : > { %v4886_v48 = vmax.f32 %v4436_v59, 0.0  ;;  %v2036_v46 = vadd.f32 %v1986_v15, %v4952_v9  ;;  %v4449_v19 = vadd.f32 %v4315_v36, %v2035_v30  ;;  %v4956_v15 = vmax.f32 %v4224_v57, 0.0 }
 0x3ad   : > { %v1990_v25 = vpop.f32.mrf.mxu1  ;;  %v4608_v40 = vrot.slane %v2179_v5, %v4949_v11  ;;  %v4611_v60 = vrot.slane %v2179_v5, %v4950_v22 }
 0x3ae   : > { %v4452_v4 = vadd.f32 %v4320_v58, %v2036_v46  ;;  %v2037_v38 = vadd.f32 %v1990_v25, %v4953_v41  ;;  %2297 = vmatprep.mubr.f32.mxu0 %v4886_v48  ;;  %v4885_v62 = vmax.f32 %v4449_v19, 0.0  ;;  %v4593_v48 = vld [vmem:[#allocation13 + $0x30] sm:$0xff] }
 0x3af   : > { %v1992_v12 = vpop.f32.mrf.mxu1  ;;  %2298 = vmatmul.mubr.f32.gmra.mxu0 %v4887_v28  ;;  %v4596_v28 = vld [vmem:[#allocation13 + $0xa8] sm:$0xff] }
 0x3b0   : > { %v4884_v47 = vmax.f32 %v4452_v4, 0.0  ;;  %v2038_v8 = vadd.f32 %v1992_v12, %v4954_v35  ;;  %v4465_v26 = vadd.f32 %v4315_v36, %v2037_v38  ;;  %v4957_v38 = vmax.f32 %v4235_v42, 0.0 }
 0x3b1   : > { %v1996_v45 = vpop.f32.mrf.mxu1 }
 0x3b2   : > { %v4468_v14 = vadd.f32 %v4320_v58, %v2038_v8  ;;  %v2039_v13 = vadd.f32 %v1996_v45, %v4955_v18  ;;  %2303 = vmatprep.mubr.f32.mxu0 %v4884_v47  ;;  %v4883_v46 = vmax.f32 %v4465_v26, 0.0  ;;  %v4958_v8 = vmax.f32 %v4240_v0, 0.0  ;;  %v4587_v47 = vld [vmem:[#allocation13 + $0x38] sm:$0xff] }
 0x3b3   : > { %v1998_v30 = vpop.f32.mrf.mxu1  ;;  %2304 = vmatmul.mubr.f32.gmra.mxu0 %v4885_v62  ;;  %v4590_v62 = vld [vmem:[#allocation13 + $0xb0] sm:$0xff] }
 0x3b4   : > { %v4882_v50 = vmax.f32 %v4468_v14, 0.0  ;;  %v2040_v9 = vadd.f32 %v1998_v30, %v4956_v15  ;;  %v4481_v25 = vadd.f32 %v4315_v36, %v2039_v13  ;;  %v4959_v15 = vmax.f32 %v4249_v34, 0.0 }
 0x3b5   : > { %v2002_v41 = vpop.f32.mrf.mxu1 }
 0x3b6   : > { %v4484_v24 = vadd.f32 %v4320_v58, %v2040_v9  ;;  %v2041_v12 = vadd.f32 %v2002_v41, %v4957_v38  ;;  %2309 = vmatprep.mubr.f32.mxu0 %v4882_v50  ;;  %v4881_v18 = vmax.f32 %v4481_v25, 0.0  ;;  %v4960_v38 = vmax.f32 %v4252_v51, 0.0  ;;  %v4581_v50 = vld [vmem:[#allocation13 + $0x40] sm:$0xff] }
 0x3b7   : > { %v2004_v35 = vpop.f32.mrf.mxu1  ;;  %2310 = vmatmul.mubr.f32.gmra.mxu0 %v4883_v46  ;;  %v4584_v46 = vld [vmem:[#allocation13 + $0xb8] sm:$0xff] }
 0x3b8   : > { %v4874_v57 = vmax.f32 %v4484_v24, 0.0  ;;  %v2042_v45 = vadd.f32 %v2004_v35, %v4958_v8  ;;  %v4497_v13 = vadd.f32 %v4315_v36, %v2041_v12 }
 0x3b9   : > { %v2008_v30 = vpop.f32.mrf.mxu1 }
 0x3ba   : > { %v4500_v42 = vadd.f32 %v4320_v58, %v2042_v45  ;;  %v2043_v9 = vadd.f32 %v2008_v30, %v4959_v15  ;;  %2315 = vmatprep.mubr.f32.mxu0 %v4874_v57  ;;  %v4880_v35 = vmax.f32 %v4497_v13, 0.0  ;;  %v4962_v30 = vmax.f32 %v4260_v1, 0.0 }
 0x3bb   : > { %v2010_v41 = vpop.f32.mrf.mxu1  ;;  %2316 = vmatmul.mubr.f32.gmra.mxu0 %v4881_v18  ;;  %v4578_v18 = vld [vmem:[#allocation13 + $0xc0] sm:$0xff] }
 0x3bc   : > { %v4878_v0 = vmax.f32 %v4500_v42, 0.0  ;;  %v2044_v12 = vadd.f32 %v2010_v41, %v4960_v38  ;;  %v4513_v8 = vadd.f32 %v4315_v36, %v2043_v9  ;;  %v4963_v41 = vmax.f32 %v4262_v44, 0.0  ;;  %v2407_v44 = vld [vmem:[#allocation11 + $0x138] sm:$0xff] }
 0x3bd   : > { %v2014_v45 = vpop.f32.mrf.mxu1  ;;  %2488 = vmatprep.subr.mxu1 %v2407_v44  ;;  %v4546_v44 = vld [vmem:[#allocation13 + $0x70] sm:$0xff] }
 0x3be   : > { %v4516_v34 = vadd.f32 %v4320_v58, %v2044_v12  ;;  %v2045_v15 = vadd.f32 %v2014_v45, %v4962_v30  ;;  %2321 = vmatprep.mubr.f32.mxu0 %v4878_v0  ;;  %v4877_v38 = vmax.f32 %v4513_v8, 0.0  ;;  %v4544_v0 = vld [vmem:[#allocation13 + $0xf0] sm:$0xff] }
 0x3bf   : > { %v2016_v57 = vpop.f32.mrf.mxu1  ;;  %2322 = vmatmul.mubr.f32.gmra.mxu0 %v4880_v35  ;;  %v4575_v35 = vld [vmem:[#allocation13 + $0x48] sm:$0xff] }
 0x3c0   : > { %4961 = vst [vmem:[#allocation24_spill] sm:$0xff] %v4516_v34  ;;  %v4875_v51 = vmax.f32 %v4516_v34, 0.0  ;;  %v2046_v9 = vadd.f32 %v2016_v57, %v4963_v41  ;;  %v4529_v12 = vadd.f32 %v4315_v36, %v2045_v15  ;;  %v2406_v36 = vld [vmem:[#allocation11 + $0x130] sm:$0xff]  ;;  %v2404_v57 = vld [vmem:[#allocation11 + $0x120] sm:$0xff]  ;;  %v2403_v15 = vld [vmem:[#allocation11 + $0x118] sm:$0xff] }
 0x3c1   : > { %2489 = vmatpush2.msra.mxu1 %v2406_v36  ;;  %v2402_v41 = vld [vmem:[#allocation11 + $0x110] sm:$0xff]  ;;  %v4548_v36 = vld [vmem:[#allocation13 + $0xe8] sm:$0xff] }
 0x3c2   : > { %4964 = vst [vmem:[#allocation23_spill] sm:$0xff] %v4529_v12  ;;  %v4532_v1 = vadd.f32 %v4320_v58, %v2046_v9  ;;  %2327 = vmatprep.mubr.f32.mxu0 %v4875_v51  ;;  %v4879_v30 = vmax.f32 %v4529_v12, 0.0  ;;  %v2405_v58 = vld [vmem:[#allocation11 + $0x128] sm:$0xff]  ;;  %v2400_v51 = vld [vmem:[#allocation11 + $0x100] sm:$0xff] }
 0x3c3   : > { %2328 = vmatmul.mubr.f32.gmra.mxu0 %v4877_v38  ;;  %2490 = vmatprep.subr.mxu1 %v2405_v58  ;;  %v2401_v9 = vld [vmem:[#allocation11 + $0x108] sm:$0xff]  ;;  %v2692_v38 = vld [vmem:[#allocation13 + $0x78] sm:$0xff] }
 0x3c4   : > { %4965 = vst [vmem:[#allocation26_spill] sm:$0xff] %v4532_v1  ;;  %v4876_v45 = vmax.f32 %v4532_v1, 0.0  ;;  %2491 = vmatpush2.msra.mxu1 %v2404_v57  ;;  %v4551_v58 = vld [vmem:[#allocation13 + $0x68] sm:$0xff]  ;;  %v4554_v57 = vld [vmem:[#allocation13 + $0xe0] sm:$0xff] }
 0x3c5   : > { %2492 = vmatprep.subr.mxu1 %v2403_v15  ;;  %v4563_v15 = vld [vmem:[#allocation13 + $0x58] sm:$0xff] }
 0x3c6   : > { %2333 = vmatprep.mubr.f32.mxu0 %v4876_v45  ;;  %2493 = vmatpush2.msra.mxu1 %v2402_v41  ;;  %v2708_v45 = vld [vmem:[#allocation13 + $0xf8] sm:$0xff]  ;;  %v4566_v41 = vld [vmem:[#allocation13 + $0xd0] sm:$0xff] }
 0x3c7   : > { %2334 = vmatmul.mubr.f32.gmra.mxu0 %v4879_v30  ;;  %2494 = vmatprep.subr.mxu1 %v2401_v9  ;;  %v4569_v9 = vld [vmem:[#allocation13 + $0x50] sm:$0xff]  ;;  %v4572_v30 = vld [vmem:[#allocation13 + $0xc8] sm:$0xff] }
 0x3c8   : > { %2495 = vmatpush2.msra.mxu1 %v2400_v51  ;;  %3035 = vmatprep.subr.mxu0 %v2708_v45  ;;  %v4557_v51 = vld [vmem:[#allocation13 + $0x60] sm:$0xff] }
 0x3c9   : > { %3109 = vmatprep.subr.mxu1 %v2708_v45  ;;  %3036 = vmatpush3.msra.mxu0 %v2692_v38  ;;  %v4560_v45 = vld [vmem:[#allocation13 + $0xd8] sm:$0xff] }
 0x3ca   : > { %3037 = vmatprep.subr.mxu0 %v4544_v0 }
 0x3cb   : > { %3038 = vmatpush3.msra.mxu0 %v4546_v44 }
 0x3cc   : > { %3039 = vmatprep.subr.mxu0 %v4548_v36 }
 0x3cd   : > { %3040 = vmatpush3.msra.mxu0 %v4551_v58 }
 0x3ce   : > { %3041 = vmatprep.subr.mxu0 %v4554_v57 }
 0x3cf   : > { %3042 = vmatpush3.msra.mxu0 %v4557_v51 }
 0x3d0   : > { %3043 = vmatprep.subr.mxu0 %v4560_v45 }
 0x3d1   : > { %3044 = vmatpush3.msra.mxu0 %v4563_v15 }
 0x3d2   : > { %3045 = vmatprep.subr.mxu0 %v4566_v41 }
 0x3d3   : > { %3046 = vmatpush3.msra.mxu0 %v4569_v9 }
 0x3d4   : > { %3047 = vmatprep.subr.mxu0 %v4572_v30 }
 0x3d5   : > { %3048 = vmatpush3.msra.mxu0 %v4575_v35 }
 0x3d6   : > { %3049 = vmatprep.subr.mxu0 %v4578_v18 }
 0x3d7   : > { %3050 = vmatpush3.msra.mxu0 %v4581_v50 }
 0x3d8   : > { %3051 = vmatprep.subr.mxu0 %v4584_v46 }
 0x3d9   : > { %3052 = vmatpush3.msra.mxu0 %v4587_v47 }
 0x3da   : > { %3053 = vmatprep.subr.mxu0 %v4590_v62 }
 0x3db   : > { %3054 = vmatpush3.msra.mxu0 %v4593_v48 }
 0x3dc   : > { %3055 = vmatprep.subr.mxu0 %v4596_v28 }
 0x3dd   : > { %3056 = vmatpush3.msra.mxu0 %v4599_v55 }
 0x453   : > { %v2257_v54 = vpop.f32.mrf.mxu0 }
 0x454   : > { %v2258_v3 = vadd.f32 %v2257_v54, %v4608_v40 }
 0x455   : > { %v2259_v20 = vpop.f32.mrf.mxu0 }
 0x456   : > { %v2260_v2 = vadd.f32 %v2259_v20, %v4611_v60  ;;  %v2340_v27 = vmax.f32 %v2258_v3, 0.0 }
 0x457   : > { %v2263_v32 = vpop.f32.mrf.mxu0 }
 0x458   : > { %v2341_v7 = vmax.f32 %v2260_v2, 0.0  ;;  %v2264_v61 = vadd.f32 %v2263_v32, %v4608_v40 }
 0x459   : > { %v2265_v49 = vpop.f32.mrf.mxu0 }
 0x45a   : > { %v2266_v17 = vadd.f32 %v2265_v49, %v4611_v60  ;;  %2496 = vmatprep.mubr.f32.mxu1 %v2341_v7  ;;  %v2342_v5 = vmax.f32 %v2264_v61, 0.0 }
 0x45b   : > { %v2269_v1 = vpop.f32.mrf.mxu0  ;;  %2497 = vmatmul.mubr.f32.vlgmr.msra.gmra.mxu1 %v2340_v27 }
 0x45c   : > { %v2343_v12 = vmax.f32 %v2266_v17, 0.0  ;;  %3125 = vmatpush3.msra.mxu1 %v2692_v38  ;;  %v2270_v34 = vadd.f32 %v2269_v1, %v4608_v40 }
 0x45d   : > { %v2271_v54 = vpop.f32.mrf.mxu0  ;;  %3110 = vmatprep.subr.mxu1 %v4544_v0 }
 0x45e   : > { %v2272_v20 = vadd.f32 %v2271_v54, %v4611_v60  ;;  %2502 = vmatprep.mubr.f32.mxu1 %v2343_v12  ;;  %3126 = vmatpush3.msra.mxu1 %v4546_v44  ;;  %v2344_v17 = vmax.f32 %v2270_v34, 0.0 }
 0x45f   : > { %v2275_v32 = vpop.f32.mrf.mxu0  ;;  %2503 = vmatmul.mubr.f32.gmra.mxu1 %v2342_v5  ;;  %3111 = vmatprep.subr.mxu1 %v4548_v36 }
 0x460   : > { %v2345_v49 = vmax.f32 %v2272_v20, 0.0  ;;  %3127 = vmatpush3.msra.mxu1 %v4551_v58  ;;  %v2276_v27 = vadd.f32 %v2275_v32, %v4608_v40 }
 0x461   : > { %v2277_v61 = vpop.f32.mrf.mxu0  ;;  %3112 = vmatprep.subr.mxu1 %v4554_v57 }
 0x462   : > { %v2278_v7 = vadd.f32 %v2277_v61, %v4611_v60  ;;  %2508 = vmatprep.mubr.f32.mxu1 %v2345_v49  ;;  %3128 = vmatpush3.msra.mxu1 %v4557_v51  ;;  %v2346_v0 = vmax.f32 %v2276_v27, 0.0 }
 0x463   : > { %v2281_v2 = vpop.f32.mrf.mxu0  ;;  %2509 = vmatmul.mubr.f32.gmra.mxu1 %v2344_v17  ;;  %3113 = vmatprep.subr.mxu1 %v4560_v45 }
 0x464   : > { %v2347_v3 = vmax.f32 %v2278_v7, 0.0  ;;  %3129 = vmatpush3.msra.mxu1 %v4563_v15  ;;  %v2282_v34 = vadd.f32 %v2281_v2, %v4608_v40 }
 0x465   : > { %v2283_v38 = vpop.f32.mrf.mxu0  ;;  %3114 = vmatprep.subr.mxu1 %v4566_v41 }
 0x466   : > { %v2284_v12 = vadd.f32 %v2283_v38, %v4611_v60  ;;  %2514 = vmatprep.mubr.f32.mxu1 %v2347_v3  ;;  %3130 = vmatpush3.msra.mxu1 %v4569_v9  ;;  %v2348_v36 = vmax.f32 %v2282_v34, 0.0 }
 0x467   : > { %v2287_v1 = vpop.f32.mrf.mxu0  ;;  %2515 = vmatmul.mubr.f32.gmra.mxu1 %v2346_v0  ;;  %3115 = vmatprep.subr.mxu1 %v4572_v30 }
 0x468   : > { %v2349_v44 = vmax.f32 %v2284_v12, 0.0  ;;  %3131 = vmatpush3.msra.mxu1 %v4575_v35  ;;  %v2288_v58 = vadd.f32 %v2287_v1, %v4608_v40 }
 0x469   : > { %v2289_v57 = vpop.f32.mrf.mxu0  ;;  %3116 = vmatprep.subr.mxu1 %v4578_v18 }
 0x46a   : > { %v2290_v51 = vadd.f32 %v2289_v57, %v4611_v60  ;;  %2520 = vmatprep.mubr.f32.mxu1 %v2349_v44  ;;  %3132 = vmatpush3.msra.mxu1 %v4581_v50  ;;  %v2350_v30 = vmax.f32 %v2288_v58, 0.0 }
 0x46b   : > { %v2293_v45 = vpop.f32.mrf.mxu0  ;;  %2521 = vmatmul.mubr.f32.gmra.mxu1 %v2348_v36  ;;  %3117 = vmatprep.subr.mxu1 %v4584_v46 }
 0x46c   : > { %v2351_v15 = vmax.f32 %v2290_v51, 0.0  ;;  %3133 = vmatpush3.msra.mxu1 %v4587_v47  ;;  %v2294_v35 = vadd.f32 %v2293_v45, %v4608_v40 }
 0x46d   : > { %v2295_v41 = vpop.f32.mrf.mxu0  ;;  %3118 = vmatprep.subr.mxu1 %v4590_v62 }
 0x46e   : > { %v2296_v18 = vadd.f32 %v2295_v41, %v4611_v60  ;;  %2526 = vmatprep.mubr.f32.mxu1 %v2351_v15  ;;  %3134 = vmatpush3.msra.mxu1 %v4593_v48  ;;  %v2352_v46 = vmax.f32 %v2294_v35, 0.0 }
 0x46f   : > { %v2299_v9 = vpop.f32.mrf.mxu0  ;;  %2527 = vmatmul.mubr.f32.gmra.mxu1 %v2350_v30  ;;  %3119 = vmatprep.subr.mxu1 %v4596_v28 }
 0x470   : > { %v2353_v50 = vmax.f32 %v2296_v18, 0.0  ;;  %3135 = vmatpush3.msra.mxu1 %v4599_v55  ;;  %v2300_v47 = vadd.f32 %v2299_v9, %v4608_v40 }
 0x471   : > { %v2301_v5 = vpop.f32.mrf.mxu0 }
 0x472   : > { %v2302_v54 = vadd.f32 %v2301_v5, %v4611_v60  ;;  %2532 = vmatprep.mubr.f32.mxu1 %v2353_v50  ;;  %v2354_v32 = vmax.f32 %v2300_v47, 0.0 }
 0x473   : > { %v2305_v62 = vpop.f32.mrf.mxu0  ;;  %2533 = vmatmul.mubr.f32.gmra.mxu1 %v2352_v46 }
 0x474   : > { %v2355_v20 = vmax.f32 %v2302_v54, 0.0  ;;  %v2306_v48 = vadd.f32 %v2305_v62, %v4608_v40 }
 0x475   : > { %v2307_v49 = vpop.f32.mrf.mxu0 }
 0x476   : > { %v2308_v17 = vadd.f32 %v2307_v49, %v4611_v60  ;;  %2538 = vmatprep.mubr.f32.mxu1 %v2355_v20  ;;  %v2356_v27 = vmax.f32 %v2306_v48, 0.0  ;;  %v2697_v48 = vld [vmem:[#allocation13 + $0xa0] sm:$0xff] }
 0x477   : > { %v2311_v28 = vpop.f32.mrf.mxu0  ;;  %2539 = vmatmul.mubr.f32.gmra.mxu1 %v2354_v32  ;;  %3057 = vmatprep.subr.mxu0 %v2697_v48  ;;  %v2681_v49 = vld [vmem:[#allocation13 + $0x20] sm:$0xff] }
 0x478   : > { %v2357_v55 = vmax.f32 %v2308_v17, 0.0  ;;  %v2312_v61 = vadd.f32 %v2311_v28, %v4608_v40  ;;  %3120 = vmatprep.subr.mxu1 %v2697_v48  ;;  %3058 = vmatpush3.msra.mxu0 %v2681_v49  ;;  %v2696_v17 = vld [vmem:[#allocation13 + $0x98] sm:$0xff] }
 0x479   : > { %v2313_v7 = vpop.f32.mrf.mxu0  ;;  %3136 = vmatpush3.msra.mxu1 %v2681_v49  ;;  %3059 = vmatprep.subr.mxu0 %v2696_v17  ;;  %v2680_v28 = vld [vmem:[#allocation13 + $0x18] sm:$0xff] }
 0x47a   : > { %v2314_v2 = vadd.f32 %v2313_v7, %v4611_v60  ;;  %2544 = vmatprep.mubr.f32.mxu1 %v2357_v55  ;;  %v2358_v34 = vmax.f32 %v2312_v61, 0.0  ;;  %3121 = vmatprep.subr.mxu1 %v2696_v17  ;;  %v2694_v55 = vld [vmem:[#allocation13 + $0x88] sm:$0xff]  ;;  %v2693_v61 = vld [vmem:[#allocation13 + $0x80] sm:$0xff]  ;;  %v4973_v17 = vmax.f32 %v4372_v33, 0.0 }
 0x47b   : > { %v2317_v3 = vpop.f32.mrf.mxu0  ;;  %2545 = vmatmul.mubr.f32.gmra.mxu1 %v2356_v27  ;;  %3060 = vmatpush3.msra.mxu0 %v2680_v28  ;;  %v2678_v27 = vld [vmem:[#allocation13 + $0x8] sm:$0xff]  ;;  %v2677_v7 = vld [vmem:[#allocation13] sm:$0xff] }
 0x47c   : > { %v2359_v0 = vmax.f32 %v2314_v2, 0.0  ;;  %v2318_v38 = vadd.f32 %v2317_v3, %v4608_v40  ;;  %3137 = vmatpush3.msra.mxu1 %v2680_v28  ;;  %v2609_v2 = vld [vmem:[%s4850_s10] sm:$0x3] }
 0x47d   : > { %v2319_v12 = vpop.f32.mrf.mxu0 }
 0x47e   : > { %v2320_v1 = vadd.f32 %v2319_v12, %v4611_v60  ;;  %2550 = vmatprep.mubr.f32.mxu1 %v2359_v0  ;;  %v2360_v58 = vmax.f32 %v2318_v38, 0.0  ;;  %v4665_v0 = vrot.slane %v2609_v2, %v4949_v11  ;;  %v4670_v12 = vrot.slane %v2609_v2, %v4950_v22 }
 0x47f   : > { %v2323_v44 = vpop.f32.mrf.mxu0  ;;  %2551 = vmatmul.mubr.f32.gmra.mxu1 %v2358_v34  ;;  %v4966_v34 = vmax.f32 %v4325_v10, 0.0  ;;  %v4969_v10 = vmax.f32 %v4340_v63, 0.0  ;;  %v4975_v2 = vmax.f32 %v4388_v52, 0.0 }
 0x480   : > { %v2361_v36 = vmax.f32 %v2320_v1, 0.0  ;;  %v2324_v57 = vadd.f32 %v2323_v44, %v4608_v40  ;;  %v4967_v44 = vmax.f32 %v4328_v53, 0.0 }
 0x481   : > { %v2325_v51 = vpop.f32.mrf.mxu0 }
 0x482   : > { %v2326_v45 = vadd.f32 %v2325_v51, %v4611_v60  ;;  %2556 = vmatprep.mubr.f32.mxu1 %v2361_v36  ;;  %v2362_v35 = vmax.f32 %v2324_v57, 0.0 }
 0x483   : > { %v2329_v15 = vpop.f32.mrf.mxu0  ;;  %2557 = vmatmul.mubr.f32.gmra.mxu1 %v2360_v58 }
 0x484   : > { %v2363_v30 = vmax.f32 %v2326_v45, 0.0  ;;  %v2330_v41 = vadd.f32 %v2329_v15, %v4608_v40  ;;  %v4968_v45 = vmax.f32 %v4337_v16, 0.0  ;;  %v4971_v16 = vmax.f32 %v4356_v6, 0.0 }
 0x485   : > { %v2331_v18 = vpop.f32.mrf.mxu0 }
 0x486   : > { %v2332_v9 = vadd.f32 %v2331_v18, %v4611_v60  ;;  %2562 = vmatprep.mubr.f32.mxu1 %v2363_v30  ;;  %v2364_v47 = vmax.f32 %v2330_v41, 0.0 }
 0x487   : > { %v2335_v50 = vpop.f32.mrf.mxu0  ;;  %2563 = vmatmul.mubr.f32.gmra.mxu1 %v2362_v35 }
 0x488   : > { %v2365_v46 = vmax.f32 %v2332_v9, 0.0  ;;  %v2336_v5 = vadd.f32 %v2335_v50, %v4608_v40  ;;  %v2695_v40 = vld [vmem:[#allocation13 + $0x90] sm:$0xff]  ;;  %v4970_v9 = vmax.f32 %v4353_v43, 0.0 }
 0x489   : > { %v2337_v54 = vpop.f32.mrf.mxu0  ;;  %3061 = vmatprep.subr.mxu0 %v2695_v40  ;;  %3122 = vmatprep.subr.mxu1 %v2695_v40 }
 0x48a   : > { %v2338_v62 = vadd.f32 %v2337_v54, %v4611_v60  ;;  %2568 = vmatprep.mubr.f32.mxu1 %v2365_v46  ;;  %v2366_v32 = vmax.f32 %v2336_v5, 0.0  ;;  %v2679_v60 = vld [vmem:[#allocation13 + $0x10] sm:$0xff] }
 0x48b   : > { %2569 = vmatmul.mubr.f32.gmra.mxu1 %v2364_v47  ;;  %3062 = vmatpush3.msra.mxu0 %v2679_v60 }
 0x48c   : > { %v2367_v20 = vmax.f32 %v2338_v62, 0.0  ;;  %3138 = vmatpush3.msra.mxu1 %v2679_v60  ;;  %3063 = vmatprep.subr.mxu0 %v2694_v55 }
 0x48d   : > { %3123 = vmatprep.subr.mxu1 %v2694_v55  ;;  %3064 = vmatpush3.msra.mxu0 %v2678_v27 }
 0x48e   : > { %2574 = vmatprep.mubr.f32.mxu1 %v2367_v20  ;;  %3139 = vmatpush3.msra.mxu1 %v2678_v27  ;;  %v4974_v27 = vmax.f32 %v4385_v23, 0.0 }
 0x48f   : > { %2575 = vmatmul.mubr.f32.gmra.mxu1 %v2366_v32  ;;  %3065 = vmatprep.subr.mxu0 %v2693_v61  ;;  %v4972_v32 = vmax.f32 %v4369_v21, 0.0 }
 0x490   : > { %3124 = vmatprep.subr.mxu1 %v2693_v61  ;;  %3066 = vmatpush3.msra.mxu0 %v2677_v7 }
 0x491   : > { %3140 = vmatpush3.msra.mxu1 %v2677_v7 }
 0x51b   : > { %v2498_v3 = vpop.f32.mrf.mxu1 }
 0x51c   : > { %v2581_v38 = vadd.f32 %v2498_v3, %v4966_v34 }
 0x51d   : > { %v2500_v1 = vpop.f32.mrf.mxu1 }
 0x51e   : > { %v2582_v36 = vadd.f32 %v2500_v1, %v4967_v44  ;;  %v2621_v58 = vadd.f32 %v4665_v0, %v2581_v38  ;;  %v4976_v44 = vmax.f32 %v4401_v29, 0.0 }
 0x51f   : > { %v2504_v57 = vpop.f32.mrf.mxu1 }
 0x520   : > { %v2622_v51 = vadd.f32 %v4670_v12, %v2582_v36  ;;  %v2583_v15 = vadd.f32 %v2504_v57, %v4968_v45  ;;  %v2649_v41 = vmax.f32 %v2621_v58, 0.0  ;;  %v4977_v57 = vmax.f32 %v4404_v39, 0.0 }
 0x521   : > { %v2506_v11 = vpop.f32.mrf.mxu1 }
 0x522   : > { %v2650_v30 = vmax.f32 %v2622_v51, 0.0  ;;  %v2584_v35 = vadd.f32 %v2506_v11, %v4969_v10  ;;  %v2623_v22 = vadd.f32 %v4665_v0, %v2583_v15 }
 0x523   : > { %v2510_v18 = vpop.f32.mrf.mxu1 }
 0x524   : > { %v2624_v53 = vadd.f32 %v4670_v12, %v2584_v35  ;;  %v2585_v50 = vadd.f32 %v2510_v18, %v4970_v9  ;;  %2780 = vmatprep.mubr.f32.mxu0 %v2650_v30  ;;  %v2651_v54 = vmax.f32 %v2623_v22, 0.0  ;;  %v4978_v30 = vmax.f32 %v4417_v56, 0.0 }
 0x525   : > { %v2512_v46 = vpop.f32.mrf.mxu1  ;;  %2781 = vmatmul.mubr.f32.vlgmr.msra.gmra.mxu0 %v2649_v41  ;;  %v4979_v41 = vmax.f32 %v4420_v37, 0.0 }
 0x526   : > { %v2652_v47 = vmax.f32 %v2624_v53, 0.0  ;;  %v2586_v5 = vadd.f32 %v2512_v46, %v4971_v16  ;;  %v2625_v63 = vadd.f32 %v4665_v0, %v2585_v50  ;;  %v4980_v50 = vmax.f32 %v4433_v31, 0.0 }
 0x527   : > { %v2516_v62 = vpop.f32.mrf.mxu1  ;;  %v4981_v16 = vmax.f32 %v4436_v59, 0.0 }
 0x528   : > { %v2626_v20 = vadd.f32 %v4670_v12, %v2586_v5  ;;  %v2587_v48 = vadd.f32 %v2516_v62, %v4972_v32  ;;  %2785 = vmatprep.mubr.f32.mxu0 %v2652_v47  ;;  %v2653_v40 = vmax.f32 %v2625_v63, 0.0 }
 0x529   : > { %v2518_v49 = vpop.f32.mrf.mxu1  ;;  %2786 = vmatmul.mubr.f32.gmra.mxu0 %v2651_v54 }
 0x52a   : > { %v2654_v43 = vmax.f32 %v2626_v20, 0.0  ;;  %v2588_v28 = vadd.f32 %v2518_v49, %v4973_v17  ;;  %v2627_v6 = vadd.f32 %v4665_v0, %v2587_v48  ;;  %v4982_v20 = vmax.f32 %v4449_v19, 0.0 }
 0x52b   : > { %v2522_v60 = vpop.f32.mrf.mxu1  ;;  %v4983_v49 = vmax.f32 %v4452_v4, 0.0 }
 0x52c   : > { %v2628_v55 = vadd.f32 %v4670_v12, %v2588_v28  ;;  %v2589_v61 = vadd.f32 %v2522_v60, %v4974_v27  ;;  %2790 = vmatprep.mubr.f32.mxu0 %v2654_v43  ;;  %v2655_v34 = vmax.f32 %v2627_v6, 0.0  ;;  %v4984_v6 = vmax.f32 %v4465_v26, 0.0 }
 0x52d   : > { %v2524_v7 = vpop.f32.mrf.mxu1  ;;  %2791 = vmatmul.mubr.f32.gmra.mxu0 %v2653_v40  ;;  %v4985_v27 = vmax.f32 %v4468_v14, 0.0 }
 0x52e   : > { %v2656_v21 = vmax.f32 %v2628_v55, 0.0  ;;  %v2590_v3 = vadd.f32 %v2524_v7, %v4975_v2  ;;  %v2629_v33 = vadd.f32 %v4665_v0, %v2589_v61 }
 0x52f   : > { %v2528_v38 = vpop.f32.mrf.mxu1 }
 0x530   : > { %v2630_v1 = vadd.f32 %v4670_v12, %v2590_v3  ;;  %v2591_v36 = vadd.f32 %v2528_v38, %v4976_v44  ;;  %2795 = vmatprep.mubr.f32.mxu0 %v2656_v21  ;;  %v2657_v45 = vmax.f32 %v2629_v33, 0.0  ;;  %v4986_v3 = vmax.f32 %v4481_v25, 0.0 }
 0x531   : > { %v2530_v58 = vpop.f32.mrf.mxu1  ;;  %2796 = vmatmul.mubr.f32.gmra.mxu0 %v2655_v34  ;;  %v4987_v38 = vmax.f32 %v4484_v24, 0.0 }
 0x532   : > { %v2658_v23 = vmax.f32 %v2630_v1, 0.0  ;;  %v2592_v51 = vadd.f32 %v2530_v58, %v4977_v57  ;;  %v2631_v52 = vadd.f32 %v4665_v0, %v2591_v36 }
 0x533   : > { %v2534_v15 = vpop.f32.mrf.mxu1 }
 0x534   : > { %v2632_v11 = vadd.f32 %v4670_v12, %v2592_v51  ;;  %v2593_v10 = vadd.f32 %v2534_v15, %v4978_v30  ;;  %2800 = vmatprep.mubr.f32.mxu0 %v2658_v23  ;;  %v2659_v18 = vmax.f32 %v2631_v52, 0.0  ;;  %v4988_v23 = vmax.f32 %v4497_v13, 0.0 }
 0x535   : > { %v2536_v35 = vpop.f32.mrf.mxu1  ;;  %2801 = vmatmul.mubr.f32.gmra.mxu0 %v2657_v45  ;;  %v4989_v45 = vmax.f32 %v4500_v42, 0.0 }
 0x536   : > { %v2660_v29 = vmax.f32 %v2632_v11, 0.0  ;;  %v2594_v22 = vadd.f32 %v2536_v35, %v4979_v41  ;;  %v2633_v39 = vadd.f32 %v4665_v0, %v2593_v10  ;;  %v4990_v10 = vmax.f32 %v4513_v8, 0.0  ;;  %v4991_v41 = vld [vmem:[#allocation24_spill] sm:$0xff] }
 0x537   : > { %v2540_v53 = vpop.f32.mrf.mxu1 }
 0x538   : > { %v2634_v9 = vadd.f32 %v4670_v12, %v2594_v22  ;;  %v2595_v46 = vadd.f32 %v2540_v53, %v4980_v50  ;;  %2805 = vmatprep.mubr.f32.mxu0 %v2660_v29  ;;  %v2661_v54 = vmax.f32 %v2633_v39, 0.0  ;;  %v4992_v22 = vmax.f32 %v4991_v41, 0.0  ;;  %v4993_v50 = vld [vmem:[#allocation23_spill] sm:$0xff] }
 0x539   : > { %v2542_v47 = vpop.f32.mrf.mxu1  ;;  %2806 = vmatmul.mubr.f32.gmra.mxu0 %v2659_v18 }
 0x53a   : > { %v2662_v56 = vmax.f32 %v2634_v9, 0.0  ;;  %v2596_v5 = vadd.f32 %v2542_v47, %v4981_v16  ;;  %v2635_v37 = vadd.f32 %v4665_v0, %v2595_v46  ;;  %v4994_v46 = vmax.f32 %v4993_v50, 0.0  ;;  %v4995_v16 = vld [vmem:[#allocation26_spill] sm:$0xff] }
 0x53b   : > { %v2546_v63 = vpop.f32.mrf.mxu1 }
 0x53c   : > { %v2636_v62 = vadd.f32 %v4670_v12, %v2596_v5  ;;  %v2597_v32 = vadd.f32 %v2546_v63, %v4982_v20  ;;  %2810 = vmatprep.mubr.f32.mxu0 %v2662_v56  ;;  %v2663_v17 = vmax.f32 %v2635_v37, 0.0  ;;  %v4996_v5 = vmax.f32 %v4995_v16, 0.0 }
 0x53d   : > { %v2548_v48 = vpop.f32.mrf.mxu1  ;;  %2811 = vmatmul.mubr.f32.gmra.mxu0 %v2661_v54 }
 0x53e   : > { %v2664_v31 = vmax.f32 %v2636_v62, 0.0  ;;  %v2598_v43 = vadd.f32 %v2548_v48, %v4983_v49  ;;  %v2637_v59 = vadd.f32 %v4665_v0, %v2597_v32 }
 0x53f   : > { %v2552_v28 = vpop.f32.mrf.mxu1 }
 0x540   : > { %v2638_v40 = vadd.f32 %v4670_v12, %v2598_v43  ;;  %v2599_v60 = vadd.f32 %v2552_v28, %v4984_v6  ;;  %2815 = vmatprep.mubr.f32.mxu1 %v2664_v31  ;;  %v2665_v7 = vmax.f32 %v2637_v59, 0.0  ;;  %v4758_v31 = vld [vmem:[%s4852_s12] ss:$0 sm:$0xff] }
 0x541   : > { %v2554_v55 = vpop.f32.mrf.mxu1  ;;  %2816 = vmatmul.mubr.f32.vlgmr.msra.gmra.mxu1 %v2663_v17 }
 0x542   : > { %v2666_v19 = vmax.f32 %v2638_v40, 0.0  ;;  %v2600_v61 = vadd.f32 %v2554_v55, %v4985_v27  ;;  %v2639_v4 = vadd.f32 %v4665_v0, %v2599_v60 }
 0x543   : > { %v2558_v21 = vpop.f32.mrf.mxu1 }
 0x544   : > { %v2640_v2 = vadd.f32 %v4670_v12, %v2600_v61  ;;  %v2601_v34 = vadd.f32 %v2558_v21, %v4986_v3  ;;  %2820 = vmatprep.mubr.f32.mxu1 %v2666_v19  ;;  %v2667_v44 = vmax.f32 %v2639_v4, 0.0 }
 0x545   : > { %v2560_v33 = vpop.f32.mrf.mxu1  ;;  %2821 = vmatmul.mubr.f32.gmra.mxu1 %v2665_v7 }
 0x546   : > { %v2668_v26 = vmax.f32 %v2640_v2, 0.0  ;;  %v2602_v1 = vadd.f32 %v2560_v33, %v4987_v38  ;;  %v2641_v14 = vadd.f32 %v4665_v0, %v2601_v34 }
 0x547   : > { %v2564_v36 = vpop.f32.mrf.mxu1 }
 0x548   : > { %v2642_v58 = vadd.f32 %v4670_v12, %v2602_v1  ;;  %v2603_v57 = vadd.f32 %v2564_v36, %v4988_v23  ;;  %2825 = vmatprep.mubr.f32.mxu1 %v2668_v26  ;;  %v2669_v15 = vmax.f32 %v2641_v14, 0.0 }
 0x549   : > { %v2566_v51 = vpop.f32.mrf.mxu1  ;;  %2826 = vmatmul.mubr.f32.gmra.mxu1 %v2667_v44 }
 0x54a   : > { %v2670_v25 = vmax.f32 %v2642_v58, 0.0  ;;  %v2604_v52 = vadd.f32 %v2566_v51, %v4989_v45  ;;  %v2643_v24 = vadd.f32 %v4665_v0, %v2603_v57 }
 0x54b   : > { %v2570_v11 = vpop.f32.mrf.mxu1 }
 0x54c   : > { %v2644_v30 = vadd.f32 %v4670_v12, %v2604_v52  ;;  %v2605_v35 = vadd.f32 %v2570_v11, %v4990_v10  ;;  %2830 = vmatprep.mubr.f32.mxu1 %v2670_v25  ;;  %v2671_v39 = vmax.f32 %v2643_v24, 0.0 }
 0x54d   : > { %v2572_v29 = vpop.f32.mrf.mxu1  ;;  %2831 = vmatmul.mubr.f32.gmra.mxu1 %v2669_v15 }
 0x54e   : > { %v2672_v13 = vmax.f32 %v2644_v30, 0.0  ;;  %v2606_v18 = vadd.f32 %v2572_v29, %v4992_v22  ;;  %v2645_v42 = vadd.f32 %v4665_v0, %v2605_v35 }
 0x54f   : > { %v2576_v53 = vpop.f32.mrf.mxu1 }
 0x550   : > { %v2646_v9 = vadd.f32 %v4670_v12, %v2606_v18  ;;  %v2607_v47 = vadd.f32 %v2576_v53, %v4994_v46  ;;  %2835 = vmatprep.mubr.f32.mxu1 %v2672_v13  ;;  %v2673_v37 = vmax.f32 %v2645_v42, 0.0 }
 0x551   : > { %v2578_v8 = vpop.f32.mrf.mxu1  ;;  %2836 = vmatmul.mubr.f32.gmra.mxu1 %v2671_v39 }
 0x552   : > { %v2674_v56 = vmax.f32 %v2646_v9, 0.0  ;;  %v2608_v54 = vadd.f32 %v2578_v8, %v4996_v5  ;;  %v2647_v63 = vadd.f32 %v4665_v0, %v2607_v47 }
 0x554   : > { %v2648_v62 = vadd.f32 %v4670_v12, %v2608_v54  ;;  %2840 = vmatprep.mubr.f32.mxu1 %v2674_v56  ;;  %v2675_v32 = vmax.f32 %v2647_v63, 0.0 }
 0x555   : > { %2841 = vmatmul.mubr.f32.gmra.mxu1 %v2673_v37 }
 0x556   : > { %v2676_v20 = vmax.f32 %v2648_v62, 0.0 }
 0x558   : > { %2845 = vmatprep.mubr.f32.mxu1 %v2676_v20 }
 0x559   : > { %2846 = vmatmul.mubr.f32.gmra.mxu1 %v2675_v32 }
 0x5e5   : > { %v3067_v48 = vpop.f32.mrf.mxu0 }
 0x5e7   : > { %v3068_v49 = vpop.f32.mrf.mxu0 }
 0x5e8   : > { %v3069_v43 = vadd.f32 %v3068_v49, %v3067_v48 }
 0x5e9   : > { %v3070_v17 = vpop.f32.mrf.mxu0 }
 0x5ea   : > { %v2783_v0 = vadd.f32 %v3069_v43, %v4758_v31 }
 0x5eb   : > { %v3071_v59 = vpop.f32.mrf.mxu0 }
 0x5ec   : > { %2851 = vst [vmem:[%s4761_s3] sm:$0xff] %v2783_v0  ;;  %v3072_v12 = vadd.f32 %v3071_v59, %v3070_v17 }
 0x5ed   : > { %v3073_v28 = vpop.f32.mrf.mxu0 }
 0x5ee   : > { %v2788_v40 = vadd.f32 %v3072_v12, %v4758_v31 }
 0x5ef   : > { %v3074_v6 = vpop.f32.mrf.mxu0 }
 0x5f0   : > { %2852 = vst [vmem:[%s4761_s3 + $0x8] sm:$0xff] %v2788_v40  ;;  %v3075_v60 = vadd.f32 %v3074_v6, %v3073_v28 }
 0x5f1   : > { %v3076_v55 = vpop.f32.mrf.mxu0 }
 0x5f2   : > { %v2793_v19 = vadd.f32 %v3075_v60, %v4758_v31 }
 0x5f3   : > { %v3077_v27 = vpop.f32.mrf.mxu0 }
 0x5f4   : > { %2853 = vst [vmem:[%s4761_s3 + $0x10] sm:$0xff] %v2793_v19  ;;  %v3078_v61 = vadd.f32 %v3077_v27, %v3076_v55 }
 0x5f5   : > { %v3079_v7 = vpop.f32.mrf.mxu0 }
 0x5f6   : > { %v2798_v4 = vadd.f32 %v3078_v61, %v4758_v31 }
 0x5f7   : > { %v3080_v21 = vpop.f32.mrf.mxu0 }
 0x5f8   : > { %2854 = vst [vmem:[%s4761_s3 + $0x18] sm:$0xff] %v2798_v4  ;;  %v3081_v2 = vadd.f32 %v3080_v21, %v3079_v7 }
 0x5f9   : > { %v3082_v3 = vpop.f32.mrf.mxu0 }
 0x5fa   : > { %v2803_v34 = vadd.f32 %v3081_v2, %v4758_v31 }
 0x5fb   : > { %v3083_v33 = vpop.f32.mrf.mxu0 }
 0x5fc   : > { %2855 = vst [vmem:[%s4761_s3 + $0x20] sm:$0xff] %v2803_v34  ;;  %v3084_v26 = vadd.f32 %v3083_v33, %v3082_v3 }
 0x5fd   : > { %v3085_v38 = vpop.f32.mrf.mxu0 }
 0x5fe   : > { %v2808_v1 = vadd.f32 %v3084_v26, %v4758_v31 }
 0x5ff   : > { %v3086_v44 = vpop.f32.mrf.mxu0 }
 0x600   : > { %2856 = vst [vmem:[%s4761_s3 + $0x28] sm:$0xff] %v2808_v1  ;;  %v3087_v14 = vadd.f32 %v3086_v44, %v3085_v38 }
 0x601   : > { %v3088_v36 = vpop.f32.mrf.mxu1 }
 0x602   : > { %v2813_v58 = vadd.f32 %v3087_v14, %v4758_v31 }
 0x603   : > { %v3089_v23 = vpop.f32.mrf.mxu1 }
 0x604   : > { %2857 = vst [vmem:[%s4761_s3 + $0x30] sm:$0xff] %v2813_v58  ;;  %v3090_v57 = vadd.f32 %v3089_v23, %v3088_v36 }
 0x605   : > { %v3091_v51 = vpop.f32.mrf.mxu1 }
 0x606   : > { %v2818_v25 = vadd.f32 %v3090_v57, %v4758_v31 }
 0x607   : > { %v3092_v45 = vpop.f32.mrf.mxu1 }
 0x608   : > { %2858 = vst [vmem:[%s4761_s3 + $0x38] sm:$0xff] %v2818_v25  ;;  %v3093_v52 = vadd.f32 %v3092_v45, %v3091_v51 }
 0x609   : > { %v3094_v15 = vpop.f32.mrf.mxu1 }
 0x60a   : > { %v2823_v24 = vadd.f32 %v3093_v52, %v4758_v31 }
 0x60b   : > { %v3095_v11 = vpop.f32.mrf.mxu1 }
 0x60c   : > { %2859 = vst [vmem:[%s4761_s3 + $0x40] sm:$0xff] %v2823_v24  ;;  %v3096_v30 = vadd.f32 %v3095_v11, %v3094_v15 }
 0x60d   : > { %v3097_v10 = vpop.f32.mrf.mxu1 }
 0x60e   : > { %v2828_v35 = vadd.f32 %v3096_v30, %v4758_v31 }
 0x60f   : > { %v3098_v29 = vpop.f32.mrf.mxu1 }
 0x610   : > { %2860 = vst [vmem:[%s4761_s3 + $0x48] sm:$0xff] %v2828_v35  ;;  %v3099_v13 = vadd.f32 %v3098_v29, %v3097_v10 }
 0x611   : > { %v3100_v41 = vpop.f32.mrf.mxu1 }
 0x612   : > { %v2833_v22 = vadd.f32 %v3099_v13, %v4758_v31 }
 0x613   : > { %v3101_v18 = vpop.f32.mrf.mxu1 }
 0x614   : > { %2861 = vst [vmem:[%s4761_s3 + $0x50] sm:$0xff] %v2833_v22  ;;  %v3102_v39 = vadd.f32 %v3101_v18, %v3100_v41 }
 0x615   : > { %v3103_v42 = vpop.f32.mrf.mxu1 }
 0x616   : > { %v2838_v53 = vadd.f32 %v3102_v39, %v4758_v31 }
 0x617   : > { %v3104_v9 = vpop.f32.mrf.mxu1 }
 0x618   : > { %2862 = vst [vmem:[%s4761_s3 + $0x58] sm:$0xff] %v2838_v53  ;;  %v3105_v50 = vadd.f32 %v3104_v9, %v3103_v42 }
 0x619   : > { %v3106_v46 = vpop.f32.mrf.mxu1 }
 0x61a   : > { %v2843_v47 = vadd.f32 %v3105_v50, %v4758_v31 }
 0x61b   : > { %v3107_v8 = vpop.f32.mrf.mxu1 }
 0x61c   : > { %2863 = vst [vmem:[%s4761_s3 + $0x60] sm:$0xff] %v2843_v47  ;;  %v3108_v56 = vadd.f32 %v3107_v8, %v3106_v46 }
 0x61e   : > { %v2848_v16 = vadd.f32 %v3108_v56, %v4758_v31 }
 0x620   : > { %2864 = vst [vmem:[%s4761_s3 + $0x68] sm:$0xff] %v2848_v16 }
 0x621   : > { %3456 = shalt.err (!%p3453_p3)
}
 0x622   : > { %s3457_s9 = scalar_lea.hbm %s4793_s23, 1792  ;;  %s3461_s29 = scalar_lea.hbm %s4853_s13, 3584 }
 0x623   : > { %p3458_p4 = scmp.ne.s32.totalorder %s4793_s23, %s3457_s9  ;;  %p3462_p0 = scmp.lt.s32.totalorder %s4793_s23, %s4853_s13 }
 0x624   : > { %p3463_p7 = scmp.lt.s32.totalorder %s3461_s29, %s3457_s9 }
 0x625   : > { %p3459_p9 = pnand %p3458_p4, %p4997_p6 }
 0x626   : > { %p3464_p2 = por %p3463_p7, %p3462_p0 }
 0x627   : > { %p3460_p12 = pneg %p3459_p9 }
 0x629   : > { %p3465_p8 = pnand %p3464_p2, %p3460_p12 }
 0x62b   : > { %3468 = shalt.err (!%p3465_p8)
}
 0x62c   : > { %s3535_s15 = smov 128   ;;  %s3536_s18 = smov 8  }
 0x62d   : > { %3170 = dma.vmem_to_hbm [thread:$0]  (%p4997_p6), %s4795_s7, 1792, %s4793_s23, %s2866_s14, %s3535_s15, %s3535_s15, %s3536_s18  }
 0x62e PF: > { %s2894_s24 = sand.u32 1, %s3507_s25   ;;  %p4998_p10 = scmp.ne.s32.totalorder %s4923_s16, 0 }
 0x62f   : > { %p4999_p11 = scmp.ge.s32.totalorder %s3519_s28, 2  ;;  %s2895_s30 = scalar_lea.sflag [#allocation4], %s2894_s24 }
 0x631   : > { %p3196_p13 = pnand %p4999_p11, %p4998_p10 }
 0x633   : > { %p3197_p5 = pneg %p3196_p13 }
 0x635   : > { %3502 = dma.done.wait (%p3197_p5), %s2895_s30, 1792  }
 0x636   : > { %3504 = vsyncadd (%p3197_p5), %s2895_s30, 4294965504  ;;  %s5000_s1 = sld [smem:[#allocation20_spill]]  ;;  %p29_p1 = scmp.ge.s32.totalorder %s3725_s19, 4  }
 0x637   : > { %s5001_s25 = smov %s3511_s26  ;;  %s5002_s26 = smov %s3515_s27 }
 0x638   : > { %s5004_s28 = smov %s3725_s19  ;;  %31 = sbr.rel (!%p29_p1) target bundleno = 15 (0xf), region = 141 }
 0x63c   : > { %s5003_s27 = smov %s5000_s1 }
 0x63d   :  { %2900 = vsyncpa [#allocation3], 1 }
 0x63e   :  { %2902 = vsyncpa [#allocation3 + $0x1], 1 }
 0x63f   :  { %2903 = vsyncpa [#allocation6], 1 }
 0x640   :  { %2904 = vsyncpa [#allocation9], 1 }
 0x641   :  { %2905 = vsyncpa [#allocation12], 1 }
 0x642   :  { %2906 = vsyncpa [#allocation4], 1 }
 0x643   :  { %2908 = vsyncpa [#allocation4 + $0x1], 1 }

// kernel: tpu_custom_call.1
= control target key start
LH: loop header
LB: loop body
LE: loop exit
PB: predicated region body
PF: predicated region fallthrough
CT: control target
= control target key end

     0   :  { %s4840_s0 = inlined_call_operand.hbm [shape: f32[224,1024], index: 0, kind: input, shape index: {}]   ;;  %s4841_s1 = inlined_call_operand.hbm [shape: f32[1024,256], index: 1, kind: input, shape index: {}]   ;;  %s4842_s2 = inlined_call_operand.vmem [shape: f32[1,256], index: 2, kind: input, shape index: {}]   ;;  %s4843_s3 = inlined_call_operand.hbm [shape: f32[256,256], index: 3, kind: input, shape index: {}]   ;;  %s4844_s4 = inlined_call_operand.vmem [shape: f32[1,256], index: 4, kind: input, shape index: {}]   ;;  %s4845_s5 = inlined_call_operand.hbm [shape: f32[256,256], index: 5, kind: input, shape index: {}]   ;;  %s4846_s6 = inlined_call_operand.vmem [shape: f32[1,256], index: 6, kind: input, shape index: {}]   ;;  %s4847_s7 = inlined_call_operand.hbm [shape: f32[256,256], index: 7, kind: input, shape index: {}]   ;;  %s4848_s8 = inlined_call_operand.vmem [shape: f32[1,256], index: 8, kind: input, shape index: {}]   ;;  %s4849_s9 = inlined_call_operand.hbm [shape: f32[256,256], index: 9, kind: input, shape index: {}]   ;;  %s4850_s10 = inlined_call_operand.vmem [shape: f32[1,256], index: 10, kind: input, shape index: {}]   ;;  %s4851_s11 = inlined_call_operand.hbm [shape: f32[256,128], index: 11, kind: input, shape index: {}]   ;;  %s4852_s12 = inlined_call_operand.vmem [shape: f32[1,128], index: 12, kind: input, shape index: {}]   ;;  %s4853_s13 = inlined_call_operand.hbm [shape: f32[224,128], index: 13, kind: output, shape index: {}]  }
   0x1   :  { %4905 = sst [smem:[#allocation30_spill]] %s4841_s1 }
   0x2   :  { %4906 = sst [smem:[#allocation31_spill]] %s4843_s3 }
   0x3   :  { %4907 = sst [smem:[#allocation32_spill]] %s4845_s5 }
   0x4   :  { %4908 = sst [smem:[#allocation33_spill]] %s4847_s7 }
   0x5   :  { %4909 = sst [smem:[#allocation34_spill]] %s4849_s9 }
   0x6   :  { %4910 = sst [smem:[#allocation35_spill]] %s4851_s11 }
   0x7   :  { %18 = vsyncpa [#allocation3], 0 }
   0x8   :  { %20 = vsyncpa [#allocation3 + $0x1], 0 }
   0x9   :  { %21 = vsyncpa [#allocation6], 0 }
   0xa   :  { %22 = vsyncpa [#allocation9], 0 }
   0xb   :  { %23 = vsyncpa [#allocation12], 0 }
   0xc   :  { %24 = vsyncpa [#allocation4], 0 }
   0xd   :  { %26 = vsyncpa [#allocation4 + $0x1], 0  ;;  %s3607_s25 = smov 0   ;;  %s3609_s26 = smov 0  }
   0xe   :  { %s3611_s27 = smov 0   ;;  %s3613_s28 = smov 0  }
   0xf LB: > { %s3521_s29 = smov [#allocation5]   ;;  %s3628_s14 = sadd.s32 4294967295, %s3519_s28   ;;  %s3519_s28 = sphi %s3613_s28, %s5004_s28   ;;  %s3515_s27 = sphi %s3611_s27, %s5003_s27   ;;  %s3511_s26 = sphi %s3609_s26, %s5002_s26   ;;  %s3507_s25 = sphi %s3607_s25, %s5001_s25  }
  0x10   : > { %s353_s30 = sshll.u32 %s3521_s29, 4  ;;  %p3010_p0 = scmp.ge.s32.totalorder %s3519_s28, 1  ;;  %s354_s30 = int_to_ptr.vmem [resolvable:$true] %s353_s30 }
  0x11   : > { %p4854_p1 = scmp.eq.s32.totalorder %s3628_s14, 0  ;;  %p341_p2 = scmp.lt.s32.totalorder %s3519_s28, 3 }
  0x12   : > { %s3522_s16 = smov [#allocation8]   ;;  %s3523_s19 = smov [#allocation11]  }
  0x13   : > { %p3633_p3 = pnand %p3010_p0, %p341_p2  ;;  %s385_s17 = sshll.u32 %s3522_s16, 4  ;;  %s3646_s17 = int_to_ptr.vmem [resolvable:$true] %s385_s17 }
  0x14   : > { %s417_s20 = sshll.u32 %s3523_s19, 4  ;;  %s3270_s22 = scalar_lea.vmem %s354_s30, 32768  ;;  %s3648_s20 = int_to_ptr.vmem [resolvable:$true] %s417_s20 }
  0x15   : > { %s4911_s15 = scalar_select %p3633_p3, 1, 0 }
  0x16   : > { %p3172_p5 = pneg %p3633_p3  ;;  %p3271_p8 = scmp.ne.s32.totalorder %s354_s30, %s3270_s22 }
  0x17   : > { %p3278_p11 = scmp.lt.s32.totalorder %s354_s30, %s354_s30  ;;  %p3279_p12 = scmp.lt.s32.totalorder %s3270_s22, %s3270_s22 }
  0x18   : > { %p3642_p6 = pnand %p3172_p5, %p4854_p1 }
  0x19   : > { %p3280_p13 = por %p3279_p12, %p3278_p11 }
  0x1a   : > { %p3652_p7 = pneg %p3642_p6 }
  0x1c   : > { %p3273_p9 = pnand %p3271_p8, %p3652_p7 }
  0x1e   : > { %p3274_p10 = pneg %p3273_p9 }
  0x20   : > { %p3281_p0 = pnand %p3280_p13, %p3274_p10 }
  0x22   : > { %3284 = shalt.err (!%p3281_p0)
}
  0x23   : > { %s3524_s23 = smov 256   ;;  %s3525_s24 = smov 16  }
  0x24   : > { %s4914_s1 = sld [smem:[#allocation30_spill]]  ;;  %s3296_s19 = scalar_lea.vmem %s3646_s17, 8192 }
  0x25   : > { %p3297_p2 = scmp.ne.s32.totalorder %s3646_s17, %s3296_s19  ;;  %p3304_p9 = scmp.lt.s32.totalorder %s3646_s17, %s3646_s17 }
  0x26   : > { %p3305_p10 = scmp.lt.s32.totalorder %s3296_s19, %s3296_s19 }
  0x27   : > { %p3299_p5 = pnand %p3297_p2, %p3652_p7 }
  0x28   : > { %p3306_p11 = por %p3305_p10, %p3304_p9 }
  0x29   : > { %p3300_p8 = pneg %p3299_p5 }
  0x2a   : > { %3175 = dma.hbm_to_vmem [thread:$0]  (!%p3642_p6), %s4914_s1, 32768, %s354_s30, [#allocation6], %s3524_s23, %s3524_s23, %s3525_s24  }
  0x2b   : > { %p3307_p12 = pnand %p3306_p11, %p3300_p8 }
  0x2d   : > { %3310 = shalt.err (!%p3307_p12)
}
  0x2e   : > { %s4915_s5 = sld [smem:[#allocation32_spill]]  ;;  %s3322_s30 = scalar_lea.vmem %s3648_s20, 8192 }
  0x2f   : > { %p3323_p13 = scmp.ne.s32.totalorder %s3648_s20, %s3322_s30  ;;  %p3330_p5 = scmp.lt.s32.totalorder %s3648_s20, %s3648_s20 }
  0x30   : > { %p3331_p8 = scmp.lt.s32.totalorder %s3322_s30, %s3322_s30 }
  0x31   : > { %p3325_p0 = pnand %p3323_p13, %p3652_p7 }
  0x32   : > { %p3332_p9 = por %p3331_p8, %p3330_p5 }
  0x33   : > { %p3326_p2 = pneg %p3325_p0 }
  0x34   : > { %3181 = dma.hbm_to_vmem [thread:$0]  (!%p3642_p6), %s4915_s5, 8192, %s3646_s17, [#allocation9], %s3524_s23, %s3524_s23, %s3525_s24  }
  0x35   : > { %p3333_p10 = pnand %p3332_p9, %p3326_p2 }
  0x37   : > { %3336 = shalt.err (!%p3333_p10)
}
  0x38   : > { %s4916_s9 = sld [smem:[#allocation34_spill]]  ;;  %s3526_s17 = smov [#allocation7]  }
  0x39   : > { %s369_s22 = sshll.u32 %s3526_s17, 4  ;;  %s3527_s29 = smov [#allocation10]   ;;  %s370_s22 = int_to_ptr.vmem [resolvable:$true] %s369_s22 }
  0x3a   : > { %s401_s1 = sshll.u32 %s3527_s29, 4  ;;  %s3348_s30 = scalar_lea.vmem %s370_s22, 8192  ;;  %s402_s1 = int_to_ptr.vmem [resolvable:$true] %s401_s1 }
  0x3b   : > { %p3349_p11 = scmp.ne.s32.totalorder %s370_s22, %s3348_s30  ;;  %p3356_p0 = scmp.lt.s32.totalorder %s370_s22, %s370_s22 }
  0x3c   : > { %p3357_p2 = scmp.lt.s32.totalorder %s3348_s30, %s3348_s30 }
  0x3d   : > { %p3351_p12 = pnand %p3349_p11, %p3652_p7 }
  0x3e   : > { %3187 = dma.hbm_to_vmem [thread:$0]  (!%p3642_p6), %s4916_s9, 8192, %s3648_s20, [#allocation12], %s3524_s23, %s3524_s23, %s3525_s24  }
  0x3f   : > { %p3352_p13 = pneg %p3351_p12  ;;  %p3358_p5 = por %p3357_p2, %p3356_p0 }
  0x41   : > { %p3359_p8 = pnand %p3358_p5, %p3352_p13 }
  0x43   : > { %3362 = shalt.err (!%p3359_p8)
}
  0x44   : > { %s4917_s3 = sld [smem:[#allocation31_spill]]  ;;  %s3374_s19 = scalar_lea.vmem %s402_s1, 8192 }
  0x45   : > { %p3375_p9 = scmp.ne.s32.totalorder %s402_s1, %s3374_s19  ;;  %p3382_p12 = scmp.lt.s32.totalorder %s402_s1, %s402_s1 }
  0x46   : > { %p3383_p0 = scmp.lt.s32.totalorder %s3374_s19, %s3374_s19 }
  0x47   : > { %p3377_p10 = pnand %p3375_p9, %p3652_p7 }
  0x48   : > { %p3384_p13 = por %p3383_p0, %p3382_p12 }
  0x49   : > { %p3378_p11 = pneg %p3377_p10 }
  0x4a   : > { %3178 = dma.hbm_to_vmem [thread:$0]  (!%p3642_p6), %s4917_s3, 8192, %s370_s22, [#allocation6], %s3524_s23, %s3524_s23, %s3525_s24  }
  0x4b   : > { %p3385_p2 = pnand %p3384_p13, %p3378_p11 }
  0x4d   : > { %3388 = shalt.err (!%p3385_p2)
}
  0x4e   : > { %s4918_s7 = sld [smem:[#allocation33_spill]]  ;;  %s3528_s22 = smov [#allocation13]  }
  0x4f   : > { %s433_s30 = sshll.u32 %s3528_s22, 4  ;;  %s434_s30 = int_to_ptr.vmem [resolvable:$true] %s433_s30 }
  0x50   : > { %s3400_s20 = scalar_lea.vmem %s434_s30, 4096  ;;  %p3408_p10 = scmp.lt.s32.totalorder %s434_s30, %s434_s30 }
  0x51   : > { %p3401_p5 = scmp.ne.s32.totalorder %s434_s30, %s3400_s20  ;;  %p3409_p11 = scmp.lt.s32.totalorder %s3400_s20, %s3400_s20 }
  0x53   : > { %p3403_p8 = pnand %p3401_p5, %p3652_p7  ;;  %p3410_p12 = por %p3409_p11, %p3408_p10 }
  0x54   : > { %3184 = dma.hbm_to_vmem [thread:$0]  (!%p3642_p6), %s4918_s7, 8192, %s402_s1, [#allocation9], %s3524_s23, %s3524_s23, %s3525_s24  }
  0x55   : > { %p3404_p9 = pneg %p3403_p8 }
  0x57   : > { %p3411_p0 = pnand %p3410_p12, %p3404_p9 }
  0x59   : > { %3414 = shalt.err (!%p3411_p0)
}
  0x5a   : > { %s3529_s16 = smov 128   ;;  %s3530_s1 = smov 8  }
  0x5b   : > { %s4919_s11 = sld [smem:[#allocation35_spill]]  ;;  %s3009_s24 = sadd.s32 4294967294, %s3519_s28  }
  0x5c   : > { %s3725_s19 = sadd.s32 1, %s3519_s28   ;;  %s39_s29 = sadd.s32 1, %s3515_s27 }
  0x5d   : > { %s36_s17 = ssub.s32 %s3519_s28, %s3725_s19  ;;  %p46_p13 = scmp.ne.s32.totalorder %s3515_s27, %s3511_s26 }
  0x5e   : > { %p37_p7 = scmp.eq.s32.totalorder %s36_s17, 0  ;;  %p47_p2 = scmp.eq.s32.totalorder %s3519_s28, 0 }
  0x5f   : > { %p52_p5 = scmp.ne.s32.totalorder %s3511_s26, %s3507_s25  ;;  %p334_p10 = scmp.eq.s32.totalorder %s3009_s24, 1 }
  0x60   : > { %s3736_s22 = scalar_select %p37_p7, %s3515_s27, %s39_s29  }
  0x61   : > { %3190 = dma.hbm_to_vmem [thread:$0]  (!%p3642_p6), %s4919_s11, 4096, %s434_s30, [#allocation12], %s3529_s16, %s3529_s16, %s3530_s1  }
  0x62   : > { %4920 = sst [smem:[#allocation20_spill]] %s3736_s22  ;;  %p48_p8 = por %p47_p2, %p46_p13 }
  0x63   : > { %p3740_p9 = por %p4854_p1, %p52_p5  ;;  %p328_p6 = scmp.eq.s32.totalorder %s3628_s14, 1 }
  0x64   : > { %p3205_p11 = scmp.lt.s32.totalorder %s3519_s28, 2  ;;  %s450_s30 = sand.u32 1, %s3515_s27  }
  0x65   : > { %s4921_s18 = scalar_select %p3740_p9, 1, 0 }
  0x66   : > { %p3747_p12 = por %p328_p6, %p46_p13  ;;  %p3751_p0 = por %p334_p10, %p52_p5 }
  0x67   : > { %s3141_s1 = smul.u32 896, %s450_s30  ;;  %p3756_p7 = pnand %p3205_p11, %p48_p8 }
  0x68   : > { %s4922_s20 = scalar_select %p3747_p12, 1, 0 }
  0x69   : > { %s4923_s16 = scalar_select %p3751_p0, 1, 0 }
  0x6a   : > { %s3034_s21 = smul.u32 14336, %s3519_s28  ;;  %s454_s3 = scalar_lea.vmem [#allocation2], %s3141_s1 }
  0x6b   : > { %s462_s5 = sshll.u32 %s454_s3, 4  ;;  %s3767_s7 = scalar_lea.sflag [#allocation3], %s450_s30  ;;  %s3765_s5 = int_to_ptr.vmem [resolvable:$true] %s462_s5 }
  0x6c   : > { %s3763_s24 = scalar_lea.hbm %s4840_s0, %s3034_s21  ;;  %p3417_p2 = pneg %p3756_p7 }
  0x6d   : > { %s3415_s9 = scalar_lea.hbm %s3763_s24, 14336  ;;  %s3420_s21 = scalar_lea.hbm %s4840_s0, 28672 }
  0x6e   : > { %p3416_p13 = scmp.ne.s32.totalorder %s3763_s24, %s3415_s9  ;;  %p3421_p6 = scmp.lt.s32.totalorder %s3763_s24, %s4840_s0 }
  0x6f   : > { %p3422_p10 = scmp.lt.s32.totalorder %s3420_s21, %s3415_s9 }
  0x70   : > { %p3418_p5 = pnand %p3417_p2, %p3416_p13 }
  0x71   : > { %p3423_p11 = por %p3422_p10, %p3421_p6 }
  0x72   : > { %p3419_p8 = pneg %p3418_p5 }
  0x74   : > { %p3424_p4 = pnand %p3423_p11, %p3419_p8 }
  0x76   : > { %3427 = shalt.err (!%p3424_p4)
}
  0x77   : > { %s3428_s3 = scalar_lea.vmem %s3765_s5, 14336  ;;  %s3531_s30 = smov [#allocation2]  }
  0x78   : > { %p3429_p1 = scmp.ne.s32.totalorder %s3765_s5, %s3428_s3  ;;  %s3433_s1 = sshll.u32 %s3531_s30, 4  ;;  %s3434_s1 = int_to_ptr.vmem [resolvable:$false] %s3433_s1 }
  0x79   : > { %s3435_s11 = scalar_lea.vmem %s3434_s1, 28672  ;;  %p3436_p5 = scmp.lt.s32.totalorder %s3765_s5, %s3434_s1 }
  0x7a   : > { %p3431_p0 = pnand %p3429_p1, %p3417_p2  ;;  %p3437_p12 = scmp.lt.s32.totalorder %s3435_s11, %s3428_s3 }
  0x7c   : > { %p3432_p13 = pneg %p3431_p0  ;;  %p3438_p9 = por %p3437_p12, %p3436_p5 }
  0x7e   : > { %p3439_p3 = pnand %p3438_p9, %p3432_p13 }
  0x80   : > { %3442 = shalt.err (!%p3439_p3)
}
  0x81   : > { %s3532_s9 = smov 1024   ;;  %s3533_s22 = smov 64  }
  0x82   : > { %3194 = dma.hbm_to_vmem [thread:$0]  (!%p3756_p7), %s3763_s24, 14336, %s3765_s5, %s3767_s7, %s3532_s9, %s3532_s9, %s3533_s22  }
  0x83   : > { %p4925_p1 = scmp.ne.s32.totalorder %s4911_s15, 0 }
  0x85   : > { %474 = sbr.rel (%p4925_p1) target bundleno = 1582 (0x62e), region = 72 }
  0x8a   : > { %s3791_s17 = sand.u32 1, %s3511_s26   ;;  %p4926_p3 = scmp.ne.s32.totalorder %s4921_s18, 0 }
  0x8b   : > { %s3142_s21 = smul.u32 896, %s3791_s17  ;;  %s477_s29 = scalar_lea.sflag [#allocation3], %s3791_s17 }
  0x8d   : > { %s3795_s3 = scalar_lea.vmem [#allocation2], %s3142_s21 }
  0x8e   : > { %3486 = dma.done.wait (%p4926_p3), %s477_s29, 14336  }
  0x8f   : > { %3488 = vsyncadd (%p4926_p3), %s477_s29, 4294952960  ;;  %p4927_p4 = scmp.eq.s32.totalorder %s3628_s14, 0 }
  0x91   : > { %3490 = dma.done.wait (%p4927_p4), [#allocation6], 40960   ;;  %p4928_p9 = pmov %p4927_p4 }
  0x92   : > { %p4929_p12 = pmov %p4927_p4 }
  0x93   : > { %3492 = vsyncadd (%p4928_p9), [#allocation6], 4294926336 }
  0x94   : > { %3494 = dma.done.wait (%p4929_p12), [#allocation9], 16384   ;;  %p4930_p0 = pmov %p4927_p4 }
  0x96   : > { %3496 = vsyncadd (%p4930_p0), [#allocation9], 4294950912  ;;  %p4931_p7 = pmov %p4930_p0 }
  0x97   : > { %p4932_p2 = pmov %p4930_p0 }
  0x98   : > { %3498 = dma.done.wait (%p4931_p7), [#allocation12], 12288  }
  0x99   : > { %3500 = vsyncadd (%p4932_p2), [#allocation12], 4294955008  ;;  %v692_v0 = vld [vmem:[#allocation5 + $0xf8] sm:$0xff]  ;;  %v691_v2 = vld [vmem:[#allocation5 + $0xf0] sm:$0xff]  ;;  %s3143_s22 = smul.u32 112, %s3791_s17  ;;  %p4997_p6 = scmp.ne.s32.totalorder %s4922_s20, 0 }
  0x9a   : > { %v756_v1 = vld [vmem:[#allocation5 + $0x2f8] sm:$0xff]  ;;  %929 = vmatprep.subr.mxu0 %v692_v0  ;;  %v755_v3 = vld [vmem:[#allocation5 + $0x2f0] sm:$0xff]  ;;  %v690_v4 = vld [vmem:[#allocation5 + $0xe8] sm:$0xff]  ;;  %s3033_s5 = smul.u32 1792, %s3628_s14  ;;  %s2866_s14 = scalar_lea.sflag [#allocation4], %s3791_s17 }
  0x9b   : > { %1078 = vmatprep.subr.mxu1 %v756_v1  ;;  %v754_v5 = vld [vmem:[#allocation5 + $0x2e8] sm:$0xff]  ;;  %930 = vmatpush1.msra.mxu0 %v691_v2  ;;  %v689_v6 = vld [vmem:[#allocation5 + $0xe0] sm:$0xff]  ;;  %v688_v8 = vld [vmem:[#allocation5 + $0xd8] sm:$0xff]  ;;  %s3534_s30 = smov [#allocation14]  }
  0x9c   : > { %1079 = vmatpush1.msra.mxu1 %v755_v3  ;;  %v753_v7 = vld [vmem:[#allocation5 + $0x2e0] sm:$0xff]  ;;  %931 = vmatprep.subr.mxu0 %v690_v4  ;;  %v752_v9 = vld [vmem:[#allocation5 + $0x2d8] sm:$0xff]  ;;  %v687_v10 = vld [vmem:[#allocation5 + $0xd0] sm:$0xff]  ;;  %s4793_s23 = scalar_lea.hbm %s4853_s13, %s3033_s5  ;;  %s3447_s1 = sshll.u32 %s3534_s30, 4  ;;  %s3448_s1 = int_to_ptr.vmem [resolvable:$false] %s3447_s1 }
  0x9d   : > { %1080 = vmatprep.subr.mxu1 %v754_v5  ;;  %v751_v11 = vld [vmem:[#allocation5 + $0x2d0] sm:$0xff]  ;;  %932 = vmatpush1.msra.mxu0 %v689_v6  ;;  %v686_v12 = vld [vmem:[#allocation5 + $0xc8] sm:$0xff]  ;;  %v685_v14 = vld [vmem:[#allocation5 + $0xc0] sm:$0xff]  ;;  %s3449_s11 = scalar_lea.vmem %s3448_s1, 3584 }
  0x9e   : > { %1081 = vmatpush1.msra.mxu1 %v753_v7  ;;  %v750_v13 = vld [vmem:[#allocation5 + $0x2c8] sm:$0xff]  ;;  %933 = vmatprep.subr.mxu0 %v688_v8  ;;  %v749_v15 = vld [vmem:[#allocation5 + $0x2c0] sm:$0xff]  ;;  %v684_v16 = vld [vmem:[#allocation5 + $0xb8] sm:$0xff] }
  0x9f   : > { %1082 = vmatprep.subr.mxu1 %v752_v9  ;;  %934 = vmatpush1.msra.mxu0 %v687_v10  ;;  %v748_v17 = vld [vmem:[#allocation5 + $0x2b8] sm:$0xff]  ;;  %v683_v18 = vld [vmem:[#allocation5 + $0xb0] sm:$0xff]  ;;  %v682_v20 = vld [vmem:[#allocation5 + $0xa8] sm:$0xff] }
  0xa0   : > { %1083 = vmatpush1.msra.mxu1 %v751_v11  ;;  %935 = vmatprep.subr.mxu0 %v686_v12  ;;  %v747_v19 = vld [vmem:[#allocation5 + $0x2b0] sm:$0xff]  ;;  %v746_v21 = vld [vmem:[#allocation5 + $0x2a8] sm:$0xff]  ;;  %v681_v22 = vld [vmem:[#allocation5 + $0xa0] sm:$0xff] }
  0xa1   : > { %1084 = vmatprep.subr.mxu1 %v750_v13  ;;  %936 = vmatpush1.msra.mxu0 %v685_v14  ;;  %v745_v23 = vld [vmem:[#allocation5 + $0x2a0] sm:$0xff]  ;;  %v680_v24 = vld [vmem:[#allocation5 + $0x98] sm:$0xff]  ;;  %v679_v26 = vld [vmem:[#allocation5 + $0x90] sm:$0xff] }
  0xa2   : > { %1085 = vmatpush1.msra.mxu1 %v749_v15  ;;  %937 = vmatprep.subr.mxu0 %v684_v16  ;;  %v744_v25 = vld [vmem:[#allocation5 + $0x298] sm:$0xff]  ;;  %v743_v27 = vld [vmem:[#allocation5 + $0x290] sm:$0xff]  ;;  %v678_v28 = vld [vmem:[#allocation5 + $0x88] sm:$0xff] }
  0xa3   : > { %1086 = vmatprep.subr.mxu1 %v748_v17  ;;  %938 = vmatpush1.msra.mxu0 %v683_v18  ;;  %v742_v29 = vld [vmem:[#allocation5 + $0x288] sm:$0xff]  ;;  %v677_v30 = vld [vmem:[#allocation5 + $0x80] sm:$0xff]  ;;  %v676_v32 = vld [vmem:[#allocation5 + $0x78] sm:$0xff] }
  0xa4   : > { %1087 = vmatpush1.msra.mxu1 %v747_v19  ;;  %939 = vmatprep.subr.mxu0 %v682_v20  ;;  %v741_v31 = vld [vmem:[#allocation5 + $0x280] sm:$0xff]  ;;  %v740_v33 = vld [vmem:[#allocation5 + $0x278] sm:$0xff]  ;;  %v675_v34 = vld [vmem:[#allocation5 + $0x70] sm:$0xff] }
  0xa5   : > { %1088 = vmatprep.subr.mxu1 %v746_v21  ;;  %940 = vmatpush1.msra.mxu0 %v681_v22  ;;  %v739_v35 = vld [vmem:[#allocation5 + $0x270] sm:$0xff]  ;;  %v674_v36 = vld [vmem:[#allocation5 + $0x68] sm:$0xff]  ;;  %v673_v38 = vld [vmem:[#allocation5 + $0x60] sm:$0xff] }
  0xa6   : > { %1089 = vmatpush1.msra.mxu1 %v745_v23  ;;  %941 = vmatprep.subr.mxu0 %v680_v24  ;;  %v738_v37 = vld [vmem:[#allocation5 + $0x268] sm:$0xff]  ;;  %v737_v39 = vld [vmem:[#allocation5 + $0x260] sm:$0xff]  ;;  %v672_v40 = vld [vmem:[#allocation5 + $0x58] sm:$0xff] }
  0xa7   : > { %1090 = vmatprep.subr.mxu1 %v744_v25  ;;  %942 = vmatpush1.msra.mxu0 %v679_v26  ;;  %v736_v41 = vld [vmem:[#allocation5 + $0x258] sm:$0xff]  ;;  %v671_v42 = vld [vmem:[#allocation5 + $0x50] sm:$0xff]  ;;  %v670_v44 = vld [vmem:[#allocation5 + $0x48] sm:$0xff] }
  0xa8   : > { %1091 = vmatpush1.msra.mxu1 %v743_v27  ;;  %943 = vmatprep.subr.mxu0 %v678_v28  ;;  %v735_v43 = vld [vmem:[#allocation5 + $0x250] sm:$0xff]  ;;  %v734_v45 = vld [vmem:[#allocation5 + $0x248] sm:$0xff]  ;;  %v669_v46 = vld [vmem:[#allocation5 + $0x40] sm:$0xff] }
  0xa9   : > { %1092 = vmatprep.subr.mxu1 %v742_v29  ;;  %944 = vmatpush1.msra.mxu0 %v677_v30  ;;  %v733_v47 = vld [vmem:[#allocation5 + $0x240] sm:$0xff]  ;;  %v668_v48 = vld [vmem:[#allocation5 + $0x38] sm:$0xff]  ;;  %v667_v50 = vld [vmem:[#allocation5 + $0x30] sm:$0xff] }
  0xaa   : > { %1093 = vmatpush1.msra.mxu1 %v741_v31  ;;  %945 = vmatprep.subr.mxu0 %v676_v32  ;;  %v732_v49 = vld [vmem:[#allocation5 + $0x238] sm:$0xff]  ;;  %v731_v51 = vld [vmem:[#allocation5 + $0x230] sm:$0xff]  ;;  %v666_v52 = vld [vmem:[#allocation5 + $0x28] sm:$0xff] }
  0xab   : > { %1094 = vmatprep.subr.mxu1 %v740_v33  ;;  %946 = vmatpush1.msra.mxu0 %v675_v34  ;;  %v730_v53 = vld [vmem:[#allocation5 + $0x228] sm:$0xff]  ;;  %v665_v54 = vld [vmem:[#allocation5 + $0x20] sm:$0xff]  ;;  %v664_v56 = vld [vmem:[#allocation5 + $0x18] sm:$0xff] }
  0xac   : > { %1095 = vmatpush1.msra.mxu1 %v739_v35  ;;  %947 = vmatprep.subr.mxu0 %v674_v36  ;;  %v729_v55 = vld [vmem:[#allocation5 + $0x220] sm:$0xff]  ;;  %v728_v57 = vld [vmem:[#allocation5 + $0x218] sm:$0xff]  ;;  %v663_v58 = vld [vmem:[#allocation5 + $0x10] sm:$0xff] }
  0xad   : > { %1096 = vmatprep.subr.mxu1 %v738_v37  ;;  %948 = vmatpush1.msra.mxu0 %v673_v38  ;;  %v727_v59 = vld [vmem:[#allocation5 + $0x210] sm:$0xff]  ;;  %v662_v60 = vld [vmem:[#allocation5 + $0x8] sm:$0xff]  ;;  %v661_v62 = vld [vmem:[#allocation5] sm:$0xff] }
  0xae   : > { %1097 = vmatpush1.msra.mxu1 %v737_v39  ;;  %949 = vmatprep.subr.mxu0 %v672_v40  ;;  %v726_v61 = vld [vmem:[#allocation5 + $0x208] sm:$0xff]  ;;  %v725_v63 = vld [vmem:[#allocation5 + $0x200] sm:$0xff]  ;;  %v724_v0 = vld [vmem:[#allocation5 + $0x1f8] sm:$0xff] }
  0xaf   : > { %1098 = vmatprep.subr.mxu1 %v736_v41  ;;  %950 = vmatpush1.msra.mxu0 %v671_v42  ;;  %v788_v1 = vld [vmem:[#allocation5 + $0x3f8] sm:$0xff]  ;;  %v723_v2 = vld [vmem:[#allocation5 + $0x1f0] sm:$0xff]  ;;  %v722_v4 = vld [vmem:[#allocation5 + $0x1e8] sm:$0xff] }
  0xb0   : > { %1099 = vmatpush1.msra.mxu1 %v735_v43  ;;  %951 = vmatprep.subr.mxu0 %v670_v44  ;;  %v787_v3 = vld [vmem:[#allocation5 + $0x3f0] sm:$0xff]  ;;  %v786_v5 = vld [vmem:[#allocation5 + $0x3e8] sm:$0xff]  ;;  %v721_v6 = vld [vmem:[#allocation5 + $0x1e0] sm:$0xff] }
  0xb1   : > { %1100 = vmatprep.subr.mxu1 %v734_v45  ;;  %952 = vmatpush1.msra.mxu0 %v669_v46  ;;  %v785_v7 = vld [vmem:[#allocation5 + $0x3e0] sm:$0xff]  ;;  %v720_v8 = vld [vmem:[#allocation5 + $0x1d8] sm:$0xff]  ;;  %v719_v10 = vld [vmem:[#allocation5 + $0x1d0] sm:$0xff] }
  0xb2   : > { %1101 = vmatpush1.msra.mxu1 %v733_v47  ;;  %953 = vmatprep.subr.mxu0 %v668_v48  ;;  %v784_v9 = vld [vmem:[#allocation5 + $0x3d8] sm:$0xff]  ;;  %v783_v11 = vld [vmem:[#allocation5 + $0x3d0] sm:$0xff]  ;;  %v718_v12 = vld [vmem:[#allocation5 + $0x1c8] sm:$0xff] }
  0xb3   : > { %1102 = vmatprep.subr.mxu1 %v732_v49  ;;  %954 = vmatpush1.msra.mxu0 %v667_v50  ;;  %v782_v13 = vld [vmem:[#allocation5 + $0x3c8] sm:$0xff]  ;;  %v717_v14 = vld [vmem:[#allocation5 + $0x1c0] sm:$0xff]  ;;  %v716_v16 = vld [vmem:[#allocation5 + $0x1b8] sm:$0xff] }
  0xb4   : > { %1103 = vmatpush1.msra.mxu1 %v731_v51  ;;  %955 = vmatprep.subr.mxu0 %v666_v52  ;;  %v781_v15 = vld [vmem:[#allocation5 + $0x3c0] sm:$0xff]  ;;  %v780_v17 = vld [vmem:[#allocation5 + $0x3b8] sm:$0xff]  ;;  %v715_v18 = vld [vmem:[#allocation5 + $0x1b0] sm:$0xff] }
  0xb5   : > { %1104 = vmatprep.subr.mxu1 %v730_v53  ;;  %956 = vmatpush1.msra.mxu0 %v665_v54  ;;  %v779_v19 = vld [vmem:[#allocation5 + $0x3b0] sm:$0xff]  ;;  %v714_v20 = vld [vmem:[#allocation5 + $0x1a8] sm:$0xff]  ;;  %v713_v22 = vld [vmem:[#allocation5 + $0x1a0] sm:$0xff] }
  0xb6   : > { %1105 = vmatpush1.msra.mxu1 %v729_v55  ;;  %957 = vmatprep.subr.mxu0 %v664_v56  ;;  %v778_v21 = vld [vmem:[#allocation5 + $0x3a8] sm:$0xff]  ;;  %v777_v23 = vld [vmem:[#allocation5 + $0x3a0] sm:$0xff]  ;;  %v712_v24 = vld [vmem:[#allocation5 + $0x198] sm:$0xff] }
  0xb7   : > { %1106 = vmatprep.subr.mxu1 %v728_v57  ;;  %958 = vmatpush1.msra.mxu0 %v663_v58  ;;  %v776_v25 = vld [vmem:[#allocation5 + $0x398] sm:$0xff]  ;;  %v711_v26 = vld [vmem:[#allocation5 + $0x190] sm:$0xff]  ;;  %v710_v28 = vld [vmem:[#allocation5 + $0x188] sm:$0xff] }
  0xb8   : > { %1107 = vmatpush1.msra.mxu1 %v727_v59  ;;  %959 = vmatprep.subr.mxu0 %v662_v60  ;;  %v775_v27 = vld [vmem:[#allocation5 + $0x390] sm:$0xff]  ;;  %v774_v29 = vld [vmem:[#allocation5 + $0x388] sm:$0xff]  ;;  %v709_v30 = vld [vmem:[#allocation5 + $0x180] sm:$0xff] }
  0xb9   : > { %1108 = vmatprep.subr.mxu1 %v726_v61  ;;  %960 = vmatpush1.msra.mxu0 %v661_v62  ;;  %v773_v31 = vld [vmem:[#allocation5 + $0x380] sm:$0xff]  ;;  %v708_v32 = vld [vmem:[#allocation5 + $0x178] sm:$0xff]  ;;  %v707_v34 = vld [vmem:[#allocation5 + $0x170] sm:$0xff] }
  0xba   : > { %1109 = vmatpush1.msra.mxu1 %v725_v63  ;;  %961 = vmatprep.subr.mxu0 %v724_v0  ;;  %v772_v33 = vld [vmem:[#allocation5 + $0x378] sm:$0xff]  ;;  %v771_v35 = vld [vmem:[#allocation5 + $0x370] sm:$0xff]  ;;  %v706_v36 = vld [vmem:[#allocation5 + $0x168] sm:$0xff] }
  0xbb   : > { %1110 = vmatprep.subr.mxu1 %v788_v1  ;;  %962 = vmatpush2.msra.mxu0 %v723_v2  ;;  %v770_v37 = vld [vmem:[#allocation5 + $0x368] sm:$0xff]  ;;  %v705_v38 = vld [vmem:[#allocation5 + $0x160] sm:$0xff]  ;;  %v704_v40 = vld [vmem:[#allocation5 + $0x158] sm:$0xff] }
  0xbc   : > { %1111 = vmatpush2.msra.mxu1 %v787_v3  ;;  %963 = vmatprep.subr.mxu0 %v722_v4  ;;  %v769_v39 = vld [vmem:[#allocation5 + $0x360] sm:$0xff]  ;;  %v768_v41 = vld [vmem:[#allocation5 + $0x358] sm:$0xff]  ;;  %v703_v42 = vld [vmem:[#allocation5 + $0x150] sm:$0xff] }
  0xbd   : > { %1112 = vmatprep.subr.mxu1 %v786_v5  ;;  %964 = vmatpush2.msra.mxu0 %v721_v6  ;;  %v767_v43 = vld [vmem:[#allocation5 + $0x350] sm:$0xff]  ;;  %v702_v44 = vld [vmem:[#allocation5 + $0x148] sm:$0xff]  ;;  %v701_v46 = vld [vmem:[#allocation5 + $0x140] sm:$0xff] }
  0xbe   : > { %1113 = vmatpush2.msra.mxu1 %v785_v7  ;;  %965 = vmatprep.subr.mxu0 %v720_v8  ;;  %v766_v45 = vld [vmem:[#allocation5 + $0x348] sm:$0xff]  ;;  %v765_v47 = vld [vmem:[#allocation5 + $0x340] sm:$0xff]  ;;  %v700_v48 = vld [vmem:[#allocation5 + $0x138] sm:$0xff] }
  0xbf   : > { %1114 = vmatprep.subr.mxu1 %v784_v9  ;;  %966 = vmatpush2.msra.mxu0 %v719_v10  ;;  %v764_v49 = vld [vmem:[#allocation5 + $0x338] sm:$0xff]  ;;  %v699_v50 = vld [vmem:[#allocation5 + $0x130] sm:$0xff]  ;;  %v698_v52 = vld [vmem:[#allocation5 + $0x128] sm:$0xff] }
  0xc0   : > { %1115 = vmatpush2.msra.mxu1 %v783_v11  ;;  %967 = vmatprep.subr.mxu0 %v718_v12  ;;  %v763_v51 = vld [vmem:[#allocation5 + $0x330] sm:$0xff]  ;;  %v762_v53 = vld [vmem:[#allocation5 + $0x328] sm:$0xff]  ;;  %v697_v54 = vld [vmem:[#allocation5 + $0x120] sm:$0xff] }
  0xc1   : > { %1116 = vmatprep.subr.mxu1 %v782_v13  ;;  %968 = vmatpush2.msra.mxu0 %v717_v14  ;;  %v761_v55 = vld [vmem:[#allocation5 + $0x320] sm:$0xff]  ;;  %v696_v56 = vld [vmem:[#allocation5 + $0x118] sm:$0xff]  ;;  %v695_v58 = vld [vmem:[#allocation5 + $0x110] sm:$0xff] }
  0xc2   : > { %1117 = vmatpush2.msra.mxu1 %v781_v15  ;;  %969 = vmatprep.subr.mxu0 %v716_v16  ;;  %v760_v57 = vld [vmem:[#allocation5 + $0x318] sm:$0xff]  ;;  %v759_v59 = vld [vmem:[#allocation5 + $0x310] sm:$0xff]  ;;  %v694_v60 = vld [vmem:[#allocation5 + $0x108] sm:$0xff] }
  0xc3   : > { %1118 = vmatprep.subr.mxu1 %v780_v17  ;;  %970 = vmatpush2.msra.mxu0 %v715_v18  ;;  %v758_v61 = vld [vmem:[#allocation5 + $0x308] sm:$0xff]  ;;  %v693_v62 = vld [vmem:[#allocation5 + $0x100] sm:$0xff]  ;;  %v552_v2 = vld [vmem:[%s3795_s3 + $0x18] sm:$0xff] }
  0xc4   : > { %1119 = vmatpush2.msra.mxu1 %v779_v19  ;;  %971 = vmatprep.subr.mxu0 %v714_v20  ;;  %v550_v63 = vld [vmem:[%s3795_s3 + $0x8] sm:$0xff]  ;;  %v757_v0 = vld [vmem:[#allocation5 + $0x300] sm:$0xff]  ;;  %v820_v3 = vld [vmem:[#allocation5 + $0x4f8] sm:$0xff] }
  0xc5   : > { %1120 = vmatprep.subr.mxu1 %v778_v21  ;;  %972 = vmatpush2.msra.mxu0 %v713_v22  ;;  %v549_v1 = vld [vmem:[%s3795_s3] sm:$0xff]  ;;  %v884_v4 = vld [vmem:[#allocation5 + $0x6f8] sm:$0xff]  ;;  %v551_v5 = vld [vmem:[%s3795_s3 + $0x10] sm:$0xff] }
  0xc6   : > { %1121 = vmatpush2.msra.mxu1 %v777_v23  ;;  %973 = vmatprep.subr.mxu0 %v712_v24  ;;  %v819_v6 = vld [vmem:[#allocation5 + $0x4f0] sm:$0xff]  ;;  %v818_v8 = vld [vmem:[#allocation5 + $0x4e8] sm:$0xff]  ;;  %v817_v10 = vld [vmem:[#allocation5 + $0x4e0] sm:$0xff] }
  0xc7   : > { %1122 = vmatprep.subr.mxu1 %v776_v25  ;;  %974 = vmatpush2.msra.mxu0 %v711_v26  ;;  %v883_v7 = vld [vmem:[#allocation5 + $0x6f0] sm:$0xff]  ;;  %v882_v9 = vld [vmem:[#allocation5 + $0x6e8] sm:$0xff]  ;;  %v881_v11 = vld [vmem:[#allocation5 + $0x6e0] sm:$0xff] }
  0xc8   : > { %1123 = vmatpush2.msra.mxu1 %v775_v27  ;;  %975 = vmatprep.subr.mxu0 %v710_v28  ;;  %v816_v12 = vld [vmem:[#allocation5 + $0x4d8] sm:$0xff]  ;;  %v815_v14 = vld [vmem:[#allocation5 + $0x4d0] sm:$0xff]  ;;  %v814_v16 = vld [vmem:[#allocation5 + $0x4c8] sm:$0xff] }
  0xc9   : > { %1124 = vmatprep.subr.mxu1 %v774_v29  ;;  %976 = vmatpush2.msra.mxu0 %v709_v30  ;;  %v880_v13 = vld [vmem:[#allocation5 + $0x6d8] sm:$0xff]  ;;  %v879_v15 = vld [vmem:[#allocation5 + $0x6d0] sm:$0xff]  ;;  %v878_v17 = vld [vmem:[#allocation5 + $0x6c8] sm:$0xff] }
  0xca   : > { %1125 = vmatpush2.msra.mxu1 %v773_v31  ;;  %977 = vmatprep.subr.mxu0 %v708_v32  ;;  %v813_v18 = vld [vmem:[#allocation5 + $0x4c0] sm:$0xff]  ;;  %v812_v20 = vld [vmem:[#allocation5 + $0x4b8] sm:$0xff]  ;;  %v558_v22 = vld [vmem:[%s3795_s3 + $0x48] sm:$0xff] }
  0xcb   : > { %1126 = vmatprep.subr.mxu1 %v772_v33  ;;  %978 = vmatpush2.msra.mxu0 %v707_v34  ;;  %v877_v19 = vld [vmem:[#allocation5 + $0x6c0] sm:$0xff]  ;;  %v876_v21 = vld [vmem:[#allocation5 + $0x6b8] sm:$0xff]  ;;  %v811_v23 = vld [vmem:[#allocation5 + $0x4b0] sm:$0xff] }
  0xcc   : > { %1127 = vmatpush2.msra.mxu1 %v771_v35  ;;  %979 = vmatprep.subr.mxu0 %v706_v36  ;;  %v875_v24 = vld [vmem:[#allocation5 + $0x6b0] sm:$0xff]  ;;  %v557_v25 = vld [vmem:[%s3795_s3 + $0x40] sm:$0xff]  ;;  %v810_v26 = vld [vmem:[#allocation5 + $0x4a8] sm:$0xff] }
  0xcd   : > { %1128 = vmatprep.subr.mxu1 %v770_v37  ;;  %980 = vmatpush2.msra.mxu0 %v705_v38  ;;  %v874_v27 = vld [vmem:[#allocation5 + $0x6a8] sm:$0xff]  ;;  %v560_v28 = vld [vmem:[%s3795_s3 + $0x58] sm:$0xff]  ;;  %v809_v29 = vld [vmem:[#allocation5 + $0x4a0] sm:$0xff] }
  0xce   : > { %1129 = vmatpush2.msra.mxu1 %v769_v39  ;;  %981 = vmatprep.subr.mxu0 %v704_v40  ;;  %v873_v30 = vld [vmem:[#allocation5 + $0x6a0] sm:$0xff]  ;;  %v808_v31 = vld [vmem:[#allocation5 + $0x498] sm:$0xff]  ;;  %v559_v32 = vld [vmem:[%s3795_s3 + $0x50] sm:$0xff] }
  0xcf   : > { %1130 = vmatprep.subr.mxu1 %v768_v41  ;;  %982 = vmatpush2.msra.mxu0 %v703_v42  ;;  %v872_v33 = vld [vmem:[#allocation5 + $0x698] sm:$0xff]  ;;  %v566_v34 = vld [vmem:[%s3795_s3 + $0x88] sm:$0xff]  ;;  %v807_v35 = vld [vmem:[#allocation5 + $0x490] sm:$0xff] }
  0xd0   : > { %1131 = vmatpush2.msra.mxu1 %v767_v43  ;;  %983 = vmatprep.subr.mxu0 %v702_v44  ;;  %v871_v36 = vld [vmem:[#allocation5 + $0x690] sm:$0xff]  ;;  %v565_v37 = vld [vmem:[%s3795_s3 + $0x80] sm:$0xff]  ;;  %v806_v38 = vld [vmem:[#allocation5 + $0x488] sm:$0xff] }
  0xd1   : > { %1132 = vmatprep.subr.mxu1 %v766_v45  ;;  %984 = vmatpush2.msra.mxu0 %v701_v46  ;;  %v870_v39 = vld [vmem:[#allocation5 + $0x688] sm:$0xff]  ;;  %v568_v40 = vld [vmem:[%s3795_s3 + $0x98] sm:$0xff]  ;;  %v805_v41 = vld [vmem:[#allocation5 + $0x480] sm:$0xff] }
  0xd2   : > { %1133 = vmatpush2.msra.mxu1 %v765_v47  ;;  %985 = vmatprep.subr.mxu0 %v700_v48  ;;  %v869_v42 = vld [vmem:[#allocation5 + $0x680] sm:$0xff]  ;;  %v804_v43 = vld [vmem:[#allocation5 + $0x478] sm:$0xff]  ;;  %v567_v44 = vld [vmem:[%s3795_s3 + $0x90] sm:$0xff] }
  0xd3   : > { %1134 = vmatprep.subr.mxu1 %v764_v49  ;;  %986 = vmatpush2.msra.mxu0 %v699_v50  ;;  %v868_v45 = vld [vmem:[#allocation5 + $0x678] sm:$0xff]  ;;  %v574_v46 = vld [vmem:[%s3795_s3 + $0xc8] sm:$0xff]  ;;  %v803_v47 = vld [vmem:[#allocation5 + $0x470] sm:$0xff] }
  0xd4   : > { %1135 = vmatpush2.msra.mxu1 %v763_v51  ;;  %987 = vmatprep.subr.mxu0 %v698_v52  ;;  %v867_v48 = vld [vmem:[#allocation5 + $0x670] sm:$0xff]  ;;  %v573_v49 = vld [vmem:[%s3795_s3 + $0xc0] sm:$0xff]  ;;  %v802_v50 = vld [vmem:[#allocation5 + $0x468] sm:$0xff] }
  0xd5   : > { %1136 = vmatprep.subr.mxu1 %v762_v53  ;;  %988 = vmatpush2.msra.mxu0 %v697_v54  ;;  %v866_v51 = vld [vmem:[#allocation5 + $0x668] sm:$0xff]  ;;  %v576_v52 = vld [vmem:[%s3795_s3 + $0xd8] sm:$0xff]  ;;  %v801_v53 = vld [vmem:[#allocation5 + $0x460] sm:$0xff] }
  0xd6   : > { %1137 = vmatpush2.msra.mxu1 %v761_v55  ;;  %989 = vmatprep.subr.mxu0 %v696_v56  ;;  %v865_v54 = vld [vmem:[#allocation5 + $0x660] sm:$0xff]  ;;  %v800_v55 = vld [vmem:[#allocation5 + $0x458] sm:$0xff]  ;;  %v575_v56 = vld [vmem:[%s3795_s3 + $0xd0] sm:$0xff] }
  0xd7   : > { %1138 = vmatprep.subr.mxu1 %v760_v57  ;;  %990 = vmatpush2.msra.mxu0 %v695_v58  ;;  %v864_v57 = vld [vmem:[#allocation5 + $0x658] sm:$0xff]  ;;  %v582_v58 = vld [vmem:[%s3795_s3 + $0x108] sm:$0xff] }
  0xd8   : > { %1139 = vmatpush2.msra.mxu1 %v759_v59  ;;  %991 = vmatprep.subr.mxu0 %v694_v60  ;;  %v799_v59 = vld [vmem:[#allocation5 + $0x450] sm:$0xff] }
  0xd9   : > { %1140 = vmatprep.subr.mxu1 %v758_v61  ;;  %992 = vmatpush2.msra.mxu0 %v693_v62  ;;  %v863_v60 = vld [vmem:[#allocation5 + $0x650] sm:$0xff]  ;;  %v581_v61 = vld [vmem:[%s3795_s3 + $0x100] sm:$0xff]  ;;  %v798_v62 = vld [vmem:[#allocation5 + $0x448] sm:$0xff] }
  0xda   : > { %993 = vmatprep.mubr.f32.mxu0 %v550_v63  ;;  %1141 = vmatpush2.msra.mxu1 %v757_v0  ;;  %v862_v63 = vld [vmem:[#allocation5 + $0x648] sm:$0xff]  ;;  %v584_v0 = vld [vmem:[%s3795_s3 + $0x118] sm:$0xff] }
  0xdb   : > { %994 = vmatmul.mubr.f32.vlgmr.msra.gmra.mxu0 %v549_v1  ;;  %1142 = vmatprep.mubr.f32.mxu1 %v552_v2  ;;  %v797_v1 = vld [vmem:[#allocation5 + $0x440] sm:$0xff] }
  0xdc   : > { %1227 = vmatprep.subr.mxu0 %v820_v3  ;;  %1376 = vmatprep.subr.mxu1 %v884_v4  ;;  %v861_v2 = vld [vmem:[#allocation5 + $0x640] sm:$0xff]  ;;  %v796_v3 = vld [vmem:[#allocation5 + $0x438] sm:$0xff]  ;;  %v583_v4 = vld [vmem:[%s3795_s3 + $0x110] sm:$0xff] }
  0xdd   : > { %1143 = vmatmul.mubr.f32.vlgmr.msra.gmra.mxu1 %v551_v5  ;;  %1228 = vmatpush1.msra.mxu0 %v819_v6  ;;  %v860_v5 = vld [vmem:[#allocation5 + $0x638] sm:$0xff]  ;;  %v590_v6 = vld [vmem:[%s3795_s3 + $0x148] sm:$0xff] }
  0xde   : > { %1377 = vmatpush1.msra.mxu1 %v883_v7  ;;  %1229 = vmatprep.subr.mxu0 %v818_v8  ;;  %v795_v7 = vld [vmem:[#allocation5 + $0x430] sm:$0xff] }
  0xdf   : > { %1378 = vmatprep.subr.mxu1 %v882_v9  ;;  %1230 = vmatpush1.msra.mxu0 %v817_v10  ;;  %v859_v8 = vld [vmem:[#allocation5 + $0x630] sm:$0xff]  ;;  %v589_v9 = vld [vmem:[%s3795_s3 + $0x140] sm:$0xff]  ;;  %v794_v10 = vld [vmem:[#allocation5 + $0x428] sm:$0xff] }
  0xe0   : > { %1379 = vmatpush1.msra.mxu1 %v881_v11  ;;  %1231 = vmatprep.subr.mxu0 %v816_v12  ;;  %v858_v11 = vld [vmem:[#allocation5 + $0x628] sm:$0xff]  ;;  %v592_v12 = vld [vmem:[%s3795_s3 + $0x158] sm:$0xff] }
  0xe1   : > { %1380 = vmatprep.subr.mxu1 %v880_v13  ;;  %1232 = vmatpush1.msra.mxu0 %v815_v14  ;;  %v793_v13 = vld [vmem:[#allocation5 + $0x420] sm:$0xff] }
  0xe2   : > { %1381 = vmatpush1.msra.mxu1 %v879_v15  ;;  %1233 = vmatprep.subr.mxu0 %v814_v16  ;;  %v857_v14 = vld [vmem:[#allocation5 + $0x620] sm:$0xff]  ;;  %v792_v15 = vld [vmem:[#allocation5 + $0x418] sm:$0xff]  ;;  %v591_v16 = vld [vmem:[%s3795_s3 + $0x150] sm:$0xff] }
  0xe3   : > { %1382 = vmatprep.subr.mxu1 %v878_v17  ;;  %1234 = vmatpush1.msra.mxu0 %v813_v18  ;;  %v856_v17 = vld [vmem:[#allocation5 + $0x618] sm:$0xff]  ;;  %v598_v18 = vld [vmem:[%s3795_s3 + $0x188] sm:$0xff] }
  0xe4   : > { %1383 = vmatpush1.msra.mxu1 %v877_v19  ;;  %1235 = vmatprep.subr.mxu0 %v812_v20  ;;  %v791_v19 = vld [vmem:[#allocation5 + $0x410] sm:$0xff] }
  0xe5   : > { %1384 = vmatprep.subr.mxu1 %v876_v21  ;;  %999 = vmatprep.mubr.f32.mxu0 %v558_v22  ;;  %v855_v20 = vld [vmem:[#allocation5 + $0x610] sm:$0xff]  ;;  %v597_v21 = vld [vmem:[%s3795_s3 + $0x180] sm:$0xff]  ;;  %v790_v22 = vld [vmem:[#allocation5 + $0x408] sm:$0xff] }
  0xe6   : > { %1236 = vmatpush1.msra.mxu0 %v811_v23  ;;  %1385 = vmatpush1.msra.mxu1 %v875_v24  ;;  %v854_v23 = vld [vmem:[#allocation5 + $0x608] sm:$0xff]  ;;  %v600_v24 = vld [vmem:[%s3795_s3 + $0x198] sm:$0xff] }
  0xe7   : > { %1000 = vmatmul.mubr.f32.gmra.mxu0 %v557_v25  ;;  %1237 = vmatprep.subr.mxu0 %v810_v26  ;;  %v789_v25 = vld [vmem:[#allocation5 + $0x400] sm:$0xff] }
  0xe8   : > { %1386 = vmatprep.subr.mxu1 %v874_v27  ;;  %1148 = vmatprep.mubr.f32.mxu1 %v560_v28  ;;  %v853_v26 = vld [vmem:[#allocation5 + $0x600] sm:$0xff]  ;;  %v852_v27 = vld [vmem:[#allocation5 + $0x5f8] sm:$0xff]  ;;  %v599_v28 = vld [vmem:[%s3795_s3 + $0x190] sm:$0xff] }
  0xe9   : > { %1238 = vmatpush1.msra.mxu0 %v809_v29  ;;  %1387 = vmatpush1.msra.mxu1 %v873_v30  ;;  %v916_v29 = vld [vmem:[#allocation5 + $0x7f8] sm:$0xff]  ;;  %v606_v30 = vld [vmem:[%s3795_s3 + $0x1c8] sm:$0xff] }
  0xea   : > { %1239 = vmatprep.subr.mxu0 %v808_v31  ;;  %1149 = vmatmul.mubr.f32.gmra.mxu1 %v559_v32  ;;  %v851_v31 = vld [vmem:[#allocation5 + $0x5f0] sm:$0xff] }
  0xeb   : > { %1388 = vmatprep.subr.mxu1 %v872_v33  ;;  %1005 = vmatprep.mubr.f32.mxu0 %v566_v34  ;;  %v915_v32 = vld [vmem:[#allocation5 + $0x7f0] sm:$0xff]  ;;  %v605_v33 = vld [vmem:[%s3795_s3 + $0x1c0] sm:$0xff]  ;;  %v850_v34 = vld [vmem:[#allocation5 + $0x5e8] sm:$0xff] }
  0xec   : > { %1240 = vmatpush1.msra.mxu0 %v807_v35  ;;  %1389 = vmatpush1.msra.mxu1 %v871_v36  ;;  %v914_v35 = vld [vmem:[#allocation5 + $0x7e8] sm:$0xff]  ;;  %v608_v36 = vld [vmem:[%s3795_s3 + $0x1d8] sm:$0xff] }
  0xed   : > { %1006 = vmatmul.mubr.f32.gmra.mxu0 %v565_v37  ;;  %1241 = vmatprep.subr.mxu0 %v806_v38  ;;  %v849_v37 = vld [vmem:[#allocation5 + $0x5e0] sm:$0xff] }
  0xee   : > { %1390 = vmatprep.subr.mxu1 %v870_v39  ;;  %1154 = vmatprep.mubr.f32.mxu1 %v568_v40  ;;  %v913_v38 = vld [vmem:[#allocation5 + $0x7e0] sm:$0xff]  ;;  %v848_v39 = vld [vmem:[#allocation5 + $0x5d8] sm:$0xff]  ;;  %v607_v40 = vld [vmem:[%s3795_s3 + $0x1d0] sm:$0xff] }
  0xef   : > { %1242 = vmatpush1.msra.mxu0 %v805_v41  ;;  %1391 = vmatpush1.msra.mxu1 %v869_v42  ;;  %v912_v41 = vld [vmem:[#allocation5 + $0x7d8] sm:$0xff]  ;;  %v614_v42 = vld [vmem:[%s3795_s3 + $0x208] sm:$0xff] }
  0xf0   : > { %1243 = vmatprep.subr.mxu0 %v804_v43  ;;  %1155 = vmatmul.mubr.f32.gmra.mxu1 %v567_v44  ;;  %v847_v43 = vld [vmem:[#allocation5 + $0x5d0] sm:$0xff] }
  0xf1   : > { %1392 = vmatprep.subr.mxu1 %v868_v45  ;;  %1011 = vmatprep.mubr.f32.mxu0 %v574_v46  ;;  %v911_v44 = vld [vmem:[#allocation5 + $0x7d0] sm:$0xff]  ;;  %v613_v45 = vld [vmem:[%s3795_s3 + $0x200] sm:$0xff]  ;;  %v846_v46 = vld [vmem:[#allocation5 + $0x5c8] sm:$0xff] }
  0xf2   : > { %1244 = vmatpush1.msra.mxu0 %v803_v47  ;;  %1393 = vmatpush1.msra.mxu1 %v867_v48  ;;  %v910_v47 = vld [vmem:[#allocation5 + $0x7c8] sm:$0xff]  ;;  %v616_v48 = vld [vmem:[%s3795_s3 + $0x218] sm:$0xff] }
  0xf3   : > { %1012 = vmatmul.mubr.f32.gmra.mxu0 %v573_v49  ;;  %1245 = vmatprep.subr.mxu0 %v802_v50  ;;  %v845_v49 = vld [vmem:[#allocation5 + $0x5c0] sm:$0xff] }
  0xf4   : > { %1394 = vmatprep.subr.mxu1 %v866_v51  ;;  %1160 = vmatprep.mubr.f32.mxu1 %v576_v52  ;;  %v909_v50 = vld [vmem:[#allocation5 + $0x7c0] sm:$0xff]  ;;  %v844_v51 = vld [vmem:[#allocation5 + $0x5b8] sm:$0xff]  ;;  %v615_v52 = vld [vmem:[%s3795_s3 + $0x210] sm:$0xff] }
  0xf5   : > { %1246 = vmatpush1.msra.mxu0 %v801_v53  ;;  %1395 = vmatpush1.msra.mxu1 %v865_v54  ;;  %v908_v53 = vld [vmem:[#allocation5 + $0x7b8] sm:$0xff]  ;;  %v622_v54 = vld [vmem:[%s3795_s3 + $0x248] sm:$0xff] }
  0xf6   : > { %1247 = vmatprep.subr.mxu0 %v800_v55  ;;  %1161 = vmatmul.mubr.f32.gmra.mxu1 %v575_v56  ;;  %v843_v55 = vld [vmem:[#allocation5 + $0x5b0] sm:$0xff] }
  0xf7   : > { %1396 = vmatprep.subr.mxu1 %v864_v57  ;;  %1017 = vmatprep.mubr.f32.mxu0 %v582_v58  ;;  %v907_v56 = vld [vmem:[#allocation5 + $0x7b0] sm:$0xff]  ;;  %v621_v57 = vld [vmem:[%s3795_s3 + $0x240] sm:$0xff]  ;;  %v842_v58 = vld [vmem:[#allocation5 + $0x5a8] sm:$0xff] }
  0xf8   : > { %1248 = vmatpush1.msra.mxu0 %v799_v59  ;;  %1397 = vmatpush1.msra.mxu1 %v863_v60  ;;  %v906_v59 = vld [vmem:[#allocation5 + $0x7a8] sm:$0xff]  ;;  %v624_v60 = vld [vmem:[%s3795_s3 + $0x258] sm:$0xff] }
  0xf9   : > { %1018 = vmatmul.mubr.f32.gmra.mxu0 %v581_v61  ;;  %1249 = vmatprep.subr.mxu0 %v798_v62  ;;  %v841_v61 = vld [vmem:[#allocation5 + $0x5a0] sm:$0xff] }
  0xfa   : > { %1398 = vmatprep.subr.mxu1 %v862_v63  ;;  %1166 = vmatprep.mubr.f32.mxu1 %v584_v0  ;;  %v905_v62 = vld [vmem:[#allocation5 + $0x7a0] sm:$0xff]  ;;  %v840_v63 = vld [vmem:[#allocation5 + $0x598] sm:$0xff]  ;;  %v623_v0 = vld [vmem:[%s3795_s3 + $0x250] sm:$0xff] }
  0xfb   : > { %1250 = vmatpush1.msra.mxu0 %v797_v1  ;;  %1399 = vmatpush1.msra.mxu1 %v861_v2  ;;  %v904_v1 = vld [vmem:[#allocation5 + $0x798] sm:$0xff]  ;;  %v630_v2 = vld [vmem:[%s3795_s3 + $0x288] sm:$0xff] }
  0xfc   : > { %1251 = vmatprep.subr.mxu0 %v796_v3  ;;  %1167 = vmatmul.mubr.f32.gmra.mxu1 %v583_v4  ;;  %v839_v3 = vld [vmem:[#allocation5 + $0x590] sm:$0xff] }
  0xfd   : > { %1400 = vmatprep.subr.mxu1 %v860_v5  ;;  %1023 = vmatprep.mubr.f32.mxu0 %v590_v6  ;;  %v903_v4 = vld [vmem:[#allocation5 + $0x790] sm:$0xff]  ;;  %v629_v5 = vld [vmem:[%s3795_s3 + $0x280] sm:$0xff]  ;;  %v838_v6 = vld [vmem:[#allocation5 + $0x588] sm:$0xff] }
  0xfe   : > { %1252 = vmatpush1.msra.mxu0 %v795_v7  ;;  %1401 = vmatpush1.msra.mxu1 %v859_v8  ;;  %v902_v7 = vld [vmem:[#allocation5 + $0x788] sm:$0xff]  ;;  %v632_v8 = vld [vmem:[%s3795_s3 + $0x298] sm:$0xff] }
  0xff   : > { %1024 = vmatmul.mubr.f32.gmra.mxu0 %v589_v9  ;;  %1253 = vmatprep.subr.mxu0 %v794_v10  ;;  %v837_v9 = vld [vmem:[#allocation5 + $0x580] sm:$0xff] }
 0x100   : > { %1402 = vmatprep.subr.mxu1 %v858_v11  ;;  %1172 = vmatprep.mubr.f32.mxu1 %v592_v12  ;;  %v901_v10 = vld [vmem:[#allocation5 + $0x780] sm:$0xff]  ;;  %v836_v11 = vld [vmem:[#allocation5 + $0x578] sm:$0xff]  ;;  %v631_v12 = vld [vmem:[%s3795_s3 + $0x290] sm:$0xff] }
 0x101   : > { %1254 = vmatpush1.msra.mxu0 %v793_v13  ;;  %1403 = vmatpush1.msra.mxu1 %v857_v14  ;;  %v900_v13 = vld [vmem:[#allocation5 + $0x778] sm:$0xff]  ;;  %v638_v14 = vld [vmem:[%s3795_s3 + $0x2c8] sm:$0xff] }
 0x102   : > { %1255 = vmatprep.subr.mxu0 %v792_v15  ;;  %1173 = vmatmul.mubr.f32.gmra.mxu1 %v591_v16  ;;  %v835_v15 = vld [vmem:[#allocation5 + $0x570] sm:$0xff] }
 0x103   : > { %1404 = vmatprep.subr.mxu1 %v856_v17  ;;  %1029 = vmatprep.mubr.f32.mxu0 %v598_v18  ;;  %v899_v16 = vld [vmem:[#allocation5 + $0x770] sm:$0xff]  ;;  %v637_v17 = vld [vmem:[%s3795_s3 + $0x2c0] sm:$0xff]  ;;  %v834_v18 = vld [vmem:[#allocation5 + $0x568] sm:$0xff] }
 0x104   : > { %1256 = vmatpush1.msra.mxu0 %v791_v19  ;;  %1405 = vmatpush1.msra.mxu1 %v855_v20  ;;  %v898_v19 = vld [vmem:[#allocation5 + $0x768] sm:$0xff]  ;;  %v640_v20 = vld [vmem:[%s3795_s3 + $0x2d8] sm:$0xff] }
 0x105   : > { %1030 = vmatmul.mubr.f32.gmra.mxu0 %v597_v21  ;;  %1257 = vmatprep.subr.mxu0 %v790_v22  ;;  %v833_v21 = vld [vmem:[#allocation5 + $0x560] sm:$0xff] }
 0x106   : > { %1406 = vmatprep.subr.mxu1 %v854_v23  ;;  %1178 = vmatprep.mubr.f32.mxu1 %v600_v24  ;;  %v897_v22 = vld [vmem:[#allocation5 + $0x760] sm:$0xff]  ;;  %v832_v23 = vld [vmem:[#allocation5 + $0x558] sm:$0xff]  ;;  %v639_v24 = vld [vmem:[%s3795_s3 + $0x2d0] sm:$0xff] }
 0x107   : > { %1258 = vmatpush1.msra.mxu0 %v789_v25  ;;  %1407 = vmatpush1.msra.mxu1 %v853_v26  ;;  %v896_v25 = vld [vmem:[#allocation5 + $0x758] sm:$0xff]  ;;  %v646_v26 = vld [vmem:[%s3795_s3 + $0x308] sm:$0xff] }
 0x108   : > { %1259 = vmatprep.subr.mxu0 %v852_v27  ;;  %1179 = vmatmul.mubr.f32.gmra.mxu1 %v599_v28  ;;  %v831_v27 = vld [vmem:[#allocation5 + $0x550] sm:$0xff] }
 0x109   : > { %1408 = vmatprep.subr.mxu1 %v916_v29  ;;  %1035 = vmatprep.mubr.f32.mxu0 %v606_v30  ;;  %v895_v28 = vld [vmem:[#allocation5 + $0x750] sm:$0xff]  ;;  %v645_v29 = vld [vmem:[%s3795_s3 + $0x300] sm:$0xff]  ;;  %v830_v30 = vld [vmem:[#allocation5 + $0x548] sm:$0xff] }
 0x10a   : > { %1260 = vmatpush2.msra.mxu0 %v851_v31  ;;  %1409 = vmatpush2.msra.mxu1 %v915_v32  ;;  %v894_v31 = vld [vmem:[#allocation5 + $0x748] sm:$0xff]  ;;  %v648_v32 = vld [vmem:[%s3795_s3 + $0x318] sm:$0xff] }
 0x10b   : > { %1036 = vmatmul.mubr.f32.gmra.mxu0 %v605_v33  ;;  %1261 = vmatprep.subr.mxu0 %v850_v34  ;;  %v829_v33 = vld [vmem:[#allocation5 + $0x540] sm:$0xff] }
 0x10c   : > { %1410 = vmatprep.subr.mxu1 %v914_v35  ;;  %1184 = vmatprep.mubr.f32.mxu1 %v608_v36  ;;  %v893_v34 = vld [vmem:[#allocation5 + $0x740] sm:$0xff]  ;;  %v828_v35 = vld [vmem:[#allocation5 + $0x538] sm:$0xff]  ;;  %v647_v36 = vld [vmem:[%s3795_s3 + $0x310] sm:$0xff] }
 0x10d   : > { %1262 = vmatpush2.msra.mxu0 %v849_v37  ;;  %1411 = vmatpush2.msra.mxu1 %v913_v38  ;;  %v892_v37 = vld [vmem:[#allocation5 + $0x738] sm:$0xff]  ;;  %v654_v38 = vld [vmem:[%s3795_s3 + $0x348] sm:$0xff] }
 0x10e   : > { %1263 = vmatprep.subr.mxu0 %v848_v39  ;;  %1185 = vmatmul.mubr.f32.gmra.mxu1 %v607_v40  ;;  %v827_v39 = vld [vmem:[#allocation5 + $0x530] sm:$0xff] }
 0x10f   : > { %1412 = vmatprep.subr.mxu1 %v912_v41  ;;  %1041 = vmatprep.mubr.f32.mxu0 %v614_v42  ;;  %v891_v40 = vld [vmem:[#allocation5 + $0x730] sm:$0xff]  ;;  %v653_v41 = vld [vmem:[%s3795_s3 + $0x340] sm:$0xff]  ;;  %v826_v42 = vld [vmem:[#allocation5 + $0x528] sm:$0xff] }
 0x110   : > { %1264 = vmatpush2.msra.mxu0 %v847_v43  ;;  %1413 = vmatpush2.msra.mxu1 %v911_v44  ;;  %v890_v43 = vld [vmem:[#allocation5 + $0x728] sm:$0xff]  ;;  %v656_v44 = vld [vmem:[%s3795_s3 + $0x358] sm:$0xff] }
 0x111   : > { %1042 = vmatmul.mubr.f32.gmra.mxu0 %v613_v45  ;;  %1265 = vmatprep.subr.mxu0 %v846_v46  ;;  %v825_v45 = vld [vmem:[#allocation5 + $0x520] sm:$0xff] }
 0x112   : > { %1414 = vmatprep.subr.mxu1 %v910_v47  ;;  %1190 = vmatprep.mubr.f32.mxu1 %v616_v48  ;;  %v889_v46 = vld [vmem:[#allocation5 + $0x720] sm:$0xff]  ;;  %v824_v47 = vld [vmem:[#allocation5 + $0x518] sm:$0xff]  ;;  %v655_v48 = vld [vmem:[%s3795_s3 + $0x350] sm:$0xff] }
 0x113   : > { %1266 = vmatpush2.msra.mxu0 %v845_v49  ;;  %1415 = vmatpush2.msra.mxu1 %v909_v50  ;;  %v888_v49 = vld [vmem:[#allocation5 + $0x718] sm:$0xff]  ;;  %v823_v50 = vld [vmem:[#allocation5 + $0x510] sm:$0xff] }
 0x114   : > { %1267 = vmatprep.subr.mxu0 %v844_v51  ;;  %1191 = vmatmul.mubr.f32.gmra.mxu1 %v615_v52  ;;  %v887_v51 = vld [vmem:[#allocation5 + $0x710] sm:$0xff]  ;;  %v822_v52 = vld [vmem:[#allocation5 + $0x508] sm:$0xff] }
 0x115   : > { %1416 = vmatprep.subr.mxu1 %v908_v53  ;;  %1047 = vmatprep.mubr.f32.mxu0 %v622_v54  ;;  %v886_v53 = vld [vmem:[#allocation5 + $0x708] sm:$0xff]  ;;  %v821_v54 = vld [vmem:[#allocation5 + $0x500] sm:$0xff] }
 0x116   : > { %1268 = vmatpush2.msra.mxu0 %v843_v55  ;;  %1417 = vmatpush2.msra.mxu1 %v907_v56  ;;  %v554_v55 = vld [vmem:[%s3795_s3 + $0x28] sm:$0xff]  ;;  %v885_v56 = vld [vmem:[#allocation5 + $0x700] sm:$0xff] }
 0x117   : > { %1048 = vmatmul.mubr.f32.gmra.mxu0 %v621_v57  ;;  %1269 = vmatprep.subr.mxu0 %v842_v58  ;;  %v556_v57 = vld [vmem:[%s3795_s3 + $0x38] sm:$0xff]  ;;  %v553_v58 = vld [vmem:[%s3795_s3 + $0x20] sm:$0xff] }
 0x118   : > { %1418 = vmatprep.subr.mxu1 %v906_v59  ;;  %1196 = vmatprep.mubr.f32.mxu1 %v624_v60  ;;  %v555_v59 = vld [vmem:[%s3795_s3 + $0x30] sm:$0xff]  ;;  %v562_v60 = vld [vmem:[%s3795_s3 + $0x68] sm:$0xff] }
 0x119   : > { %1270 = vmatpush2.msra.mxu0 %v841_v61  ;;  %1419 = vmatpush2.msra.mxu1 %v905_v62  ;;  %v564_v61 = vld [vmem:[%s3795_s3 + $0x78] sm:$0xff] }
 0x11a   : > { %1271 = vmatprep.subr.mxu0 %v840_v63  ;;  %1197 = vmatmul.mubr.f32.gmra.mxu1 %v623_v0  ;;  %v1584_v62 = vld [vmem:[#allocation7 + $0xf8] sm:$0xff]  ;;  %v1583_v63 = vld [vmem:[#allocation7 + $0xf0] sm:$0xff]  ;;  %v561_v0 = vld [vmem:[%s3795_s3 + $0x60] sm:$0xff] }
 0x11b   : > { %1420 = vmatprep.subr.mxu1 %v904_v1  ;;  %1053 = vmatprep.mubr.f32.mxu0 %v630_v2  ;;  %v563_v1 = vld [vmem:[%s3795_s3 + $0x70] sm:$0xff]  ;;  %v570_v2 = vld [vmem:[%s3795_s3 + $0xa8] sm:$0xff] }
 0x11c   : > { %1272 = vmatpush2.msra.mxu0 %v839_v3  ;;  %1421 = vmatpush2.msra.mxu1 %v903_v4  ;;  %v572_v3 = vld [vmem:[%s3795_s3 + $0xb8] sm:$0xff]  ;;  %v1582_v4 = vld [vmem:[#allocation7 + $0xe8] sm:$0xff] }
 0x11d   : > { %1054 = vmatmul.mubr.f32.gmra.mxu0 %v629_v5  ;;  %1273 = vmatprep.subr.mxu0 %v838_v6  ;;  %v1581_v5 = vld [vmem:[#allocation7 + $0xe0] sm:$0xff] }
 0x11e   : > { %1422 = vmatprep.subr.mxu1 %v902_v7  ;;  %1202 = vmatprep.mubr.f32.mxu1 %v632_v8  ;;  %v569_v6 = vld [vmem:[%s3795_s3 + $0xa0] sm:$0xff]  ;;  %v571_v7 = vld [vmem:[%s3795_s3 + $0xb0] sm:$0xff]  ;;  %v578_v8 = vld [vmem:[%s3795_s3 + $0xe8] sm:$0xff] }
 0x11f   : > { %1274 = vmatpush2.msra.mxu0 %v837_v9  ;;  %1423 = vmatpush2.msra.mxu1 %v901_v10  ;;  %v580_v9 = vld [vmem:[%s3795_s3 + $0xf8] sm:$0xff] }
 0x120   : > { %1275 = vmatprep.subr.mxu0 %v836_v11  ;;  %1203 = vmatmul.mubr.f32.gmra.mxu1 %v631_v12  ;;  %v1580_v10 = vld [vmem:[#allocation7 + $0xd8] sm:$0xff]  ;;  %v1579_v11 = vld [vmem:[#allocation7 + $0xd0] sm:$0xff]  ;;  %v577_v12 = vld [vmem:[%s3795_s3 + $0xe0] sm:$0xff] }
 0x121   : > { %1424 = vmatprep.subr.mxu1 %v900_v13  ;;  %1059 = vmatprep.mubr.f32.mxu0 %v638_v14  ;;  %v579_v13 = vld [vmem:[%s3795_s3 + $0xf0] sm:$0xff]  ;;  %v586_v14 = vld [vmem:[%s3795_s3 + $0x128] sm:$0xff] }
 0x122   : > { %1276 = vmatpush2.msra.mxu0 %v835_v15  ;;  %1425 = vmatpush2.msra.mxu1 %v899_v16  ;;  %v588_v15 = vld [vmem:[%s3795_s3 + $0x138] sm:$0xff]  ;;  %v1578_v16 = vld [vmem:[#allocation7 + $0xc8] sm:$0xff] }
 0x123   : > { %1060 = vmatmul.mubr.f32.gmra.mxu0 %v637_v17  ;;  %1277 = vmatprep.subr.mxu0 %v834_v18  ;;  %v1577_v17 = vld [vmem:[#allocation7 + $0xc0] sm:$0xff] }
 0x124   : > { %1426 = vmatprep.subr.mxu1 %v898_v19  ;;  %1208 = vmatprep.mubr.f32.mxu1 %v640_v20  ;;  %v585_v18 = vld [vmem:[%s3795_s3 + $0x120] sm:$0xff]  ;;  %v587_v19 = vld [vmem:[%s3795_s3 + $0x130] sm:$0xff]  ;;  %v594_v20 = vld [vmem:[%s3795_s3 + $0x168] sm:$0xff] }
 0x125   : > { %1278 = vmatpush2.msra.mxu0 %v833_v21  ;;  %1427 = vmatpush2.msra.mxu1 %v897_v22  ;;  %v596_v21 = vld [vmem:[%s3795_s3 + $0x178] sm:$0xff] }
 0x126   : > { %1279 = vmatprep.subr.mxu0 %v832_v23  ;;  %1209 = vmatmul.mubr.f32.gmra.mxu1 %v639_v24  ;;  %v1576_v22 = vld [vmem:[#allocation7 + $0xb8] sm:$0xff]  ;;  %v1575_v23 = vld [vmem:[#allocation7 + $0xb0] sm:$0xff]  ;;  %v593_v24 = vld [vmem:[%s3795_s3 + $0x160] sm:$0xff] }
 0x127   : > { %1428 = vmatprep.subr.mxu1 %v896_v25  ;;  %1065 = vmatprep.mubr.f32.mxu0 %v646_v26  ;;  %v595_v25 = vld [vmem:[%s3795_s3 + $0x170] sm:$0xff]  ;;  %v602_v26 = vld [vmem:[%s3795_s3 + $0x1a8] sm:$0xff] }
 0x128   : > { %1280 = vmatpush2.msra.mxu0 %v831_v27  ;;  %1429 = vmatpush2.msra.mxu1 %v895_v28  ;;  %v604_v27 = vld [vmem:[%s3795_s3 + $0x1b8] sm:$0xff]  ;;  %v1574_v28 = vld [vmem:[#allocation7 + $0xa8] sm:$0xff] }
 0x129   : > { %1066 = vmatmul.mubr.f32.gmra.mxu0 %v645_v29  ;;  %1281 = vmatprep.subr.mxu0 %v830_v30  ;;  %v1573_v29 = vld [vmem:[#allocation7 + $0xa0] sm:$0xff] }
 0x12a   : > { %1430 = vmatprep.subr.mxu1 %v894_v31  ;;  %1214 = vmatprep.mubr.f32.mxu1 %v648_v32  ;;  %v601_v30 = vld [vmem:[%s3795_s3 + $0x1a0] sm:$0xff]  ;;  %v603_v31 = vld [vmem:[%s3795_s3 + $0x1b0] sm:$0xff]  ;;  %v610_v32 = vld [vmem:[%s3795_s3 + $0x1e8] sm:$0xff] }
 0x12b   : > { %1282 = vmatpush2.msra.mxu0 %v829_v33  ;;  %1431 = vmatpush2.msra.mxu1 %v893_v34  ;;  %v612_v33 = vld [vmem:[%s3795_s3 + $0x1f8] sm:$0xff] }
 0x12c   : > { %1283 = vmatprep.subr.mxu0 %v828_v35  ;;  %1215 = vmatmul.mubr.f32.gmra.mxu1 %v647_v36  ;;  %v1572_v34 = vld [vmem:[#allocation7 + $0x98] sm:$0xff]  ;;  %v1571_v35 = vld [vmem:[#allocation7 + $0x90] sm:$0xff]  ;;  %v609_v36 = vld [vmem:[%s3795_s3 + $0x1e0] sm:$0xff] }
 0x12d   : > { %1432 = vmatprep.subr.mxu1 %v892_v37  ;;  %1071 = vmatprep.mubr.f32.mxu0 %v654_v38  ;;  %v611_v37 = vld [vmem:[%s3795_s3 + $0x1f0] sm:$0xff]  ;;  %v618_v38 = vld [vmem:[%s3795_s3 + $0x228] sm:$0xff] }
 0x12e   : > { %1284 = vmatpush2.msra.mxu0 %v827_v39  ;;  %1433 = vmatpush2.msra.mxu1 %v891_v40  ;;  %v620_v39 = vld [vmem:[%s3795_s3 + $0x238] sm:$0xff]  ;;  %v1570_v40 = vld [vmem:[#allocation7 + $0x88] sm:$0xff] }
 0x12f   : > { %1072 = vmatmul.mubr.f32.gmra.mxu0 %v653_v41  ;;  %1285 = vmatprep.subr.mxu0 %v826_v42  ;;  %v1569_v41 = vld [vmem:[#allocation7 + $0x80] sm:$0xff] }
 0x130   : > { %1434 = vmatprep.subr.mxu1 %v890_v43  ;;  %1220 = vmatprep.mubr.f32.mxu1 %v656_v44  ;;  %v617_v42 = vld [vmem:[%s3795_s3 + $0x220] sm:$0xff]  ;;  %v619_v43 = vld [vmem:[%s3795_s3 + $0x230] sm:$0xff]  ;;  %v626_v44 = vld [vmem:[%s3795_s3 + $0x268] sm:$0xff] }
 0x131   : > { %1286 = vmatpush2.msra.mxu0 %v825_v45  ;;  %1435 = vmatpush2.msra.mxu1 %v889_v46  ;;  %v628_v45 = vld [vmem:[%s3795_s3 + $0x278] sm:$0xff] }
 0x132   : > { %1287 = vmatprep.subr.mxu0 %v824_v47  ;;  %1221 = vmatmul.mubr.f32.gmra.mxu1 %v655_v48  ;;  %v1568_v46 = vld [vmem:[#allocation7 + $0x78] sm:$0xff]  ;;  %v1567_v47 = vld [vmem:[#allocation7 + $0x70] sm:$0xff]  ;;  %v625_v48 = vld [vmem:[%s3795_s3 + $0x260] sm:$0xff] }
 0x133   : > { %1436 = vmatprep.subr.mxu1 %v888_v49  ;;  %1288 = vmatpush2.msra.mxu0 %v823_v50  ;;  %v627_v49 = vld [vmem:[%s3795_s3 + $0x270] sm:$0xff]  ;;  %v634_v50 = vld [vmem:[%s3795_s3 + $0x2a8] sm:$0xff] }
 0x134   : > { %1437 = vmatpush2.msra.mxu1 %v887_v51  ;;  %1289 = vmatprep.subr.mxu0 %v822_v52  ;;  %v636_v51 = vld [vmem:[%s3795_s3 + $0x2b8] sm:$0xff]  ;;  %v1566_v52 = vld [vmem:[#allocation7 + $0x68] sm:$0xff] }
 0x135   : > { %1438 = vmatprep.subr.mxu1 %v886_v53  ;;  %1290 = vmatpush2.msra.mxu0 %v821_v54  ;;  %v1565_v53 = vld [vmem:[#allocation7 + $0x60] sm:$0xff] }
 0x136   : > { %1291 = vmatprep.mubr.f32.mxu0 %v554_v55  ;;  %1439 = vmatpush2.msra.mxu1 %v885_v56  ;;  %v633_v54 = vld [vmem:[%s3795_s3 + $0x2a0] sm:$0xff]  ;;  %v635_v55 = vld [vmem:[%s3795_s3 + $0x2b0] sm:$0xff]  ;;  %v642_v56 = vld [vmem:[%s3795_s3 + $0x2e8] sm:$0xff] }
 0x137   : > { %1440 = vmatprep.mubr.f32.mxu1 %v556_v57  ;;  %1292 = vmatmul.mubr.f32.vlgmr.msra.gmra.mxu0 %v553_v58  ;;  %v644_v57 = vld [vmem:[%s3795_s3 + $0x2f8] sm:$0xff] }
 0x138   : > { %1441 = vmatmul.mubr.f32.vlgmr.msra.gmra.mxu1 %v555_v59  ;;  %1297 = vmatprep.mubr.f32.mxu0 %v562_v60  ;;  %v1564_v58 = vld [vmem:[#allocation7 + $0x58] sm:$0xff]  ;;  %v1563_v59 = vld [vmem:[#allocation7 + $0x50] sm:$0xff]  ;;  %v641_v60 = vld [vmem:[%s3795_s3 + $0x2e0] sm:$0xff] }
 0x139   : > { %1446 = vmatprep.mubr.f32.mxu1 %v564_v61  ;;  %1629 = vmatprep.subr.mxu0 %v1584_v62  ;;  %v643_v61 = vld [vmem:[%s3795_s3 + $0x2f0] sm:$0xff]  ;;  %v650_v62 = vld [vmem:[%s3795_s3 + $0x328] sm:$0xff] }
 0x13a   : > { %1630 = vmatpush1.msra.mxu0 %v1583_v63  ;;  %v652_v63 = vld [vmem:[%s3795_s3 + $0x338] sm:$0xff] }
 0x13b   : > { %1298 = vmatmul.mubr.f32.gmra.mxu0 %v561_v0  ;;  %1631 = vmatprep.subr.mxu0 %v1582_v4  ;;  %v1562_v0 = vld [vmem:[#allocation7 + $0x48] sm:$0xff] }
 0x13c   : > { %1447 = vmatmul.mubr.f32.gmra.mxu1 %v563_v1  ;;  %1303 = vmatprep.mubr.f32.mxu0 %v570_v2  ;;  %v1561_v1 = vld [vmem:[#allocation7 + $0x40] sm:$0xff]  ;;  %v658_v4 = vld [vmem:[%s3795_s3 + $0x368] sm:$0xff] }
 0x13d   : > { %1452 = vmatprep.mubr.f32.mxu1 %v572_v3  ;;  %1632 = vmatpush1.msra.mxu0 %v1581_v5  ;;  %v649_v2 = vld [vmem:[%s3795_s3 + $0x320] sm:$0xff]  ;;  %v651_v3 = vld [vmem:[%s3795_s3 + $0x330] sm:$0xff]  ;;  %v660_v5 = vld [vmem:[%s3795_s3 + $0x378] sm:$0xff] }
 0x13e   : > { %1633 = vmatprep.subr.mxu0 %v1580_v10  ;;  %v1558_v10 = vld [vmem:[#allocation7 + $0x28] sm:$0xff] }
 0x13f   : > { %1304 = vmatmul.mubr.f32.gmra.mxu0 %v569_v6  ;;  %v1560_v6 = vld [vmem:[#allocation7 + $0x38] sm:$0xff] }
 0x140   : > { %1453 = vmatmul.mubr.f32.gmra.mxu1 %v571_v7  ;;  %1309 = vmatprep.mubr.f32.mxu0 %v578_v8  ;;  %v1559_v7 = vld [vmem:[#allocation7 + $0x30] sm:$0xff]  ;;  %v657_v8 = vld [vmem:[%s3795_s3 + $0x360] sm:$0xff] }
 0x141   : > { %1458 = vmatprep.mubr.f32.mxu1 %v580_v9  ;;  %1634 = vmatpush1.msra.mxu0 %v1579_v11  ;;  %v659_v9 = vld [vmem:[%s3795_s3 + $0x370] sm:$0xff]  ;;  %v1557_v11 = vld [vmem:[#allocation7 + $0x20] sm:$0xff]  ;;  %s4761_s3 = scalar_lea.vmem [#allocation14], %s3143_s22 }
 0x142   : > { %1635 = vmatprep.subr.mxu0 %v1578_v16  ;;  %v1616_v16 = vld [vmem:[#allocation7 + $0x1f8] sm:$0xff]  ;;  %s2879_s7 = sshll.u32 %s4761_s3, 4  ;;  %s4795_s7 = int_to_ptr.vmem [resolvable:$true] %s2879_s7 }
 0x143   : > { %1310 = vmatmul.mubr.f32.gmra.mxu0 %v577_v12  ;;  %v1556_v12 = vld [vmem:[#allocation7 + $0x18] sm:$0xff]  ;;  %s3443_s24 = scalar_lea.vmem %s4795_s7, 1792  ;;  %p3450_p13 = scmp.lt.s32.totalorder %s4795_s7, %s3448_s1 }
 0x144   : > { %1459 = vmatmul.mubr.f32.gmra.mxu1 %v579_v13  ;;  %1315 = vmatprep.mubr.f32.mxu0 %v586_v14  ;;  %v1555_v13 = vld [vmem:[#allocation7 + $0x10] sm:$0xff]  ;;  %v1554_v14 = vld [vmem:[#allocation7 + $0x8] sm:$0xff]  ;;  %p3444_p8 = scmp.ne.s32.totalorder %s4795_s7, %s3443_s24  ;;  %p3451_p5 = scmp.lt.s32.totalorder %s3449_s11, %s3443_s24 }
 0x145   : > { %1464 = vmatprep.mubr.f32.mxu1 %v588_v15  ;;  %1636 = vmatpush1.msra.mxu0 %v1577_v17  ;;  %v1553_v15 = vld [vmem:[#allocation7] sm:$0xff]  ;;  %v1615_v17 = vld [vmem:[#allocation7 + $0x1f0] sm:$0xff] }
 0x146   : > { %1637 = vmatprep.subr.mxu0 %v1576_v22  ;;  %v1610_v22 = vld [vmem:[#allocation7 + $0x1c8] sm:$0xff]  ;;  %p3445_p10 = pnand %p3444_p8, %p4997_p6  ;;  %p3452_p1 = por %p3451_p5, %p3450_p13 }
 0x147   : > { %1316 = vmatmul.mubr.f32.gmra.mxu0 %v585_v18  ;;  %v1614_v18 = vld [vmem:[#allocation7 + $0x1e8] sm:$0xff] }
 0x148   : > { %1465 = vmatmul.mubr.f32.gmra.mxu1 %v587_v19  ;;  %1321 = vmatprep.mubr.f32.mxu0 %v594_v20  ;;  %v1613_v19 = vld [vmem:[#allocation7 + $0x1e0] sm:$0xff]  ;;  %v1612_v20 = vld [vmem:[#allocation7 + $0x1d8] sm:$0xff]  ;;  %p3446_p11 = pneg %p3445_p10 }
 0x149   : > { %1470 = vmatprep.mubr.f32.mxu1 %v596_v21  ;;  %1638 = vmatpush1.msra.mxu0 %v1575_v23  ;;  %v1611_v21 = vld [vmem:[#allocation7 + $0x1d0] sm:$0xff]  ;;  %v1609_v23 = vld [vmem:[#allocation7 + $0x1c0] sm:$0xff] }
 0x14a   : > { %1639 = vmatprep.subr.mxu0 %v1574_v28  ;;  %v1604_v28 = vld [vmem:[#allocation7 + $0x198] sm:$0xff]  ;;  %p3453_p3 = pnand %p3452_p1, %p3446_p11 }
 0x14b   : > { %1322 = vmatmul.mubr.f32.gmra.mxu0 %v593_v24  ;;  %v1608_v24 = vld [vmem:[#allocation7 + $0x1b8] sm:$0xff] }
 0x14c   : > { %1471 = vmatmul.mubr.f32.gmra.mxu1 %v595_v25  ;;  %1327 = vmatprep.mubr.f32.mxu0 %v602_v26  ;;  %v1607_v25 = vld [vmem:[#allocation7 + $0x1b0] sm:$0xff]  ;;  %v1606_v26 = vld [vmem:[#allocation7 + $0x1a8] sm:$0xff] }
 0x14d   : > { %1476 = vmatprep.mubr.f32.mxu1 %v604_v27  ;;  %1640 = vmatpush1.msra.mxu0 %v1573_v29  ;;  %v1605_v27 = vld [vmem:[#allocation7 + $0x1a0] sm:$0xff]  ;;  %v1603_v29 = vld [vmem:[#allocation7 + $0x190] sm:$0xff] }
 0x14e   : > { %1641 = vmatprep.subr.mxu0 %v1572_v34  ;;  %v1598_v34 = vld [vmem:[#allocation7 + $0x168] sm:$0xff] }
 0x14f   : > { %1328 = vmatmul.mubr.f32.gmra.mxu0 %v601_v30  ;;  %v1602_v30 = vld [vmem:[#allocation7 + $0x188] sm:$0xff] }
 0x150   : > { %1477 = vmatmul.mubr.f32.gmra.mxu1 %v603_v31  ;;  %1333 = vmatprep.mubr.f32.mxu0 %v610_v32  ;;  %v1601_v31 = vld [vmem:[#allocation7 + $0x180] sm:$0xff]  ;;  %v1600_v32 = vld [vmem:[#allocation7 + $0x178] sm:$0xff] }
 0x151   : > { %1482 = vmatprep.mubr.f32.mxu1 %v612_v33  ;;  %1642 = vmatpush1.msra.mxu0 %v1571_v35  ;;  %v1599_v33 = vld [vmem:[#allocation7 + $0x170] sm:$0xff]  ;;  %v1597_v35 = vld [vmem:[#allocation7 + $0x160] sm:$0xff] }
 0x152   : > { %1643 = vmatprep.subr.mxu0 %v1570_v40  ;;  %v1592_v40 = vld [vmem:[#allocation7 + $0x138] sm:$0xff] }
 0x153   : > { %1334 = vmatmul.mubr.f32.gmra.mxu0 %v609_v36  ;;  %v1596_v36 = vld [vmem:[#allocation7 + $0x158] sm:$0xff] }
 0x154   : > { %1483 = vmatmul.mubr.f32.gmra.mxu1 %v611_v37  ;;  %1339 = vmatprep.mubr.f32.mxu0 %v618_v38  ;;  %v1595_v37 = vld [vmem:[#allocation7 + $0x150] sm:$0xff]  ;;  %v1594_v38 = vld [vmem:[#allocation7 + $0x148] sm:$0xff] }
 0x155   : > { %1488 = vmatprep.mubr.f32.mxu1 %v620_v39  ;;  %1644 = vmatpush1.msra.mxu0 %v1569_v41  ;;  %v1593_v39 = vld [vmem:[#allocation7 + $0x140] sm:$0xff]  ;;  %v1591_v41 = vld [vmem:[#allocation7 + $0x130] sm:$0xff] }
 0x156   : > { %1645 = vmatprep.subr.mxu0 %v1568_v46  ;;  %v1586_v46 = vld [vmem:[#allocation7 + $0x108] sm:$0xff] }
 0x157   : > { %1340 = vmatmul.mubr.f32.gmra.mxu0 %v617_v42  ;;  %v1590_v42 = vld [vmem:[#allocation7 + $0x128] sm:$0xff] }
 0x158   : > { %1489 = vmatmul.mubr.f32.gmra.mxu1 %v619_v43  ;;  %1345 = vmatprep.mubr.f32.mxu0 %v626_v44  ;;  %v1589_v43 = vld [vmem:[#allocation7 + $0x120] sm:$0xff]  ;;  %v1588_v44 = vld [vmem:[#allocation7 + $0x118] sm:$0xff] }
 0x159   : > { %1494 = vmatprep.mubr.f32.mxu1 %v628_v45  ;;  %1646 = vmatpush1.msra.mxu0 %v1567_v47  ;;  %v1587_v45 = vld [vmem:[#allocation7 + $0x110] sm:$0xff]  ;;  %v1585_v47 = vld [vmem:[#allocation7 + $0x100] sm:$0xff] }
 0x15a   : > { %1647 = vmatprep.subr.mxu0 %v1566_v52 }
 0x15b   : > { %1346 = vmatmul.mubr.f32.gmra.mxu0 %v625_v48 }
 0x15c   : > { %1495 = vmatmul.mubr.f32.gmra.mxu1 %v627_v49  ;;  %1351 = vmatprep.mubr.f32.mxu0 %v634_v50 }
 0x15d   : > { %1500 = vmatprep.mubr.f32.mxu1 %v636_v51  ;;  %1648 = vmatpush1.msra.mxu0 %v1565_v53 }
 0x15e   : > { %1649 = vmatprep.subr.mxu0 %v1564_v58 }
 0x15f   : > { %1352 = vmatmul.mubr.f32.gmra.mxu0 %v633_v54 }
 0x160   : > { %1501 = vmatmul.mubr.f32.gmra.mxu1 %v635_v55  ;;  %1357 = vmatprep.mubr.f32.mxu0 %v642_v56 }
 0x161   : > { %1506 = vmatprep.mubr.f32.mxu1 %v644_v57  ;;  %1650 = vmatpush1.msra.mxu0 %v1563_v59 }
 0x162   : > { %1651 = vmatprep.subr.mxu0 %v1562_v0  ;;  %v1835_v0 = vld [vmem:[#allocation8 + $0xe8] sm:$0xff] }
 0x163   : > { %1358 = vmatmul.mubr.f32.gmra.mxu0 %v641_v60 }
 0x164   : > { %1507 = vmatmul.mubr.f32.gmra.mxu1 %v643_v61  ;;  %1363 = vmatprep.mubr.f32.mxu0 %v650_v62  ;;  %v1837_v62 = vld [vmem:[#allocation8 + $0xf8] sm:$0xff] }
 0x165   : > { %1512 = vmatprep.mubr.f32.mxu1 %v652_v63  ;;  %1652 = vmatpush1.msra.mxu0 %v1561_v1  ;;  %v1836_v63 = vld [vmem:[#allocation8 + $0xf0] sm:$0xff] }
 0x166   : > { %1653 = vmatprep.subr.mxu0 %v1560_v6  ;;  %1870 = vmatprep.subr.mxu1 %v1837_v62  ;;  %v1832_v6 = vld [vmem:[#allocation8 + $0xd0] sm:$0xff] }
 0x167   : > { %1364 = vmatmul.mubr.f32.gmra.mxu0 %v649_v2  ;;  %v1834_v2 = vld [vmem:[#allocation8 + $0xe0] sm:$0xff]  ;;  %1871 = vmatpush1.msra.mxu1 %v1836_v63 }
 0x168   : > { %1513 = vmatmul.mubr.f32.gmra.mxu1 %v651_v3  ;;  %1369 = vmatprep.mubr.f32.mxu0 %v658_v4  ;;  %v1833_v3 = vld [vmem:[#allocation8 + $0xd8] sm:$0xff]  ;;  %v1806_v63 = vld [vmem:[#allocation8] sm:$0xff] }
 0x169   : > { %1518 = vmatprep.mubr.f32.mxu1 %v660_v5  ;;  %1654 = vmatpush1.msra.mxu0 %v1559_v7  ;;  %v1831_v7 = vld [vmem:[#allocation8 + $0xc8] sm:$0xff] }
 0x16a   : > { %1655 = vmatprep.subr.mxu0 %v1558_v10  ;;  %1872 = vmatprep.subr.mxu1 %v1835_v0  ;;  %v1829_v10 = vld [vmem:[#allocation8 + $0xb8] sm:$0xff] }
 0x16b   : > { %1370 = vmatmul.mubr.f32.gmra.mxu0 %v657_v8  ;;  %1873 = vmatpush1.msra.mxu1 %v1834_v2  ;;  %v1869_v0 = vld [vmem:[#allocation8 + $0x1f8] sm:$0xff] }
 0x16c   : > { %1519 = vmatmul.mubr.f32.gmra.mxu1 %v659_v9  ;;  %1656 = vmatpush1.msra.mxu0 %v1557_v11  ;;  %v1830_v9 = vld [vmem:[#allocation8 + $0xc0] sm:$0xff] }
 0x16d   : > { %1657 = vmatprep.subr.mxu0 %v1556_v12  ;;  %1874 = vmatprep.subr.mxu1 %v1833_v3  ;;  %v1828_v12 = vld [vmem:[#allocation8 + $0xb0] sm:$0xff] }
 0x16e   : > { %1658 = vmatpush1.msra.mxu0 %v1555_v13  ;;  %1875 = vmatpush1.msra.mxu1 %v1832_v6  ;;  %v1827_v13 = vld [vmem:[#allocation8 + $0xa8] sm:$0xff]  ;;  %v1868_v3 = vld [vmem:[#allocation8 + $0x1f0] sm:$0xff] }
 0x16f   : > { %1659 = vmatprep.subr.mxu0 %v1554_v14  ;;  %1876 = vmatprep.subr.mxu1 %v1831_v7  ;;  %v1867_v6 = vld [vmem:[#allocation8 + $0x1e8] sm:$0xff] }
 0x170   : > { %1660 = vmatpush1.msra.mxu0 %v1553_v15  ;;  %1877 = vmatpush1.msra.mxu1 %v1830_v9 }
 0x171   : > { %1661 = vmatprep.subr.mxu0 %v1616_v16  ;;  %1878 = vmatprep.subr.mxu1 %v1829_v10  ;;  %v1826_v16 = vld [vmem:[#allocation8 + $0xa0] sm:$0xff] }
 0x172   : > { %1662 = vmatpush2.msra.mxu0 %v1615_v17  ;;  %1879 = vmatpush1.msra.mxu1 %v1828_v12  ;;  %v1825_v17 = vld [vmem:[#allocation8 + $0x98] sm:$0xff]  ;;  %v1866_v10 = vld [vmem:[#allocation8 + $0x1e0] sm:$0xff] }
 0x173   : > { %1663 = vmatprep.subr.mxu0 %v1614_v18  ;;  %1880 = vmatprep.subr.mxu1 %v1827_v13  ;;  %v1865_v12 = vld [vmem:[#allocation8 + $0x1d8] sm:$0xff] }
 0x174   : > { %1664 = vmatpush2.msra.mxu0 %v1613_v19  ;;  %v1824_v19 = vld [vmem:[#allocation8 + $0x90] sm:$0xff]  ;;  %1881 = vmatpush1.msra.mxu1 %v1826_v16 }
 0x175   : > { %1665 = vmatprep.subr.mxu0 %v1612_v20  ;;  %v1823_v20 = vld [vmem:[#allocation8 + $0x88] sm:$0xff]  ;;  %1882 = vmatprep.subr.mxu1 %v1825_v17  ;;  %v1864_v16 = vld [vmem:[#allocation8 + $0x1d0] sm:$0xff] }
 0x176   : > { %1666 = vmatpush2.msra.mxu0 %v1611_v21  ;;  %1883 = vmatpush1.msra.mxu1 %v1824_v19  ;;  %v1863_v17 = vld [vmem:[#allocation8 + $0x1c8] sm:$0xff] }
 0x177   : > { %1667 = vmatprep.subr.mxu0 %v1610_v22  ;;  %v1822_v22 = vld [vmem:[#allocation8 + $0x80] sm:$0xff]  ;;  %1884 = vmatprep.subr.mxu1 %v1823_v20 }
 0x178   : > { %1668 = vmatpush2.msra.mxu0 %v1609_v23  ;;  %v1821_v23 = vld [vmem:[#allocation8 + $0x78] sm:$0xff]  ;;  %1885 = vmatpush1.msra.mxu1 %v1822_v22  ;;  %v1862_v20 = vld [vmem:[#allocation8 + $0x1c0] sm:$0xff] }
 0x179   : > { %1669 = vmatprep.subr.mxu0 %v1608_v24  ;;  %1886 = vmatprep.subr.mxu1 %v1821_v23  ;;  %v1861_v22 = vld [vmem:[#allocation8 + $0x1b8] sm:$0xff] }
 0x17a   : > { %1670 = vmatpush2.msra.mxu0 %v1607_v25 }
 0x17b   : > { %1671 = vmatprep.subr.mxu0 %v1606_v26  ;;  %v1820_v26 = vld [vmem:[#allocation8 + $0x70] sm:$0xff] }
 0x17c   : > { %1672 = vmatpush2.msra.mxu0 %v1605_v27  ;;  %v1819_v27 = vld [vmem:[#allocation8 + $0x68] sm:$0xff]  ;;  %1887 = vmatpush1.msra.mxu1 %v1820_v26 }
 0x17d   : > { %1673 = vmatprep.subr.mxu0 %v1604_v28  ;;  %1888 = vmatprep.subr.mxu1 %v1819_v27  ;;  %v1860_v27 = vld [vmem:[#allocation8 + $0x1b0] sm:$0xff] }
 0x17e   : > { %1674 = vmatpush2.msra.mxu0 %v1603_v29  ;;  %v1818_v29 = vld [vmem:[#allocation8 + $0x60] sm:$0xff] }
 0x17f   : > { %1675 = vmatprep.subr.mxu0 %v1602_v30  ;;  %v1817_v30 = vld [vmem:[#allocation8 + $0x58] sm:$0xff]  ;;  %1889 = vmatpush1.msra.mxu1 %v1818_v29  ;;  %v1859_v29 = vld [vmem:[#allocation8 + $0x1a8] sm:$0xff] }
 0x180   : > { %1676 = vmatpush2.msra.mxu0 %v1601_v31  ;;  %1890 = vmatprep.subr.mxu1 %v1817_v30 }
 0x181   : > { %1677 = vmatprep.subr.mxu0 %v1600_v32  ;;  %v1816_v32 = vld [vmem:[#allocation8 + $0x50] sm:$0xff] }
 0x182   : > { %1678 = vmatpush2.msra.mxu0 %v1599_v33  ;;  %v1815_v33 = vld [vmem:[#allocation8 + $0x48] sm:$0xff]  ;;  %1891 = vmatpush1.msra.mxu1 %v1816_v32  ;;  %v1858_v32 = vld [vmem:[#allocation8 + $0x1a0] sm:$0xff] }
 0x183   : > { %1679 = vmatprep.subr.mxu0 %v1598_v34  ;;  %1892 = vmatprep.subr.mxu1 %v1815_v33  ;;  %v1857_v33 = vld [vmem:[#allocation8 + $0x198] sm:$0xff] }
 0x184   : > { %1680 = vmatpush2.msra.mxu0 %v1597_v35 }
 0x185   : > { %1681 = vmatprep.subr.mxu0 %v1596_v36  ;;  %v1814_v36 = vld [vmem:[#allocation8 + $0x40] sm:$0xff] }
 0x186   : > { %1682 = vmatpush2.msra.mxu0 %v1595_v37  ;;  %v1813_v37 = vld [vmem:[#allocation8 + $0x38] sm:$0xff]  ;;  %1893 = vmatpush1.msra.mxu1 %v1814_v36 }
 0x187   : > { %1683 = vmatprep.subr.mxu0 %v1594_v38  ;;  %1894 = vmatprep.subr.mxu1 %v1813_v37  ;;  %v1856_v37 = vld [vmem:[#allocation8 + $0x190] sm:$0xff] }
 0x188   : > { %1684 = vmatpush2.msra.mxu0 %v1593_v39  ;;  %v1812_v39 = vld [vmem:[#allocation8 + $0x30] sm:$0xff] }
 0x189   : > { %1685 = vmatprep.subr.mxu0 %v1592_v40  ;;  %v1811_v40 = vld [vmem:[#allocation8 + $0x28] sm:$0xff]  ;;  %1895 = vmatpush1.msra.mxu1 %v1812_v39 }
 0x18a   : > { %1686 = vmatpush2.msra.mxu0 %v1591_v41  ;;  %1896 = vmatprep.subr.mxu1 %v1811_v40  ;;  %v1855_v39 = vld [vmem:[#allocation8 + $0x188] sm:$0xff]  ;;  %v919_v40 = vlaneseq }
 0x18b   : > { %1687 = vmatprep.subr.mxu0 %v1590_v42  ;;  %v1810_v42 = vld [vmem:[#allocation8 + $0x20] sm:$0xff] }
 0x18c   : > { %1688 = vmatpush2.msra.mxu0 %v1589_v43  ;;  %v1809_v43 = vld [vmem:[#allocation8 + $0x18] sm:$0xff]  ;;  %1897 = vmatpush1.msra.mxu1 %v1810_v42 }
 0x18d   : > { %1689 = vmatprep.subr.mxu0 %v1588_v44  ;;  %1898 = vmatprep.subr.mxu1 %v1809_v43 }
 0x18e   : > { %1690 = vmatpush2.msra.mxu0 %v1587_v45 }
 0x18f   : > { %1691 = vmatprep.subr.mxu0 %v1586_v46  ;;  %v1808_v46 = vld [vmem:[#allocation8 + $0x10] sm:$0xff] }
 0x190   : > { %1692 = vmatpush2.msra.mxu0 %v1585_v47  ;;  %v1807_v47 = vld [vmem:[#allocation8 + $0x8] sm:$0xff]  ;;  %1899 = vmatpush1.msra.mxu1 %v1808_v46  ;;  %v1854_v46 = vld [vmem:[#allocation8 + $0x180] sm:$0xff] }
 0x191   : > { %1900 = vmatprep.subr.mxu1 %v1807_v47  ;;  %v1853_v47 = vld [vmem:[#allocation8 + $0x178] sm:$0xff] }
 0x192   : > { %1901 = vmatpush1.msra.mxu1 %v1806_v63  ;;  %v1852_v63 = vld [vmem:[#allocation8 + $0x170] sm:$0xff] }
 0x193   : > { %1902 = vmatprep.subr.mxu1 %v1869_v0 }
 0x194   : > { %1903 = vmatpush2.msra.mxu1 %v1868_v3  ;;  %v1851_v3 = vld [vmem:[#allocation8 + $0x168] sm:$0xff] }
 0x195   : > { %1904 = vmatprep.subr.mxu1 %v1867_v6  ;;  %v920_v6 = vshrl.u32 %v919_v40, 7 }
 0x196   : > { %1905 = vmatpush2.msra.mxu1 %v1866_v10 }
 0x197   : > { %1906 = vmatprep.subr.mxu1 %v1865_v12  ;;  %v1850_v12 = vld [vmem:[#allocation8 + $0x160] sm:$0xff] }
 0x198   : > { %1907 = vmatpush2.msra.mxu1 %v1864_v16  ;;  %v1849_v16 = vld [vmem:[#allocation8 + $0x158] sm:$0xff] }
 0x199   : > { %1908 = vmatprep.subr.mxu1 %v1863_v17 }
 0x19a   : > { %1909 = vmatpush2.msra.mxu1 %v1862_v20  ;;  %v1848_v20 = vld [vmem:[#allocation8 + $0x150] sm:$0xff] }
 0x19b   : > { %v3925_v48 = vpop.f32.mrf.mxu0  ;;  %1910 = vmatprep.subr.mxu1 %v1861_v22 }
 0x19c   : > { %1911 = vmatpush2.msra.mxu1 %v1860_v27  ;;  %v1847_v27 = vld [vmem:[#allocation8 + $0x148] sm:$0xff] }
 0x19d   : > { %v3927_v49 = vpop.f32.mrf.mxu1  ;;  %v3929_v50 = vpop.f32.mrf.mxu0  ;;  %1912 = vmatprep.subr.mxu1 %v1859_v29  ;;  %v4023_v29 = vsub.s32 0, %v920_v6 }
 0x19e   : > { %1913 = vmatpush2.msra.mxu1 %v1858_v32  ;;  %v1846_v32 = vld [vmem:[#allocation8 + $0x140] sm:$0xff] }
 0x19f   : > { %v3933_v52 = vpop.f32.mrf.mxu1  ;;  %1914 = vmatprep.subr.mxu1 %v1857_v33  ;;  %4933 = vst [vmem:[#allocation21_spill] sm:$0xff] %v4023_v29  ;;  %v917_v33 = vld [vmem:[%s4842_s2] sm:$0x3] }
 0x1a0   : > { %1915 = vmatpush2.msra.mxu1 %v1856_v37  ;;  %v4028_v37 = vsub.s32 1, %v920_v6 }
 0x1a1   : > { %1916 = vmatprep.subr.mxu1 %v1855_v39 }
 0x1a2   : > { %1917 = vmatpush2.msra.mxu1 %v1854_v46  ;;  %4934 = vst [vmem:[#allocation22_spill] sm:$0xff] %v4028_v37  ;;  %v4035_v46 = vrot.slane %v917_v33, %v4023_v29 }
 0x1a3   : > { %1918 = vmatprep.subr.mxu1 %v1853_v47 }
 0x1a4   : > { %1919 = vmatpush2.msra.mxu1 %v1852_v63  ;;  %v4040_v63 = vrot.slane %v917_v33, %v4028_v37  ;;  %v996_v6 = vadd.f32 %v3925_v48, %v4035_v46 }
 0x1a5   : > { %1920 = vmatprep.subr.mxu1 %v1851_v3 }
 0x1a6   : > { %1921 = vmatpush2.msra.mxu1 %v1850_v12 }
 0x1a7   : > { %v3931_v51 = vpop.f32.mrf.mxu0  ;;  %1922 = vmatprep.subr.mxu1 %v1849_v16  ;;  %v998_v16 = vadd.f32 %v3929_v50, %v4040_v63 }
 0x1a8   : > { %1923 = vmatpush2.msra.mxu1 %v1848_v20  ;;  %v1002_v33 = vadd.f32 %v3931_v51, %v4035_v46 }
 0x1a9   : > { %v3935_v53 = vpop.f32.mrf.mxu0  ;;  %1924 = vmatprep.subr.mxu1 %v1847_v27 }
 0x1aa   : > { %v3937_v54 = vpop.f32.mrf.mxu1  ;;  %1925 = vmatpush2.msra.mxu1 %v1846_v32  ;;  %v1145_v32 = vadd.f32 %v3927_v49, %v996_v6  ;;  %v1004_v48 = vadd.f32 %v3935_v53, %v4040_v63 }
 0x1ab   : > { %v1151_v50 = vadd.f32 %v3937_v54, %v1002_v33 }
 0x1ac   : > { %v3941_v56 = vpop.f32.mrf.mxu1 }
 0x1ad   : > { %v3939_v55 = vpop.f32.mrf.mxu0 }
 0x1af   : > { %v3943_v57 = vpop.f32.mrf.mxu0 }
 0x1b0   : > { %v3945_v58 = vpop.f32.mrf.mxu1 }
 0x1b2   : > { %v3949_v60 = vpop.f32.mrf.mxu1 }
 0x1b3   : > { %v3947_v59 = vpop.f32.mrf.mxu0 }
 0x1b5   : > { %v3951_v61 = vpop.f32.mrf.mxu0 }
 0x1b6   : > { %v3953_v1 = vpop.f32.mrf.mxu1 }
 0x1b8   : > { %v3957_v5 = vpop.f32.mrf.mxu1 }
 0x1b9   : > { %v3955_v4 = vpop.f32.mrf.mxu0 }
 0x1bb   : > { %v3959_v8 = vpop.f32.mrf.mxu0 }
 0x1bc   : > { %v3961_v11 = vpop.f32.mrf.mxu1 }
 0x1be   : > { %v3965_v15 = vpop.f32.mrf.mxu1 }
 0x1bf   : > { %v3963_v14 = vpop.f32.mrf.mxu0 }
 0x1c1   : > { %v3967_v18 = vpop.f32.mrf.mxu0 }
 0x1c2   : > { %v3969_v21 = vpop.f32.mrf.mxu1 }
 0x1c4   : > { %v3973_v25 = vpop.f32.mrf.mxu1 }
 0x1c5   : > { %v3971_v24 = vpop.f32.mrf.mxu0 }
 0x1c7   : > { %v3975_v28 = vpop.f32.mrf.mxu0 }
 0x1c8   : > { %v3977_v31 = vpop.f32.mrf.mxu1 }
 0x1ca   : > { %v3981_v35 = vpop.f32.mrf.mxu1 }
 0x1cb   : > { %v3979_v34 = vpop.f32.mrf.mxu0 }
 0x1cd   : > { %v3983_v38 = vpop.f32.mrf.mxu0 }
 0x1ce   : > { %v3985_v41 = vpop.f32.mrf.mxu1 }
 0x1d0   : > { %v3989_v45 = vpop.f32.mrf.mxu1 }
 0x1d1   : > { %v3987_v44 = vpop.f32.mrf.mxu0 }
 0x1d3   : > { %v3991_v62 = vpop.f32.mrf.mxu0 }
 0x1d4   : > { %v3993_v2 = vpop.f32.mrf.mxu1 }
 0x1d6   : > { %v3997_v9 = vpop.f32.mrf.mxu1 }
 0x1d7   : > { %v3995_v7 = vpop.f32.mrf.mxu0 }
 0x1d9   : > { %v3999_v13 = vpop.f32.mrf.mxu0 }
 0x1da   : > { %v4001_v19 = vpop.f32.mrf.mxu1 }
 0x1dc   : > { %v4005_v26 = vpop.f32.mrf.mxu1 }
 0x1dd   : > { %v4003_v23 = vpop.f32.mrf.mxu0 }
 0x1df   : > { %v4007_v30 = vpop.f32.mrf.mxu0 }
 0x1e0   : > { %v4009_v36 = vpop.f32.mrf.mxu1 }
 0x1e2   : > { %v4013_v43 = vpop.f32.mrf.mxu1 }
 0x1e3   : > { %v4011_v42 = vpop.f32.mrf.mxu0 }
 0x1e5   : > { %v4015_v0 = vpop.f32.mrf.mxu0 }
 0x1e6   : > { %v4017_v10 = vpop.f32.mrf.mxu1 }
 0x1e8   : > { %v4019_v17 = vpop.f32.mrf.mxu1 }
 0x1e9   : > { %v4021_v22 = vpop.f32.mrf.mxu0 }
 0x1eb   : > { %v4032_v40 = vpop.f32.mrf.mxu0 }
 0x1ec   : > { %v4030_v39 = vpop.f32.mrf.mxu1  ;;  %4936 = vst [vmem:[#allocation24_spill] sm:$0xff] %v4032_v40  ;;  %v1153_v40 = vadd.f32 %v3941_v56, %v1004_v48  ;;  %v1020_v48 = vadd.f32 %v3955_v4, %v4035_v46 }
 0x1ed   : > { %4935 = vst [vmem:[#allocation23_spill] sm:$0xff] %v4030_v39 }
 0x1ee   : > { %v4037_v47 = vpop.f32.mrf.mxu1 }
 0x1ef   : > { %4937 = vst [vmem:[#allocation25_spill] sm:$0xff] %v4037_v47  ;;  %v4042_v3 = vpop.f32.mrf.mxu0  ;;  %v1147_v47 = vadd.f32 %v3933_v52, %v998_v16  ;;  %v1010_v52 = vadd.f32 %v3943_v57, %v4040_v63 }
 0x1f0   : > { %4938 = vst [vmem:[#allocation26_spill] sm:$0xff] %v4042_v3 }
 0x1f1   : > { %v4052_v27 = vpop.f32.mrf.mxu0  ;;  %v1159_v57 = vadd.f32 %v3949_v60, %v1010_v52 }
 0x1f2   : > { %v4046_v12 = vpop.f32.mrf.mxu1  ;;  %4941 = vst [vmem:[#allocation29_spill] sm:$0xff] %v4052_v27 }
 0x1f3   : > { %4939 = vst [vmem:[#allocation27_spill] sm:$0xff] %v4046_v12 }
 0x1f4   : > { %v4050_v20 = vpop.f32.mrf.mxu1 }
 0x1f5   : > { %4940 = vst [vmem:[#allocation28_spill] sm:$0xff] %v4050_v20  ;;  %v1008_v20 = vadd.f32 %v3939_v55, %v4035_v46  ;;  %v1014_v55 = vadd.f32 %v3947_v59, %v4035_v46 }
 0x1f7   : > { %v1293_v37 = vpop.f32.mrf.mxu0  ;;  %v1157_v54 = vadd.f32 %v3945_v58, %v1008_v20 }
 0x1f8   : > { %v1442_v29 = vpop.f32.mrf.mxu1  ;;  %v1294_v12 = vadd.f32 %v1293_v37, %v1145_v32 }
 0x1f9   : > { %v1295_v3 = vpop.f32.mrf.mxu0 }
 0x1fa   : > { %v1444_v39 = vpop.f32.mrf.mxu1  ;;  %v1296_v27 = vadd.f32 %v1295_v3, %v1147_v47  ;;  %v4063_v49 = vadd.f32 %v1442_v29, %v1294_v12 }
 0x1fb   : > { %v1299_v6 = vpop.f32.mrf.mxu0 }
 0x1fc   : > { %v1448_v51 = vpop.f32.mrf.mxu1  ;;  %v4068_v16 = vadd.f32 %v1444_v39, %v1296_v27  ;;  %v1300_v53 = vadd.f32 %v1299_v6, %v1151_v50  ;;  %v1525_v3 = vmax.f32 %v4063_v49, 0.0  ;;  %v1016_v39 = vadd.f32 %v3951_v61, %v4040_v63 }
 0x1fd   : > { %v1301_v37 = vpop.f32.mrf.mxu0 }
 0x1fe   : > { %v1450_v32 = vpop.f32.mrf.mxu1  ;;  %v1526_v29 = vmax.f32 %v4068_v16, 0.0  ;;  %v1302_v47 = vadd.f32 %v1301_v37, %v1153_v40  ;;  %v4075_v12 = vadd.f32 %v1448_v51, %v1300_v53  ;;  %v1163_v40 = vadd.f32 %v3953_v1, %v1014_v55 }
 0x1ff   : > { %v1305_v56 = vpop.f32.mrf.mxu0  ;;  %v1165_v53 = vadd.f32 %v3957_v5, %v1016_v39  ;;  %v1022_v37 = vadd.f32 %v3959_v8, %v4040_v63  ;;  %v1169_v55 = vadd.f32 %v3961_v11, %v1020_v48 }
 0x200   : > { %v1454_v33 = vpop.f32.mrf.mxu1  ;;  %v4080_v27 = vadd.f32 %v1450_v32, %v1302_v47  ;;  %v1306_v58 = vadd.f32 %v1305_v56, %v1157_v54  ;;  %1693 = vmatprep.mubr.f32.mxu0 %v1526_v29  ;;  %v1527_v61 = vmax.f32 %v4075_v12, 0.0  ;;  %v1026_v47 = vadd.f32 %v3963_v14, %v4035_v46 }
 0x201   : > { %v1307_v59 = vpop.f32.mrf.mxu0  ;;  %1694 = vmatmul.mubr.f32.vlgmr.msra.gmra.mxu0 %v1525_v3 }
 0x202   : > { %v1456_v20 = vpop.f32.mrf.mxu1  ;;  %v1528_v60 = vmax.f32 %v4080_v27, 0.0  ;;  %v1308_v50 = vadd.f32 %v1307_v59, %v1159_v57  ;;  %v4091_v6 = vadd.f32 %v1454_v33, %v1306_v58  ;;  %v1171_v58 = vadd.f32 %v3965_v15, %v1022_v37 }
 0x203   : > { %v1311_v51 = vpop.f32.mrf.mxu0  ;;  %v1028_v59 = vadd.f32 %v3967_v18, %v4040_v63  ;;  %v1175_v48 = vadd.f32 %v3969_v21, %v1026_v47 }
 0x204   : > { %v1460_v52 = vpop.f32.mrf.mxu1  ;;  %v4096_v32 = vadd.f32 %v1456_v20, %v1308_v50  ;;  %v1312_v1 = vadd.f32 %v1311_v51, %v1163_v40  ;;  %1699 = vmatprep.mubr.f32.mxu0 %v1528_v60  ;;  %v1529_v8 = vmax.f32 %v4091_v6, 0.0  ;;  %v1032_v50 = vadd.f32 %v3971_v24, %v4035_v46 }
 0x205   : > { %v1313_v4 = vpop.f32.mrf.mxu0  ;;  %1700 = vmatmul.mubr.f32.gmra.mxu0 %v1527_v61 }
 0x206   : > { %v1462_v54 = vpop.f32.mrf.mxu1  ;;  %v1530_v5 = vmax.f32 %v4096_v32, 0.0  ;;  %v1314_v56 = vadd.f32 %v1313_v4, %v1165_v53  ;;  %v4107_v33 = vadd.f32 %v1460_v52, %v1312_v1  ;;  %v1177_v1 = vadd.f32 %v3973_v25, %v1028_v59 }
 0x207   : > { %v1317_v57 = vpop.f32.mrf.mxu0  ;;  %v1034_v4 = vadd.f32 %v3975_v28, %v4040_v63  ;;  %v1181_v47 = vadd.f32 %v3977_v31, %v1032_v50 }
 0x208   : > { %v1466_v39 = vpop.f32.mrf.mxu1  ;;  %v4112_v20 = vadd.f32 %v1462_v54, %v1314_v56  ;;  %v1318_v11 = vadd.f32 %v1317_v57, %v1169_v55  ;;  %1705 = vmatprep.mubr.f32.mxu0 %v1530_v5  ;;  %v1531_v18 = vmax.f32 %v4107_v33, 0.0  ;;  %v1038_v56 = vadd.f32 %v3979_v34, %v4035_v46 }
 0x209   : > { %v1319_v14 = vpop.f32.mrf.mxu0  ;;  %1706 = vmatmul.mubr.f32.gmra.mxu0 %v1529_v8 }
 0x20a   : > { %v1468_v40 = vpop.f32.mrf.mxu1  ;;  %v1532_v15 = vmax.f32 %v4112_v20, 0.0  ;;  %v1320_v51 = vadd.f32 %v1319_v14, %v1171_v58  ;;  %v4123_v52 = vadd.f32 %v1466_v39, %v1318_v11  ;;  %v1183_v11 = vadd.f32 %v3981_v35, %v1034_v4 }
 0x20b   : > { %v1323_v53 = vpop.f32.mrf.mxu0  ;;  %v1040_v14 = vadd.f32 %v3983_v38, %v4040_v63  ;;  %v1187_v50 = vadd.f32 %v3985_v41, %v1038_v56 }
 0x20c   : > { %v1472_v37 = vpop.f32.mrf.mxu1  ;;  %v4128_v54 = vadd.f32 %v1468_v40, %v1320_v51  ;;  %v1324_v21 = vadd.f32 %v1323_v53, %v1175_v48  ;;  %1711 = vmatprep.mubr.f32.mxu0 %v1532_v15  ;;  %v1533_v28 = vmax.f32 %v4123_v52, 0.0  ;;  %v1044_v51 = vadd.f32 %v3987_v44, %v4035_v46 }
 0x20d   : > { %v1325_v24 = vpop.f32.mrf.mxu0  ;;  %1712 = vmatmul.mubr.f32.gmra.mxu0 %v1531_v18 }
 0x20e   : > { %v1474_v55 = vpop.f32.mrf.mxu1  ;;  %v1534_v25 = vmax.f32 %v4128_v54, 0.0  ;;  %v1326_v57 = vadd.f32 %v1325_v24, %v1177_v1  ;;  %v4139_v39 = vadd.f32 %v1472_v37, %v1324_v21  ;;  %v1189_v21 = vadd.f32 %v3989_v45, %v1040_v14 }
 0x20f   : > { %v1329_v58 = vpop.f32.mrf.mxu0  ;;  %v1046_v24 = vadd.f32 %v3991_v62, %v4040_v63  ;;  %v1193_v56 = vadd.f32 %v3993_v2, %v1044_v51 }
 0x210   : > { %v1478_v59 = vpop.f32.mrf.mxu1  ;;  %v4144_v40 = vadd.f32 %v1474_v55, %v1326_v57  ;;  %v1330_v31 = vadd.f32 %v1329_v58, %v1181_v47  ;;  %1717 = vmatprep.mubr.f32.mxu0 %v1534_v25  ;;  %v1535_v38 = vmax.f32 %v4139_v39, 0.0  ;;  %v1050_v57 = vadd.f32 %v3995_v7, %v4035_v46 }
 0x211   : > { %v1331_v34 = vpop.f32.mrf.mxu0  ;;  %1718 = vmatmul.mubr.f32.gmra.mxu0 %v1533_v28 }
 0x212   : > { %v1480_v48 = vpop.f32.mrf.mxu1  ;;  %v1536_v35 = vmax.f32 %v4144_v40, 0.0  ;;  %v1332_v53 = vadd.f32 %v1331_v34, %v1183_v11  ;;  %v4155_v37 = vadd.f32 %v1478_v59, %v1330_v31  ;;  %v1195_v31 = vadd.f32 %v3997_v9, %v1046_v24 }
 0x213   : > { %v1335_v1 = vpop.f32.mrf.mxu0  ;;  %v1052_v34 = vadd.f32 %v3999_v13, %v4040_v63  ;;  %v1199_v51 = vadd.f32 %v4001_v19, %v1050_v57 }
 0x214   : > { %v1484_v4 = vpop.f32.mrf.mxu1  ;;  %v4160_v55 = vadd.f32 %v1480_v48, %v1332_v53  ;;  %v1336_v41 = vadd.f32 %v1335_v1, %v1187_v50  ;;  %1723 = vmatprep.mubr.f32.mxu0 %v1536_v35  ;;  %v1537_v62 = vmax.f32 %v4155_v37, 0.0  ;;  %v1056_v53 = vadd.f32 %v4003_v23, %v4035_v46 }
 0x215   : > { %v1337_v44 = vpop.f32.mrf.mxu0  ;;  %1724 = vmatmul.mubr.f32.gmra.mxu0 %v1535_v38 }
 0x216   : > { %v1486_v47 = vpop.f32.mrf.mxu1  ;;  %v1538_v45 = vmax.f32 %v4160_v55, 0.0  ;;  %v1338_v58 = vadd.f32 %v1337_v44, %v1189_v21  ;;  %v4171_v59 = vadd.f32 %v1484_v4, %v1336_v41  ;;  %v1201_v41 = vadd.f32 %v4005_v26, %v1052_v34 }
 0x217   : > { %v1341_v11 = vpop.f32.mrf.mxu0  ;;  %v1058_v44 = vadd.f32 %v4007_v30, %v4040_v63  ;;  %v1205_v57 = vadd.f32 %v4009_v36, %v1056_v53 }
 0x218   : > { %v1490_v14 = vpop.f32.mrf.mxu1  ;;  %v4176_v48 = vadd.f32 %v1486_v47, %v1338_v58  ;;  %v1342_v2 = vadd.f32 %v1341_v11, %v1193_v56  ;;  %1729 = vmatprep.mubr.f32.mxu0 %v1538_v45  ;;  %v1539_v13 = vmax.f32 %v4171_v59, 0.0  ;;  %v1062_v58 = vadd.f32 %v4011_v42, %v4035_v46 }
 0x219   : > { %v1343_v7 = vpop.f32.mrf.mxu0  ;;  %1730 = vmatmul.mubr.f32.gmra.mxu0 %v1537_v62 }
 0x21a   : > { %v1492_v50 = vpop.f32.mrf.mxu1  ;;  %v1540_v9 = vmax.f32 %v4176_v48, 0.0  ;;  %v1344_v1 = vadd.f32 %v1343_v7, %v1195_v31  ;;  %v4187_v4 = vadd.f32 %v1490_v14, %v1342_v2  ;;  %v1207_v2 = vadd.f32 %v4013_v43, %v1058_v44 }
 0x21b   : > { %v1347_v21 = vpop.f32.mrf.mxu0  ;;  %v1064_v7 = vadd.f32 %v4015_v0, %v4040_v63  ;;  %v1211_v53 = vadd.f32 %v4017_v10, %v1062_v58 }
 0x21c   : > { %v1496_v24 = vpop.f32.mrf.mxu1  ;;  %v4192_v47 = vadd.f32 %v1492_v50, %v1344_v1  ;;  %v1348_v19 = vadd.f32 %v1347_v21, %v1199_v51  ;;  %1735 = vmatprep.mubr.f32.mxu0 %v1540_v9  ;;  %v4873_v30 = vmax.f32 %v4187_v4, 0.0  ;;  %v1068_v1 = vadd.f32 %v4021_v22, %v4035_v46 }
 0x21d   : > { %v1349_v23 = vpop.f32.mrf.mxu0  ;;  %1736 = vmatmul.mubr.f32.gmra.mxu0 %v1539_v13 }
 0x21e   : > { %v1498_v56 = vpop.f32.mrf.mxu1  ;;  %v4872_v26 = vmax.f32 %v4192_v47, 0.0  ;;  %v1350_v11 = vadd.f32 %v1349_v23, %v1201_v41  ;;  %v4203_v14 = vadd.f32 %v1496_v24, %v1348_v19  ;;  %v1213_v19 = vadd.f32 %v4019_v17, %v1064_v7  ;;  %v4942_v23 = vld [vmem:[#allocation24_spill] sm:$0xff] }
 0x21f   : > { %v1353_v31 = vpop.f32.mrf.mxu0 }
 0x220   : > { %v1502_v34 = vpop.f32.mrf.mxu1  ;;  %v4208_v50 = vadd.f32 %v1498_v56, %v1350_v11  ;;  %v1354_v36 = vadd.f32 %v1353_v31, %v1205_v57  ;;  %1741 = vmatprep.mubr.f32.mxu0 %v4872_v26  ;;  %v4863_v0 = vmax.f32 %v4203_v14, 0.0  ;;  %v1070_v56 = vadd.f32 %v4942_v23, %v4040_v63  ;;  %v4943_v11 = vld [vmem:[#allocation23_spill] sm:$0xff]  ;;  %v4946_v23 = vld [vmem:[#allocation29_spill] sm:$0xff] }
 0x221   : > { %v1355_v42 = vpop.f32.mrf.mxu0  ;;  %1742 = vmatmul.mubr.f32.gmra.mxu0 %v4873_v30  ;;  %v1217_v31 = vadd.f32 %v4943_v11, %v1068_v1 }
 0x222   : > { %v1504_v51 = vpop.f32.mrf.mxu1  ;;  %v4862_v43 = vmax.f32 %v4208_v50, 0.0  ;;  %v1356_v21 = vadd.f32 %v1355_v42, %v1207_v2  ;;  %v4219_v24 = vadd.f32 %v1502_v34, %v1354_v36  ;;  %v4944_v34 = vld [vmem:[#allocation26_spill] sm:$0xff] }
 0x223   : > { %v1359_v41 = vpop.f32.mrf.mxu0  ;;  %v1074_v2 = vadd.f32 %v4944_v34, %v4035_v46 }
 0x224   : > { %v1508_v44 = vpop.f32.mrf.mxu1  ;;  %v4224_v57 = vadd.f32 %v1504_v51, %v1356_v21  ;;  %v1360_v10 = vadd.f32 %v1359_v41, %v1211_v53  ;;  %1747 = vmatprep.mubr.f32.mxu0 %v4862_v43  ;;  %v4871_v36 = vmax.f32 %v4219_v24, 0.0  ;;  %v4945_v21 = vld [vmem:[#allocation25_spill] sm:$0xff]  ;;  %v1076_v43 = vadd.f32 %v4946_v23, %v4040_v63 }
 0x225   : > { %v1361_v22 = vpop.f32.mrf.mxu0  ;;  %1748 = vmatmul.mubr.f32.gmra.mxu0 %v4863_v0  ;;  %v1219_v41 = vadd.f32 %v4945_v21, %v1070_v56 }
 0x226   : > { %v1510_v58 = vpop.f32.mrf.mxu1  ;;  %v4870_v17 = vmax.f32 %v4224_v57, 0.0  ;;  %v1362_v7 = vadd.f32 %v1361_v22, %v1213_v19  ;;  %v4235_v42 = vadd.f32 %v1508_v44, %v1360_v10  ;;  %v4947_v44 = vld [vmem:[#allocation27_spill] sm:$0xff] }
 0x227   : > { %v1365_v51 = vpop.f32.mrf.mxu0  ;;  %v1223_v19 = vadd.f32 %v4947_v44, %v1074_v2 }
 0x228   : > { %v1514_v53 = vpop.f32.mrf.mxu1  ;;  %v4240_v0 = vadd.f32 %v1510_v58, %v1362_v7  ;;  %v1366_v1 = vadd.f32 %v1365_v51, %v1217_v31  ;;  %1753 = vmatprep.mubr.f32.mxu0 %v4870_v17  ;;  %v4869_v56 = vmax.f32 %v4235_v42, 0.0  ;;  %v4948_v31 = vld [vmem:[#allocation28_spill] sm:$0xff] }
 0x229   : > { %v1367_v46 = vpop.f32.mrf.mxu0  ;;  %1754 = vmatmul.mubr.f32.gmra.mxu0 %v4871_v36  ;;  %v1225_v7 = vadd.f32 %v4948_v31, %v1076_v43  ;;  %v1841_v31 = vld [vmem:[#allocation8 + $0x118] sm:$0xff] }
 0x22a   : > { %v1516_v11 = vpop.f32.mrf.mxu1  ;;  %v4868_v10 = vmax.f32 %v4240_v0, 0.0  ;;  %v1368_v22 = vadd.f32 %v1367_v46, %v1219_v41  ;;  %v4249_v34 = vadd.f32 %v1514_v53, %v1366_v1 }
 0x22b   : > { %v1371_v63 = vpop.f32.mrf.mxu0 }
 0x22c   : > { %v1520_v58 = vpop.f32.mrf.mxu1  ;;  %v4252_v51 = vadd.f32 %v1516_v11, %v1368_v22  ;;  %v1372_v21 = vadd.f32 %v1371_v63, %v1223_v19  ;;  %1759 = vmatprep.mubr.f32.mxu0 %v4868_v10  ;;  %v4867_v53 = vmax.f32 %v4249_v34, 0.0  ;;  %v1845_v19 = vld [vmem:[#allocation8 + $0x138] sm:$0xff]  ;;  %v1844_v22 = vld [vmem:[#allocation8 + $0x130] sm:$0xff]  ;;  %v1843_v63 = vld [vmem:[#allocation8 + $0x128] sm:$0xff] }
 0x22d   : > { %v1373_v23 = vpop.f32.mrf.mxu0  ;;  %1760 = vmatmul.mubr.f32.gmra.mxu0 %v4869_v56  ;;  %1926 = vmatprep.subr.mxu1 %v1845_v19  ;;  %v2142_v19 = vld [vmem:[#allocation10 + $0xd8] sm:$0xff] }
 0x22e   : > { %v4866_v2 = vmax.f32 %v4252_v51, 0.0  ;;  %v1374_v41 = vadd.f32 %v1373_v23, %v1225_v7  ;;  %v4260_v1 = vadd.f32 %v1520_v58, %v1372_v21  ;;  %v1522_v46 = vpop.f32.mrf.mxu1  ;;  %1927 = vmatpush2.msra.mxu1 %v1844_v22  ;;  %v1842_v58 = vld [vmem:[#allocation8 + $0x120] sm:$0xff]  ;;  %v1840_v7 = vld [vmem:[#allocation8 + $0x110] sm:$0xff]  ;;  %v1839_v21 = vld [vmem:[#allocation8 + $0x108] sm:$0xff] }
 0x22f   : > { %1928 = vmatprep.subr.mxu1 %v1843_v63  ;;  %v1838_v23 = vld [vmem:[#allocation8 + $0x100] sm:$0xff]  ;;  %v2141_v22 = vld [vmem:[#allocation10 + $0xd0] sm:$0xff]  ;;  %v2140_v63 = vld [vmem:[#allocation10 + $0xc8] sm:$0xff] }
 0x230   : > { %v4262_v44 = vadd.f32 %v1522_v46, %v1374_v41  ;;  %1765 = vmatprep.mubr.f32.mxu0 %v4866_v2  ;;  %v4865_v11 = vmax.f32 %v4260_v1, 0.0  ;;  %1929 = vmatpush2.msra.mxu1 %v1842_v58  ;;  %v2146_v41 = vld [vmem:[#allocation10 + $0xf8] sm:$0xff]  ;;  %v2145_v46 = vld [vmem:[#allocation10 + $0xf0] sm:$0xff]  ;;  %v2139_v58 = vld [vmem:[#allocation10 + $0xc0] sm:$0xff] }
 0x231   : > { %1766 = vmatmul.mubr.f32.gmra.mxu0 %v4867_v53  ;;  %1930 = vmatprep.subr.mxu1 %v1841_v31  ;;  %v2138_v31 = vld [vmem:[#allocation10 + $0xb8] sm:$0xff] }
 0x232   : > { %v4864_v43 = vmax.f32 %v4262_v44, 0.0  ;;  %1931 = vmatpush2.msra.mxu1 %v1840_v7  ;;  %2191 = vmatprep.subr.mxu0 %v2146_v41  ;;  %v2137_v7 = vld [vmem:[#allocation10 + $0xb0] sm:$0xff]  ;;  %v2134_v2 = vld [vmem:[#allocation10 + $0x98] sm:$0xff] }
 0x233   : > { %1932 = vmatprep.subr.mxu1 %v1839_v21  ;;  %2192 = vmatpush1.msra.mxu0 %v2145_v46  ;;  %v2136_v21 = vld [vmem:[#allocation10 + $0xa8] sm:$0xff]  ;;  %v2133_v41 = vld [vmem:[#allocation10 + $0x90] sm:$0xff] }
 0x234   : > { %1771 = vmatprep.mubr.f32.mxu0 %v4864_v43  ;;  %1933 = vmatpush2.msra.mxu1 %v1838_v23  ;;  %v2144_v43 = vld [vmem:[#allocation10 + $0xe8] sm:$0xff]  ;;  %v2135_v23 = vld [vmem:[#allocation10 + $0xa0] sm:$0xff] }
 0x235   : > { %1772 = vmatmul.mubr.f32.gmra.mxu0 %v4865_v11  ;;  %v2143_v11 = vld [vmem:[#allocation10 + $0xe0] sm:$0xff]  ;;  %2193 = vmatprep.subr.mxu0 %v2144_v43  ;;  %v2132_v46 = vld [vmem:[#allocation10 + $0x88] sm:$0xff] }
 0x236   : > { %2194 = vmatpush1.msra.mxu0 %v2143_v11  ;;  %v2131_v43 = vld [vmem:[#allocation10 + $0x80] sm:$0xff]  ;;  %v2130_v11 = vld [vmem:[#allocation10 + $0x78] sm:$0xff] }
 0x237   : > { %2195 = vmatprep.subr.mxu0 %v2142_v19  ;;  %v2129_v19 = vld [vmem:[#allocation10 + $0x70] sm:$0xff] }
 0x238   : > { %2196 = vmatpush1.msra.mxu0 %v2141_v22  ;;  %v2128_v22 = vld [vmem:[#allocation10 + $0x68] sm:$0xff] }
 0x239   : > { %2197 = vmatprep.subr.mxu0 %v2140_v63  ;;  %v2127_v63 = vld [vmem:[#allocation10 + $0x60] sm:$0xff] }
 0x23a   : > { %2198 = vmatpush1.msra.mxu0 %v2139_v58  ;;  %v2126_v58 = vld [vmem:[#allocation10 + $0x58] sm:$0xff] }
 0x23b   : > { %2199 = vmatprep.subr.mxu0 %v2138_v31  ;;  %v2125_v31 = vld [vmem:[#allocation10 + $0x50] sm:$0xff] }
 0x23c   : > { %2200 = vmatpush1.msra.mxu0 %v2137_v7  ;;  %v2124_v7 = vld [vmem:[#allocation10 + $0x48] sm:$0xff] }
 0x23d   : > { %2201 = vmatprep.subr.mxu0 %v2136_v21  ;;  %v2123_v21 = vld [vmem:[#allocation10 + $0x40] sm:$0xff] }
 0x23e   : > { %2202 = vmatpush1.msra.mxu0 %v2135_v23  ;;  %v2122_v23 = vld [vmem:[#allocation10 + $0x38] sm:$0xff] }
 0x23f   : > { %2203 = vmatprep.subr.mxu0 %v2134_v2  ;;  %v2121_v2 = vld [vmem:[#allocation10 + $0x30] sm:$0xff] }
 0x240   : > { %2204 = vmatpush1.msra.mxu0 %v2133_v41  ;;  %v2120_v41 = vld [vmem:[#allocation10 + $0x28] sm:$0xff] }
 0x241   : > { %2205 = vmatprep.subr.mxu0 %v2132_v46  ;;  %v2119_v46 = vld [vmem:[#allocation10 + $0x20] sm:$0xff] }
 0x242   : > { %2206 = vmatpush1.msra.mxu0 %v2131_v43  ;;  %v2118_v43 = vld [vmem:[#allocation10 + $0x18] sm:$0xff] }
 0x243   : > { %2207 = vmatprep.subr.mxu0 %v2130_v11  ;;  %v2117_v11 = vld [vmem:[#allocation10 + $0x10] sm:$0xff] }
 0x244   : > { %2208 = vmatpush1.msra.mxu0 %v2129_v19  ;;  %v2116_v19 = vld [vmem:[#allocation10 + $0x8] sm:$0xff] }
 0x245   : > { %2209 = vmatprep.subr.mxu0 %v2128_v22  ;;  %v2115_v22 = vld [vmem:[#allocation10] sm:$0xff] }
 0x246   : > { %2210 = vmatpush1.msra.mxu0 %v2127_v63  ;;  %v2178_v63 = vld [vmem:[#allocation10 + $0x1f8] sm:$0xff] }
 0x247   : > { %2211 = vmatprep.subr.mxu0 %v2126_v58  ;;  %v2177_v58 = vld [vmem:[#allocation10 + $0x1f0] sm:$0xff] }
 0x248   : > { %2212 = vmatpush1.msra.mxu0 %v2125_v31  ;;  %v2176_v31 = vld [vmem:[#allocation10 + $0x1e8] sm:$0xff] }
 0x249   : > { %2213 = vmatprep.subr.mxu0 %v2124_v7  ;;  %v2175_v7 = vld [vmem:[#allocation10 + $0x1e0] sm:$0xff] }
 0x24a   : > { %2214 = vmatpush1.msra.mxu0 %v2123_v21  ;;  %v2174_v21 = vld [vmem:[#allocation10 + $0x1d8] sm:$0xff] }
 0x24b   : > { %2215 = vmatprep.subr.mxu0 %v2122_v23  ;;  %v2173_v23 = vld [vmem:[#allocation10 + $0x1d0] sm:$0xff] }
 0x24c   : > { %2216 = vmatpush1.msra.mxu0 %v2121_v2  ;;  %v2172_v2 = vld [vmem:[#allocation10 + $0x1c8] sm:$0xff] }
 0x24d   : > { %2217 = vmatprep.subr.mxu0 %v2120_v41  ;;  %v2171_v41 = vld [vmem:[#allocation10 + $0x1c0] sm:$0xff] }
 0x24e   : > { %2218 = vmatpush1.msra.mxu0 %v2119_v46  ;;  %v2170_v46 = vld [vmem:[#allocation10 + $0x1b8] sm:$0xff] }
 0x24f   : > { %2219 = vmatprep.subr.mxu0 %v2118_v43  ;;  %v2169_v43 = vld [vmem:[#allocation10 + $0x1b0] sm:$0xff] }
 0x250   : > { %2220 = vmatpush1.msra.mxu0 %v2117_v11  ;;  %v2168_v11 = vld [vmem:[#allocation10 + $0x1a8] sm:$0xff] }
 0x251   : > { %2221 = vmatprep.subr.mxu0 %v2116_v19  ;;  %v2167_v19 = vld [vmem:[#allocation10 + $0x1a0] sm:$0xff] }
 0x252   : > { %2222 = vmatpush1.msra.mxu0 %v2115_v22  ;;  %v2166_v22 = vld [vmem:[#allocation10 + $0x198] sm:$0xff] }
 0x253   : > { %2223 = vmatprep.subr.mxu0 %v2178_v63  ;;  %v2165_v63 = vld [vmem:[#allocation10 + $0x190] sm:$0xff] }
 0x254   : > { %2224 = vmatpush2.msra.mxu0 %v2177_v58  ;;  %v2164_v58 = vld [vmem:[#allocation10 + $0x188] sm:$0xff] }
 0x255   : > { %2225 = vmatprep.subr.mxu0 %v2176_v31  ;;  %v2163_v31 = vld [vmem:[#allocation10 + $0x180] sm:$0xff] }
 0x256   : > { %2226 = vmatpush2.msra.mxu0 %v2175_v7  ;;  %v2162_v7 = vld [vmem:[#allocation10 + $0x178] sm:$0xff] }
 0x257   : > { %2227 = vmatprep.subr.mxu0 %v2174_v21  ;;  %v2161_v21 = vld [vmem:[#allocation10 + $0x170] sm:$0xff] }
 0x258   : > { %2228 = vmatpush2.msra.mxu0 %v2173_v23  ;;  %v2160_v23 = vld [vmem:[#allocation10 + $0x168] sm:$0xff] }
 0x259   : > { %2229 = vmatprep.subr.mxu0 %v2172_v2  ;;  %v2159_v2 = vld [vmem:[#allocation10 + $0x160] sm:$0xff] }
 0x25a   : > { %2230 = vmatpush2.msra.mxu0 %v2171_v41  ;;  %v2158_v41 = vld [vmem:[#allocation10 + $0x158] sm:$0xff] }
 0x25b   : > { %2231 = vmatprep.subr.mxu0 %v2170_v46  ;;  %v2157_v46 = vld [vmem:[#allocation10 + $0x150] sm:$0xff] }
 0x25c   : > { %2232 = vmatpush2.msra.mxu0 %v2169_v43  ;;  %v1617_v43 = vld [vmem:[%s4844_s4] sm:$0x3] }
 0x25d   : > { %2233 = vmatprep.subr.mxu0 %v2168_v11  ;;  %v4949_v11 = vld [vmem:[#allocation21_spill] sm:$0xff] }
 0x25e   : > { %2234 = vmatpush2.msra.mxu0 %v2167_v19  ;;  %v4278_v19 = vrot.slane %v1617_v43, %v4949_v11 }
 0x25f   : > { %2235 = vmatprep.subr.mxu0 %v2166_v22  ;;  %v4950_v22 = vld [vmem:[#allocation22_spill] sm:$0xff] }
 0x260   : > { %2236 = vmatpush2.msra.mxu0 %v2165_v63  ;;  %v4281_v63 = vrot.slane %v1617_v43, %v4950_v22 }
 0x261   : > { %2237 = vmatprep.subr.mxu0 %v2164_v58 }
 0x262   : > { %2238 = vmatpush2.msra.mxu0 %v2163_v31 }
 0x263   : > { %2239 = vmatprep.subr.mxu0 %v2162_v7 }
 0x264   : > { %2240 = vmatpush2.msra.mxu0 %v2161_v21 }
 0x265   : > { %2241 = vmatprep.subr.mxu0 %v2160_v23 }
 0x266   : > { %2242 = vmatpush2.msra.mxu0 %v2159_v2 }
 0x267   : > { %2243 = vmatprep.subr.mxu0 %v2158_v41 }
 0x268   : > { %2244 = vmatpush2.msra.mxu0 %v2157_v46 }
 0x2c1   : > { %v1695_v58 = vpop.f32.mrf.mxu0 }
 0x2c2   : > { %v1696_v31 = vadd.f32 %v1695_v58, %v4278_v19 }
 0x2c3   : > { %v1697_v7 = vpop.f32.mrf.mxu0 }
 0x2c4   : > { %v1698_v21 = vadd.f32 %v1697_v7, %v4281_v63  ;;  %v1778_v41 = vmax.f32 %v1696_v31, 0.0 }
 0x2c5   : > { %v1701_v23 = vpop.f32.mrf.mxu0 }
 0x2c6   : > { %v1779_v2 = vmax.f32 %v1698_v21, 0.0  ;;  %v1702_v46 = vadd.f32 %v1701_v23, %v4278_v19 }
 0x2c7   : > { %v1703_v53 = vpop.f32.mrf.mxu0 }
 0x2c8   : > { %v1704_v10 = vadd.f32 %v1703_v53, %v4281_v63  ;;  %1934 = vmatprep.mubr.f32.mxu1 %v1779_v2  ;;  %v1780_v43 = vmax.f32 %v1702_v46, 0.0 }
 0x2c9   : > { %v1707_v56 = vpop.f32.mrf.mxu0  ;;  %1935 = vmatmul.mubr.f32.vlgmr.msra.gmra.mxu1 %v1778_v41 }
 0x2ca   : > { %v1781_v17 = vmax.f32 %v1704_v10, 0.0  ;;  %v1708_v36 = vadd.f32 %v1707_v56, %v4278_v19 }
 0x2cb   : > { %v1709_v26 = vpop.f32.mrf.mxu0 }
 0x2cc   : > { %v1710_v58 = vadd.f32 %v1709_v26, %v4281_v63  ;;  %1940 = vmatprep.mubr.f32.mxu1 %v1781_v17  ;;  %v1782_v31 = vmax.f32 %v1708_v36, 0.0 }
 0x2cd   : > { %v1713_v7 = vpop.f32.mrf.mxu0  ;;  %1941 = vmatmul.mubr.f32.gmra.mxu1 %v1780_v43 }
 0x2ce   : > { %v1783_v21 = vmax.f32 %v1710_v58, 0.0  ;;  %v1714_v23 = vadd.f32 %v1713_v7, %v4278_v19 }
 0x2cf   : > { %v1715_v30 = vpop.f32.mrf.mxu0 }
 0x2d0   : > { %v1716_v53 = vadd.f32 %v1715_v30, %v4281_v63  ;;  %1946 = vmatprep.mubr.f32.mxu1 %v1783_v21  ;;  %v1784_v41 = vmax.f32 %v1714_v23, 0.0 }
 0x2d1   : > { %v1719_v2 = vpop.f32.mrf.mxu0  ;;  %1947 = vmatmul.mubr.f32.gmra.mxu1 %v1782_v31 }
 0x2d2   : > { %v1785_v10 = vmax.f32 %v1716_v53, 0.0  ;;  %v1720_v56 = vadd.f32 %v1719_v2, %v4278_v19 }
 0x2d3   : > { %v1721_v46 = vpop.f32.mrf.mxu0 }
 0x2d4   : > { %v1722_v26 = vadd.f32 %v1721_v46, %v4281_v63  ;;  %1952 = vmatprep.mubr.f32.mxu1 %v1785_v10  ;;  %v1786_v36 = vmax.f32 %v1720_v56, 0.0 }
 0x2d5   : > { %v1725_v17 = vpop.f32.mrf.mxu0  ;;  %1953 = vmatmul.mubr.f32.gmra.mxu1 %v1784_v41 }
 0x2d6   : > { %v1787_v43 = vmax.f32 %v1722_v26, 0.0  ;;  %v1726_v58 = vadd.f32 %v1725_v17, %v4278_v19 }
 0x2d7   : > { %v1727_v7 = vpop.f32.mrf.mxu0 }
 0x2d8   : > { %v1728_v30 = vadd.f32 %v1727_v7, %v4281_v63  ;;  %1958 = vmatprep.mubr.f32.mxu1 %v1787_v43  ;;  %v1788_v23 = vmax.f32 %v1726_v58, 0.0 }
 0x2d9   : > { %v1731_v21 = vpop.f32.mrf.mxu0  ;;  %1959 = vmatmul.mubr.f32.gmra.mxu1 %v1786_v36 }
 0x2da   : > { %v1789_v31 = vmax.f32 %v1728_v30, 0.0  ;;  %v1732_v53 = vadd.f32 %v1731_v21, %v4278_v19 }
 0x2db   : > { %v1733_v2 = vpop.f32.mrf.mxu0 }
 0x2dc   : > { %v1734_v46 = vadd.f32 %v1733_v2, %v4281_v63  ;;  %1964 = vmatprep.mubr.f32.mxu1 %v1789_v31  ;;  %v1790_v56 = vmax.f32 %v1732_v53, 0.0 }
 0x2dd   : > { %v1737_v10 = vpop.f32.mrf.mxu0  ;;  %1965 = vmatmul.mubr.f32.gmra.mxu1 %v1788_v23 }
 0x2de   : > { %v1791_v41 = vmax.f32 %v1734_v46, 0.0  ;;  %v1738_v26 = vadd.f32 %v1737_v10, %v4278_v19 }
 0x2df   : > { %v1739_v17 = vpop.f32.mrf.mxu0 }
 0x2e0   : > { %v1740_v7 = vadd.f32 %v1739_v17, %v4281_v63  ;;  %1970 = vmatprep.mubr.f32.mxu1 %v1791_v41  ;;  %v1792_v58 = vmax.f32 %v1738_v26, 0.0 }
 0x2e1   : > { %v1743_v43 = vpop.f32.mrf.mxu0  ;;  %1971 = vmatmul.mubr.f32.gmra.mxu1 %v1790_v56 }
 0x2e2   : > { %v1793_v36 = vmax.f32 %v1740_v7, 0.0  ;;  %v1744_v30 = vadd.f32 %v1743_v43, %v4278_v19 }
 0x2e3   : > { %v1745_v21 = vpop.f32.mrf.mxu0 }
 0x2e4   : > { %v1746_v2 = vadd.f32 %v1745_v21, %v4281_v63  ;;  %1976 = vmatprep.mubr.f32.mxu1 %v1793_v36  ;;  %v1794_v53 = vmax.f32 %v1744_v30, 0.0 }
 0x2e5   : > { %v1749_v31 = vpop.f32.mrf.mxu0  ;;  %1977 = vmatmul.mubr.f32.gmra.mxu1 %v1792_v58 }
 0x2e6   : > { %v1795_v23 = vmax.f32 %v1746_v2, 0.0  ;;  %v1750_v46 = vadd.f32 %v1749_v31, %v4278_v19 }
 0x2e7   : > { %v1751_v10 = vpop.f32.mrf.mxu0 }
 0x2e8   : > { %v1752_v17 = vadd.f32 %v1751_v10, %v4281_v63  ;;  %1982 = vmatprep.mubr.f32.mxu1 %v1795_v23  ;;  %v1796_v26 = vmax.f32 %v1750_v46, 0.0 }
 0x2e9   : > { %v1755_v41 = vpop.f32.mrf.mxu0  ;;  %1983 = vmatmul.mubr.f32.gmra.mxu1 %v1794_v53 }
 0x2ea   : > { %v1797_v56 = vmax.f32 %v1752_v17, 0.0  ;;  %v1756_v7 = vadd.f32 %v1755_v41, %v4278_v19 }
 0x2eb   : > { %v1757_v43 = vpop.f32.mrf.mxu0 }
 0x2ec   : > { %v1758_v21 = vadd.f32 %v1757_v43, %v4281_v63  ;;  %1988 = vmatprep.mubr.f32.mxu1 %v1797_v56  ;;  %v1798_v30 = vmax.f32 %v1756_v7, 0.0 }
 0x2ed   : > { %v1761_v36 = vpop.f32.mrf.mxu0  ;;  %1989 = vmatmul.mubr.f32.gmra.mxu1 %v1796_v26 }
 0x2ee   : > { %v1799_v58 = vmax.f32 %v1758_v21, 0.0  ;;  %v1762_v2 = vadd.f32 %v1761_v36, %v4278_v19 }
 0x2ef   : > { %v1763_v31 = vpop.f32.mrf.mxu0 }
 0x2f0   : > { %v1764_v10 = vadd.f32 %v1763_v31, %v4281_v63  ;;  %1994 = vmatprep.mubr.f32.mxu1 %v1799_v58  ;;  %v1800_v46 = vmax.f32 %v1762_v2, 0.0  ;;  %v2156_v2 = vld [vmem:[#allocation10 + $0x148] sm:$0xff] }
 0x2f1   : > { %v1767_v23 = vpop.f32.mrf.mxu0  ;;  %1995 = vmatmul.mubr.f32.gmra.mxu1 %v1798_v30  ;;  %2245 = vmatprep.subr.mxu0 %v2156_v2  ;;  %v2391_v2 = vld [vmem:[#allocation11 + $0xb8] sm:$0xff] }
 0x2f2   : > { %v1801_v53 = vmax.f32 %v1764_v10, 0.0  ;;  %v1768_v17 = vadd.f32 %v1767_v23, %v4278_v19  ;;  %v2155_v10 = vld [vmem:[#allocation10 + $0x140] sm:$0xff]  ;;  %v2154_v23 = vld [vmem:[#allocation10 + $0x138] sm:$0xff] }
 0x2f3   : > { %v1769_v41 = vpop.f32.mrf.mxu0  ;;  %2246 = vmatpush2.msra.mxu0 %v2155_v10  ;;  %v2390_v10 = vld [vmem:[#allocation11 + $0xb0] sm:$0xff] }
 0x2f4   : > { %v1770_v43 = vadd.f32 %v1769_v41, %v4281_v63  ;;  %2000 = vmatprep.mubr.f32.mxu1 %v1801_v53  ;;  %v1802_v7 = vmax.f32 %v1768_v17, 0.0  ;;  %2247 = vmatprep.subr.mxu0 %v2154_v23  ;;  %v2153_v53 = vld [vmem:[#allocation10 + $0x130] sm:$0xff]  ;;  %v2150_v17 = vld [vmem:[#allocation10 + $0x118] sm:$0xff]  ;;  %v2148_v41 = vld [vmem:[#allocation10 + $0x108] sm:$0xff] }
 0x2f5   : > { %v1773_v56 = vpop.f32.mrf.mxu0  ;;  %2001 = vmatmul.mubr.f32.gmra.mxu1 %v1800_v46  ;;  %2248 = vmatpush2.msra.mxu0 %v2153_v53  ;;  %v2152_v46 = vld [vmem:[#allocation10 + $0x128] sm:$0xff]  ;;  %v2388_v53 = vld [vmem:[#allocation11 + $0xa0] sm:$0xff] }
 0x2f6   : > { %v1803_v26 = vmax.f32 %v1770_v43, 0.0  ;;  %v1774_v21 = vadd.f32 %v1773_v56, %v4278_v19  ;;  %2249 = vmatprep.subr.mxu0 %v2152_v46  ;;  %v2151_v19 = vld [vmem:[#allocation10 + $0x120] sm:$0xff]  ;;  %v2399_v56 = vld [vmem:[#allocation11 + $0xf8] sm:$0xff]  ;;  %v2389_v23 = vld [vmem:[#allocation11 + $0xa8] sm:$0xff] }
 0x2f7   : > { %v1775_v36 = vpop.f32.mrf.mxu0  ;;  %2250 = vmatpush2.msra.mxu0 %v2151_v19  ;;  %v2147_v43 = vld [vmem:[#allocation10 + $0x100] sm:$0xff]  ;;  %2432 = vmatprep.subr.mxu1 %v2399_v56  ;;  %v2387_v46 = vld [vmem:[#allocation11 + $0x98] sm:$0xff]  ;;  %v2386_v19 = vld [vmem:[#allocation11 + $0x90] sm:$0xff] }
 0x2f8   : > { %v1776_v31 = vadd.f32 %v1775_v36, %v4281_v63  ;;  %2006 = vmatprep.mubr.f32.mxu1 %v1803_v26  ;;  %v1804_v30 = vmax.f32 %v1774_v21, 0.0  ;;  %2251 = vmatprep.subr.mxu0 %v2150_v17  ;;  %v2149_v63 = vld [vmem:[#allocation10 + $0x110] sm:$0xff]  ;;  %v2396_v21 = vld [vmem:[#allocation11 + $0xe0] sm:$0xff]  ;;  %v2395_v36 = vld [vmem:[#allocation11 + $0xd8] sm:$0xff] }
 0x2f9   : > { %2007 = vmatmul.mubr.f32.gmra.mxu1 %v1802_v7  ;;  %2252 = vmatpush2.msra.mxu0 %v2149_v63  ;;  %v2398_v26 = vld [vmem:[#allocation11 + $0xf0] sm:$0xff]  ;;  %v2397_v7 = vld [vmem:[#allocation11 + $0xe8] sm:$0xff]  ;;  %v2384_v63 = vld [vmem:[#allocation11 + $0x80] sm:$0xff] }
 0x2fa   : > { %v1805_v58 = vmax.f32 %v1776_v31, 0.0  ;;  %2253 = vmatprep.subr.mxu0 %v2148_v41  ;;  %2433 = vmatpush1.msra.mxu1 %v2398_v26  ;;  %v2394_v31 = vld [vmem:[#allocation11 + $0xd0] sm:$0xff]  ;;  %v2385_v17 = vld [vmem:[#allocation11 + $0x88] sm:$0xff]  ;;  %v2383_v41 = vld [vmem:[#allocation11 + $0x78] sm:$0xff] }
 0x2fb   : > { %2254 = vmatpush2.msra.mxu0 %v2147_v43  ;;  %2434 = vmatprep.subr.mxu1 %v2397_v7  ;;  %v2382_v43 = vld [vmem:[#allocation11 + $0x70] sm:$0xff]  ;;  %v2381_v56 = vld [vmem:[#allocation11 + $0x68] sm:$0xff]  ;;  %v2380_v26 = vld [vmem:[#allocation11 + $0x60] sm:$0xff] }
 0x2fc   : > { %2012 = vmatprep.mubr.f32.mxu1 %v1805_v58  ;;  %2435 = vmatpush1.msra.mxu1 %v2396_v21  ;;  %v2393_v58 = vld [vmem:[#allocation11 + $0xc8] sm:$0xff]  ;;  %v2379_v7 = vld [vmem:[#allocation11 + $0x58] sm:$0xff]  ;;  %v2378_v21 = vld [vmem:[#allocation11 + $0x50] sm:$0xff] }
 0x2fd   : > { %2013 = vmatmul.mubr.f32.gmra.mxu1 %v1804_v30  ;;  %2436 = vmatprep.subr.mxu1 %v2395_v36  ;;  %v2392_v30 = vld [vmem:[#allocation11 + $0xc0] sm:$0xff]  ;;  %v2377_v36 = vld [vmem:[#allocation11 + $0x48] sm:$0xff] }
 0x2fe   : > { %2437 = vmatpush1.msra.mxu1 %v2394_v31  ;;  %v2376_v31 = vld [vmem:[#allocation11 + $0x40] sm:$0xff] }
 0x2ff   : > { %2438 = vmatprep.subr.mxu1 %v2393_v58  ;;  %v2375_v58 = vld [vmem:[#allocation11 + $0x38] sm:$0xff] }
 0x300   : > { %2439 = vmatpush1.msra.mxu1 %v2392_v30  ;;  %v2374_v30 = vld [vmem:[#allocation11 + $0x30] sm:$0xff] }
 0x301   : > { %2440 = vmatprep.subr.mxu1 %v2391_v2  ;;  %v2373_v2 = vld [vmem:[#allocation11 + $0x28] sm:$0xff] }
 0x302   : > { %2441 = vmatpush1.msra.mxu1 %v2390_v10  ;;  %v2372_v10 = vld [vmem:[#allocation11 + $0x20] sm:$0xff] }
 0x303   : > { %2442 = vmatprep.subr.mxu1 %v2389_v23  ;;  %v2371_v23 = vld [vmem:[#allocation11 + $0x18] sm:$0xff] }
 0x304   : > { %2443 = vmatpush1.msra.mxu1 %v2388_v53  ;;  %v2370_v53 = vld [vmem:[#allocation11 + $0x10] sm:$0xff] }
 0x305   : > { %2444 = vmatprep.subr.mxu1 %v2387_v46  ;;  %v2369_v46 = vld [vmem:[#allocation11 + $0x8] sm:$0xff] }
 0x306   : > { %2445 = vmatpush1.msra.mxu1 %v2386_v19  ;;  %v2368_v19 = vld [vmem:[#allocation11] sm:$0xff] }
 0x307   : > { %2446 = vmatprep.subr.mxu1 %v2385_v17  ;;  %v2431_v17 = vld [vmem:[#allocation11 + $0x1f8] sm:$0xff] }
 0x308   : > { %2447 = vmatpush1.msra.mxu1 %v2384_v63  ;;  %v2430_v63 = vld [vmem:[#allocation11 + $0x1f0] sm:$0xff] }
 0x309   : > { %2448 = vmatprep.subr.mxu1 %v2383_v41  ;;  %v2429_v41 = vld [vmem:[#allocation11 + $0x1e8] sm:$0xff] }
 0x30a   : > { %2449 = vmatpush1.msra.mxu1 %v2382_v43  ;;  %v2428_v43 = vld [vmem:[#allocation11 + $0x1e0] sm:$0xff] }
 0x30b   : > { %2450 = vmatprep.subr.mxu1 %v2381_v56  ;;  %v2427_v56 = vld [vmem:[#allocation11 + $0x1d8] sm:$0xff] }
 0x30c   : > { %2451 = vmatpush1.msra.mxu1 %v2380_v26  ;;  %v2426_v26 = vld [vmem:[#allocation11 + $0x1d0] sm:$0xff] }
 0x30d   : > { %2452 = vmatprep.subr.mxu1 %v2379_v7  ;;  %v2425_v7 = vld [vmem:[#allocation11 + $0x1c8] sm:$0xff] }
 0x30e   : > { %2453 = vmatpush1.msra.mxu1 %v2378_v21  ;;  %v2424_v21 = vld [vmem:[#allocation11 + $0x1c0] sm:$0xff] }
 0x30f   : > { %2454 = vmatprep.subr.mxu1 %v2377_v36  ;;  %v2423_v36 = vld [vmem:[#allocation11 + $0x1b8] sm:$0xff] }
 0x310   : > { %2455 = vmatpush1.msra.mxu1 %v2376_v31  ;;  %v2422_v31 = vld [vmem:[#allocation11 + $0x1b0] sm:$0xff] }
 0x311   : > { %2456 = vmatprep.subr.mxu1 %v2375_v58  ;;  %v2421_v58 = vld [vmem:[#allocation11 + $0x1a8] sm:$0xff] }
 0x312   : > { %2457 = vmatpush1.msra.mxu1 %v2374_v30  ;;  %v2420_v30 = vld [vmem:[#allocation11 + $0x1a0] sm:$0xff] }
 0x313   : > { %2458 = vmatprep.subr.mxu1 %v2373_v2  ;;  %v2419_v2 = vld [vmem:[#allocation11 + $0x198] sm:$0xff] }
 0x314   : > { %2459 = vmatpush1.msra.mxu1 %v2372_v10  ;;  %v2418_v10 = vld [vmem:[#allocation11 + $0x190] sm:$0xff] }
 0x315   : > { %2460 = vmatprep.subr.mxu1 %v2371_v23  ;;  %v2417_v23 = vld [vmem:[#allocation11 + $0x188] sm:$0xff] }
 0x316   : > { %2461 = vmatpush1.msra.mxu1 %v2370_v53  ;;  %v2416_v53 = vld [vmem:[#allocation11 + $0x180] sm:$0xff] }
 0x317   : > { %2462 = vmatprep.subr.mxu1 %v2369_v46  ;;  %v2415_v46 = vld [vmem:[#allocation11 + $0x178] sm:$0xff] }
 0x318   : > { %2463 = vmatpush1.msra.mxu1 %v2368_v19  ;;  %v2414_v19 = vld [vmem:[#allocation11 + $0x170] sm:$0xff] }
 0x319   : > { %2464 = vmatprep.subr.mxu1 %v2431_v17  ;;  %v2413_v17 = vld [vmem:[#allocation11 + $0x168] sm:$0xff] }
 0x31a   : > { %2465 = vmatpush2.msra.mxu1 %v2430_v63  ;;  %v2412_v63 = vld [vmem:[#allocation11 + $0x160] sm:$0xff] }
 0x31b   : > { %2466 = vmatprep.subr.mxu1 %v2429_v41  ;;  %v2411_v41 = vld [vmem:[#allocation11 + $0x158] sm:$0xff] }
 0x31c   : > { %2467 = vmatpush2.msra.mxu1 %v2428_v43  ;;  %v2410_v43 = vld [vmem:[#allocation11 + $0x150] sm:$0xff] }
 0x31d   : > { %2468 = vmatprep.subr.mxu1 %v2427_v56  ;;  %v2409_v56 = vld [vmem:[#allocation11 + $0x148] sm:$0xff] }
 0x31e   : > { %2469 = vmatpush2.msra.mxu1 %v2426_v26  ;;  %v2408_v26 = vld [vmem:[#allocation11 + $0x140] sm:$0xff] }
 0x31f   : > { %2470 = vmatprep.subr.mxu1 %v2425_v7  ;;  %v2047_v7 = vld [vmem:[%s4846_s6] sm:$0x3] }
 0x320   : > { %2471 = vmatpush2.msra.mxu1 %v2424_v21 }
 0x321   : > { %2472 = vmatprep.subr.mxu1 %v2423_v36  ;;  %v4315_v36 = vrot.slane %v2047_v7, %v4949_v11 }
 0x322   : > { %2473 = vmatpush2.msra.mxu1 %v2422_v31 }
 0x323   : > { %2474 = vmatprep.subr.mxu1 %v2421_v58  ;;  %v4320_v58 = vrot.slane %v2047_v7, %v4950_v22 }
 0x324   : > { %2475 = vmatpush2.msra.mxu1 %v2420_v30 }
 0x325   : > { %2476 = vmatprep.subr.mxu1 %v2419_v2 }
 0x326   : > { %2477 = vmatpush2.msra.mxu1 %v2418_v10 }
 0x327   : > { %2478 = vmatprep.subr.mxu1 %v2417_v23 }
 0x328   : > { %2479 = vmatpush2.msra.mxu1 %v2416_v53 }
 0x329   : > { %2480 = vmatprep.subr.mxu1 %v2415_v46 }
 0x32a   : > { %2481 = vmatpush2.msra.mxu1 %v2414_v19 }
 0x32b   : > { %2482 = vmatprep.subr.mxu1 %v2413_v17 }
 0x32c   : > { %2483 = vmatpush2.msra.mxu1 %v2412_v63 }
 0x32d   : > { %2484 = vmatprep.subr.mxu1 %v2411_v41 }
 0x32e   : > { %2485 = vmatpush2.msra.mxu1 %v2410_v43 }
 0x32f   : > { %2486 = vmatprep.subr.mxu1 %v2409_v56 }
 0x330   : > { %2487 = vmatpush2.msra.mxu1 %v2408_v26 }
 0x389   : > { %v1936_v21 = vpop.f32.mrf.mxu1 }
 0x38a   : > { %v2019_v31 = vadd.f32 %v1936_v21, %v1525_v3 }
 0x38b   : > { %v1938_v30 = vpop.f32.mrf.mxu1 }
 0x38c   : > { %v2020_v2 = vadd.f32 %v1938_v30, %v1526_v29  ;;  %v4325_v10 = vadd.f32 %v4315_v36, %v2019_v31 }
 0x38d   : > { %v1942_v23 = vpop.f32.mrf.mxu1 }
 0x38e   : > { %v4328_v53 = vadd.f32 %v4320_v58, %v2020_v2  ;;  %v2021_v46 = vadd.f32 %v1942_v23, %v1527_v61  ;;  %v4901_v17 = vmax.f32 %v4325_v10, 0.0 }
 0x38f   : > { %v1944_v19 = vpop.f32.mrf.mxu1 }
 0x390   : > { %v4900_v49 = vmax.f32 %v4328_v53, 0.0  ;;  %v2022_v3 = vadd.f32 %v1944_v19, %v1528_v60  ;;  %v4337_v16 = vadd.f32 %v4315_v36, %v2021_v46 }
 0x391   : > { %v1948_v29 = vpop.f32.mrf.mxu1 }
 0x392   : > { %v4340_v63 = vadd.f32 %v4320_v58, %v2022_v3  ;;  %v2023_v41 = vadd.f32 %v1948_v29, %v1529_v8  ;;  %2255 = vmatprep.mubr.f32.mxu0 %v4900_v49  ;;  %v4899_v61 = vmax.f32 %v4337_v16, 0.0 }
 0x393   : > { %v1950_v12 = vpop.f32.mrf.mxu1  ;;  %2256 = vmatmul.mubr.f32.vlgmr.msra.gmra.mxu0 %v4901_v17 }
 0x394   : > { %v4898_v27 = vmax.f32 %v4340_v63, 0.0  ;;  %v2024_v60 = vadd.f32 %v1950_v12, %v1530_v5  ;;  %v4353_v43 = vadd.f32 %v4315_v36, %v2023_v41 }
 0x395   : > { %v1954_v56 = vpop.f32.mrf.mxu1 }
 0x396   : > { %v4356_v6 = vadd.f32 %v4320_v58, %v2024_v60  ;;  %v2025_v8 = vadd.f32 %v1954_v56, %v1531_v18  ;;  %2261 = vmatprep.mubr.f32.mxu0 %v4898_v27  ;;  %v4897_v7 = vmax.f32 %v4353_v43, 0.0 }
 0x397   : > { %v1956_v26 = vpop.f32.mrf.mxu1  ;;  %2262 = vmatmul.mubr.f32.gmra.mxu0 %v4899_v61 }
 0x398   : > { %v4896_v32 = vmax.f32 %v4356_v6, 0.0  ;;  %v2026_v5 = vadd.f32 %v1956_v26, %v1532_v15  ;;  %v4369_v21 = vadd.f32 %v4315_v36, %v2025_v8 }
 0x399   : > { %v1960_v31 = vpop.f32.mrf.mxu1 }
 0x39a   : > { %v4372_v33 = vadd.f32 %v4320_v58, %v2026_v5  ;;  %v2027_v18 = vadd.f32 %v1960_v31, %v1533_v28  ;;  %2267 = vmatprep.mubr.f32.mxu0 %v4896_v32  ;;  %v4895_v2 = vmax.f32 %v4369_v21, 0.0 }
 0x39b   : > { %v1962_v30 = vpop.f32.mrf.mxu1  ;;  %2268 = vmatmul.mubr.f32.gmra.mxu0 %v4897_v7 }
 0x39c   : > { %v4894_v20 = vmax.f32 %v4372_v33, 0.0  ;;  %v2028_v15 = vadd.f32 %v1962_v30, %v1534_v25  ;;  %v4385_v23 = vadd.f32 %v4315_v36, %v2027_v18 }
 0x39d   : > { %v1966_v46 = vpop.f32.mrf.mxu1 }
 0x39e   : > { %v4388_v52 = vadd.f32 %v4320_v58, %v2028_v15  ;;  %v2029_v28 = vadd.f32 %v1966_v46, %v1535_v38  ;;  %2273 = vmatprep.mubr.f32.mxu0 %v4894_v20  ;;  %v4893_v3 = vmax.f32 %v4385_v23, 0.0 }
 0x39f   : > { %v1968_v19 = vpop.f32.mrf.mxu1  ;;  %2274 = vmatmul.mubr.f32.gmra.mxu0 %v4895_v2 }
 0x3a0   : > { %v4892_v54 = vmax.f32 %v4388_v52, 0.0  ;;  %v2030_v25 = vadd.f32 %v1968_v19, %v1536_v35  ;;  %v4401_v29 = vadd.f32 %v4315_v36, %v2029_v28 }
 0x3a1   : > { %v1972_v41 = vpop.f32.mrf.mxu1 }
 0x3a2   : > { %v4404_v39 = vadd.f32 %v4320_v58, %v2030_v25  ;;  %v2031_v38 = vadd.f32 %v1972_v41, %v1537_v62  ;;  %2279 = vmatprep.mubr.f32.mxu0 %v4892_v54  ;;  %v4891_v60 = vmax.f32 %v4401_v29, 0.0  ;;  %v4953_v41 = vmax.f32 %v4203_v14, 0.0 }
 0x3a3   : > { %v1974_v12 = vpop.f32.mrf.mxu1  ;;  %2280 = vmatmul.mubr.f32.gmra.mxu0 %v4893_v3 }
 0x3a4   : > { %v4890_v40 = vmax.f32 %v4404_v39, 0.0  ;;  %v2032_v35 = vadd.f32 %v1974_v12, %v1538_v45  ;;  %v4417_v56 = vadd.f32 %v4315_v36, %v2031_v38 }
 0x3a5   : > { %v1978_v8 = vpop.f32.mrf.mxu1 }
 0x3a6   : > { %v4420_v37 = vadd.f32 %v4320_v58, %v2032_v35  ;;  %v2033_v62 = vadd.f32 %v1978_v8, %v1539_v13  ;;  %2285 = vmatprep.mubr.f32.mxu0 %v4890_v40  ;;  %v4889_v5 = vmax.f32 %v4417_v56, 0.0  ;;  %v4951_v13 = vmax.f32 %v4187_v4, 0.0 }
 0x3a7   : > { %v1980_v26 = vpop.f32.mrf.mxu1  ;;  %2286 = vmatmul.mubr.f32.gmra.mxu0 %v4891_v60  ;;  %v4954_v35 = vmax.f32 %v4208_v50, 0.0 }
 0x3a8   : > { %v4888_v55 = vmax.f32 %v4420_v37, 0.0  ;;  %v2034_v45 = vadd.f32 %v1980_v26, %v1540_v9  ;;  %v4433_v31 = vadd.f32 %v4315_v36, %v2033_v62  ;;  %v4952_v9 = vmax.f32 %v4192_v47, 0.0 }
 0x3a9   : > { %v1984_v18 = vpop.f32.mrf.mxu1 }
 0x3aa   : > { %v4436_v59 = vadd.f32 %v4320_v58, %v2034_v45  ;;  %v2035_v30 = vadd.f32 %v1984_v18, %v4951_v13  ;;  %2291 = vmatprep.mubr.f32.mxu0 %v4888_v55  ;;  %v4887_v28 = vmax.f32 %v4433_v31, 0.0  ;;  %v4955_v18 = vmax.f32 %v4219_v24, 0.0  ;;  %v4599_v55 = vld [vmem:[#allocation13 + $0x28] sm:$0xff] }
 0x3ab   : > { %v1986_v15 = vpop.f32.mrf.mxu1  ;;  %2292 = vmatmul.mubr.f32.gmra.mxu0 %v4889_v5  ;;  %v2179_v5 = vld [vmem:[%s4848_s8] sm:$0x3] }
 0x3ac   : > { %v4886_v48 = vmax.f32 %v4436_v59, 0.0  ;;  %v2036_v46 = vadd.f32 %v1986_v15, %v4952_v9  ;;  %v4449_v19 = vadd.f32 %v4315_v36, %v2035_v30  ;;  %v4956_v15 = vmax.f32 %v4224_v57, 0.0 }
 0x3ad   : > { %v1990_v25 = vpop.f32.mrf.mxu1  ;;  %v4608_v40 = vrot.slane %v2179_v5, %v4949_v11  ;;  %v4611_v60 = vrot.slane %v2179_v5, %v4950_v22 }
 0x3ae   : > { %v4452_v4 = vadd.f32 %v4320_v58, %v2036_v46  ;;  %v2037_v38 = vadd.f32 %v1990_v25, %v4953_v41  ;;  %2297 = vmatprep.mubr.f32.mxu0 %v4886_v48  ;;  %v4885_v62 = vmax.f32 %v4449_v19, 0.0  ;;  %v4593_v48 = vld [vmem:[#allocation13 + $0x30] sm:$0xff] }
 0x3af   : > { %v1992_v12 = vpop.f32.mrf.mxu1  ;;  %2298 = vmatmul.mubr.f32.gmra.mxu0 %v4887_v28  ;;  %v4596_v28 = vld [vmem:[#allocation13 + $0xa8] sm:$0xff] }
 0x3b0   : > { %v4884_v47 = vmax.f32 %v4452_v4, 0.0  ;;  %v2038_v8 = vadd.f32 %v1992_v12, %v4954_v35  ;;  %v4465_v26 = vadd.f32 %v4315_v36, %v2037_v38  ;;  %v4957_v38 = vmax.f32 %v4235_v42, 0.0 }
 0x3b1   : > { %v1996_v45 = vpop.f32.mrf.mxu1 }
 0x3b2   : > { %v4468_v14 = vadd.f32 %v4320_v58, %v2038_v8  ;;  %v2039_v13 = vadd.f32 %v1996_v45, %v4955_v18  ;;  %2303 = vmatprep.mubr.f32.mxu0 %v4884_v47  ;;  %v4883_v46 = vmax.f32 %v4465_v26, 0.0  ;;  %v4958_v8 = vmax.f32 %v4240_v0, 0.0  ;;  %v4587_v47 = vld [vmem:[#allocation13 + $0x38] sm:$0xff] }
 0x3b3   : > { %v1998_v30 = vpop.f32.mrf.mxu1  ;;  %2304 = vmatmul.mubr.f32.gmra.mxu0 %v4885_v62  ;;  %v4590_v62 = vld [vmem:[#allocation13 + $0xb0] sm:$0xff] }
 0x3b4   : > { %v4882_v50 = vmax.f32 %v4468_v14, 0.0  ;;  %v2040_v9 = vadd.f32 %v1998_v30, %v4956_v15  ;;  %v4481_v25 = vadd.f32 %v4315_v36, %v2039_v13  ;;  %v4959_v15 = vmax.f32 %v4249_v34, 0.0 }
 0x3b5   : > { %v2002_v41 = vpop.f32.mrf.mxu1 }
 0x3b6   : > { %v4484_v24 = vadd.f32 %v4320_v58, %v2040_v9  ;;  %v2041_v12 = vadd.f32 %v2002_v41, %v4957_v38  ;;  %2309 = vmatprep.mubr.f32.mxu0 %v4882_v50  ;;  %v4881_v18 = vmax.f32 %v4481_v25, 0.0  ;;  %v4960_v38 = vmax.f32 %v4252_v51, 0.0  ;;  %v4581_v50 = vld [vmem:[#allocation13 + $0x40] sm:$0xff] }
 0x3b7   : > { %v2004_v35 = vpop.f32.mrf.mxu1  ;;  %2310 = vmatmul.mubr.f32.gmra.mxu0 %v4883_v46  ;;  %v4584_v46 = vld [vmem:[#allocation13 + $0xb8] sm:$0xff] }
 0x3b8   : > { %v4874_v57 = vmax.f32 %v4484_v24, 0.0  ;;  %v2042_v45 = vadd.f32 %v2004_v35, %v4958_v8  ;;  %v4497_v13 = vadd.f32 %v4315_v36, %v2041_v12 }
 0x3b9   : > { %v2008_v30 = vpop.f32.mrf.mxu1 }
 0x3ba   : > { %v4500_v42 = vadd.f32 %v4320_v58, %v2042_v45  ;;  %v2043_v9 = vadd.f32 %v2008_v30, %v4959_v15  ;;  %2315 = vmatprep.mubr.f32.mxu0 %v4874_v57  ;;  %v4880_v35 = vmax.f32 %v4497_v13, 0.0  ;;  %v4962_v30 = vmax.f32 %v4260_v1, 0.0 }
 0x3bb   : > { %v2010_v41 = vpop.f32.mrf.mxu1  ;;  %2316 = vmatmul.mubr.f32.gmra.mxu0 %v4881_v18  ;;  %v4578_v18 = vld [vmem:[#allocation13 + $0xc0] sm:$0xff] }
 0x3bc   : > { %v4878_v0 = vmax.f32 %v4500_v42, 0.0  ;;  %v2044_v12 = vadd.f32 %v2010_v41, %v4960_v38  ;;  %v4513_v8 = vadd.f32 %v4315_v36, %v2043_v9  ;;  %v4963_v41 = vmax.f32 %v4262_v44, 0.0  ;;  %v2407_v44 = vld [vmem:[#allocation11 + $0x138] sm:$0xff] }
 0x3bd   : > { %v2014_v45 = vpop.f32.mrf.mxu1  ;;  %2488 = vmatprep.subr.mxu1 %v2407_v44  ;;  %v4546_v44 = vld [vmem:[#allocation13 + $0x70] sm:$0xff] }
 0x3be   : > { %v4516_v34 = vadd.f32 %v4320_v58, %v2044_v12  ;;  %v2045_v15 = vadd.f32 %v2014_v45, %v4962_v30  ;;  %2321 = vmatprep.mubr.f32.mxu0 %v4878_v0  ;;  %v4877_v38 = vmax.f32 %v4513_v8, 0.0  ;;  %v4544_v0 = vld [vmem:[#allocation13 + $0xf0] sm:$0xff] }
 0x3bf   : > { %v2016_v57 = vpop.f32.mrf.mxu1  ;;  %2322 = vmatmul.mubr.f32.gmra.mxu0 %v4880_v35  ;;  %v4575_v35 = vld [vmem:[#allocation13 + $0x48] sm:$0xff] }
 0x3c0   : > { %4961 = vst [vmem:[#allocation24_spill] sm:$0xff] %v4516_v34  ;;  %v4875_v51 = vmax.f32 %v4516_v34, 0.0  ;;  %v2046_v9 = vadd.f32 %v2016_v57, %v4963_v41  ;;  %v4529_v12 = vadd.f32 %v4315_v36, %v2045_v15  ;;  %v2406_v36 = vld [vmem:[#allocation11 + $0x130] sm:$0xff]  ;;  %v2404_v57 = vld [vmem:[#allocation11 + $0x120] sm:$0xff]  ;;  %v2403_v15 = vld [vmem:[#allocation11 + $0x118] sm:$0xff] }
 0x3c1   : > { %2489 = vmatpush2.msra.mxu1 %v2406_v36  ;;  %v2402_v41 = vld [vmem:[#allocation11 + $0x110] sm:$0xff]  ;;  %v4548_v36 = vld [vmem:[#allocation13 + $0xe8] sm:$0xff] }
 0x3c2   : > { %4964 = vst [vmem:[#allocation23_spill] sm:$0xff] %v4529_v12  ;;  %v4532_v1 = vadd.f32 %v4320_v58, %v2046_v9  ;;  %2327 = vmatprep.mubr.f32.mxu0 %v4875_v51  ;;  %v4879_v30 = vmax.f32 %v4529_v12, 0.0  ;;  %v2405_v58 = vld [vmem:[#allocation11 + $0x128] sm:$0xff]  ;;  %v2400_v51 = vld [vmem:[#allocation11 + $0x100] sm:$0xff] }
 0x3c3   : > { %2328 = vmatmul.mubr.f32.gmra.mxu0 %v4877_v38  ;;  %2490 = vmatprep.subr.mxu1 %v2405_v58  ;;  %v2401_v9 = vld [vmem:[#allocation11 + $0x108] sm:$0xff]  ;;  %v2692_v38 = vld [vmem:[#allocation13 + $0x78] sm:$0xff] }
 0x3c4   : > { %4965 = vst [vmem:[#allocation26_spill] sm:$0xff] %v4532_v1  ;;  %v4876_v45 = vmax.f32 %v4532_v1, 0.0  ;;  %2491 = vmatpush2.msra.mxu1 %v2404_v57  ;;  %v4551_v58 = vld [vmem:[#allocation13 + $0x68] sm:$0xff]  ;;  %v4554_v57 = vld [vmem:[#allocation13 + $0xe0] sm:$0xff] }
 0x3c5   : > { %2492 = vmatprep.subr.mxu1 %v2403_v15  ;;  %v4563_v15 = vld [vmem:[#allocation13 + $0x58] sm:$0xff] }
 0x3c6   : > { %2333 = vmatprep.mubr.f32.mxu0 %v4876_v45  ;;  %2493 = vmatpush2.msra.mxu1 %v2402_v41  ;;  %v2708_v45 = vld [vmem:[#allocation13 + $0xf8] sm:$0xff]  ;;  %v4566_v41 = vld [vmem:[#allocation13 + $0xd0] sm:$0xff] }
 0x3c7   : > { %2334 = vmatmul.mubr.f32.gmra.mxu0 %v4879_v30  ;;  %2494 = vmatprep.subr.mxu1 %v2401_v9  ;;  %v4569_v9 = vld [vmem:[#allocation13 + $0x50] sm:$0xff]  ;;  %v4572_v30 = vld [vmem:[#allocation13 + $0xc8] sm:$0xff] }
 0x3c8   : > { %2495 = vmatpush2.msra.mxu1 %v2400_v51  ;;  %3035 = vmatprep.subr.mxu0 %v2708_v45  ;;  %v4557_v51 = vld [vmem:[#allocation13 + $0x60] sm:$0xff] }
 0x3c9   : > { %3109 = vmatprep.subr.mxu1 %v2708_v45  ;;  %3036 = vmatpush3.msra.mxu0 %v2692_v38  ;;  %v4560_v45 = vld [vmem:[#allocation13 + $0xd8] sm:$0xff] }
 0x3ca   : > { %3037 = vmatprep.subr.mxu0 %v4544_v0 }
 0x3cb   : > { %3038 = vmatpush3.msra.mxu0 %v4546_v44 }
 0x3cc   : > { %3039 = vmatprep.subr.mxu0 %v4548_v36 }
 0x3cd   : > { %3040 = vmatpush3.msra.mxu0 %v4551_v58 }
 0x3ce   : > { %3041 = vmatprep.subr.mxu0 %v4554_v57 }
 0x3cf   : > { %3042 = vmatpush3.msra.mxu0 %v4557_v51 }
 0x3d0   : > { %3043 = vmatprep.subr.mxu0 %v4560_v45 }
 0x3d1   : > { %3044 = vmatpush3.msra.mxu0 %v4563_v15 }
 0x3d2   : > { %3045 = vmatprep.subr.mxu0 %v4566_v41 }
 0x3d3   : > { %3046 = vmatpush3.msra.mxu0 %v4569_v9 }
 0x3d4   : > { %3047 = vmatprep.subr.mxu0 %v4572_v30 }
 0x3d5   : > { %3048 = vmatpush3.msra.mxu0 %v4575_v35 }
 0x3d6   : > { %3049 = vmatprep.subr.mxu0 %v4578_v18 }
 0x3d7   : > { %3050 = vmatpush3.msra.mxu0 %v4581_v50 }
 0x3d8   : > { %3051 = vmatprep.subr.mxu0 %v4584_v46 }
 0x3d9   : > { %3052 = vmatpush3.msra.mxu0 %v4587_v47 }
 0x3da   : > { %3053 = vmatprep.subr.mxu0 %v4590_v62 }
 0x3db   : > { %3054 = vmatpush3.msra.mxu0 %v4593_v48 }
 0x3dc   : > { %3055 = vmatprep.subr.mxu0 %v4596_v28 }
 0x3dd   : > { %3056 = vmatpush3.msra.mxu0 %v4599_v55 }
 0x453   : > { %v2257_v54 = vpop.f32.mrf.mxu0 }
 0x454   : > { %v2258_v3 = vadd.f32 %v2257_v54, %v4608_v40 }
 0x455   : > { %v2259_v20 = vpop.f32.mrf.mxu0 }
 0x456   : > { %v2260_v2 = vadd.f32 %v2259_v20, %v4611_v60  ;;  %v2340_v27 = vmax.f32 %v2258_v3, 0.0 }
 0x457   : > { %v2263_v32 = vpop.f32.mrf.mxu0 }
 0x458   : > { %v2341_v7 = vmax.f32 %v2260_v2, 0.0  ;;  %v2264_v61 = vadd.f32 %v2263_v32, %v4608_v40 }
 0x459   : > { %v2265_v49 = vpop.f32.mrf.mxu0 }
 0x45a   : > { %v2266_v17 = vadd.f32 %v2265_v49, %v4611_v60  ;;  %2496 = vmatprep.mubr.f32.mxu1 %v2341_v7  ;;  %v2342_v5 = vmax.f32 %v2264_v61, 0.0 }
 0x45b   : > { %v2269_v1 = vpop.f32.mrf.mxu0  ;;  %2497 = vmatmul.mubr.f32.vlgmr.msra.gmra.mxu1 %v2340_v27 }
 0x45c   : > { %v2343_v12 = vmax.f32 %v2266_v17, 0.0  ;;  %3125 = vmatpush3.msra.mxu1 %v2692_v38  ;;  %v2270_v34 = vadd.f32 %v2269_v1, %v4608_v40 }
 0x45d   : > { %v2271_v54 = vpop.f32.mrf.mxu0  ;;  %3110 = vmatprep.subr.mxu1 %v4544_v0 }
 0x45e   : > { %v2272_v20 = vadd.f32 %v2271_v54, %v4611_v60  ;;  %2502 = vmatprep.mubr.f32.mxu1 %v2343_v12  ;;  %3126 = vmatpush3.msra.mxu1 %v4546_v44  ;;  %v2344_v17 = vmax.f32 %v2270_v34, 0.0 }
 0x45f   : > { %v2275_v32 = vpop.f32.mrf.mxu0  ;;  %2503 = vmatmul.mubr.f32.gmra.mxu1 %v2342_v5  ;;  %3111 = vmatprep.subr.mxu1 %v4548_v36 }
 0x460   : > { %v2345_v49 = vmax.f32 %v2272_v20, 0.0  ;;  %3127 = vmatpush3.msra.mxu1 %v4551_v58  ;;  %v2276_v27 = vadd.f32 %v2275_v32, %v4608_v40 }
 0x461   : > { %v2277_v61 = vpop.f32.mrf.mxu0  ;;  %3112 = vmatprep.subr.mxu1 %v4554_v57 }
 0x462   : > { %v2278_v7 = vadd.f32 %v2277_v61, %v4611_v60  ;;  %2508 = vmatprep.mubr.f32.mxu1 %v2345_v49  ;;  %3128 = vmatpush3.msra.mxu1 %v4557_v51  ;;  %v2346_v0 = vmax.f32 %v2276_v27, 0.0 }
 0x463   : > { %v2281_v2 = vpop.f32.mrf.mxu0  ;;  %2509 = vmatmul.mubr.f32.gmra.mxu1 %v2344_v17  ;;  %3113 = vmatprep.subr.mxu1 %v4560_v45 }
 0x464   : > { %v2347_v3 = vmax.f32 %v2278_v7, 0.0  ;;  %3129 = vmatpush3.msra.mxu1 %v4563_v15  ;;  %v2282_v34 = vadd.f32 %v2281_v2, %v4608_v40 }
 0x465   : > { %v2283_v38 = vpop.f32.mrf.mxu0  ;;  %3114 = vmatprep.subr.mxu1 %v4566_v41 }
 0x466   : > { %v2284_v12 = vadd.f32 %v2283_v38, %v4611_v60  ;;  %2514 = vmatprep.mubr.f32.mxu1 %v2347_v3  ;;  %3130 = vmatpush3.msra.mxu1 %v4569_v9  ;;  %v2348_v36 = vmax.f32 %v2282_v34, 0.0 }
 0x467   : > { %v2287_v1 = vpop.f32.mrf.mxu0  ;;  %2515 = vmatmul.mubr.f32.gmra.mxu1 %v2346_v0  ;;  %3115 = vmatprep.subr.mxu1 %v4572_v30 }
 0x468   : > { %v2349_v44 = vmax.f32 %v2284_v12, 0.0  ;;  %3131 = vmatpush3.msra.mxu1 %v4575_v35  ;;  %v2288_v58 = vadd.f32 %v2287_v1, %v4608_v40 }
 0x469   : > { %v2289_v57 = vpop.f32.mrf.mxu0  ;;  %3116 = vmatprep.subr.mxu1 %v4578_v18 }
 0x46a   : > { %v2290_v51 = vadd.f32 %v2289_v57, %v4611_v60  ;;  %2520 = vmatprep.mubr.f32.mxu1 %v2349_v44  ;;  %3132 = vmatpush3.msra.mxu1 %v4581_v50  ;;  %v2350_v30 = vmax.f32 %v2288_v58, 0.0 }
 0x46b   : > { %v2293_v45 = vpop.f32.mrf.mxu0  ;;  %2521 = vmatmul.mubr.f32.gmra.mxu1 %v2348_v36  ;;  %3117 = vmatprep.subr.mxu1 %v4584_v46 }
 0x46c   : > { %v2351_v15 = vmax.f32 %v2290_v51, 0.0  ;;  %3133 = vmatpush3.msra.mxu1 %v4587_v47  ;;  %v2294_v35 = vadd.f32 %v2293_v45, %v4608_v40 }
 0x46d   : > { %v2295_v41 = vpop.f32.mrf.mxu0  ;;  %3118 = vmatprep.subr.mxu1 %v4590_v62 }
 0x46e   : > { %v2296_v18 = vadd.f32 %v2295_v41, %v4611_v60  ;;  %2526 = vmatprep.mubr.f32.mxu1 %v2351_v15  ;;  %3134 = vmatpush3.msra.mxu1 %v4593_v48  ;;  %v2352_v46 = vmax.f32 %v2294_v35, 0.0 }
 0x46f   : > { %v2299_v9 = vpop.f32.mrf.mxu0  ;;  %2527 = vmatmul.mubr.f32.gmra.mxu1 %v2350_v30  ;;  %3119 = vmatprep.subr.mxu1 %v4596_v28 }
 0x470   : > { %v2353_v50 = vmax.f32 %v2296_v18, 0.0  ;;  %3135 = vmatpush3.msra.mxu1 %v4599_v55  ;;  %v2300_v47 = vadd.f32 %v2299_v9, %v4608_v40 }
 0x471   : > { %v2301_v5 = vpop.f32.mrf.mxu0 }
 0x472   : > { %v2302_v54 = vadd.f32 %v2301_v5, %v4611_v60  ;;  %2532 = vmatprep.mubr.f32.mxu1 %v2353_v50  ;;  %v2354_v32 = vmax.f32 %v2300_v47, 0.0 }
 0x473   : > { %v2305_v62 = vpop.f32.mrf.mxu0  ;;  %2533 = vmatmul.mubr.f32.gmra.mxu1 %v2352_v46 }
 0x474   : > { %v2355_v20 = vmax.f32 %v2302_v54, 0.0  ;;  %v2306_v48 = vadd.f32 %v2305_v62, %v4608_v40 }
 0x475   : > { %v2307_v49 = vpop.f32.mrf.mxu0 }
 0x476   : > { %v2308_v17 = vadd.f32 %v2307_v49, %v4611_v60  ;;  %2538 = vmatprep.mubr.f32.mxu1 %v2355_v20  ;;  %v2356_v27 = vmax.f32 %v2306_v48, 0.0  ;;  %v2697_v48 = vld [vmem:[#allocation13 + $0xa0] sm:$0xff] }
 0x477   : > { %v2311_v28 = vpop.f32.mrf.mxu0  ;;  %2539 = vmatmul.mubr.f32.gmra.mxu1 %v2354_v32  ;;  %3057 = vmatprep.subr.mxu0 %v2697_v48  ;;  %v2681_v49 = vld [vmem:[#allocation13 + $0x20] sm:$0xff] }
 0x478   : > { %v2357_v55 = vmax.f32 %v2308_v17, 0.0  ;;  %v2312_v61 = vadd.f32 %v2311_v28, %v4608_v40  ;;  %3120 = vmatprep.subr.mxu1 %v2697_v48  ;;  %3058 = vmatpush3.msra.mxu0 %v2681_v49  ;;  %v2696_v17 = vld [vmem:[#allocation13 + $0x98] sm:$0xff] }
 0x479   : > { %v2313_v7 = vpop.f32.mrf.mxu0  ;;  %3136 = vmatpush3.msra.mxu1 %v2681_v49  ;;  %3059 = vmatprep.subr.mxu0 %v2696_v17  ;;  %v2680_v28 = vld [vmem:[#allocation13 + $0x18] sm:$0xff] }
 0x47a   : > { %v2314_v2 = vadd.f32 %v2313_v7, %v4611_v60  ;;  %2544 = vmatprep.mubr.f32.mxu1 %v2357_v55  ;;  %v2358_v34 = vmax.f32 %v2312_v61, 0.0  ;;  %3121 = vmatprep.subr.mxu1 %v2696_v17  ;;  %v2694_v55 = vld [vmem:[#allocation13 + $0x88] sm:$0xff]  ;;  %v2693_v61 = vld [vmem:[#allocation13 + $0x80] sm:$0xff]  ;;  %v4973_v17 = vmax.f32 %v4372_v33, 0.0 }
 0x47b   : > { %v2317_v3 = vpop.f32.mrf.mxu0  ;;  %2545 = vmatmul.mubr.f32.gmra.mxu1 %v2356_v27  ;;  %3060 = vmatpush3.msra.mxu0 %v2680_v28  ;;  %v2678_v27 = vld [vmem:[#allocation13 + $0x8] sm:$0xff]  ;;  %v2677_v7 = vld [vmem:[#allocation13] sm:$0xff] }
 0x47c   : > { %v2359_v0 = vmax.f32 %v2314_v2, 0.0  ;;  %v2318_v38 = vadd.f32 %v2317_v3, %v4608_v40  ;;  %3137 = vmatpush3.msra.mxu1 %v2680_v28  ;;  %v2609_v2 = vld [vmem:[%s4850_s10] sm:$0x3] }
 0x47d   : > { %v2319_v12 = vpop.f32.mrf.mxu0 }
 0x47e   : > { %v2320_v1 = vadd.f32 %v2319_v12, %v4611_v60  ;;  %2550 = vmatprep.mubr.f32.mxu1 %v2359_v0  ;;  %v2360_v58 = vmax.f32 %v2318_v38, 0.0  ;;  %v4665_v0 = vrot.slane %v2609_v2, %v4949_v11  ;;  %v4670_v12 = vrot.slane %v2609_v2, %v4950_v22 }
 0x47f   : > { %v2323_v44 = vpop.f32.mrf.mxu0  ;;  %2551 = vmatmul.mubr.f32.gmra.mxu1 %v2358_v34  ;;  %v4966_v34 = vmax.f32 %v4325_v10, 0.0  ;;  %v4969_v10 = vmax.f32 %v4340_v63, 0.0  ;;  %v4975_v2 = vmax.f32 %v4388_v52, 0.0 }
 0x480   : > { %v2361_v36 = vmax.f32 %v2320_v1, 0.0  ;;  %v2324_v57 = vadd.f32 %v2323_v44, %v4608_v40  ;;  %v4967_v44 = vmax.f32 %v4328_v53, 0.0 }
 0x481   : > { %v2325_v51 = vpop.f32.mrf.mxu0 }
 0x482   : > { %v2326_v45 = vadd.f32 %v2325_v51, %v4611_v60  ;;  %2556 = vmatprep.mubr.f32.mxu1 %v2361_v36  ;;  %v2362_v35 = vmax.f32 %v2324_v57, 0.0 }
 0x483   : > { %v2329_v15 = vpop.f32.mrf.mxu0  ;;  %2557 = vmatmul.mubr.f32.gmra.mxu1 %v2360_v58 }
 0x484   : > { %v2363_v30 = vmax.f32 %v2326_v45, 0.0  ;;  %v2330_v41 = vadd.f32 %v2329_v15, %v4608_v40  ;;  %v4968_v45 = vmax.f32 %v4337_v16, 0.0  ;;  %v4971_v16 = vmax.f32 %v4356_v6, 0.0 }
 0x485   : > { %v2331_v18 = vpop.f32.mrf.mxu0 }
 0x486   : > { %v2332_v9 = vadd.f32 %v2331_v18, %v4611_v60  ;;  %2562 = vmatprep.mubr.f32.mxu1 %v2363_v30  ;;  %v2364_v47 = vmax.f32 %v2330_v41, 0.0 }
 0x487   : > { %v2335_v50 = vpop.f32.mrf.mxu0  ;;  %2563 = vmatmul.mubr.f32.gmra.mxu1 %v2362_v35 }
 0x488   : > { %v2365_v46 = vmax.f32 %v2332_v9, 0.0  ;;  %v2336_v5 = vadd.f32 %v2335_v50, %v4608_v40  ;;  %v2695_v40 = vld [vmem:[#allocation13 + $0x90] sm:$0xff]  ;;  %v4970_v9 = vmax.f32 %v4353_v43, 0.0 }
 0x489   : > { %v2337_v54 = vpop.f32.mrf.mxu0  ;;  %3061 = vmatprep.subr.mxu0 %v2695_v40  ;;  %3122 = vmatprep.subr.mxu1 %v2695_v40 }
 0x48a   : > { %v2338_v62 = vadd.f32 %v2337_v54, %v4611_v60  ;;  %2568 = vmatprep.mubr.f32.mxu1 %v2365_v46  ;;  %v2366_v32 = vmax.f32 %v2336_v5, 0.0  ;;  %v2679_v60 = vld [vmem:[#allocation13 + $0x10] sm:$0xff] }
 0x48b   : > { %2569 = vmatmul.mubr.f32.gmra.mxu1 %v2364_v47  ;;  %3062 = vmatpush3.msra.mxu0 %v2679_v60 }
 0x48c   : > { %v2367_v20 = vmax.f32 %v2338_v62, 0.0  ;;  %3138 = vmatpush3.msra.mxu1 %v2679_v60  ;;  %3063 = vmatprep.subr.mxu0 %v2694_v55 }
 0x48d   : > { %3123 = vmatprep.subr.mxu1 %v2694_v55  ;;  %3064 = vmatpush3.msra.mxu0 %v2678_v27 }
 0x48e   : > { %2574 = vmatprep.mubr.f32.mxu1 %v2367_v20  ;;  %3139 = vmatpush3.msra.mxu1 %v2678_v27  ;;  %v4974_v27 = vmax.f32 %v4385_v23, 0.0 }
 0x48f   : > { %2575 = vmatmul.mubr.f32.gmra.mxu1 %v2366_v32  ;;  %3065 = vmatprep.subr.mxu0 %v2693_v61  ;;  %v4972_v32 = vmax.f32 %v4369_v21, 0.0 }
 0x490   : > { %3124 = vmatprep.subr.mxu1 %v2693_v61  ;;  %3066 = vmatpush3.msra.mxu0 %v2677_v7 }
 0x491   : > { %3140 = vmatpush3.msra.mxu1 %v2677_v7 }
 0x51b   : > { %v2498_v3 = vpop.f32.mrf.mxu1 }
 0x51c   : > { %v2581_v38 = vadd.f32 %v2498_v3, %v4966_v34 }
 0x51d   : > { %v2500_v1 = vpop.f32.mrf.mxu1 }
 0x51e   : > { %v2582_v36 = vadd.f32 %v2500_v1, %v4967_v44  ;;  %v2621_v58 = vadd.f32 %v4665_v0, %v2581_v38  ;;  %v4976_v44 = vmax.f32 %v4401_v29, 0.0 }
 0x51f   : > { %v2504_v57 = vpop.f32.mrf.mxu1 }
 0x520   : > { %v2622_v51 = vadd.f32 %v4670_v12, %v2582_v36  ;;  %v2583_v15 = vadd.f32 %v2504_v57, %v4968_v45  ;;  %v2649_v41 = vmax.f32 %v2621_v58, 0.0  ;;  %v4977_v57 = vmax.f32 %v4404_v39, 0.0 }
 0x521   : > { %v2506_v11 = vpop.f32.mrf.mxu1 }
 0x522   : > { %v2650_v30 = vmax.f32 %v2622_v51, 0.0  ;;  %v2584_v35 = vadd.f32 %v2506_v11, %v4969_v10  ;;  %v2623_v22 = vadd.f32 %v4665_v0, %v2583_v15 }
 0x523   : > { %v2510_v18 = vpop.f32.mrf.mxu1 }
 0x524   : > { %v2624_v53 = vadd.f32 %v4670_v12, %v2584_v35  ;;  %v2585_v50 = vadd.f32 %v2510_v18, %v4970_v9  ;;  %2780 = vmatprep.mubr.f32.mxu0 %v2650_v30  ;;  %v2651_v54 = vmax.f32 %v2623_v22, 0.0  ;;  %v4978_v30 = vmax.f32 %v4417_v56, 0.0 }
 0x525   : > { %v2512_v46 = vpop.f32.mrf.mxu1  ;;  %2781 = vmatmul.mubr.f32.vlgmr.msra.gmra.mxu0 %v2649_v41  ;;  %v4979_v41 = vmax.f32 %v4420_v37, 0.0 }
 0x526   : > { %v2652_v47 = vmax.f32 %v2624_v53, 0.0  ;;  %v2586_v5 = vadd.f32 %v2512_v46, %v4971_v16  ;;  %v2625_v63 = vadd.f32 %v4665_v0, %v2585_v50  ;;  %v4980_v50 = vmax.f32 %v4433_v31, 0.0 }
 0x527   : > { %v2516_v62 = vpop.f32.mrf.mxu1  ;;  %v4981_v16 = vmax.f32 %v4436_v59, 0.0 }
 0x528   : > { %v2626_v20 = vadd.f32 %v4670_v12, %v2586_v5  ;;  %v2587_v48 = vadd.f32 %v2516_v62, %v4972_v32  ;;  %2785 = vmatprep.mubr.f32.mxu0 %v2652_v47  ;;  %v2653_v40 = vmax.f32 %v2625_v63, 0.0 }
 0x529   : > { %v2518_v49 = vpop.f32.mrf.mxu1  ;;  %2786 = vmatmul.mubr.f32.gmra.mxu0 %v2651_v54 }
 0x52a   : > { %v2654_v43 = vmax.f32 %v2626_v20, 0.0  ;;  %v2588_v28 = vadd.f32 %v2518_v49, %v4973_v17  ;;  %v2627_v6 = vadd.f32 %v4665_v0, %v2587_v48  ;;  %v4982_v20 = vmax.f32 %v4449_v19, 0.0 }
 0x52b   : > { %v2522_v60 = vpop.f32.mrf.mxu1  ;;  %v4983_v49 = vmax.f32 %v4452_v4, 0.0 }
 0x52c   : > { %v2628_v55 = vadd.f32 %v4670_v12, %v2588_v28  ;;  %v2589_v61 = vadd.f32 %v2522_v60, %v4974_v27  ;;  %2790 = vmatprep.mubr.f32.mxu0 %v2654_v43  ;;  %v2655_v34 = vmax.f32 %v2627_v6, 0.0  ;;  %v4984_v6 = vmax.f32 %v4465_v26, 0.0 }
 0x52d   : > { %v2524_v7 = vpop.f32.mrf.mxu1  ;;  %2791 = vmatmul.mubr.f32.gmra.mxu0 %v2653_v40  ;;  %v4985_v27 = vmax.f32 %v4468_v14, 0.0 }
 0x52e   : > { %v2656_v21 = vmax.f32 %v2628_v55, 0.0  ;;  %v2590_v3 = vadd.f32 %v2524_v7, %v4975_v2  ;;  %v2629_v33 = vadd.f32 %v4665_v0, %v2589_v61 }
 0x52f   : > { %v2528_v38 = vpop.f32.mrf.mxu1 }
 0x530   : > { %v2630_v1 = vadd.f32 %v4670_v12, %v2590_v3  ;;  %v2591_v36 = vadd.f32 %v2528_v38, %v4976_v44  ;;  %2795 = vmatprep.mubr.f32.mxu0 %v2656_v21  ;;  %v2657_v45 = vmax.f32 %v2629_v33, 0.0  ;;  %v4986_v3 = vmax.f32 %v4481_v25, 0.0 }
 0x531   : > { %v2530_v58 = vpop.f32.mrf.mxu1  ;;  %2796 = vmatmul.mubr.f32.gmra.mxu0 %v2655_v34  ;;  %v4987_v38 = vmax.f32 %v4484_v24, 0.0 }
 0x532   : > { %v2658_v23 = vmax.f32 %v2630_v1, 0.0  ;;  %v2592_v51 = vadd.f32 %v2530_v58, %v4977_v57  ;;  %v2631_v52 = vadd.f32 %v4665_v0, %v2591_v36 }
 0x533   : > { %v2534_v15 = vpop.f32.mrf.mxu1 }
 0x534   : > { %v2632_v11 = vadd.f32 %v4670_v12, %v2592_v51  ;;  %v2593_v10 = vadd.f32 %v2534_v15, %v4978_v30  ;;  %2800 = vmatprep.mubr.f32.mxu0 %v2658_v23  ;;  %v2659_v18 = vmax.f32 %v2631_v52, 0.0  ;;  %v4988_v23 = vmax.f32 %v4497_v13, 0.0 }
 0x535   : > { %v2536_v35 = vpop.f32.mrf.mxu1  ;;  %2801 = vmatmul.mubr.f32.gmra.mxu0 %v2657_v45  ;;  %v4989_v45 = vmax.f32 %v4500_v42, 0.0 }
 0x536   : > { %v2660_v29 = vmax.f32 %v2632_v11, 0.0  ;;  %v2594_v22 = vadd.f32 %v2536_v35, %v4979_v41  ;;  %v2633_v39 = vadd.f32 %v4665_v0, %v2593_v10  ;;  %v4990_v10 = vmax.f32 %v4513_v8, 0.0  ;;  %v4991_v41 = vld [vmem:[#allocation24_spill] sm:$0xff] }
 0x537   : > { %v2540_v53 = vpop.f32.mrf.mxu1 }
 0x538   : > { %v2634_v9 = vadd.f32 %v4670_v12, %v2594_v22  ;;  %v2595_v46 = vadd.f32 %v2540_v53, %v4980_v50  ;;  %2805 = vmatprep.mubr.f32.mxu0 %v2660_v29  ;;  %v2661_v54 = vmax.f32 %v2633_v39, 0.0  ;;  %v4992_v22 = vmax.f32 %v4991_v41, 0.0  ;;  %v4993_v50 = vld [vmem:[#allocation23_spill] sm:$0xff] }
 0x539   : > { %v2542_v47 = vpop.f32.mrf.mxu1  ;;  %2806 = vmatmul.mubr.f32.gmra.mxu0 %v2659_v18 }
 0x53a   : > { %v2662_v56 = vmax.f32 %v2634_v9, 0.0  ;;  %v2596_v5 = vadd.f32 %v2542_v47, %v4981_v16  ;;  %v2635_v37 = vadd.f32 %v4665_v0, %v2595_v46  ;;  %v4994_v46 = vmax.f32 %v4993_v50, 0.0  ;;  %v4995_v16 = vld [vmem:[#allocation26_spill] sm:$0xff] }
 0x53b   : > { %v2546_v63 = vpop.f32.mrf.mxu1 }
 0x53c   : > { %v2636_v62 = vadd.f32 %v4670_v12, %v2596_v5  ;;  %v2597_v32 = vadd.f32 %v2546_v63, %v4982_v20  ;;  %2810 = vmatprep.mubr.f32.mxu0 %v2662_v56  ;;  %v2663_v17 = vmax.f32 %v2635_v37, 0.0  ;;  %v4996_v5 = vmax.f32 %v4995_v16, 0.0 }
 0x53d   : > { %v2548_v48 = vpop.f32.mrf.mxu1  ;;  %2811 = vmatmul.mubr.f32.gmra.mxu0 %v2661_v54 }
 0x53e   : > { %v2664_v31 = vmax.f32 %v2636_v62, 0.0  ;;  %v2598_v43 = vadd.f32 %v2548_v48, %v4983_v49  ;;  %v2637_v59 = vadd.f32 %v4665_v0, %v2597_v32 }
 0x53f   : > { %v2552_v28 = vpop.f32.mrf.mxu1 }
 0x540   : > { %v2638_v40 = vadd.f32 %v4670_v12, %v2598_v43  ;;  %v2599_v60 = vadd.f32 %v2552_v28, %v4984_v6  ;;  %2815 = vmatprep.mubr.f32.mxu1 %v2664_v31  ;;  %v2665_v7 = vmax.f32 %v2637_v59, 0.0  ;;  %v4758_v31 = vld [vmem:[%s4852_s12] ss:$0 sm:$0xff] }
 0x541   : > { %v2554_v55 = vpop.f32.mrf.mxu1  ;;  %2816 = vmatmul.mubr.f32.vlgmr.msra.gmra.mxu1 %v2663_v17 }
 0x542   : > { %v2666_v19 = vmax.f32 %v2638_v40, 0.0  ;;  %v2600_v61 = vadd.f32 %v2554_v55, %v4985_v27  ;;  %v2639_v4 = vadd.f32 %v4665_v0, %v2599_v60 }
 0x543   : > { %v2558_v21 = vpop.f32.mrf.mxu1 }
 0x544   : > { %v2640_v2 = vadd.f32 %v4670_v12, %v2600_v61  ;;  %v2601_v34 = vadd.f32 %v2558_v21, %v4986_v3  ;;  %2820 = vmatprep.mubr.f32.mxu1 %v2666_v19  ;;  %v2667_v44 = vmax.f32 %v2639_v4, 0.0 }
 0x545   : > { %v2560_v33 = vpop.f32.mrf.mxu1  ;;  %2821 = vmatmul.mubr.f32.gmra.mxu1 %v2665_v7 }
 0x546   : > { %v2668_v26 = vmax.f32 %v2640_v2, 0.0  ;;  %v2602_v1 = vadd.f32 %v2560_v33, %v4987_v38  ;;  %v2641_v14 = vadd.f32 %v4665_v0, %v2601_v34 }
 0x547   : > { %v2564_v36 = vpop.f32.mrf.mxu1 }
 0x548   : > { %v2642_v58 = vadd.f32 %v4670_v12, %v2602_v1  ;;  %v2603_v57 = vadd.f32 %v2564_v36, %v4988_v23  ;;  %2825 = vmatprep.mubr.f32.mxu1 %v2668_v26  ;;  %v2669_v15 = vmax.f32 %v2641_v14, 0.0 }
 0x549   : > { %v2566_v51 = vpop.f32.mrf.mxu1  ;;  %2826 = vmatmul.mubr.f32.gmra.mxu1 %v2667_v44 }
 0x54a   : > { %v2670_v25 = vmax.f32 %v2642_v58, 0.0  ;;  %v2604_v52 = vadd.f32 %v2566_v51, %v4989_v45  ;;  %v2643_v24 = vadd.f32 %v4665_v0, %v2603_v57 }
 0x54b   : > { %v2570_v11 = vpop.f32.mrf.mxu1 }
 0x54c   : > { %v2644_v30 = vadd.f32 %v4670_v12, %v2604_v52  ;;  %v2605_v35 = vadd.f32 %v2570_v11, %v4990_v10  ;;  %2830 = vmatprep.mubr.f32.mxu1 %v2670_v25  ;;  %v2671_v39 = vmax.f32 %v2643_v24, 0.0 }
 0x54d   : > { %v2572_v29 = vpop.f32.mrf.mxu1  ;;  %2831 = vmatmul.mubr.f32.gmra.mxu1 %v2669_v15 }
 0x54e   : > { %v2672_v13 = vmax.f32 %v2644_v30, 0.0  ;;  %v2606_v18 = vadd.f32 %v2572_v29, %v4992_v22  ;;  %v2645_v42 = vadd.f32 %v4665_v0, %v2605_v35 }
 0x54f   : > { %v2576_v53 = vpop.f32.mrf.mxu1 }
 0x550   : > { %v2646_v9 = vadd.f32 %v4670_v12, %v2606_v18  ;;  %v2607_v47 = vadd.f32 %v2576_v53, %v4994_v46  ;;  %2835 = vmatprep.mubr.f32.mxu1 %v2672_v13  ;;  %v2673_v37 = vmax.f32 %v2645_v42, 0.0 }
 0x551   : > { %v2578_v8 = vpop.f32.mrf.mxu1  ;;  %2836 = vmatmul.mubr.f32.gmra.mxu1 %v2671_v39 }
 0x552   : > { %v2674_v56 = vmax.f32 %v2646_v9, 0.0  ;;  %v2608_v54 = vadd.f32 %v2578_v8, %v4996_v5  ;;  %v2647_v63 = vadd.f32 %v4665_v0, %v2607_v47 }
 0x554   : > { %v2648_v62 = vadd.f32 %v4670_v12, %v2608_v54  ;;  %2840 = vmatprep.mubr.f32.mxu1 %v2674_v56  ;;  %v2675_v32 = vmax.f32 %v2647_v63, 0.0 }
 0x555   : > { %2841 = vmatmul.mubr.f32.gmra.mxu1 %v2673_v37 }
 0x556   : > { %v2676_v20 = vmax.f32 %v2648_v62, 0.0 }
 0x558   : > { %2845 = vmatprep.mubr.f32.mxu1 %v2676_v20 }
 0x559   : > { %2846 = vmatmul.mubr.f32.gmra.mxu1 %v2675_v32 }
 0x5e5   : > { %v3067_v48 = vpop.f32.mrf.mxu0 }
 0x5e7   : > { %v3068_v49 = vpop.f32.mrf.mxu0 }
 0x5e8   : > { %v3069_v43 = vadd.f32 %v3068_v49, %v3067_v48 }
 0x5e9   : > { %v3070_v17 = vpop.f32.mrf.mxu0 }
 0x5ea   : > { %v2783_v0 = vadd.f32 %v3069_v43, %v4758_v31 }
 0x5eb   : > { %v3071_v59 = vpop.f32.mrf.mxu0 }
 0x5ec   : > { %2851 = vst [vmem:[%s4761_s3] sm:$0xff] %v2783_v0  ;;  %v3072_v12 = vadd.f32 %v3071_v59, %v3070_v17 }
 0x5ed   : > { %v3073_v28 = vpop.f32.mrf.mxu0 }
 0x5ee   : > { %v2788_v40 = vadd.f32 %v3072_v12, %v4758_v31 }
 0x5ef   : > { %v3074_v6 = vpop.f32.mrf.mxu0 }
 0x5f0   : > { %2852 = vst [vmem:[%s4761_s3 + $0x8] sm:$0xff] %v2788_v40  ;;  %v3075_v60 = vadd.f32 %v3074_v6, %v3073_v28 }
 0x5f1   : > { %v3076_v55 = vpop.f32.mrf.mxu0 }
 0x5f2   : > { %v2793_v19 = vadd.f32 %v3075_v60, %v4758_v31 }
 0x5f3   : > { %v3077_v27 = vpop.f32.mrf.mxu0 }
 0x5f4   : > { %2853 = vst [vmem:[%s4761_s3 + $0x10] sm:$0xff] %v2793_v19  ;;  %v3078_v61 = vadd.f32 %v3077_v27, %v3076_v55 }
 0x5f5   : > { %v3079_v7 = vpop.f32.mrf.mxu0 }
 0x5f6   : > { %v2798_v4 = vadd.f32 %v3078_v61, %v4758_v31 }
 0x5f7   : > { %v3080_v21 = vpop.f32.mrf.mxu0 }
 0x5f8   : > { %2854 = vst [vmem:[%s4761_s3 + $0x18] sm:$0xff] %v2798_v4  ;;  %v3081_v2 = vadd.f32 %v3080_v21, %v3079_v7 }
 0x5f9   : > { %v3082_v3 = vpop.f32.mrf.mxu0 }
 0x5fa   : > { %v2803_v34 = vadd.f32 %v3081_v2, %v4758_v31 }
 0x5fb   : > { %v3083_v33 = vpop.f32.mrf.mxu0 }
 0x5fc   : > { %2855 = vst [vmem:[%s4761_s3 + $0x20] sm:$0xff] %v2803_v34  ;;  %v3084_v26 = vadd.f32 %v3083_v33, %v3082_v3 }
 0x5fd   : > { %v3085_v38 = vpop.f32.mrf.mxu0 }
 0x5fe   : > { %v2808_v1 = vadd.f32 %v3084_v26, %v4758_v31 }
 0x5ff   : > { %v3086_v44 = vpop.f32.mrf.mxu0 }
 0x600   : > { %2856 = vst [vmem:[%s4761_s3 + $0x28] sm:$0xff] %v2808_v1  ;;  %v3087_v14 = vadd.f32 %v3086_v44, %v3085_v38 }
 0x601   : > { %v3088_v36 = vpop.f32.mrf.mxu1 }
 0x602   : > { %v2813_v58 = vadd.f32 %v3087_v14, %v4758_v31 }
 0x603   : > { %v3089_v23 = vpop.f32.mrf.mxu1 }
 0x604   : > { %2857 = vst [vmem:[%s4761_s3 + $0x30] sm:$0xff] %v2813_v58  ;;  %v3090_v57 = vadd.f32 %v3089_v23, %v3088_v36 }
 0x605   : > { %v3091_v51 = vpop.f32.mrf.mxu1 }
 0x606   : > { %v2818_v25 = vadd.f32 %v3090_v57, %v4758_v31 }
 0x607   : > { %v3092_v45 = vpop.f32.mrf.mxu1 }
 0x608   : > { %2858 = vst [vmem:[%s4761_s3 + $0x38] sm:$0xff] %v2818_v25  ;;  %v3093_v52 = vadd.f32 %v3092_v45, %v3091_v51 }
 0x609   : > { %v3094_v15 = vpop.f32.mrf.mxu1 }
 0x60a   : > { %v2823_v24 = vadd.f32 %v3093_v52, %v4758_v31 }
 0x60b   : > { %v3095_v11 = vpop.f32.mrf.mxu1 }
 0x60c   : > { %2859 = vst [vmem:[%s4761_s3 + $0x40] sm:$0xff] %v2823_v24  ;;  %v3096_v30 = vadd.f32 %v3095_v11, %v3094_v15 }
 0x60d   : > { %v3097_v10 = vpop.f32.mrf.mxu1 }
 0x60e   : > { %v2828_v35 = vadd.f32 %v3096_v30, %v4758_v31 }
 0x60f   : > { %v3098_v29 = vpop.f32.mrf.mxu1 }
 0x610   : > { %2860 = vst [vmem:[%s4761_s3 + $0x48] sm:$0xff] %v2828_v35  ;;  %v3099_v13 = vadd.f32 %v3098_v29, %v3097_v10 }
 0x611   : > { %v3100_v41 = vpop.f32.mrf.mxu1 }
 0x612   : > { %v2833_v22 = vadd.f32 %v3099_v13, %v4758_v31 }
 0x613   : > { %v3101_v18 = vpop.f32.mrf.mxu1 }
 0x614   : > { %2861 = vst [vmem:[%s4761_s3 + $0x50] sm:$0xff] %v2833_v22  ;;  %v3102_v39 = vadd.f32 %v3101_v18, %v3100_v41 }
 0x615   : > { %v3103_v42 = vpop.f32.mrf.mxu1 }
 0x616   : > { %v2838_v53 = vadd.f32 %v3102_v39, %v4758_v31 }
 0x617   : > { %v3104_v9 = vpop.f32.mrf.mxu1 }
 0x618   : > { %2862 = vst [vmem:[%s4761_s3 + $0x58] sm:$0xff] %v2838_v53  ;;  %v3105_v50 = vadd.f32 %v3104_v9, %v3103_v42 }
 0x619   : > { %v3106_v46 = vpop.f32.mrf.mxu1 }
 0x61a   : > { %v2843_v47 = vadd.f32 %v3105_v50, %v4758_v31 }
 0x61b   : > { %v3107_v8 = vpop.f32.mrf.mxu1 }
 0x61c   : > { %2863 = vst [vmem:[%s4761_s3 + $0x60] sm:$0xff] %v2843_v47  ;;  %v3108_v56 = vadd.f32 %v3107_v8, %v3106_v46 }
 0x61e   : > { %v2848_v16 = vadd.f32 %v3108_v56, %v4758_v31 }
 0x620   : > { %2864 = vst [vmem:[%s4761_s3 + $0x68] sm:$0xff] %v2848_v16 }
 0x621   : > { %3456 = shalt.err (!%p3453_p3)
}
 0x622   : > { %s3457_s9 = scalar_lea.hbm %s4793_s23, 1792  ;;  %s3461_s29 = scalar_lea.hbm %s4853_s13, 3584 }
 0x623   : > { %p3458_p4 = scmp.ne.s32.totalorder %s4793_s23, %s3457_s9  ;;  %p3462_p0 = scmp.lt.s32.totalorder %s4793_s23, %s4853_s13 }
 0x624   : > { %p3463_p7 = scmp.lt.s32.totalorder %s3461_s29, %s3457_s9 }
 0x625   : > { %p3459_p9 = pnand %p3458_p4, %p4997_p6 }
 0x626   : > { %p3464_p2 = por %p3463_p7, %p3462_p0 }
 0x627   : > { %p3460_p12 = pneg %p3459_p9 }
 0x629   : > { %p3465_p8 = pnand %p3464_p2, %p3460_p12 }
 0x62b   : > { %3468 = shalt.err (!%p3465_p8)
}
 0x62c   : > { %s3535_s15 = smov 128   ;;  %s3536_s18 = smov 8  }
 0x62d   : > { %3170 = dma.vmem_to_hbm [thread:$0]  (%p4997_p6), %s4795_s7, 1792, %s4793_s23, %s2866_s14, %s3535_s15, %s3535_s15, %s3536_s18  }
 0x62e PF: > { %s2894_s24 = sand.u32 1, %s3507_s25   ;;  %p4998_p10 = scmp.ne.s32.totalorder %s4923_s16, 0 }
 0x62f   : > { %p4999_p11 = scmp.ge.s32.totalorder %s3519_s28, 2  ;;  %s2895_s30 = scalar_lea.sflag [#allocation4], %s2894_s24 }
 0x631   : > { %p3196_p13 = pnand %p4999_p11, %p4998_p10 }
 0x633   : > { %p3197_p5 = pneg %p3196_p13 }
 0x635   : > { %3502 = dma.done.wait (%p3197_p5), %s2895_s30, 1792  }
 0x636   : > { %3504 = vsyncadd (%p3197_p5), %s2895_s30, 4294965504  ;;  %s5000_s1 = sld [smem:[#allocation20_spill]]  ;;  %p29_p1 = scmp.ge.s32.totalorder %s3725_s19, 4  }
 0x637   : > { %s5001_s25 = smov %s3511_s26  ;;  %s5002_s26 = smov %s3515_s27 }
 0x638   : > { %s5004_s28 = smov %s3725_s19  ;;  %31 = sbr.rel (!%p29_p1) target bundleno = 15 (0xf), region = 141 }
 0x63c   : > { %s5003_s27 = smov %s5000_s1 }
 0x63d   :  { %2900 = vsyncpa [#allocation3], 1 }
 0x63e   :  { %2902 = vsyncpa [#allocation3 + $0x1], 1 }
 0x63f   :  { %2903 = vsyncpa [#allocation6], 1 }
 0x640   :  { %2904 = vsyncpa [#allocation9], 1 }
 0x641   :  { %2905 = vsyncpa [#allocation12], 1 }
 0x642   :  { %2906 = vsyncpa [#allocation4], 1 }
 0x643   :  { %2908 = vsyncpa [#allocation4 + $0x1], 1 }

</bundles_post_ra>
